<compile_context>
chip_gen: v5e
topology: v5e:2x2
jax: 0.10.0
libtpu: 0.0.40
codegen_flags: <defaults>
</compile_context>

<pallas_src>
import functools

import jax
import jax.numpy as jnp
from jax.experimental import pallas as pl
from jax.experimental.pallas import tpu as pltpu


# ----------------------------------------------------------------------------
# Pallas kernel: fused ASPP branches + final 1x1 conv (+ BN + ReLU everywhere)
# ----------------------------------------------------------------------------
def _aspp_fused_kernel(xp_ref, w1_ref, w3_ref, wa_ref, bb_ref, bi_ref,
                       o_ref, z_ref, *, dils, dmax, block_rows, width):
    """One row-tile of one image.

    xp_ref : (Hp, Wp, Cin)   bf16  dmax-padded channels-last image (resident)
    w1_ref : (Cin, Cb)       bf16  1x1 branch weight, BN scale folded
    w3_ref : (3, 9, Cin, Cb) bf16  per-tap dilated 3x3 weights, BN scale folded
    wa_ref : (4, Cb, Cout)   bf16  final 1x1 conv weight per branch, BN scale folded
    bb_ref : (4, 1, Cb)      f32   per-branch folded BN bias
    bi_ref : (1, Cout)       f32   per-image bias (final BN bias + GAP term)
    o_ref  : (TR*W, Cout)    f32   output tile
    z_ref  : (TR*W, Cout)    f32   VMEM scratch accumulator
    """
    TR, W = block_rows, width
    TRW = TR * W
    Cin = xp_ref.shape[-1]
    r0 = pl.program_id(1) * TR          # first (unpadded) image row of the tile

    def tap(dy, dx):
        # rows [dmax+r0+dy, +TR), cols [dmax+dx, +W) of the dmax-padded image
        t = xp_ref[pl.ds(dmax + r0 + dy, TR), pl.ds(dmax + dx, W), :]
        return t.reshape(TRW, Cin)

    x_c = tap(0, 0)                     # shared center tap (TRW, Cin), bf16

    def branch_out(acc, i):
        # per-branch (folded) BN bias + ReLU, then that branch's slice of the
        # final 1x1 conv; summing over branches == conv over the concat dim.
        y = jnp.maximum(acc + bb_ref[i], 0.0).astype(wa_ref.dtype)
        return jnp.dot(y, wa_ref[i], preferred_element_type=jnp.float32)

    # branch 1: 1x1 conv
    acc = jnp.dot(x_c, w1_ref[...], preferred_element_type=jnp.float32)
    z_ref[...] = branch_out(acc, 0)

    # branches 2-4: dilated 3x3 convs as 9 shifted VMEM slices (no HBM im2col);
    # the center tap (k == 4) reuses x_c.
    for b, d in enumerate(dils):
        acc = jnp.dot(x_c, w3_ref[b, 4], preferred_element_type=jnp.float32)
        for k in range(9):
            if k == 4:
                continue
            ky, kx = k // 3, k % 3
            acc += jnp.dot(tap((ky - 1) * d, (kx - 1) * d), w3_ref[b, k],
                           preferred_element_type=jnp.float32)
        z_ref[...] += branch_out(acc, b + 1)

    # per-image bias (final BN bias + GAP branch) + ReLU; single lane-dense store
    o_ref[...] = jnp.maximum(z_ref[...] + bi_ref[...], 0.0).astype(o_ref.dtype)


# ----------------------------------------------------------------------------
# JAX-side glue (layout, BN folding, GAP branch, parameter prep)
# ----------------------------------------------------------------------------
def _bn_fold(gamma, beta, mean, var, eps=1e-5):
    scale = gamma / jnp.sqrt(var + eps)
    bias = beta - mean * scale
    return scale[None, :], bias[None, :]


def _conv3x3_to_taps(w):
    """PyTorch conv weight (Cout, Cin, 3, 3) -> (9, Cin, Cout), k = ky*3+kx."""
    cout, cin = w.shape[0], w.shape[1]
    return jnp.transpose(w, (2, 3, 1, 0)).reshape(9, cin, cout)


def _pick_block_rows(H, W, target_rows=256):
    """Largest divisor of H whose row-tile has at most ~target_rows pixels."""
    best = 1
    for tr in range(1, H + 1):
        if H % tr == 0 and tr * W <= max(W, target_rows):
            best = tr
    return best


def aspp_forward(x_nchw, params, *, dilations, block_rows=None):
    N, Cin, H, W = x_nchw.shape
    assert W % 8 == 0, "kernel assumes W is a multiple of 8 (TPU sublane tile)"
    d2, d3, d4 = int(dilations[1]), int(dilations[2]), int(dilations[3])
    dmax = max(d2, d3, d4)

    x_nhwc = jnp.transpose(x_nchw, (0, 2, 3, 1)).astype(jnp.float32)  # (N,H,W,Cin)

    # ---- GAP branch in plain JAX (only N rows of MXU work -> a pallas_call is
    #      pure launch/DMA overhead). Bilinear upsampling of a 1x1 map is a
    #      constant broadcast for either align_corners setting.
    s5, b5 = _bn_fold(*params["bn_gap"])
    w5 = params["w_gap"][:, :, 0, 0]                        # (Cb, Cin)
    Cb = w5.shape[0]
    xm = jnp.mean(x_nhwc, axis=(1, 2))                      # (N, Cin)
    x5 = jnp.maximum(xm @ w5.T * s5 + b5, 0.0)              # (N, Cb)

    # ---- final 1x1 conv: fold BN scale into the weight, split per branch,
    #      fold GAP term + final BN bias into a per-image bias.
    w_out = params["w_out"][:, :, 0, 0]                     # (Cout, 5*Cb)
    Cout = w_out.shape[0]
    s_out, b_out = _bn_fold(*params["bn_out"])              # (1, Cout)
    gap_term = x5 @ w_out[:, 4 * Cb:].T                     # (N, Cout)
    bias_img = (b_out + gap_term * s_out)[:, None, :]       # (N, 1, Cout)
    wa = (jnp.transpose(w_out[:, :4 * Cb]) * s_out)         # (4Cb, Cout), scale folded
    wa = wa.reshape(4, Cb, Cout).astype(jnp.bfloat16)       # (4, Cb, Cout)

    # ---- branch convs: fold BN scale into the weights, keep BN bias separate
    sc, bi = zip(*[_bn_fold(*params[f"bn{i}"]) for i in (1, 2, 3, 4)])
    w1 = (jnp.transpose(params["w1"][:, :, 0, 0]) * sc[0]).astype(jnp.bfloat16)  # (Cin,Cb)
    w3 = jnp.stack([_conv3x3_to_taps(params["w2"]) * sc[1],
                    _conv3x3_to_taps(params["w3"]) * sc[2],
                    _conv3x3_to_taps(params["w4"]) * sc[3]]).astype(jnp.bfloat16)  # (3,9,Cin,Cb)
    bb = jnp.stack(bi)                                      # (4, 1, Cb) f32

    # ---- zero-padded (by dmax) channels-last input, bf16
    xp = jnp.pad(x_nhwc.astype(jnp.bfloat16),
                 ((0, 0), (dmax, dmax), (dmax, dmax), (0, 0)))
    Hp, Wp = H + 2 * dmax, W + 2 * dmax

    if block_rows is None:
        block_rows = _pick_block_rows(H, W)
    TR = int(block_rows)
    assert H % TR == 0
    TRW = TR * W

    kernel = functools.partial(_aspp_fused_kernel, dils=(d2, d3, d4),
                               dmax=dmax, block_rows=TR, width=W)

    out_flat = pl.pallas_call(
        kernel,
        out_shape=jax.ShapeDtypeStruct((N, H * W, Cout), jnp.float32),
        grid_spec=pltpu.PrefetchScalarGridSpec(
            num_scalar_prefetch=0,
            grid=(N, H // TR),
            in_specs=[
                # padded image: resident per image (block index constant in r)
                pl.BlockSpec((None, Hp, Wp, Cin), lambda n, r: (n, 0, 0, 0)),
                pl.BlockSpec((Cin, Cb), lambda n, r: (0, 0)),
                pl.BlockSpec((3, 9, Cin, Cb), lambda n, r: (0, 0, 0, 0)),
                pl.BlockSpec((4, Cb, Cout), lambda n, r: (0, 0, 0)),
                pl.BlockSpec((4, 1, Cb), lambda n, r: (0, 0, 0)),
                pl.BlockSpec((None, 1, Cout), lambda n, r: (n, 0, 0)),
            ],
            out_specs=pl.BlockSpec((None, TRW, Cout), lambda n, r: (n, r, 0)),
            scratch_shapes=[pltpu.VMEM((TRW, Cout), jnp.float32)],
        ),
        compiler_params=pltpu.CompilerParams(
            dimension_semantics=("parallel", "parallel")),
    )(xp, w1, w3, wa, bb, bias_img)

    out = out_flat.reshape(N, H, W, Cout)
    # Dropout2d exists on the module but is never applied in forward.
    return jnp.transpose(out, (0, 3, 1, 2))                 # back to NCHW


# ----------------------------------------------------------------------------
# Pure-JAX reference (inference-mode BN) for a correctness sanity check
# ----------------------------------------------------------------------------
def _aspp_reference(x_nchw, params, dilations):
    def conv(x, w, d):
        return jax.lax.conv_general_dilated(
            x, w, (1, 1), "SAME", rhs_dilation=(d, d),
            dimension_numbers=("NCHW", "OIHW", "NCHW"))

    def bn(x, p, eps=1e-5):
        g, b, m, v = p
        s = g / jnp.sqrt(v + eps)
        return x * s[None, :, None, None] + (b - m * s)[None, :, None, None]

    relu = lambda t: jnp.maximum(t, 0.0)
    x1 = relu(bn(conv(x_nchw, params["w1"], 1), params["bn1"]))
    x2 = relu(bn(conv(x_nchw, params["w2"], dilations[1]), params["bn2"]))
    x3 = relu(bn(conv(x_nchw, params["w3"], dilations[2]), params["bn3"]))
    x4 = relu(bn(conv(x_nchw, params["w4"], dilations[3]), params["bn4"]))
    xm = jnp.mean(x_nchw, axis=(2, 3), keepdims=True)
    x5 = relu(bn(conv(xm, params["w_gap"], 1), params["bn_gap"]))
    x5 = jnp.broadcast_to(x5, x5.shape[:2] + x4.shape[2:])
    cat = jnp.concatenate([x1, x2, x3, x4, x5], axis=1)
    return relu(bn(conv(cat, params["w_out"], 1), params["bn_out"]))


# ----------------------------------------------------------------------------
# Deterministic parameter init (kaiming-normal conv weights, default BN stats)
# ----------------------------------------------------------------------------
def init_params(key, inplanes, branch_planes, outplanes):
    ks = jax.random.split(key, 8)

    def kaiming(k, cout, cin, kh, kw):
        std = (2.0 / (cin * kh * kw)) ** 0.5
        return std * jax.random.normal(k, (cout, cin, kh, kw), jnp.float32)

    def bn(c):
        # (gamma, beta, running_mean, running_var) — PyTorch defaults
        return (jnp.ones((c,), jnp.float32), jnp.zeros((c,), jnp.float32),
                jnp.zeros((c,), jnp.float32), jnp.ones((c,), jnp.float32))

    return {
        "w1": kaiming(ks[0], branch_planes, inplanes, 1, 1), "bn1": bn(branch_planes),
        "w2": kaiming(ks[1], branch_planes, inplanes, 3, 3), "bn2": bn(branch_planes),
        "w3": kaiming(ks[2], branch_planes, inplanes, 3, 3), "bn3": bn(branch_planes),
        "w4": kaiming(ks[3], branch_planes, inplanes, 3, 3), "bn4": bn(branch_planes),
        "w_gap": kaiming(ks[4], branch_planes, inplanes, 1, 1), "bn_gap": bn(branch_planes),
        "w_out": kaiming(ks[5], outplanes, 5 * branch_planes, 1, 1), "bn_out": bn(outplanes),
    }


if __name__ == "__main__":
    # Small shapes consistent with ASPP(output_stride=16): channels scaled down
    # (2048->32 in, 256->32 per branch, 512->128 out so the kernel output is
    # lane-dense), spatial 16x16, batch 2.
    N, Cin, H, W = 2, 32, 16, 16
    Cb, Cout = 32, 128
    dilations = [1, 6, 12, 18]          # output_stride == 16

    key = jax.random.PRNGKey(0)
    kx, kp = jax.random.split(key)
    x = jax.random.normal(kx, (N, Cin, H, W), jnp.float32)
    params = init_params(kp, Cin, Cb, Cout)

    fwd = jax.jit(functools.partial(aspp_forward, dilations=dilations))
    out = jax.block_until_ready(fwd(x, params))

    assert out.shape == (N, Cout, H, W), out.shape
    assert bool(jnp.all(jnp.isfinite(out)))

    ref = _aspp_reference(x, params, dilations)
    rel = float(jnp.linalg.norm(out - ref) / (jnp.linalg.norm(ref) + 1e-6))
    assert rel < 5e-2, f"relative L2 error too large: {rel}"
    print("KERNEL_OK")
</pallas_src>

<mosaic_0001>
module attributes {stable_mosaic.version = 11 : i64} {
  func.func @_aspp_fused_kernel(%arg0: i32, %arg1: i32, %arg2: memref<1x52x52x32xbf16, #tpu.memory_space<vmem>>, %arg3: memref<32x32xbf16, #tpu.memory_space<vmem>>, %arg4: memref<3x9x32x32xbf16, #tpu.memory_space<vmem>>, %arg5: memref<4x32x128xbf16, #tpu.memory_space<vmem>>, %arg6: memref<4x1x32xf32, #tpu.memory_space<vmem>>, %arg7: memref<1x1x128xf32, #tpu.memory_space<vmem>>, %arg8: memref<1x256x128xf32, #tpu.memory_space<vmem>>, %arg9: memref<256x128xf32, #tpu.memory_space<vmem>>) attributes {dimension_semantics = [#tpu.dimension_semantics<parallel>, #tpu.dimension_semantics<parallel>], iteration_bounds = array<i64: 2, 1>, scalar_prefetch = 0 : i64, scratch_operands = 1 : i64, tpu.core_type = #tpu.core_type<tc>, window_params = [{transform_indices = @transform_0, window_bounds = array<i64: 1, 52, 52, 32>}, {pipeline_mode = #tpu.pipeline_mode<synchronous>, transform_indices = @transform_1, window_bounds = array<i64: 32, 32>}, {pipeline_mode = #tpu.pipeline_mode<synchronous>, transform_indices = @transform_2, window_bounds = array<i64: 3, 9, 32, 32>}, {pipeline_mode = #tpu.pipeline_mode<synchronous>, transform_indices = @transform_3, window_bounds = array<i64: 4, 32, 128>}, {pipeline_mode = #tpu.pipeline_mode<synchronous>, transform_indices = @transform_4, window_bounds = array<i64: 4, 1, 32>}, {transform_indices = @transform_5, window_bounds = array<i64: 1, 1, 128>}, {transform_indices = @transform_6, window_bounds = array<i64: 1, 256, 128>}]} {
    %c16_i32 = arith.constant 16 : i32
    %0 = arith.muli %arg1, %c16_i32 : i32
    %c18_i32 = arith.constant 18 : i32
    %1 = arith.addi %c18_i32, %0 : i32
    %c0_i32 = arith.constant 0 : i32
    %2 = arith.addi %1, %c0_i32 : i32
    %c0 = arith.constant 0 : index
    %3 = arith.index_cast %2 : i32 to index
    %c18 = arith.constant 18 : index
    %c0_0 = arith.constant 0 : index
    %4 = vector.load %arg2[%c0, %3, %c18, %c0_0] : memref<1x52x52x32xbf16, #tpu.memory_space<vmem>>, vector<1x16x16x32xbf16>
    %5 = vector.shape_cast %4 : vector<1x16x16x32xbf16> to vector<16x16x32xbf16>
    %6 = vector.shape_cast %5 : vector<16x16x32xbf16> to vector<256x32xbf16>
    %c0_1 = arith.constant 0 : index
    %c0_2 = arith.constant 0 : index
    %7 = vector.load %arg3[%c0_1, %c0_2] : memref<32x32xbf16, #tpu.memory_space<vmem>>, vector<32x32xbf16>
    %cst = arith.constant dense<0.000000e+00> : vector<256x32xf32>
    %8 = tpu.matmul %6, %7, %cst {dimension_numbers = #tpu.dot_dimension_numbers<[1], [0], [0], [1], [0, 0, 1, 1], [], []>} : vector<256x32xbf16>, vector<32x32xbf16>, vector<256x32xf32> -> vector<256x32xf32>
    %c0_3 = arith.constant 0 : index
    %c0_4 = arith.constant 0 : index
    %c0_5 = arith.constant 0 : index
    %9 = vector.load %arg6[%c0_3, %c0_4, %c0_5] : memref<4x1x32xf32, #tpu.memory_space<vmem>>, vector<1x1x32xf32>
    %10 = vector.shape_cast %9 : vector<1x1x32xf32> to vector<1x32xf32>
    %11 = vector.broadcast %10 : vector<1x32xf32> to vector<256x32xf32>
    %12 = arith.addf %8, %11 : vector<256x32xf32>
    %cst_6 = arith.constant 0.000000e+00 : f32
    %13 = vector.broadcast %cst_6 : f32 to vector<256x32xf32>
    %14 = arith.maximumf %12, %13 : vector<256x32xf32>
    %15 = arith.truncf %14 : vector<256x32xf32> to vector<256x32xbf16>
    %c0_7 = arith.constant 0 : index
    %c0_8 = arith.constant 0 : index
    %c0_9 = arith.constant 0 : index
    %16 = vector.load %arg5[%c0_7, %c0_8, %c0_9] : memref<4x32x128xbf16, #tpu.memory_space<vmem>>, vector<1x32x128xbf16>
    %17 = vector.shape_cast %16 : vector<1x32x128xbf16> to vector<32x128xbf16>
    %cst_10 = arith.constant dense<0.000000e+00> : vector<256x128xf32>
    %18 = tpu.matmul %15, %17, %cst_10 {dimension_numbers = #tpu.dot_dimension_numbers<[1], [0], [0], [1], [0, 0, 1, 1], [], []>} : vector<256x32xbf16>, vector<32x128xbf16>, vector<256x128xf32> -> vector<256x128xf32>
    %c0_11 = arith.constant 0 : index
    %c0_12 = arith.constant 0 : index
    %19 = vector.load %arg9[%c0_11, %c0_12] : memref<256x128xf32, #tpu.memory_space<vmem>>, vector<256x128xf32>
    tpu.vector_store %arg9[%c0_11, %c0_12], %18 {strides = array<i32>} : memref<256x128xf32, #tpu.memory_space<vmem>>, vector<256x128xf32>,
    %c0_13 = arith.constant 0 : index
    %c4 = arith.constant 4 : index
    %c0_14 = arith.constant 0 : index
    %c0_15 = arith.constant 0 : index
    %20 = vector.load %arg4[%c0_13, %c4, %c0_14, %c0_15] : memref<3x9x32x32xbf16, #tpu.memory_space<vmem>>, vector<1x1x32x32xbf16>
    %21 = vector.shape_cast %20 : vector<1x1x32x32xbf16> to vector<32x32xbf16>
    %cst_16 = arith.constant dense<0.000000e+00> : vector<256x32xf32>
    %22 = tpu.matmul %6, %21, %cst_16 {dimension_numbers = #tpu.dot_dimension_numbers<[1], [0], [0], [1], [0, 0, 1, 1], [], []>} : vector<256x32xbf16>, vector<32x32xbf16>, vector<256x32xf32> -> vector<256x32xf32>
    %c18_i32_17 = arith.constant 18 : i32
    %23 = arith.addi %c18_i32_17, %0 : i32
    %c-6_i32 = arith.constant -6 : i32
    %24 = arith.addi %23, %c-6_i32 : i32
    %c0_18 = arith.constant 0 : index
    %25 = arith.index_cast %24 : i32 to index
    %c12 = arith.constant 12 : index
    %c0_19 = arith.constant 0 : index
    %26 = vector.load %arg2[%c0_18, %25, %c12, %c0_19] : memref<1x52x52x32xbf16, #tpu.memory_space<vmem>>, vector<1x16x16x32xbf16>
    %27 = vector.shape_cast %26 : vector<1x16x16x32xbf16> to vector<16x16x32xbf16>
    %28 = vector.shape_cast %27 : vector<16x16x32xbf16> to vector<256x32xbf16>
    %c0_20 = arith.constant 0 : index
    %c0_21 = arith.constant 0 : index
    %c0_22 = arith.constant 0 : index
    %c0_23 = arith.constant 0 : index
    %29 = vector.load %arg4[%c0_20, %c0_21, %c0_22, %c0_23] : memref<3x9x32x32xbf16, #tpu.memory_space<vmem>>, vector<1x1x32x32xbf16>
    %30 = vector.shape_cast %29 : vector<1x1x32x32xbf16> to vector<32x32xbf16>
    %cst_24 = arith.constant dense<0.000000e+00> : vector<256x32xf32>
    %31 = tpu.matmul %28, %30, %cst_24 {dimension_numbers = #tpu.dot_dimension_numbers<[1], [0], [0], [1], [0, 0, 1, 1], [], []>} : vector<256x32xbf16>, vector<32x32xbf16>, vector<256x32xf32> -> vector<256x32xf32>
    %32 = arith.addf %22, %31 : vector<256x32xf32>
    %c18_i32_25 = arith.constant 18 : i32
    %33 = arith.addi %c18_i32_25, %0 : i32
    %c-6_i32_26 = arith.constant -6 : i32
    %34 = arith.addi %33, %c-6_i32_26 : i32
    %c0_27 = arith.constant 0 : index
    %35 = arith.index_cast %34 : i32 to index
    %c18_28 = arith.constant 18 : index
    %c0_29 = arith.constant 0 : index
    %36 = vector.load %arg2[%c0_27, %35, %c18_28, %c0_29] : memref<1x52x52x32xbf16, #tpu.memory_space<vmem>>, vector<1x16x16x32xbf16>
    %37 = vector.shape_cast %36 : vector<1x16x16x32xbf16> to vector<16x16x32xbf16>
    %38 = vector.shape_cast %37 : vector<16x16x32xbf16> to vector<256x32xbf16>
    %c0_30 = arith.constant 0 : index
    %c1 = arith.constant 1 : index
    %c0_31 = arith.constant 0 : index
    %c0_32 = arith.constant 0 : index
    %39 = vector.load %arg4[%c0_30, %c1, %c0_31, %c0_32] : memref<3x9x32x32xbf16, #tpu.memory_space<vmem>>, vector<1x1x32x32xbf16>
    %40 = vector.shape_cast %39 : vector<1x1x32x32xbf16> to vector<32x32xbf16>
    %cst_33 = arith.constant dense<0.000000e+00> : vector<256x32xf32>
    %41 = tpu.matmul %38, %40, %cst_33 {dimension_numbers = #tpu.dot_dimension_numbers<[1], [0], [0], [1], [0, 0, 1, 1], [], []>} : vector<256x32xbf16>, vector<32x32xbf16>, vector<256x32xf32> -> vector<256x32xf32>
    %42 = arith.addf %32, %41 : vector<256x32xf32>
    %c18_i32_34 = arith.constant 18 : i32
    %43 = arith.addi %c18_i32_34, %0 : i32
    %c-6_i32_35 = arith.constant -6 : i32
    %44 = arith.addi %43, %c-6_i32_35 : i32
    %c0_36 = arith.constant 0 : index
    %45 = arith.index_cast %44 : i32 to index
    %c24 = arith.constant 24 : index
    %c0_37 = arith.constant 0 : index
    %46 = vector.load %arg2[%c0_36, %45, %c24, %c0_37] : memref<1x52x52x32xbf16, #tpu.memory_space<vmem>>, vector<1x16x16x32xbf16>
    %47 = vector.shape_cast %46 : vector<1x16x16x32xbf16> to vector<16x16x32xbf16>
    %48 = vector.shape_cast %47 : vector<16x16x32xbf16> to vector<256x32xbf16>
    %c0_38 = arith.constant 0 : index
    %c2 = arith.constant 2 : index
    %c0_39 = arith.constant 0 : index
    %c0_40 = arith.constant 0 : index
    %49 = vector.load %arg4[%c0_38, %c2, %c0_39, %c0_40] : memref<3x9x32x32xbf16, #tpu.memory_space<vmem>>, vector<1x1x32x32xbf16>
    %50 = vector.shape_cast %49 : vector<1x1x32x32xbf16> to vector<32x32xbf16>
    %cst_41 = arith.constant dense<0.000000e+00> : vector<256x32xf32>
    %51 = tpu.matmul %48, %50, %cst_41 {dimension_numbers = #tpu.dot_dimension_numbers<[1], [0], [0], [1], [0, 0, 1, 1], [], []>} : vector<256x32xbf16>, vector<32x32xbf16>, vector<256x32xf32> -> vector<256x32xf32>
    %52 = arith.addf %42, %51 : vector<256x32xf32>
    %c18_i32_42 = arith.constant 18 : i32
    %53 = arith.addi %c18_i32_42, %0 : i32
    %c0_i32_43 = arith.constant 0 : i32
    %54 = arith.addi %53, %c0_i32_43 : i32
    %c0_44 = arith.constant 0 : index
    %55 = arith.index_cast %54 : i32 to index
    %c12_45 = arith.constant 12 : index
    %c0_46 = arith.constant 0 : index
    %56 = vector.load %arg2[%c0_44, %55, %c12_45, %c0_46] : memref<1x52x52x32xbf16, #tpu.memory_space<vmem>>, vector<1x16x16x32xbf16>
    %57 = vector.shape_cast %56 : vector<1x16x16x32xbf16> to vector<16x16x32xbf16>
    %58 = vector.shape_cast %57 : vector<16x16x32xbf16> to vector<256x32xbf16>
    %c0_47 = arith.constant 0 : index
    %c3 = arith.constant 3 : index
    %c0_48 = arith.constant 0 : index
    %c0_49 = arith.constant 0 : index
    %59 = vector.load %arg4[%c0_47, %c3, %c0_48, %c0_49] : memref<3x9x32x32xbf16, #tpu.memory_space<vmem>>, vector<1x1x32x32xbf16>
    %60 = vector.shape_cast %59 : vector<1x1x32x32xbf16> to vector<32x32xbf16>
    %cst_50 = arith.constant dense<0.000000e+00> : vector<256x32xf32>
    %61 = tpu.matmul %58, %60, %cst_50 {dimension_numbers = #tpu.dot_dimension_numbers<[1], [0], [0], [1], [0, 0, 1, 1], [], []>} : vector<256x32xbf16>, vector<32x32xbf16>, vector<256x32xf32> -> vector<256x32xf32>
    %62 = arith.addf %52, %61 : vector<256x32xf32>
    %c18_i32_51 = arith.constant 18 : i32
    %63 = arith.addi %c18_i32_51, %0 : i32
    %c0_i32_52 = arith.constant 0 : i32
    %64 = arith.addi %63, %c0_i32_52 : i32
    %c0_53 = arith.constant 0 : index
    %65 = arith.index_cast %64 : i32 to index
    %c24_54 = arith.constant 24 : index
    %c0_55 = arith.constant 0 : index
    %66 = vector.load %arg2[%c0_53, %65, %c24_54, %c0_55] : memref<1x52x52x32xbf16, #tpu.memory_space<vmem>>, vector<1x16x16x32xbf16>
    %67 = vector.shape_cast %66 : vector<1x16x16x32xbf16> to vector<16x16x32xbf16>
    %68 = vector.shape_cast %67 : vector<16x16x32xbf16> to vector<256x32xbf16>
    %c0_56 = arith.constant 0 : index
    %c5 = arith.constant 5 : index
    %c0_57 = arith.constant 0 : index
    %c0_58 = arith.constant 0 : index
    %69 = vector.load %arg4[%c0_56, %c5, %c0_57, %c0_58] : memref<3x9x32x32xbf16, #tpu.memory_space<vmem>>, vector<1x1x32x32xbf16>
    %70 = vector.shape_cast %69 : vector<1x1x32x32xbf16> to vector<32x32xbf16>
    %cst_59 = arith.constant dense<0.000000e+00> : vector<256x32xf32>
    %71 = tpu.matmul %68, %70, %cst_59 {dimension_numbers = #tpu.dot_dimension_numbers<[1], [0], [0], [1], [0, 0, 1, 1], [], []>} : vector<256x32xbf16>, vector<32x32xbf16>, vector<256x32xf32> -> vector<256x32xf32>
    %72 = arith.addf %62, %71 : vector<256x32xf32>
    %c18_i32_60 = arith.constant 18 : i32
    %73 = arith.addi %c18_i32_60, %0 : i32
    %c6_i32 = arith.constant 6 : i32
    %74 = arith.addi %73, %c6_i32 : i32
    %c0_61 = arith.constant 0 : index
    %75 = arith.index_cast %74 : i32 to index
    %c12_62 = arith.constant 12 : index
    %c0_63 = arith.constant 0 : index
    %76 = vector.load %arg2[%c0_61, %75, %c12_62, %c0_63] : memref<1x52x52x32xbf16, #tpu.memory_space<vmem>>, vector<1x16x16x32xbf16>
    %77 = vector.shape_cast %76 : vector<1x16x16x32xbf16> to vector<16x16x32xbf16>
    %78 = vector.shape_cast %77 : vector<16x16x32xbf16> to vector<256x32xbf16>
    %c0_64 = arith.constant 0 : index
    %c6 = arith.constant 6 : index
    %c0_65 = arith.constant 0 : index
    %c0_66 = arith.constant 0 : index
    %79 = vector.load %arg4[%c0_64, %c6, %c0_65, %c0_66] : memref<3x9x32x32xbf16, #tpu.memory_space<vmem>>, vector<1x1x32x32xbf16>
    %80 = vector.shape_cast %79 : vector<1x1x32x32xbf16> to vector<32x32xbf16>
    %cst_67 = arith.constant dense<0.000000e+00> : vector<256x32xf32>
    %81 = tpu.matmul %78, %80, %cst_67 {dimension_numbers = #tpu.dot_dimension_numbers<[1], [0], [0], [1], [0, 0, 1, 1], [], []>} : vector<256x32xbf16>, vector<32x32xbf16>, vector<256x32xf32> -> vector<256x32xf32>
    %82 = arith.addf %72, %81 : vector<256x32xf32>
    %c18_i32_68 = arith.constant 18 : i32
    %83 = arith.addi %c18_i32_68, %0 : i32
    %c6_i32_69 = arith.constant 6 : i32
    %84 = arith.addi %83, %c6_i32_69 : i32
    %c0_70 = arith.constant 0 : index
    %85 = arith.index_cast %84 : i32 to index
    %c18_71 = arith.constant 18 : index
    %c0_72 = arith.constant 0 : index
    %86 = vector.load %arg2[%c0_70, %85, %c18_71, %c0_72] : memref<1x52x52x32xbf16, #tpu.memory_space<vmem>>, vector<1x16x16x32xbf16>
    %87 = vector.shape_cast %86 : vector<1x16x16x32xbf16> to vector<16x16x32xbf16>
    %88 = vector.shape_cast %87 : vector<16x16x32xbf16> to vector<256x32xbf16>
    %c0_73 = arith.constant 0 : index
    %c7 = arith.constant 7 : index
    %c0_74 = arith.constant 0 : index
    %c0_75 = arith.constant 0 : index
    %89 = vector.load %arg4[%c0_73, %c7, %c0_74, %c0_75] : memref<3x9x32x32xbf16, #tpu.memory_space<vmem>>, vector<1x1x32x32xbf16>
    %90 = vector.shape_cast %89 : vector<1x1x32x32xbf16> to vector<32x32xbf16>
    %cst_76 = arith.constant dense<0.000000e+00> : vector<256x32xf32>
    %91 = tpu.matmul %88, %90, %cst_76 {dimension_numbers = #tpu.dot_dimension_numbers<[1], [0], [0], [1], [0, 0, 1, 1], [], []>} : vector<256x32xbf16>, vector<32x32xbf16>, vector<256x32xf32> -> vector<256x32xf32>
    %92 = arith.addf %82, %91 : vector<256x32xf32>
    %c18_i32_77 = arith.constant 18 : i32
    %93 = arith.addi %c18_i32_77, %0 : i32
    %c6_i32_78 = arith.constant 6 : i32
    %94 = arith.addi %93, %c6_i32_78 : i32
    %c0_79 = arith.constant 0 : index
    %95 = arith.index_cast %94 : i32 to index
    %c24_80 = arith.constant 24 : index
    %c0_81 = arith.constant 0 : index
    %96 = vector.load %arg2[%c0_79, %95, %c24_80, %c0_81] : memref<1x52x52x32xbf16, #tpu.memory_space<vmem>>, vector<1x16x16x32xbf16>
    %97 = vector.shape_cast %96 : vector<1x16x16x32xbf16> to vector<16x16x32xbf16>
    %98 = vector.shape_cast %97 : vector<16x16x32xbf16> to vector<256x32xbf16>
    %c0_82 = arith.constant 0 : index
    %c8 = arith.constant 8 : index
    %c0_83 = arith.constant 0 : index
    %c0_84 = arith.constant 0 : index
    %99 = vector.load %arg4[%c0_82, %c8, %c0_83, %c0_84] : memref<3x9x32x32xbf16, #tpu.memory_space<vmem>>, vector<1x1x32x32xbf16>
    %100 = vector.shape_cast %99 : vector<1x1x32x32xbf16> to vector<32x32xbf16>
    %cst_85 = arith.constant dense<0.000000e+00> : vector<256x32xf32>
    %101 = tpu.matmul %98, %100, %cst_85 {dimension_numbers = #tpu.dot_dimension_numbers<[1], [0], [0], [1], [0, 0, 1, 1], [], []>} : vector<256x32xbf16>, vector<32x32xbf16>, vector<256x32xf32> -> vector<256x32xf32>
    %102 = arith.addf %92, %101 : vector<256x32xf32>
    %c0_86 = arith.constant 0 : index
    %c0_87 = arith.constant 0 : index
    %103 = vector.load %arg9[%c0_86, %c0_87] : memref<256x128xf32, #tpu.memory_space<vmem>>, vector<256x128xf32>
    %c1_88 = arith.constant 1 : index
    %c0_89 = arith.constant 0 : index
    %c0_90 = arith.constant 0 : index
    %104 = vector.load %arg6[%c1_88, %c0_89, %c0_90] : memref<4x1x32xf32, #tpu.memory_space<vmem>>, vector<1x1x32xf32>
    %105 = vector.shape_cast %104 : vector<1x1x32xf32> to vector<1x32xf32>
    %106 = vector.broadcast %105 : vector<1x32xf32> to vector<256x32xf32>
    %107 = arith.addf %102, %106 : vector<256x32xf32>
    %cst_91 = arith.constant 0.000000e+00 : f32
    %108 = vector.broadcast %cst_91 : f32 to vector<256x32xf32>
    %109 = arith.maximumf %107, %108 : vector<256x32xf32>
    %110 = arith.truncf %109 : vector<256x32xf32> to vector<256x32xbf16>
    %c1_92 = arith.constant 1 : index
    %c0_93 = arith.constant 0 : index
    %c0_94 = arith.constant 0 : index
    %111 = vector.load %arg5[%c1_92, %c0_93, %c0_94] : memref<4x32x128xbf16, #tpu.memory_space<vmem>>, vector<1x32x128xbf16>
    %112 = vector.shape_cast %111 : vector<1x32x128xbf16> to vector<32x128xbf16>
    %cst_95 = arith.constant dense<0.000000e+00> : vector<256x128xf32>
    %113 = tpu.matmul %110, %112, %cst_95 {dimension_numbers = #tpu.dot_dimension_numbers<[1], [0], [0], [1], [0, 0, 1, 1], [], []>} : vector<256x32xbf16>, vector<32x128xbf16>, vector<256x128xf32> -> vector<256x128xf32>
    %114 = arith.addf %103, %113 : vector<256x128xf32>
    %c0_96 = arith.constant 0 : index
    %c0_97 = arith.constant 0 : index
    %115 = vector.load %arg9[%c0_96, %c0_97] : memref<256x128xf32, #tpu.memory_space<vmem>>, vector<256x128xf32>
    tpu.vector_store %arg9[%c0_96, %c0_97], %114 {strides = array<i32>} : memref<256x128xf32, #tpu.memory_space<vmem>>, vector<256x128xf32>,
    %c1_98 = arith.constant 1 : index
    %c4_99 = arith.constant 4 : index
    %c0_100 = arith.constant 0 : index
    %c0_101 = arith.constant 0 : index
    %116 = vector.load %arg4[%c1_98, %c4_99, %c0_100, %c0_101] : memref<3x9x32x32xbf16, #tpu.memory_space<vmem>>, vector<1x1x32x32xbf16>
    %117 = vector.shape_cast %116 : vector<1x1x32x32xbf16> to vector<32x32xbf16>
    %cst_102 = arith.constant dense<0.000000e+00> : vector<256x32xf32>
    %118 = tpu.matmul %6, %117, %cst_102 {dimension_numbers = #tpu.dot_dimension_numbers<[1], [0], [0], [1], [0, 0, 1, 1], [], []>} : vector<256x32xbf16>, vector<32x32xbf16>, vector<256x32xf32> -> vector<256x32xf32>
    %c18_i32_103 = arith.constant 18 : i32
    %119 = arith.addi %c18_i32_103, %0 : i32
    %c-12_i32 = arith.constant -12 : i32
    %120 = arith.addi %119, %c-12_i32 : i32
    %c0_104 = arith.constant 0 : index
    %121 = arith.index_cast %120 : i32 to index
    %c6_105 = arith.constant 6 : index
    %c0_106 = arith.constant 0 : index
    %122 = vector.load %arg2[%c0_104, %121, %c6_105, %c0_106] : memref<1x52x52x32xbf16, #tpu.memory_space<vmem>>, vector<1x16x16x32xbf16>
    %123 = vector.shape_cast %122 : vector<1x16x16x32xbf16> to vector<16x16x32xbf16>
    %124 = vector.shape_cast %123 : vector<16x16x32xbf16> to vector<256x32xbf16>
    %c1_107 = arith.constant 1 : index
    %c0_108 = arith.constant 0 : index
    %c0_109 = arith.constant 0 : index
    %c0_110 = arith.constant 0 : index
    %125 = vector.load %arg4[%c1_107, %c0_108, %c0_109, %c0_110] : memref<3x9x32x32xbf16, #tpu.memory_space<vmem>>, vector<1x1x32x32xbf16>
    %126 = vector.shape_cast %125 : vector<1x1x32x32xbf16> to vector<32x32xbf16>
    %cst_111 = arith.constant dense<0.000000e+00> : vector<256x32xf32>
    %127 = tpu.matmul %124, %126, %cst_111 {dimension_numbers = #tpu.dot_dimension_numbers<[1], [0], [0], [1], [0, 0, 1, 1], [], []>} : vector<256x32xbf16>, vector<32x32xbf16>, vector<256x32xf32> -> vector<256x32xf32>
    %128 = arith.addf %118, %127 : vector<256x32xf32>
    %c18_i32_112 = arith.constant 18 : i32
    %129 = arith.addi %c18_i32_112, %0 : i32
    %c-12_i32_113 = arith.constant -12 : i32
    %130 = arith.addi %129, %c-12_i32_113 : i32
    %c0_114 = arith.constant 0 : index
    %131 = arith.index_cast %130 : i32 to index
    %c18_115 = arith.constant 18 : index
    %c0_116 = arith.constant 0 : index
    %132 = vector.load %arg2[%c0_114, %131, %c18_115, %c0_116] : memref<1x52x52x32xbf16, #tpu.memory_space<vmem>>, vector<1x16x16x32xbf16>
    %133 = vector.shape_cast %132 : vector<1x16x16x32xbf16> to vector<16x16x32xbf16>
    %134 = vector.shape_cast %133 : vector<16x16x32xbf16> to vector<256x32xbf16>
    %c1_117 = arith.constant 1 : index
    %c1_118 = arith.constant 1 : index
    %c0_119 = arith.constant 0 : index
    %c0_120 = arith.constant 0 : index
    %135 = vector.load %arg4[%c1_117, %c1_118, %c0_119, %c0_120] : memref<3x9x32x32xbf16, #tpu.memory_space<vmem>>, vector<1x1x32x32xbf16>
    %136 = vector.shape_cast %135 : vector<1x1x32x32xbf16> to vector<32x32xbf16>
    %cst_121 = arith.constant dense<0.000000e+00> : vector<256x32xf32>
    %137 = tpu.matmul %134, %136, %cst_121 {dimension_numbers = #tpu.dot_dimension_numbers<[1], [0], [0], [1], [0, 0, 1, 1], [], []>} : vector<256x32xbf16>, vector<32x32xbf16>, vector<256x32xf32> -> vector<256x32xf32>
    %138 = arith.addf %128, %137 : vector<256x32xf32>
    %c18_i32_122 = arith.constant 18 : i32
    %139 = arith.addi %c18_i32_122, %0 : i32
    %c-12_i32_123 = arith.constant -12 : i32
    %140 = arith.addi %139, %c-12_i32_123 : i32
    %c0_124 = arith.constant 0 : index
    %141 = arith.index_cast %140 : i32 to index
    %c30 = arith.constant 30 : index
    %c0_125 = arith.constant 0 : index
    %142 = vector.load %arg2[%c0_124, %141, %c30, %c0_125] : memref<1x52x52x32xbf16, #tpu.memory_space<vmem>>, vector<1x16x16x32xbf16>
    %143 = vector.shape_cast %142 : vector<1x16x16x32xbf16> to vector<16x16x32xbf16>
    %144 = vector.shape_cast %143 : vector<16x16x32xbf16> to vector<256x32xbf16>
    %c1_126 = arith.constant 1 : index
    %c2_127 = arith.constant 2 : index
    %c0_128 = arith.constant 0 : index
    %c0_129 = arith.constant 0 : index
    %145 = vector.load %arg4[%c1_126, %c2_127, %c0_128, %c0_129] : memref<3x9x32x32xbf16, #tpu.memory_space<vmem>>, vector<1x1x32x32xbf16>
    %146 = vector.shape_cast %145 : vector<1x1x32x32xbf16> to vector<32x32xbf16>
    %cst_130 = arith.constant dense<0.000000e+00> : vector<256x32xf32>
    %147 = tpu.matmul %144, %146, %cst_130 {dimension_numbers = #tpu.dot_dimension_numbers<[1], [0], [0], [1], [0, 0, 1, 1], [], []>} : vector<256x32xbf16>, vector<32x32xbf16>, vector<256x32xf32> -> vector<256x32xf32>
    %148 = arith.addf %138, %147 : vector<256x32xf32>
    %c18_i32_131 = arith.constant 18 : i32
    %149 = arith.addi %c18_i32_131, %0 : i32
    %c0_i32_132 = arith.constant 0 : i32
    %150 = arith.addi %149, %c0_i32_132 : i32
    %c0_133 = arith.constant 0 : index
    %151 = arith.index_cast %150 : i32 to index
    %c6_134 = arith.constant 6 : index
    %c0_135 = arith.constant 0 : index
    %152 = vector.load %arg2[%c0_133, %151, %c6_134, %c0_135] : memref<1x52x52x32xbf16, #tpu.memory_space<vmem>>, vector<1x16x16x32xbf16>
    %153 = vector.shape_cast %152 : vector<1x16x16x32xbf16> to vector<16x16x32xbf16>
    %154 = vector.shape_cast %153 : vector<16x16x32xbf16> to vector<256x32xbf16>
    %c1_136 = arith.constant 1 : index
    %c3_137 = arith.constant 3 : index
    %c0_138 = arith.constant 0 : index
    %c0_139 = arith.constant 0 : index
    %155 = vector.load %arg4[%c1_136, %c3_137, %c0_138, %c0_139] : memref<3x9x32x32xbf16, #tpu.memory_space<vmem>>, vector<1x1x32x32xbf16>
    %156 = vector.shape_cast %155 : vector<1x1x32x32xbf16> to vector<32x32xbf16>
    %cst_140 = arith.constant dense<0.000000e+00> : vector<256x32xf32>
    %157 = tpu.matmul %154, %156, %cst_140 {dimension_numbers = #tpu.dot_dimension_numbers<[1], [0], [0], [1], [0, 0, 1, 1], [], []>} : vector<256x32xbf16>, vector<32x32xbf16>, vector<256x32xf32> -> vector<256x32xf32>
    %158 = arith.addf %148, %157 : vector<256x32xf32>
    %c18_i32_141 = arith.constant 18 : i32
    %159 = arith.addi %c18_i32_141, %0 : i32
    %c0_i32_142 = arith.constant 0 : i32
    %160 = arith.addi %159, %c0_i32_142 : i32
    %c0_143 = arith.constant 0 : index
    %161 = arith.index_cast %160 : i32 to index
    %c30_144 = arith.constant 30 : index
    %c0_145 = arith.constant 0 : index
    %162 = vector.load %arg2[%c0_143, %161, %c30_144, %c0_145] : memref<1x52x52x32xbf16, #tpu.memory_space<vmem>>, vector<1x16x16x32xbf16>
    %163 = vector.shape_cast %162 : vector<1x16x16x32xbf16> to vector<16x16x32xbf16>
    %164 = vector.shape_cast %163 : vector<16x16x32xbf16> to vector<256x32xbf16>
    %c1_146 = arith.constant 1 : index
    %c5_147 = arith.constant 5 : index
    %c0_148 = arith.constant 0 : index
    %c0_149 = arith.constant 0 : index
    %165 = vector.load %arg4[%c1_146, %c5_147, %c0_148, %c0_149] : memref<3x9x32x32xbf16, #tpu.memory_space<vmem>>, vector<1x1x32x32xbf16>
    %166 = vector.shape_cast %165 : vector<1x1x32x32xbf16> to vector<32x32xbf16>
    %cst_150 = arith.constant dense<0.000000e+00> : vector<256x32xf32>
    %167 = tpu.matmul %164, %166, %cst_150 {dimension_numbers = #tpu.dot_dimension_numbers<[1], [0], [0], [1], [0, 0, 1, 1], [], []>} : vector<256x32xbf16>, vector<32x32xbf16>, vector<256x32xf32> -> vector<256x32xf32>
    %168 = arith.addf %158, %167 : vector<256x32xf32>
    %c18_i32_151 = arith.constant 18 : i32
    %169 = arith.addi %c18_i32_151, %0 : i32
    %c12_i32 = arith.constant 12 : i32
    %170 = arith.addi %169, %c12_i32 : i32
    %c0_152 = arith.constant 0 : index
    %171 = arith.index_cast %170 : i32 to index
    %c6_153 = arith.constant 6 : index
    %c0_154 = arith.constant 0 : index
    %172 = vector.load %arg2[%c0_152, %171, %c6_153, %c0_154] : memref<1x52x52x32xbf16, #tpu.memory_space<vmem>>, vector<1x16x16x32xbf16>
    %173 = vector.shape_cast %172 : vector<1x16x16x32xbf16> to vector<16x16x32xbf16>
    %174 = vector.shape_cast %173 : vector<16x16x32xbf16> to vector<256x32xbf16>
    %c1_155 = arith.constant 1 : index
    %c6_156 = arith.constant 6 : index
    %c0_157 = arith.constant 0 : index
    %c0_158 = arith.constant 0 : index
    %175 = vector.load %arg4[%c1_155, %c6_156, %c0_157, %c0_158] : memref<3x9x32x32xbf16, #tpu.memory_space<vmem>>, vector<1x1x32x32xbf16>
    %176 = vector.shape_cast %175 : vector<1x1x32x32xbf16> to vector<32x32xbf16>
    %cst_159 = arith.constant dense<0.000000e+00> : vector<256x32xf32>
    %177 = tpu.matmul %174, %176, %cst_159 {dimension_numbers = #tpu.dot_dimension_numbers<[1], [0], [0], [1], [0, 0, 1, 1], [], []>} : vector<256x32xbf16>, vector<32x32xbf16>, vector<256x32xf32> -> vector<256x32xf32>
    %178 = arith.addf %168, %177 : vector<256x32xf32>
    %c18_i32_160 = arith.constant 18 : i32
    %179 = arith.addi %c18_i32_160, %0 : i32
    %c12_i32_161 = arith.constant 12 : i32
    %180 = arith.addi %179, %c12_i32_161 : i32
    %c0_162 = arith.constant 0 : index
    %181 = arith.index_cast %180 : i32 to index
    %c18_163 = arith.constant 18 : index
    %c0_164 = arith.constant 0 : index
    %182 = vector.load %arg2[%c0_162, %181, %c18_163, %c0_164] : memref<1x52x52x32xbf16, #tpu.memory_space<vmem>>, vector<1x16x16x32xbf16>
    %183 = vector.shape_cast %182 : vector<1x16x16x32xbf16> to vector<16x16x32xbf16>
    %184 = vector.shape_cast %183 : vector<16x16x32xbf16> to vector<256x32xbf16>
    %c1_165 = arith.constant 1 : index
    %c7_166 = arith.constant 7 : index
    %c0_167 = arith.constant 0 : index
    %c0_168 = arith.constant 0 : index
    %185 = vector.load %arg4[%c1_165, %c7_166, %c0_167, %c0_168] : memref<3x9x32x32xbf16, #tpu.memory_space<vmem>>, vector<1x1x32x32xbf16>
    %186 = vector.shape_cast %185 : vector<1x1x32x32xbf16> to vector<32x32xbf16>
    %cst_169 = arith.constant dense<0.000000e+00> : vector<256x32xf32>
    %187 = tpu.matmul %184, %186, %cst_169 {dimension_numbers = #tpu.dot_dimension_numbers<[1], [0], [0], [1], [0, 0, 1, 1], [], []>} : vector<256x32xbf16>, vector<32x32xbf16>, vector<256x32xf32> -> vector<256x32xf32>
    %188 = arith.addf %178, %187 : vector<256x32xf32>
    %c18_i32_170 = arith.constant 18 : i32
    %189 = arith.addi %c18_i32_170, %0 : i32
    %c12_i32_171 = arith.constant 12 : i32
    %190 = arith.addi %189, %c12_i32_171 : i32
    %c0_172 = arith.constant 0 : index
    %191 = arith.index_cast %190 : i32 to index
    %c30_173 = arith.constant 30 : index
    %c0_174 = arith.constant 0 : index
    %192 = vector.load %arg2[%c0_172, %191, %c30_173, %c0_174] : memref<1x52x52x32xbf16, #tpu.memory_space<vmem>>, vector<1x16x16x32xbf16>
    %193 = vector.shape_cast %192 : vector<1x16x16x32xbf16> to vector<16x16x32xbf16>
    %194 = vector.shape_cast %193 : vector<16x16x32xbf16> to vector<256x32xbf16>
    %c1_175 = arith.constant 1 : index
    %c8_176 = arith.constant 8 : index
    %c0_177 = arith.constant 0 : index
    %c0_178 = arith.constant 0 : index
    %195 = vector.load %arg4[%c1_175, %c8_176, %c0_177, %c0_178] : memref<3x9x32x32xbf16, #tpu.memory_space<vmem>>, vector<1x1x32x32xbf16>
    %196 = vector.shape_cast %195 : vector<1x1x32x32xbf16> to vector<32x32xbf16>
    %cst_179 = arith.constant dense<0.000000e+00> : vector<256x32xf32>
    %197 = tpu.matmul %194, %196, %cst_179 {dimension_numbers = #tpu.dot_dimension_numbers<[1], [0], [0], [1], [0, 0, 1, 1], [], []>} : vector<256x32xbf16>, vector<32x32xbf16>, vector<256x32xf32> -> vector<256x32xf32>
    %198 = arith.addf %188, %197 : vector<256x32xf32>
    %c0_180 = arith.constant 0 : index
    %c0_181 = arith.constant 0 : index
    %199 = vector.load %arg9[%c0_180, %c0_181] : memref<256x128xf32, #tpu.memory_space<vmem>>, vector<256x128xf32>
    %c2_182 = arith.constant 2 : index
    %c0_183 = arith.constant 0 : index
    %c0_184 = arith.constant 0 : index
    %200 = vector.load %arg6[%c2_182, %c0_183, %c0_184] : memref<4x1x32xf32, #tpu.memory_space<vmem>>, vector<1x1x32xf32>
    %201 = vector.shape_cast %200 : vector<1x1x32xf32> to vector<1x32xf32>
    %202 = vector.broadcast %201 : vector<1x32xf32> to vector<256x32xf32>
    %203 = arith.addf %198, %202 : vector<256x32xf32>
    %cst_185 = arith.constant 0.000000e+00 : f32
    %204 = vector.broadcast %cst_185 : f32 to vector<256x32xf32>
    %205 = arith.maximumf %203, %204 : vector<256x32xf32>
    %206 = arith.truncf %205 : vector<256x32xf32> to vector<256x32xbf16>
    %c2_186 = arith.constant 2 : index
    %c0_187 = arith.constant 0 : index
    %c0_188 = arith.constant 0 : index
    %207 = vector.load %arg5[%c2_186, %c0_187, %c0_188] : memref<4x32x128xbf16, #tpu.memory_space<vmem>>, vector<1x32x128xbf16>
    %208 = vector.shape_cast %207 : vector<1x32x128xbf16> to vector<32x128xbf16>
    %cst_189 = arith.constant dense<0.000000e+00> : vector<256x128xf32>
    %209 = tpu.matmul %206, %208, %cst_189 {dimension_numbers = #tpu.dot_dimension_numbers<[1], [0], [0], [1], [0, 0, 1, 1], [], []>} : vector<256x32xbf16>, vector<32x128xbf16>, vector<256x128xf32> -> vector<256x128xf32>
    %210 = arith.addf %199, %209 : vector<256x128xf32>
    %c0_190 = arith.constant 0 : index
    %c0_191 = arith.constant 0 : index
    %211 = vector.load %arg9[%c0_190, %c0_191] : memref<256x128xf32, #tpu.memory_space<vmem>>, vector<256x128xf32>
    tpu.vector_store %arg9[%c0_190, %c0_191], %210 {strides = array<i32>} : memref<256x128xf32, #tpu.memory_space<vmem>>, vector<256x128xf32>,
    %c2_192 = arith.constant 2 : index
    %c4_193 = arith.constant 4 : index
    %c0_194 = arith.constant 0 : index
    %c0_195 = arith.constant 0 : index
    %212 = vector.load %arg4[%c2_192, %c4_193, %c0_194, %c0_195] : memref<3x9x32x32xbf16, #tpu.memory_space<vmem>>, vector<1x1x32x32xbf16>
    %213 = vector.shape_cast %212 : vector<1x1x32x32xbf16> to vector<32x32xbf16>
    %cst_196 = arith.constant dense<0.000000e+00> : vector<256x32xf32>
    %214 = tpu.matmul %6, %213, %cst_196 {dimension_numbers = #tpu.dot_dimension_numbers<[1], [0], [0], [1], [0, 0, 1, 1], [], []>} : vector<256x32xbf16>, vector<32x32xbf16>, vector<256x32xf32> -> vector<256x32xf32>
    %c18_i32_197 = arith.constant 18 : i32
    %215 = arith.addi %c18_i32_197, %0 : i32
    %c-18_i32 = arith.constant -18 : i32
    %216 = arith.addi %215, %c-18_i32 : i32
    %c0_198 = arith.constant 0 : index
    %217 = arith.index_cast %216 : i32 to index
    %c0_199 = arith.constant 0 : index
    %c0_200 = arith.constant 0 : index
    %218 = vector.load %arg2[%c0_198, %217, %c0_199, %c0_200] : memref<1x52x52x32xbf16, #tpu.memory_space<vmem>>, vector<1x16x16x32xbf16>
    %219 = vector.shape_cast %218 : vector<1x16x16x32xbf16> to vector<16x16x32xbf16>
    %220 = vector.shape_cast %219 : vector<16x16x32xbf16> to vector<256x32xbf16>
    %c2_201 = arith.constant 2 : index
    %c0_202 = arith.constant 0 : index
    %c0_203 = arith.constant 0 : index
    %c0_204 = arith.constant 0 : index
    %221 = vector.load %arg4[%c2_201, %c0_202, %c0_203, %c0_204] : memref<3x9x32x32xbf16, #tpu.memory_space<vmem>>, vector<1x1x32x32xbf16>
    %222 = vector.shape_cast %221 : vector<1x1x32x32xbf16> to vector<32x32xbf16>
    %cst_205 = arith.constant dense<0.000000e+00> : vector<256x32xf32>
    %223 = tpu.matmul %220, %222, %cst_205 {dimension_numbers = #tpu.dot_dimension_numbers<[1], [0], [0], [1], [0, 0, 1, 1], [], []>} : vector<256x32xbf16>, vector<32x32xbf16>, vector<256x32xf32> -> vector<256x32xf32>
    %224 = arith.addf %214, %223 : vector<256x32xf32>
    %c18_i32_206 = arith.constant 18 : i32
    %225 = arith.addi %c18_i32_206, %0 : i32
    %c-18_i32_207 = arith.constant -18 : i32
    %226 = arith.addi %225, %c-18_i32_207 : i32
    %c0_208 = arith.constant 0 : index
    %227 = arith.index_cast %226 : i32 to index
    %c18_209 = arith.constant 18 : index
    %c0_210 = arith.constant 0 : index
    %228 = vector.load %arg2[%c0_208, %227, %c18_209, %c0_210] : memref<1x52x52x32xbf16, #tpu.memory_space<vmem>>, vector<1x16x16x32xbf16>
    %229 = vector.shape_cast %228 : vector<1x16x16x32xbf16> to vector<16x16x32xbf16>
    %230 = vector.shape_cast %229 : vector<16x16x32xbf16> to vector<256x32xbf16>
    %c2_211 = arith.constant 2 : index
    %c1_212 = arith.constant 1 : index
    %c0_213 = arith.constant 0 : index
    %c0_214 = arith.constant 0 : index
    %231 = vector.load %arg4[%c2_211, %c1_212, %c0_213, %c0_214] : memref<3x9x32x32xbf16, #tpu.memory_space<vmem>>, vector<1x1x32x32xbf16>
    %232 = vector.shape_cast %231 : vector<1x1x32x32xbf16> to vector<32x32xbf16>
    %cst_215 = arith.constant dense<0.000000e+00> : vector<256x32xf32>
    %233 = tpu.matmul %230, %232, %cst_215 {dimension_numbers = #tpu.dot_dimension_numbers<[1], [0], [0], [1], [0, 0, 1, 1], [], []>} : vector<256x32xbf16>, vector<32x32xbf16>, vector<256x32xf32> -> vector<256x32xf32>
    %234 = arith.addf %224, %233 : vector<256x32xf32>
    %c18_i32_216 = arith.constant 18 : i32
    %235 = arith.addi %c18_i32_216, %0 : i32
    %c-18_i32_217 = arith.constant -18 : i32
    %236 = arith.addi %235, %c-18_i32_217 : i32
    %c0_218 = arith.constant 0 : index
    %237 = arith.index_cast %236 : i32 to index
    %c36 = arith.constant 36 : index
    %c0_219 = arith.constant 0 : index
    %238 = vector.load %arg2[%c0_218, %237, %c36, %c0_219] : memref<1x52x52x32xbf16, #tpu.memory_space<vmem>>, vector<1x16x16x32xbf16>
    %239 = vector.shape_cast %238 : vector<1x16x16x32xbf16> to vector<16x16x32xbf16>
    %240 = vector.shape_cast %239 : vector<16x16x32xbf16> to vector<256x32xbf16>
    %c2_220 = arith.constant 2 : index
    %c2_221 = arith.constant 2 : index
    %c0_222 = arith.constant 0 : index
    %c0_223 = arith.constant 0 : index
    %241 = vector.load %arg4[%c2_220, %c2_221, %c0_222, %c0_223] : memref<3x9x32x32xbf16, #tpu.memory_space<vmem>>, vector<1x1x32x32xbf16>
    %242 = vector.shape_cast %241 : vector<1x1x32x32xbf16> to vector<32x32xbf16>
    %cst_224 = arith.constant dense<0.000000e+00> : vector<256x32xf32>
    %243 = tpu.matmul %240, %242, %cst_224 {dimension_numbers = #tpu.dot_dimension_numbers<[1], [0], [0], [1], [0, 0, 1, 1], [], []>} : vector<256x32xbf16>, vector<32x32xbf16>, vector<256x32xf32> -> vector<256x32xf32>
    %244 = arith.addf %234, %243 : vector<256x32xf32>
    %c18_i32_225 = arith.constant 18 : i32
    %245 = arith.addi %c18_i32_225, %0 : i32
    %c0_i32_226 = arith.constant 0 : i32
    %246 = arith.addi %245, %c0_i32_226 : i32
    %c0_227 = arith.constant 0 : index
    %247 = arith.index_cast %246 : i32 to index
    %c0_228 = arith.constant 0 : index
    %c0_229 = arith.constant 0 : index
    %248 = vector.load %arg2[%c0_227, %247, %c0_228, %c0_229] : memref<1x52x52x32xbf16, #tpu.memory_space<vmem>>, vector<1x16x16x32xbf16>
    %249 = vector.shape_cast %248 : vector<1x16x16x32xbf16> to vector<16x16x32xbf16>
    %250 = vector.shape_cast %249 : vector<16x16x32xbf16> to vector<256x32xbf16>
    %c2_230 = arith.constant 2 : index
    %c3_231 = arith.constant 3 : index
    %c0_232 = arith.constant 0 : index
    %c0_233 = arith.constant 0 : index
    %251 = vector.load %arg4[%c2_230, %c3_231, %c0_232, %c0_233] : memref<3x9x32x32xbf16, #tpu.memory_space<vmem>>, vector<1x1x32x32xbf16>
    %252 = vector.shape_cast %251 : vector<1x1x32x32xbf16> to vector<32x32xbf16>
    %cst_234 = arith.constant dense<0.000000e+00> : vector<256x32xf32>
    %253 = tpu.matmul %250, %252, %cst_234 {dimension_numbers = #tpu.dot_dimension_numbers<[1], [0], [0], [1], [0, 0, 1, 1], [], []>} : vector<256x32xbf16>, vector<32x32xbf16>, vector<256x32xf32> -> vector<256x32xf32>
    %254 = arith.addf %244, %253 : vector<256x32xf32>
    %c18_i32_235 = arith.constant 18 : i32
    %255 = arith.addi %c18_i32_235, %0 : i32
    %c0_i32_236 = arith.constant 0 : i32
    %256 = arith.addi %255, %c0_i32_236 : i32
    %c0_237 = arith.constant 0 : index
    %257 = arith.index_cast %256 : i32 to index
    %c36_238 = arith.constant 36 : index
    %c0_239 = arith.constant 0 : index
    %258 = vector.load %arg2[%c0_237, %257, %c36_238, %c0_239] : memref<1x52x52x32xbf16, #tpu.memory_space<vmem>>, vector<1x16x16x32xbf16>
    %259 = vector.shape_cast %258 : vector<1x16x16x32xbf16> to vector<16x16x32xbf16>
    %260 = vector.shape_cast %259 : vector<16x16x32xbf16> to vector<256x32xbf16>
    %c2_240 = arith.constant 2 : index
    %c5_241 = arith.constant 5 : index
    %c0_242 = arith.constant 0 : index
    %c0_243 = arith.constant 0 : index
    %261 = vector.load %arg4[%c2_240, %c5_241, %c0_242, %c0_243] : memref<3x9x32x32xbf16, #tpu.memory_space<vmem>>, vector<1x1x32x32xbf16>
    %262 = vector.shape_cast %261 : vector<1x1x32x32xbf16> to vector<32x32xbf16>
    %cst_244 = arith.constant dense<0.000000e+00> : vector<256x32xf32>
    %263 = tpu.matmul %260, %262, %cst_244 {dimension_numbers = #tpu.dot_dimension_numbers<[1], [0], [0], [1], [0, 0, 1, 1], [], []>} : vector<256x32xbf16>, vector<32x32xbf16>, vector<256x32xf32> -> vector<256x32xf32>
    %264 = arith.addf %254, %263 : vector<256x32xf32>
    %c18_i32_245 = arith.constant 18 : i32
    %265 = arith.addi %c18_i32_245, %0 : i32
    %c18_i32_246 = arith.constant 18 : i32
    %266 = arith.addi %265, %c18_i32_246 : i32
    %c0_247 = arith.constant 0 : index
    %267 = arith.index_cast %266 : i32 to index
    %c0_248 = arith.constant 0 : index
    %c0_249 = arith.constant 0 : index
    %268 = vector.load %arg2[%c0_247, %267, %c0_248, %c0_249] : memref<1x52x52x32xbf16, #tpu.memory_space<vmem>>, vector<1x16x16x32xbf16>
    %269 = vector.shape_cast %268 : vector<1x16x16x32xbf16> to vector<16x16x32xbf16>
    %270 = vector.shape_cast %269 : vector<16x16x32xbf16> to vector<256x32xbf16>
    %c2_250 = arith.constant 2 : index
    %c6_251 = arith.constant 6 : index
    %c0_252 = arith.constant 0 : index
    %c0_253 = arith.constant 0 : index
    %271 = vector.load %arg4[%c2_250, %c6_251, %c0_252, %c0_253] : memref<3x9x32x32xbf16, #tpu.memory_space<vmem>>, vector<1x1x32x32xbf16>
    %272 = vector.shape_cast %271 : vector<1x1x32x32xbf16> to vector<32x32xbf16>
    %cst_254 = arith.constant dense<0.000000e+00> : vector<256x32xf32>
    %273 = tpu.matmul %270, %272, %cst_254 {dimension_numbers = #tpu.dot_dimension_numbers<[1], [0], [0], [1], [0, 0, 1, 1], [], []>} : vector<256x32xbf16>, vector<32x32xbf16>, vector<256x32xf32> -> vector<256x32xf32>
    %274 = arith.addf %264, %273 : vector<256x32xf32>
    %c18_i32_255 = arith.constant 18 : i32
    %275 = arith.addi %c18_i32_255, %0 : i32
    %c18_i32_256 = arith.constant 18 : i32
    %276 = arith.addi %275, %c18_i32_256 : i32
    %c0_257 = arith.constant 0 : index
    %277 = arith.index_cast %276 : i32 to index
    %c18_258 = arith.constant 18 : index
    %c0_259 = arith.constant 0 : index
    %278 = vector.load %arg2[%c0_257, %277, %c18_258, %c0_259] : memref<1x52x52x32xbf16, #tpu.memory_space<vmem>>, vector<1x16x16x32xbf16>
    %279 = vector.shape_cast %278 : vector<1x16x16x32xbf16> to vector<16x16x32xbf16>
    %280 = vector.shape_cast %279 : vector<16x16x32xbf16> to vector<256x32xbf16>
    %c2_260 = arith.constant 2 : index
    %c7_261 = arith.constant 7 : index
    %c0_262 = arith.constant 0 : index
    %c0_263 = arith.constant 0 : index
    %281 = vector.load %arg4[%c2_260, %c7_261, %c0_262, %c0_263] : memref<3x9x32x32xbf16, #tpu.memory_space<vmem>>, vector<1x1x32x32xbf16>
    %282 = vector.shape_cast %281 : vector<1x1x32x32xbf16> to vector<32x32xbf16>
    %cst_264 = arith.constant dense<0.000000e+00> : vector<256x32xf32>
    %283 = tpu.matmul %280, %282, %cst_264 {dimension_numbers = #tpu.dot_dimension_numbers<[1], [0], [0], [1], [0, 0, 1, 1], [], []>} : vector<256x32xbf16>, vector<32x32xbf16>, vector<256x32xf32> -> vector<256x32xf32>
    %284 = arith.addf %274, %283 : vector<256x32xf32>
    %c18_i32_265 = arith.constant 18 : i32
    %285 = arith.addi %c18_i32_265, %0 : i32
    %c18_i32_266 = arith.constant 18 : i32
    %286 = arith.addi %285, %c18_i32_266 : i32
    %c0_267 = arith.constant 0 : index
    %287 = arith.index_cast %286 : i32 to index
    %c36_268 = arith.constant 36 : index
    %c0_269 = arith.constant 0 : index
    %288 = vector.load %arg2[%c0_267, %287, %c36_268, %c0_269] : memref<1x52x52x32xbf16, #tpu.memory_space<vmem>>, vector<1x16x16x32xbf16>
    %289 = vector.shape_cast %288 : vector<1x16x16x32xbf16> to vector<16x16x32xbf16>
    %290 = vector.shape_cast %289 : vector<16x16x32xbf16> to vector<256x32xbf16>
    %c2_270 = arith.constant 2 : index
    %c8_271 = arith.constant 8 : index
    %c0_272 = arith.constant 0 : index
    %c0_273 = arith.constant 0 : index
    %291 = vector.load %arg4[%c2_270, %c8_271, %c0_272, %c0_273] : memref<3x9x32x32xbf16, #tpu.memory_space<vmem>>, vector<1x1x32x32xbf16>
    %292 = vector.shape_cast %291 : vector<1x1x32x32xbf16> to vector<32x32xbf16>
    %cst_274 = arith.constant dense<0.000000e+00> : vector<256x32xf32>
    %293 = tpu.matmul %290, %292, %cst_274 {dimension_numbers = #tpu.dot_dimension_numbers<[1], [0], [0], [1], [0, 0, 1, 1], [], []>} : vector<256x32xbf16>, vector<32x32xbf16>, vector<256x32xf32> -> vector<256x32xf32>
    %294 = arith.addf %284, %293 : vector<256x32xf32>
    %c0_275 = arith.constant 0 : index
    %c0_276 = arith.constant 0 : index
    %295 = vector.load %arg9[%c0_275, %c0_276] : memref<256x128xf32, #tpu.memory_space<vmem>>, vector<256x128xf32>
    %c3_277 = arith.constant 3 : index
    %c0_278 = arith.constant 0 : index
    %c0_279 = arith.constant 0 : index
    %296 = vector.load %arg6[%c3_277, %c0_278, %c0_279] : memref<4x1x32xf32, #tpu.memory_space<vmem>>, vector<1x1x32xf32>
    %297 = vector.shape_cast %296 : vector<1x1x32xf32> to vector<1x32xf32>
    %298 = vector.broadcast %297 : vector<1x32xf32> to vector<256x32xf32>
    %299 = arith.addf %294, %298 : vector<256x32xf32>
    %cst_280 = arith.constant 0.000000e+00 : f32
    %300 = vector.broadcast %cst_280 : f32 to vector<256x32xf32>
    %301 = arith.maximumf %299, %300 : vector<256x32xf32>
    %302 = arith.truncf %301 : vector<256x32xf32> to vector<256x32xbf16>
    %c3_281 = arith.constant 3 : index
    %c0_282 = arith.constant 0 : index
    %c0_283 = arith.constant 0 : index
    %303 = vector.load %arg5[%c3_281, %c0_282, %c0_283] : memref<4x32x128xbf16, #tpu.memory_space<vmem>>, vector<1x32x128xbf16>
    %304 = vector.shape_cast %303 : vector<1x32x128xbf16> to vector<32x128xbf16>
    %cst_284 = arith.constant dense<0.000000e+00> : vector<256x128xf32>
    %305 = tpu.matmul %302, %304, %cst_284 {dimension_numbers = #tpu.dot_dimension_numbers<[1], [0], [0], [1], [0, 0, 1, 1], [], []>} : vector<256x32xbf16>, vector<32x128xbf16>, vector<256x128xf32> -> vector<256x128xf32>
    %306 = arith.addf %295, %305 : vector<256x128xf32>
    %c0_285 = arith.constant 0 : index
    %c0_286 = arith.constant 0 : index
    %307 = vector.load %arg9[%c0_285, %c0_286] : memref<256x128xf32, #tpu.memory_space<vmem>>, vector<256x128xf32>
    tpu.vector_store %arg9[%c0_285, %c0_286], %306 {strides = array<i32>} : memref<256x128xf32, #tpu.memory_space<vmem>>, vector<256x128xf32>,
    %c0_287 = arith.constant 0 : index
    %c0_288 = arith.constant 0 : index
    %308 = vector.load %arg9[%c0_287, %c0_288] : memref<256x128xf32, #tpu.memory_space<vmem>>, vector<256x128xf32>
    %c0_289 = arith.constant 0 : index
    %c0_290 = arith.constant 0 : index
    %c0_291 = arith.constant 0 : index
    %309 = vector.load %arg7[%c0_289, %c0_290, %c0_291] : memref<1x1x128xf32, #tpu.memory_space<vmem>>, vector<1x1x128xf32>
    %310 = vector.shape_cast %309 : vector<1x1x128xf32> to vector<1x128xf32>
    %311 = vector.broadcast %310 : vector<1x128xf32> to vector<256x128xf32>
    %312 = arith.addf %308, %311 : vector<256x128xf32>
    %cst_292 = arith.constant 0.000000e+00 : f32
    %313 = vector.broadcast %cst_292 : f32 to vector<256x128xf32>
    %314 = arith.maximumf %312, %313 : vector<256x128xf32>
    %c0_293 = arith.constant 0 : index
    %c0_294 = arith.constant 0 : index
    %c0_295 = arith.constant 0 : index
    %315 = vector.load %arg8[%c0_293, %c0_294, %c0_295] : memref<1x256x128xf32, #tpu.memory_space<vmem>>, vector<1x256x128xf32>
    %316 = vector.shape_cast %315 : vector<1x256x128xf32> to vector<256x128xf32>
    %317 = vector.shape_cast %314 : vector<256x128xf32> to vector<1x256x128xf32>
    tpu.vector_store %arg8[%c0_293, %c0_294, %c0_295], %317 {strides = array<i32>} : memref<1x256x128xf32, #tpu.memory_space<vmem>>, vector<1x256x128xf32>,
    return
  }
  func.func @transform_0(%arg0: i32, %arg1: i32) -> (i32, i32, i32, i32) {
    %c0_i32 = arith.constant 0 : i32
    %c0_i32_0 = arith.constant 0 : i32
    %c0_i32_1 = arith.constant 0 : i32
    %c0_i32_2 = arith.constant 0 : i32
    return %arg0, %c0_i32, %c0_i32_0, %c0_i32_1 : i32, i32, i32, i32
  }
  func.func @transform_1(%arg0: i32, %arg1: i32) -> (i32, i32) {
    %c0_i32 = arith.constant 0 : i32
    %c0_i32_0 = arith.constant 0 : i32
    %c0_i32_1 = arith.constant 0 : i32
    return %c0_i32, %c0_i32_0 : i32, i32
  }
  func.func @transform_2(%arg0: i32, %arg1: i32) -> (i32, i32, i32, i32) {
    %c0_i32 = arith.constant 0 : i32
    %c0_i32_0 = arith.constant 0 : i32
    %c0_i32_1 = arith.constant 0 : i32
    %c0_i32_2 = arith.constant 0 : i32
    %c0_i32_3 = arith.constant 0 : i32
    return %c0_i32, %c0_i32_0, %c0_i32_1, %c0_i32_2 : i32, i32, i32, i32
  }
  func.func @transform_3(%arg0: i32, %arg1: i32) -> (i32, i32, i32) {
    %c0_i32 = arith.constant 0 : i32
    %c0_i32_0 = arith.constant 0 : i32
    %c0_i32_1 = arith.constant 0 : i32
    %c0_i32_2 = arith.constant 0 : i32
    return %c0_i32, %c0_i32_0, %c0_i32_1 : i32, i32, i32
  }
  func.func @transform_4(%arg0: i32, %arg1: i32) -> (i32, i32, i32) {
    %c0_i32 = arith.constant 0 : i32
    %c0_i32_0 = arith.constant 0 : i32
    %c0_i32_1 = arith.constant 0 : i32
    %c0_i32_2 = arith.constant 0 : i32
    return %c0_i32, %c0_i32_0, %c0_i32_1 : i32, i32, i32
  }
  func.func @transform_5(%arg0: i32, %arg1: i32) -> (i32, i32, i32) {
    %c0_i32 = arith.constant 0 : i32
    %c0_i32_0 = arith.constant 0 : i32
    %c0_i32_1 = arith.constant 0 : i32
    return %arg0, %c0_i32, %c0_i32_0 : i32, i32, i32
  }
  func.func @transform_6(%arg0: i32, %arg1: i32) -> (i32, i32, i32) {
    %c0_i32 = arith.constant 0 : i32
    %c0_i32_0 = arith.constant 0 : i32
    return %arg0, %arg1, %c0_i32 : i32, i32, i32
  }
}

</mosaic_0001>

<bundles_post_ra>
// kernel: aspp_forward.1
= control target key start
LH: loop header
LB: loop body
LE: loop exit
PB: predicated region body
PF: predicated region fallthrough
CT: control target
= control target key end

     0   :  { %11 = vsyncpa [#allocation4], 0  ;;  %s20723_s0 = inlined_call_operand.vmem [shape: bf16[2,52,52,32], index: 0, kind: input, shape index: {}]   ;;  %s20724_s1 = inlined_call_operand.vmem [shape: bf16[32,32], index: 1, kind: input, shape index: {}]   ;;  %s20725_s2 = inlined_call_operand.vmem [shape: bf16[3,9,32,32], index: 2, kind: input, shape index: {}]   ;;  %s20726_s3 = inlined_call_operand.vmem [shape: bf16[4,32,128], index: 3, kind: input, shape index: {}]   ;;  %s20727_s4 = inlined_call_operand.vmem [shape: f32[4,1,32], index: 4, kind: input, shape index: {}]   ;;  %s20728_s5 = inlined_call_operand.vmem [shape: f32[2,1,128], index: 5, kind: input, shape index: {}]   ;;  %s20729_s6 = inlined_call_operand.hbm [shape: f32[2,256,128], index: 6, kind: output, shape index: {}]  }
   0x1   :  { %13 = vsyncpa [#allocation4 + $0x1], 0  ;;  %s15003_s21 = smov 0   ;;  %s15005_s22 = smov 0  }
   0x2   :  { %s15007_s23 = smov 0   ;;  %s15009_s24 = smov 0  }
   0x3   :  { %s15011_s25 = smov 0   ;;  %s15013_s26 = smov 0  }
   0x4 LB: > { %s12128_s27 = sadd.s32 4294967295, %s14964_s26   ;;  %s12129_s28 = sadd.s32 4294967294, %s14964_s26   ;;  %s14964_s26 = sphi %s15013_s26, %s19_s26   ;;  %s14960_s25 = sphi %s15011_s25, %s21070_s25   ;;  %s14956_s24 = sphi %s15009_s24, %s21069_s24   ;;  %s14952_s23 = sphi %s15007_s23, %s21068_s23   ;;  %s14948_s22 = sphi %s15005_s22, %s21067_s22   ;;  %s14944_s21 = sphi %s15003_s21, %s21066_s21  }
   0x5   : > { %s31_s29 = sadd.s32 1, %s14960_s25  ;;  %s176_s30 = sadd.s32 1, %s14952_s23 }
   0x6   : > { %p33_p0 = scmp.ge.s32.totalorder %s31_s29, 2  ;;  %p186_p1 = scmp.ne.s32.totalorder %s14952_s23, %s14948_s22 }
   0x7   : > { %p187_p2 = scmp.eq.s32.totalorder %s12128_s27, 1  ;;  %p192_p3 = scmp.ne.s32.totalorder %s14948_s22, %s14944_s21 }
   0x8   : > { %s21072_s29 = smov (%p33_p0, %s31_s29), 0  ;;  %p193_p5 = scmp.eq.s32.totalorder %s12129_s28, 1 }
   0x9   : > { %p15043_p4 = por %p187_p2, %p186_p1  ;;  %s171_s8 = ssub.s32 %s14960_s25, %s21072_s29 }
   0xa   : > { %p12132_p6 = scmp.ge.s32.totalorder %s14964_s26, 1  ;;  %p174_p7 = scmp.eq.s32.totalorder %s171_s8, 0 }
   0xb   : > { %p15050_p8 = por %p193_p5, %p192_p3  ;;  %p237_p9 = scmp.lt.s32.totalorder %s14964_s26, 3 }
   0xc   : > { %s15056_s10 = scalar_select %p174_p7, %s14952_s23, %s176_s30  }
   0xd   : > { %p238_p10 = pnand %p12132_p6, %p237_p9 }
   0xf   : > { %241 = sbr.rel (%p238_p10) target bundleno = 2541 (0x9ed), region = 44 }
  0x14   : > { %v14660_v0 = vld [vmem:[%s20724_s1 + $0x8] sm:$0xff]  ;;  %p270_p11 = scmp.lt.s32.totalorder %s14956_s24, 1  ;;  %v14659_v1 = vld [vmem:[%s20724_s1] sm:$0xff]  ;;  %vm381_vm0 = vcmask 1042432   ;;  %vm382_vm1 = vcmask 1046532   ;;  %vm564_vm3 = vcmask 261120  }
  0x15   : > { %619 = vmatpush.bf16.msra.mxu0 %v14660_v0  ;;  %vm15074_vm2 = vmor %vm381_vm0, %vm382_vm1  ;;  %v14668_v19 = vld [vmem:[%s20725_s2 + $0x18] sm:$0xff]  ;;  %vm1040_vm4 = vcmask 1041408   ;;  %vm1041_vm5 = vcmask 1045508   ;;  %vm4499_vm7 = vcmask 1040384   ;;  %vm4500_vm8 = vcmask 1044484   ;;  %s14819_s20 = sshll.u32 %s14956_s24, 8 }
  0x16   : > { %s15066_s15 = scalar_select %p270_p11, %s14956_s24, 1  ;;  %vm15170_vm6 = vmor %vm1040_vm4, %vm1041_vm5 }
  0x17   : > { %vm16619_vm9 = vmor %vm4499_vm7, %vm4500_vm8  ;;  %s12016_s30 = scalar_lea.hbm %s20729_s6, %s14819_s20  ;;  %s14906_s17 = scalar_lea.hbm %s20729_s6, 512 }
  0x18   : > { %s14820_s16 = smul.u32 1456, %s15066_s15  ;;  %s277_s14 = scalar_lea.vmem %s20728_s5, %s15066_s15 }
  0x19   : > { %620 = vmatpush.bf16.msra.mxu0 %v14659_v1  ;;  %s12019_s11 = sshll.u32 %s12016_s30, 4  ;;  %s12020_s11 = int_to_ptr.hbm [resolvable:$true] %s12019_s11 }
  0x1a   : > { %s15072_s19 = scalar_lea.vmem %s20723_s0, %s14820_s16  ;;  %s14900_s12 = sshra.s32 %s12020_s11, 4  ;;  %s14901_s12 = int_to_ptr.hbm [resolvable:$true] %s14900_s12 }
  0x1b   : > { %v12135_v3 = vld [vmem:[%s15072_s19 + $0x200] sm:$0xe]  ;;  %v12136_v4 = vld [vmem:[%s15072_s19 + $0x204] sm:$0xf]  ;;  %v12137_v5 = vld [vmem:[%s15072_s19 + $0x208] sm:$0x1]  ;;  %p14907_p1 = scmp.lt.s32.totalorder %s14901_s12, %s20729_s6 }
  0x1c   : > { %v12183_v6 = vrot.slane %v12135_v3, 9  ;;  %v386_v7 = vrot.slane %v12136_v4, 5  ;;  %v389_v8 = vrot.slane %v12137_v5, 5  ;;  %v12139_v12 = vld [vmem:[%s15072_s19 + $0x220] sm:$0xf]  ;;  %s14902_s13 = scalar_lea.hbm %s14901_s12, 256 }
  0x1d   : > { %v393_v15 = vrot.slane %v12139_v12, 5  ;;  %v12138_v17 = vld [vmem:[%s15072_s19 + $0x21c] sm:$0xe]  ;;  %v12140_v18 = vld [vmem:[%s15072_s19 + $0x224] sm:$0x1]  ;;  %1784 = vmatpush.bf16.msrb.mxu0 %v14668_v19  ;;  %v14664_v19 = vld [vmem:[%s20725_s2 + $0x48] sm:$0xff]  ;;  %p14903_p12 = scmp.ne.s32.totalorder %s14901_s12, %s14902_s13  ;;  %p14908_p2 = scmp.lt.s32.totalorder %s14906_s17, %s14902_s13 }
  0x1e   : > { %v387_v9 = vsel %vm15074_vm2, %v12183_v6, %v386_v7  ;;  %v388_v10 = vrot.slane %v386_v7, 4  ;;  %v12184_v20 = vrot.slane %v12138_v17, 9  ;;  %v396_v22 = vrot.slane %v12140_v18, 5  ;;  %v12142_v27 = vld [vmem:[%s15072_s19 + $0x23c] sm:$0xf]  ;;  %v14666_v18 = vld [vmem:[%s20725_s2 + $0x8] sm:$0xff]  ;;  %1374 = vmatpush.bf16.msra.mxu3 %v14664_v19 }
  0x1f   : > { %v504_v11 = vunpack.c.l.b16 %v387_v9  ;;  %v395_v21 = vrot.slane %v393_v15, 4  ;;  %v400_v29 = vrot.slane %v12142_v27, 5  ;;  %v12141_v30 = vld [vmem:[%s15072_s19 + $0x238] sm:$0xe]  ;;  %v12143_v31 = vld [vmem:[%s15072_s19 + $0x240] sm:$0x1]  ;;  %1273 = vmatpush.bf16.msra.mxu2 %v14666_v18  ;;  %p14904_p13 = pnand %p14903_p12, %p15043_p4  ;;  %p14909_p3 = por %p14908_p2, %p14907_p1 }
  0x20   : > { %v390_v13 = vsel %vm15074_vm2, %v388_v10, %v389_v8  ;;  %v394_v23 = vsel %vm15074_vm2, %v12184_v20, %v393_v15  ;;  %v12185_v32 = vrot.slane %v12141_v30, 9  ;;  %v403_v34 = vrot.slane %v12143_v31, 5  ;;  %v12145_v39 = vld [vmem:[%s15072_s19 + $0x258] sm:$0xf]  ;;  %v12144_v42 = vld [vmem:[%s15072_s19 + $0x254] sm:$0xe] }
  0x21   : > { %v505_v14 = vunpack.c.l.b16 %v390_v13  ;;  %v397_v24 = vsel %vm15074_vm2, %v395_v21, %v396_v22  ;;  %v506_v25 = vunpack.c.l.b16 %v394_v23  ;;  %v402_v33 = vrot.slane %v400_v29, 4  ;;  %v12146_v43 = vld [vmem:[%s15072_s19 + $0x25c] sm:$0x1]  ;;  %v12148_v51 = vld [vmem:[%s15072_s19 + $0x274] sm:$0xf]  ;;  %p14905_p0 = pneg %p14904_p13 }
  0x22   : > { %v507_v26 = vunpack.c.l.b16 %v397_v24  ;;  %v401_v35 = vsel %vm15074_vm2, %v12185_v32, %v400_v29  ;;  %v407_v41 = vrot.slane %v12145_v39, 5  ;;  %v12186_v44 = vrot.slane %v12144_v42, 9  ;;  %v12147_v54 = vld [vmem:[%s15072_s19 + $0x270] sm:$0xe]  ;;  %v12149_v55 = vld [vmem:[%s15072_s19 + $0x278] sm:$0x1] }
  0x23   : > { %v15086_v16 = vpack.c.b16 %v505_v14, %v504_v11  ;;  %v404_v36 = vsel %vm15074_vm2, %v402_v33, %v403_v34  ;;  %v508_v37 = vunpack.c.l.b16 %v401_v35  ;;  %v410_v46 = vrot.slane %v12146_v43, 5  ;;  %v12151_v63 = vld [vmem:[%s15072_s19 + $0x290] sm:$0xf]  ;;  %v12150_v3 = vld [vmem:[%s15072_s19 + $0x28c] sm:$0xe]  ;;  %p14910_p5 = pnand %p14909_p3, %p14905_p0 }
  0x24   : > { %v15100_v28 = vpack.c.b16 %v507_v26, %v506_v25  ;;  %v509_v38 = vunpack.c.l.b16 %v404_v36  ;;  %v409_v45 = vrot.slane %v407_v41, 4  ;;  %v408_v47 = vsel %vm15074_vm2, %v12186_v44, %v407_v41  ;;  %v12152_v4 = vld [vmem:[%s15072_s19 + $0x294] sm:$0x1]  ;;  %v12154_v12 = vld [vmem:[%s15072_s19 + $0x2ac] sm:$0xf]  ;;  %v14665_v36 = vld [vmem:[%s20725_s2] sm:$0xff] }
  0x25   : > { %20768 = vst [vmem:[#allocation6_spill] sm:$0xff] %v15086_v16  ;;  %12207 = vmatmul.msk.bf16.vlgmr.msra.gmra.mxu0 %vm564_vm3, %v15086_v16  ;;  %v510_v49 = vunpack.c.l.b16 %v408_v47  ;;  %v414_v53 = vrot.slane %v12148_v51, 5  ;;  %v12187_v56 = vrot.slane %v12147_v54, 9  ;;  %v417_v58 = vrot.slane %v12149_v55, 5  ;;  %v12153_v15 = vld [vmem:[%s15072_s19 + $0x2a8] sm:$0xe]  ;;  %1274 = vmatpush.bf16.msra.mxu2 %v14665_v36 }
  0x26   : > { %20769 = vst [vmem:[#allocation7_spill] sm:$0xff] %v15100_v28  ;;  %v15111_v40 = vpack.c.b16 %v509_v38, %v508_v37  ;;  %v411_v48 = vsel %vm15074_vm2, %v409_v45, %v410_v46  ;;  %v421_v1 = vrot.slane %v12151_v63, 5  ;;  %v12188_v5 = vrot.slane %v12150_v3, 9  ;;  %v12155_v17 = vld [vmem:[%s15072_s19 + $0x2b0] sm:$0x1]  ;;  %v14663_v37 = vld [vmem:[%s20725_s2 + $0x40] sm:$0xff] }
  0x27   : > { %v511_v50 = vunpack.c.l.b16 %v411_v48  ;;  %v416_v57 = vrot.slane %v414_v53, 4  ;;  %v415_v59 = vsel %vm15074_vm2, %v12187_v56, %v414_v53  ;;  %v424_v7 = vrot.slane %v12152_v4, 5  ;;  %v12252_v25 = vld [vmem:[%s15072_s19 + $0x158] sm:$0xf]  ;;  %v12251_v30 = vld [vmem:[%s15072_s19 + $0x154] sm:$0xc]  ;;  %1375 = vmatpush.bf16.msra.mxu3 %v14663_v37 }
  0x28   : > { %20770 = vst [vmem:[#allocation8_spill] sm:$0xff] %v15111_v40  ;;  %v512_v61 = vunpack.c.l.b16 %v415_v59  ;;  %v423_v6 = vrot.slane %v421_v1, 4  ;;  %v422_v8 = vsel %vm15074_vm2, %v12188_v5, %v421_v1  ;;  %v428_v14 = vrot.slane %v12154_v12, 5  ;;  %v12253_v31 = vld [vmem:[%s15072_s19 + $0x15c] sm:$0x3]  ;;  %v14662_v53 = vld [vmem:[%s20726_s3 + $0x8] sm:$0xff] }
  0x29   : > { %v15122_v52 = vpack.c.b16 %v511_v50, %v510_v49  ;;  %v418_v60 = vsel %vm15074_vm2, %v416_v57, %v417_v58  ;;  %v514_v10 = vunpack.c.l.b16 %v422_v8  ;;  %v12189_v20 = vrot.slane %v12153_v15, 9  ;;  %v12157_v32 = vld [vmem:[%s15072_s19 + $0x2c8] sm:$0xf]  ;;  %v12156_v46 = vld [vmem:[%s15072_s19 + $0x2c4] sm:$0xe]  ;;  %820 = vmatpush.bf16.msra.mxu1 %v14662_v53 }
  0x2a   : > { %v513_v62 = vunpack.c.l.b16 %v418_v60  ;;  %v425_v9 = vsel %vm15074_vm2, %v423_v6, %v424_v7  ;;  %v430_v21 = vrot.slane %v428_v14, 4  ;;  %v431_v22 = vrot.slane %v12155_v17, 5  ;;  %v12158_v47 = vld [vmem:[%s15072_s19 + $0x2cc] sm:$0x1]  ;;  %12347 = vmatmul.msk.bf16.vlgmr.msra.gmra.mxu3 %vm564_vm3, %v15086_v16  ;;  %v12255_v56 = vld [vmem:[%s15072_s19 + $0x174] sm:$0xf] }
  0x2b   : > { %20771 = vst [vmem:[#allocation9_spill] sm:$0xff] %v15122_v52  ;;  %v515_v11 = vunpack.c.l.b16 %v425_v9  ;;  %v429_v23 = vsel %vm15074_vm2, %v12189_v20, %v428_v14  ;;  %v1045_v26 = vrot.slane %v12252_v25, 6  ;;  %v12299_v33 = vrot.slane %v12251_v30, 10  ;;  %v14661_v57 = vld [vmem:[%s20726_s3] sm:$0xff]  ;;  %v12256_v3 = vld [vmem:[%s15072_s19 + $0x178] sm:$0x3] }
  0x2c   : > { %v15133_v0 = vpack.c.b16 %v513_v62, %v512_v61  ;;  %v432_v24 = vsel %vm15074_vm2, %v430_v21, %v431_v22  ;;  %v516_v27 = vunpack.c.l.b16 %v429_v23  ;;  %v1048_v35 = vrot.slane %v12253_v31, 6  ;;  %v14688_v61 = vld [vmem:[%s20725_s2 + $0x38] sm:$0xff]  ;;  %v12254_v62 = vld [vmem:[%s15072_s19 + $0x170] sm:$0xc]  ;;  %v12160_v1 = vld [vmem:[%s15072_s19 + $0x2e4] sm:$0xf] }
  0x2d   : > { %v15144_v13 = vpack.c.b16 %v515_v11, %v514_v10  ;;  %v517_v29 = vunpack.c.l.b16 %v432_v24  ;;  %v1047_v34 = vrot.slane %v1045_v26, 4  ;;  %v20774_v38 = vmov 0  ;;  %821 = vmatpush.bf16.msra.mxu1 %v14661_v57  ;;  %2492 = vmatpush.bf16.msrb.mxu2 %v14688_v61  ;;  %v14686_v7 = vld [vmem:[%s20725_s2 + $0x28] sm:$0xff]  ;;  %v12159_v12 = vld [vmem:[%s15072_s19 + $0x2e0] sm:$0xe] }
  0x2e   : > { %20772 = vst [vmem:[#allocation10_spill] sm:$0xff] %v15133_v0  ;;  %v20775_v38 = vsel %vm15170_vm6, 4294967295, %v20774_v38  ;;  %v1046_v41 = vsel %vm15170_vm6, %v12299_v33, %v1045_v26  ;;  %v435_v43 = vrot.slane %v12157_v32, 5  ;;  %v12190_v49 = vrot.slane %v12156_v46, 9  ;;  %v12161_v14 = vld [vmem:[%s15072_s19 + $0x2e8] sm:$0x1] }
  0x2f   : > { %20773 = vst [vmem:[#allocation11_spill] sm:$0xff] %v15144_v13  ;;  %v15174_v39 = vpack.c.b16 %v517_v29, %v516_v27  ;;  %v1049_v42 = vsel %vm15170_vm6, %v1047_v34, %v1048_v35  ;;  %v1159_v44 = vunpack.c.l.b16 %v1046_v41  ;;  %v438_v51 = vrot.slane %v12158_v47, 5  ;;  %v12258_v23 = vld [vmem:[%s15072_s19 + $0x190] sm:$0xf]  ;;  %v12257_v27 = vld [vmem:[%s15072_s19 + $0x18c] sm:$0xc] }
  0x30   : > { %20776 = vst [vmem:[#allocation12_spill] sm:$0xff] %v20775_v38  ;;  %v1160_v45 = vunpack.c.l.b16 %v1049_v42  ;;  %v437_v50 = vrot.slane %v435_v43, 4  ;;  %v436_v54 = vsel %vm15074_vm2, %v12190_v49, %v435_v43  ;;  %v1052_v58 = vrot.slane %v12255_v56, 6  ;;  %v12259_v29 = vld [vmem:[%s15072_s19 + $0x194] sm:$0x3] }
  0x31   : > { %20777 = vst [vmem:[#allocation13_spill] sm:$0xff] %v15174_v39  ;;  %v518_v59 = vunpack.c.l.b16 %v436_v54  ;;  %v12300_v4 = vrot.slane %v12254_v62, 10  ;;  %v1055_v5 = vrot.slane %v12256_v3, 6  ;;  %v442_v9 = vrot.slane %v12160_v1, 5  ;;  %2050 = vmatpush.bf16.msrb.mxu1 %v14686_v7  ;;  %v12163_v31 = vld [vmem:[%s15072_s19 + $0x300] sm:$0xf] }
  0x32   : > { %v1191_v48 = vpack.c.b16 %v1160_v45, %v1159_v44  ;;  %v439_v55 = vsel %vm15074_vm2, %v437_v50, %v438_v51  ;;  %v1054_v63 = vrot.slane %v1052_v58, 4  ;;  %v12191_v18 = vrot.slane %v12159_v12, 9  ;;  %v12162_v44 = vld [vmem:[%s15072_s19 + $0x2fc] sm:$0xe]  ;;  %v12164_v45 = vld [vmem:[%s15072_s19 + $0x304] sm:$0x1] }
  0x33   : > { %v519_v60 = vunpack.c.l.b16 %v439_v55  ;;  %v1053_v8 = vsel %vm15170_vm6, %v12300_v4, %v1052_v58  ;;  %v444_v19 = vrot.slane %v442_v9, 4  ;;  %v445_v20 = vrot.slane %v12161_v14, 5  ;;  %v15239_v47 = vld [vmem:[%s20727_s4] ss:$0 sm:$0xff]  ;;  %v12261_v58 = vld [vmem:[%s15072_s19 + $0x1ac] sm:$0xf] }
  0x34   : > { %12323 = vmatmul.msk.bf16.vlgmr.msra.gmra.mxu2 %vm564_vm3, %v1191_v48  ;;  %v1056_v10 = vsel %vm15170_vm6, %v1054_v63, %v1055_v5  ;;  %v1161_v11 = vunpack.c.l.b16 %v1053_v8  ;;  %v443_v21 = vsel %vm15074_vm2, %v12191_v18, %v442_v9  ;;  %v1059_v24 = vrot.slane %v12258_v23, 6  ;;  %v14667_v48 = vld [vmem:[%s20725_s2 + $0x10] sm:$0xff]  ;;  %v12260_v1 = vld [vmem:[%s15072_s19 + $0x1a8] sm:$0xc]  ;;  %v12166_v5 = vld [vmem:[%s15072_s19 + $0x31c] sm:$0xf] }
  0x35   : > { %12208 = vmatmul.msk.bf16.gmra.mxu0 %vm564_vm3, %v15100_v28  ;;  %v15204_v6 = vpack.c.b16 %v519_v60, %v518_v59  ;;  %v1162_v15 = vunpack.c.l.b16 %v1056_v10  ;;  %v446_v22 = vsel %vm15074_vm2, %v444_v19, %v445_v20  ;;  %v520_v25 = vunpack.c.l.b16 %v443_v21  ;;  %v12262_v7 = vld [vmem:[%s15072_s19 + $0x1b0] sm:$0x3]  ;;  %v12165_v18 = vld [vmem:[%s15072_s19 + $0x318] sm:$0xe]  ;;  %v12167_v19 = vld [vmem:[%s15072_s19 + $0x320] sm:$0x1] }
  0x36   : > { %v521_v26 = vunpack.c.l.b16 %v446_v22  ;;  %v12301_v30 = vrot.slane %v12257_v27, 10  ;;  %v1061_v32 = vrot.slane %v1059_v24, 4  ;;  %v1062_v33 = vrot.slane %v12259_v29, 6  ;;  %1785 = vmatpush.bf16.msrb.mxu0 %v14667_v48 }
  0x37   : > { %20778 = vst [vmem:[#allocation14_spill] sm:$0xff] %v15204_v6  ;;  %v1192_v17 = vpack.c.b16 %v1162_v15, %v1161_v11  ;;  %v449_v42 = vrot.slane %v12163_v31, 5  ;;  %v12192_v49 = vrot.slane %v12162_v44, 9  ;;  %v452_v51 = vrot.slane %v12164_v45, 5  ;;  %v12264_v31 = vld [vmem:[%s15072_s19 + $0x1c8] sm:$0xf] }
  0x38   : > { %v1060_v34 = vsel %vm15170_vm6, %v12301_v30, %v1059_v24  ;;  %v15230_v35 = vpack.c.b16 %v521_v26, %v520_v25  ;;  %v1063_v36 = vsel %vm15170_vm6, %v1061_v32, %v1062_v33  ;;  %v1066_v59 = vrot.slane %v12261_v58, 6  ;;  %v12169_v44 = vld [vmem:[%s15072_s19 + $0x338] sm:$0xf]  ;;  %v12265_v45 = vld [vmem:[%s15072_s19 + $0x1cc] sm:$0x3] }
  0x39   : > { %v1163_v37 = vunpack.c.l.b16 %v1060_v34  ;;  %v1164_v43 = vunpack.c.l.b16 %v1063_v36  ;;  %v451_v50 = vrot.slane %v449_v42, 4  ;;  %v450_v55 = vsel %vm15074_vm2, %v12192_v49, %v449_v42 }
  0x3a   : > { %12348 = vmatmul.msk.bf16.gmra.mxu3 %vm564_vm3, %v15100_v28  ;;  %20779 = vst [vmem:[#allocation15_spill] sm:$0xff] %v15230_v35  ;;  %v522_v62 = vunpack.c.l.b16 %v450_v55  ;;  %v1068_v3 = vrot.slane %v1066_v59, 4  ;;  %v12302_v8 = vrot.slane %v12260_v1, 10  ;;  %v1069_v9 = vrot.slane %v12262_v7, 6  ;;  %v12267_v7 = vld [vmem:[%s15072_s19 + $0x1e4] sm:$0xf] }
  0x3b   : > { %v1193_v46 = vpack.c.b16 %v1164_v43, %v1163_v37  ;;  %v453_v56 = vsel %vm15074_vm2, %v451_v50, %v452_v51  ;;  %v456_v14 = vrot.slane %v12166_v5, 5  ;;  %v12193_v22 = vrot.slane %v12165_v18, 9 }
  0x3c   : > { %v523_v63 = vunpack.c.l.b16 %v453_v56  ;;  %v1067_v11 = vsel %vm15170_vm6, %v12302_v8, %v1066_v59  ;;  %v1070_v15 = vsel %vm15170_vm6, %v1068_v3, %v1069_v9  ;;  %v459_v24 = vrot.slane %v12167_v19, 5  ;;  %v12168_v56 = vld [vmem:[%s15072_s19 + $0x334] sm:$0xe] }
  0x3d   : > { %v1166_v20 = vunpack.c.l.b16 %v1070_v15  ;;  %v458_v23 = vrot.slane %v456_v14, 4  ;;  %v457_v27 = vsel %vm15074_vm2, %v12193_v22, %v456_v14  ;;  %v1073_v32 = vrot.slane %v12264_v31, 6  ;;  %v12266_v15 = vld [vmem:[%s15072_s19 + $0x1e0] sm:$0xc]  ;;  %v12172_v19 = vld [vmem:[%s15072_s19 + $0x354] sm:$0xf] }
  0x3e   : > { %v15260_v10 = vpack.c.b16 %v523_v63, %v522_v62  ;;  %v524_v36 = vunpack.c.l.b16 %v457_v27  ;;  %v1076_v48 = vrot.slane %v12265_v45, 6  ;;  %v1080_v8 = vrot.slane %v12267_v7, 6  ;;  %v12173_v31 = vld [vmem:[%s15072_s19 + $0x358] sm:$0x1]  ;;  %v12174_v7 = vld [vmem:[%s15072_s19 + $0x36c] sm:$0xe] }
  0x3f   : > { %v460_v29 = vsel %vm15074_vm2, %v458_v23, %v459_v24  ;;  %v1075_v42 = vrot.slane %v1073_v32, 4 }
  0x40   : > { %20780 = vst [vmem:[#allocation16_spill] sm:$0xff] %v15260_v10  ;;  %v525_v37 = vunpack.c.l.b16 %v460_v29 }
  0x42   : > { %v15284_v49 = vpack.c.b16 %v525_v37, %v524_v36  ;;  %v473_v37 = vrot.slane %v12173_v31, 5 }
  0x44   : > { %12324 = vmatmul.msk.bf16.gmra.mxu2 %vm564_vm3, %v1192_v17  ;;  %v1165_v17 = vunpack.c.l.b16 %v1067_v11  ;;  %20781 = vst [vmem:[#allocation17_spill] sm:$0xff] %v15284_v49 }
  0x45   : > { %12209 = vmatmul.msk.bf16.gmra.mxu0 %vm564_vm3, %v15111_v40 }
  0x46   : > { %v1194_v21 = vpack.c.b16 %v1166_v20, %v1165_v17  ;;  %v1082_v17 = vrot.slane %v1080_v8, 4  ;;  %v12268_v20 = vld [vmem:[%s15072_s19 + $0x1e8] sm:$0x3] }
  0x47   : > { %v1083_v22 = vrot.slane %v12268_v20, 6 }
  0x49   : > { %v1084_v27 = vsel %vm15170_vm6, %v1082_v17, %v1083_v22  ;;  %v12273_v22 = vld [vmem:[%s15072_s19 + $0x21c] sm:$0xf] }
  0x4a   : > { %12349 = vmatmul.msk.bf16.gmra.mxu3 %vm564_vm3, %v15111_v40 }
  0x54   : > { %12325 = vmatmul.msk.bf16.gmra.mxu2 %vm564_vm3, %v1193_v46 }
  0x55   : > { %12210 = vmatmul.msk.bf16.gmra.mxu0 %vm564_vm3, %v15122_v52 }
  0x5a   : > { %12350 = vmatmul.msk.bf16.gmra.mxu3 %vm564_vm3, %v15122_v52 }
  0x64   : > { %12326 = vmatmul.msk.bf16.gmra.mxu2 %vm564_vm3, %v1194_v21  ;;  %v12304_v21 = vrot.slane %v12266_v15, 10 }
  0x65   : > { %12211 = vmatmul.msk.bf16.gmra.mxu0 %vm564_vm3, %v15133_v0 }
  0x66   : > { %v1081_v24 = vsel %vm15170_vm6, %v12304_v21, %v1080_v8  ;;  %v12176_v8 = vld [vmem:[%s15072_s19 + $0x374] sm:$0x1] }
  0x67   : > { %v1169_v29 = vunpack.c.l.b16 %v1081_v24  ;;  %v480_v15 = vrot.slane %v12176_v8, 5  ;;  %v1094_v24 = vrot.slane %v12273_v22, 6  ;;  %v12275_v8 = vld [vmem:[%s15072_s19 + $0x234] sm:$0xc] }
  0x69   : > { %v1096_v31 = vrot.slane %v1094_v24, 4 }
  0x6a   : > { %12351 = vmatmul.msk.bf16.gmra.mxu3 %vm564_vm3, %v15133_v0 }
  0x75   : > { %12212 = vmatmul.msk.bf16.gmra.mxu0 %vm564_vm3, %v15144_v13 }
  0x7a   : > { %12352 = vmatmul.msk.bf16.gmra.mxu3 %vm564_vm3, %v15144_v13  ;;  %v12598_v13 = vld [vmem:[%s15072_s19 + $0x338] sm:$0x3] }
  0x85   : > { %12213 = vmatmul.msk.bf16.gmra.mxu0 %vm564_vm3, %v15174_v39 }
  0x8a   : > { %12353 = vmatmul.msk.bf16.gmra.mxu3 %vm564_vm3, %v15174_v39  ;;  %v12596_v39 = vld [vmem:[%s15072_s19 + $0x330] sm:$0xc] }
  0x95   : > { %12214 = vmatmul.msk.bf16.gmra.mxu0 %vm564_vm3, %v15204_v6 }
  0x9a   : > { %12354 = vmatmul.msk.bf16.gmra.mxu3 %vm564_vm3, %v15204_v6 }
  0xa2   : > { %v622_v41 = vpop.f32.mrf.mxu0 }
  0xa3   : > { %v623_v53 = vadd.f32 %v15239_v47, %v622_v41  ;;  %v12263_v41 = vld [vmem:[%s15072_s19 + $0x1c4] sm:$0xc] }
  0xa4   : > { %v12303_v46 = vrot.slane %v12263_v41, 10 }
  0xa5   : > { %12215 = vmatmul.msk.bf16.gmra.mxu0 %vm564_vm3, %v15230_v35  ;;  %v702_v60 = vmax.f32 %v623_v53, 0.0  ;;  %v463_v53 = vrot.slane %v12169_v44, 5 }
  0xa6   : > { %v1074_v50 = vsel %vm15170_vm6, %v12303_v46, %v1073_v32  ;;  %v1170_v32 = vunpack.c.l.b16 %v1084_v27  ;;  %v12270_v46 = vld [vmem:[%s15072_s19 + $0x200] sm:$0xf] }
  0xa7   : > { %v1167_v55 = vunpack.c.l.b16 %v1074_v50 }
  0xaa   : > { %v624_v54 = vpop.f32.mrf.mxu0  ;;  %12355 = vmatmul.msk.bf16.gmra.mxu3 %vm564_vm3, %v15230_v35  ;;  %v12783_v35 = vld [vmem:[%s15072_s19 + $0x2c4] sm:$0xf] }
  0xab   : > { %v625_v57 = vadd.f32 %v15239_v47, %v624_v54  ;;  %v1077_v54 = vsel %vm15170_vm6, %v1075_v42, %v1076_v48  ;;  %v1087_v48 = vrot.slane %v12270_v46, 6 }
  0xac   : > { %v1168_v58 = vunpack.c.l.b16 %v1077_v54 }
  0xad   : > { %v703_v61 = vmax.f32 %v625_v57, 0.0  ;;  %v12170_v57 = vld [vmem:[%s15072_s19 + $0x33c] sm:$0x1] }
  0xae   : > { %v1195_v59 = vpack.c.b16 %v1168_v58, %v1167_v55  ;;  %v466_v62 = vrot.slane %v12170_v57, 5  ;;  %v12269_v55 = vld [vmem:[%s15072_s19 + $0x1fc] sm:$0xc]  ;;  %v12175_v58 = vld [vmem:[%s15072_s19 + $0x370] sm:$0xf] }
  0xaf   : > { %v734_v4 = vpack.c.bf16 %v703_v61, %v702_v60  ;;  %v12194_v60 = vrot.slane %v12168_v56, 9  ;;  %v465_v61 = vrot.slane %v463_v53, 4  ;;  %v1089_v56 = vrot.slane %v1087_v48, 4 }
  0xb0   : > { %12327 = vmatmul.msk.bf16.gmra.mxu2 %vm564_vm3, %v1195_v59  ;;  %v12271_v59 = vld [vmem:[%s15072_s19 + $0x204] sm:$0x3] }
  0xb1   : > { %12231 = vmatmul.msk.bf16.vlgmr.msra.gmra.mxu1 %vm564_vm3, %v734_v4  ;;  %v464_v3 = vsel %vm15074_vm2, %v12194_v60, %v463_v53  ;;  %v467_v4 = vsel %vm15074_vm2, %v465_v61, %v466_v62  ;;  %v12305_v60 = vrot.slane %v12269_v55, 10  ;;  %v1090_v61 = vrot.slane %v12271_v59, 6 }
  0xb2   : > { %v627_v12 = vpop.f32.mrf.mxu0  ;;  %v527_v14 = vunpack.c.l.b16 %v467_v4 }
  0xb3   : > { %v628_v25 = vadd.f32 %v15239_v47, %v627_v12  ;;  %v526_v12 = vunpack.c.l.b16 %v464_v3  ;;  %v477_v3 = vrot.slane %v12175_v58, 5  ;;  %v1091_v4 = vsel %vm15170_vm6, %v1089_v56, %v1090_v61 }
  0xb5   : > { %12216 = vmatmul.msk.bf16.gmra.mxu0 %vm564_vm3, %v15260_v10  ;;  %v704_v33 = vmax.f32 %v628_v25, 0.0  ;;  %v15308_v23 = vpack.c.b16 %v527_v14, %v526_v12  ;;  %v12196_v12 = vrot.slane %v12174_v7, 9  ;;  %v479_v14 = vrot.slane %v477_v3, 4 }
  0xb7   : > { %20782 = vst [vmem:[#allocation18_spill] sm:$0xff] %v15308_v23  ;;  %v481_v20 = vsel %vm15074_vm2, %v479_v14, %v480_v15 }
  0xba   : > { %v629_v26 = vpop.f32.mrf.mxu0  ;;  %12356 = vmatmul.msk.bf16.gmra.mxu3 %vm564_vm3, %v15260_v10  ;;  %v12595_v10 = vld [vmem:[%s15072_s19 + $0x31c] sm:$0x3] }
  0xbb   : > { %v630_v30 = vadd.f32 %v15239_v47, %v629_v26  ;;  %v470_v26 = vrot.slane %v12172_v19, 5  ;;  %v478_v19 = vsel %vm15074_vm2, %v12196_v12, %v477_v3 }
  0xbc   : > { %v530_v27 = vunpack.c.l.b16 %v478_v19 }
  0xbd   : > { %v705_v34 = vmax.f32 %v630_v30, 0.0  ;;  %v12171_v30 = vld [vmem:[%s15072_s19 + $0x350] sm:$0xe]  ;;  %v472_v36 = vrot.slane %v470_v26, 4 }
  0xbf   : > { %v735_v43 = vpack.c.bf16 %v705_v34, %v704_v33  ;;  %v1196_v33 = vpack.c.b16 %v1170_v32, %v1169_v29  ;;  %v12195_v34 = vrot.slane %v12171_v30, 9  ;;  %v474_v44 = vsel %vm15074_vm2, %v472_v36, %v473_v37  ;;  %v12272_v30 = vld [vmem:[%s15072_s19 + $0x218] sm:$0xc] }
  0xc0   : > { %v529_v54 = vunpack.c.l.b16 %v474_v44  ;;  %v531_v29 = vunpack.c.l.b16 %v481_v20  ;;  %v12306_v36 = vrot.slane %v12272_v30, 10 }
  0xc1   : > { %12232 = vmatmul.msk.bf16.gmra.mxu1 %vm564_vm3, %v735_v43  ;;  %12328 = vmatmul.msk.bf16.gmra.mxu2 %vm564_vm3, %v1196_v33  ;;  %v471_v43 = vsel %vm15074_vm2, %v12195_v34, %v470_v26  ;;  %v12178_v33 = vld [vmem:[%s15072_s19 + $0x38c] sm:$0xf]  ;;  %v12274_v34 = vld [vmem:[%s15072_s19 + $0x220] sm:$0x3] }
  0xc2   : > { %v632_v51 = vpop.f32.mrf.mxu0  ;;  %v528_v53 = vunpack.c.l.b16 %v471_v43  ;;  %v1097_v37 = vrot.slane %v12274_v34, 6  ;;  %v484_v44 = vrot.slane %v12178_v33, 5  ;;  %v1377_v34 = vpop.f32.mrf.mxu3 }
  0xc3   : > { %v633_v63 = vadd.f32 %v15239_v47, %v632_v51 }
  0xc4   : > { %v15332_v62 = vpack.c.b16 %v529_v54, %v528_v53  ;;  %v486_v55 = vrot.slane %v484_v44, 4 }
  0xc5   : > { %12217 = vmatmul.msk.bf16.gmra.mxu0 %vm564_vm3, %v15284_v49  ;;  %v706_v9 = vmax.f32 %v633_v63, 0.0  ;;  %v1088_v63 = vsel %vm15170_vm6, %v12305_v60, %v1087_v48  ;;  %v12177_v48 = vld [vmem:[%s15072_s19 + $0x388] sm:$0xe] }
  0xc6   : > { %20783 = vst [vmem:[#allocation19_spill] sm:$0xff] %v15332_v62  ;;  %v12197_v54 = vrot.slane %v12177_v48, 9 }
  0xc8   : > { %v485_v59 = vsel %vm15074_vm2, %v12197_v54, %v484_v44 }
  0xca   : > { %v634_v1 = vpop.f32.mrf.mxu0  ;;  %12357 = vmatmul.msk.bf16.gmra.mxu3 %vm564_vm3, %v15284_v49 }
  0xcb   : > { %v635_v5 = vadd.f32 %v15239_v47, %v634_v1 }
  0xcd   : > { %v707_v11 = vmax.f32 %v635_v5, 0.0  ;;  %v1171_v5 = vunpack.c.l.b16 %v1088_v63  ;;  %v12276_v63 = vld [vmem:[%s15072_s19 + $0x238] sm:$0xf] }
  0xcf   : > { %v736_v18 = vpack.c.bf16 %v707_v11, %v706_v9  ;;  %v1172_v9 = vunpack.c.l.b16 %v1091_v4 }
  0xd1   : > { %12233 = vmatmul.msk.bf16.gmra.mxu1 %vm564_vm3, %v736_v18  ;;  %v1197_v11 = vpack.c.b16 %v1172_v9, %v1171_v5  ;;  %v532_v5 = vunpack.c.l.b16 %v485_v59  ;;  %v12277_v9 = vld [vmem:[%s15072_s19 + $0x23c] sm:$0x3] }
  0xd2   : > { %v637_v25 = vpop.f32.mrf.mxu0  ;;  %v1104_v14 = vrot.slane %v12277_v9, 6 }
  0xd3   : > { %v638_v41 = vadd.f32 %v15239_v47, %v637_v25  ;;  %12329 = vmatmul.msk.bf16.gmra.mxu2 %vm564_vm3, %v1197_v11  ;;  %v12307_v11 = vrot.slane %v12275_v8, 10  ;;  %v14685_v8 = vld [vmem:[%s20725_s2 + $0x20] sm:$0xff] }
  0xd4   : > { %2051 = vmatpush.bf16.msrb.mxu1 %v14685_v8  ;;  %v12368_v8 = vld [vmem:[%s15072_s19 + $0x17c] sm:$0x1] }
  0xd5   : > { %12218 = vmatmul.msk.bf16.gmra.mxu0 %vm564_vm3, %v15308_v23  ;;  %v708_v50 = vmax.f32 %v638_v41, 0.0  ;;  %v15356_v41 = vpack.c.b16 %v531_v29, %v530_v27  ;;  %v12182_v27 = vld [vmem:[%s15072_s19 + $0x3ac] sm:$0x1] }
  0xd7   : > { %20784 = vst [vmem:[#allocation20_spill] sm:$0xff] %v15356_v41 }
  0xda   : > { %v639_v42 = vpop.f32.mrf.mxu0  ;;  %12358 = vmatmul.msk.bf16.gmra.mxu3 %vm564_vm3, %v15308_v23  ;;  %v12408_v23 = vld [vmem:[%s15072_s19 + $0x2fc] sm:$0xe] }
  0xdb   : > { %v640_v45 = vadd.f32 %v15239_v47, %v639_v42  ;;  %v1095_v42 = vsel %vm15170_vm6, %v12306_v36, %v1094_v24  ;;  %v1276_v36 = vpop.f32.mrf.mxu2 }
  0xdc   : > { %v1173_v46 = vunpack.c.l.b16 %v1095_v42  ;;  %v15398_v44 = vadd.f32 %v1377_v34, %v1276_v36  ;;  %v12282_v34 = vld [vmem:[%s15072_s19 + $0x270] sm:$0xf] }
  0xdd   : > { %v709_v51 = vmax.f32 %v640_v45, 0.0  ;;  %v1098_v45 = vsel %vm15170_vm6, %v1096_v31, %v1097_v37  ;;  %v1115_v36 = vrot.slane %v12282_v34, 6 }
  0xdf   : > { %v737_v57 = vpack.c.bf16 %v709_v51, %v708_v50  ;;  %v12179_v50 = vld [vmem:[%s15072_s19 + $0x390] sm:$0x1]  ;;  %v1174_v51 = vunpack.c.l.b16 %v1098_v45 }
  0xe0   : > { %v487_v56 = vrot.slane %v12179_v50, 5 }
  0xe1   : > { %12234 = vmatmul.msk.bf16.gmra.mxu1 %vm564_vm3, %v737_v57  ;;  %v1198_v53 = vpack.c.b16 %v1174_v51, %v1173_v46  ;;  %v12279_v46 = vld [vmem:[%s15072_s19 + $0x254] sm:$0xf] }
  0xe2   : > { %v642_v1 = vpop.f32.mrf.mxu0  ;;  %v488_v60 = vsel %vm15074_vm2, %v486_v55, %v487_v56  ;;  %v1108_v50 = vrot.slane %v12279_v46, 6  ;;  %v14687_v55 = vld [vmem:[%s20725_s2 + $0x30] sm:$0xff]  ;;  %v12281_v46 = vld [vmem:[%s15072_s19 + $0x26c] sm:$0xc] }
  0xe3   : > { %v643_v17 = vadd.f32 %v15239_v47, %v642_v1  ;;  %12330 = vmatmul.msk.bf16.gmra.mxu2 %vm564_vm3, %v1198_v53  ;;  %v1101_v1 = vrot.slane %v12276_v63, 6  ;;  %v533_v7 = vunpack.c.l.b16 %v488_v60  ;;  %v12278_v56 = vld [vmem:[%s15072_s19 + $0x250] sm:$0xc]  ;;  %v12364_v63 = vld [vmem:[%s15072_s19 + $0x15c] sm:$0xf] }
  0xe4   : > { %v1110_v59 = vrot.slane %v1108_v50, 4  ;;  %2493 = vmatpush.bf16.msrb.mxu2 %v14687_v55  ;;  %v12367_v55 = vld [vmem:[%s15072_s19 + $0x178] sm:$0xf] }
  0xe5   : > { %12219 = vmatmul.msk.bf16.gmra.mxu0 %vm564_vm3, %v15332_v62  ;;  %v710_v25 = vmax.f32 %v643_v17, 0.0  ;;  %v1103_v12 = vrot.slane %v1101_v1, 4  ;;  %v12181_v17 = vld [vmem:[%s15072_s19 + $0x3a8] sm:$0xf]  ;;  %v15384_v20 = vpack.c.b16 %v533_v7, %v532_v5  ;;  %v1278_v7 = vpop.f32.mrf.mxu2 }
  0xe7   : > { %v1105_v19 = vsel %vm15170_vm6, %v1103_v12, %v1104_v14  ;;  %20785 = vst [vmem:[#allocation21_spill] sm:$0xff] %v15384_v20  ;;  %v1555_v14 = vrot.slane %v12364_v63, 5 }
  0xe8   : > { %v1176_v22 = vunpack.c.l.b16 %v1105_v19 }
  0xea   : > { %v644_v18 = vpop.f32.mrf.mxu0 }
  0xeb   : > { %v645_v21 = vadd.f32 %v15239_v47, %v644_v18  ;;  %v1102_v18 = vsel %vm15170_vm6, %v12307_v11, %v1101_v1  ;;  %v1379_v1 = vpop.f32.mrf.mxu3  ;;  %12359 = vmatmul.msk.bf16.gmra.mxu3 %vm564_vm3, %v15332_v62 }
  0xed   : > { %v711_v26 = vmax.f32 %v645_v21, 0.0  ;;  %v1175_v21 = vunpack.c.l.b16 %v1102_v18  ;;  %v12365_v18 = vld [vmem:[%s15072_s19 + $0x160] sm:$0x1] }
  0xef   : > { %v738_v32 = vpack.c.bf16 %v711_v26, %v710_v25  ;;  %v491_v25 = vrot.slane %v12181_v17, 5  ;;  %v12180_v26 = vld [vmem:[%s15072_s19 + $0x3a4] sm:$0xe]  ;;  %v1199_v29 = vpack.c.b16 %v1176_v22, %v1175_v21  ;;  %v12363_v17 = vld [vmem:[%s15072_s19 + $0x158] sm:$0xe]  ;;  %v1557_v22 = vrot.slane %v1555_v14, 4 }
  0xf0   : > { %v12198_v30 = vrot.slane %v12180_v26, 9  ;;  %v12411_v21 = vrot.slane %v12363_v17, 9  ;;  %v1565_v17 = vrot.slane %v12368_v8, 5 }
  0xf1   : > { %12235 = vmatmul.msk.bf16.gmra.mxu1 %vm564_vm3, %v738_v32  ;;  %v493_v31 = vrot.slane %v491_v25, 4  ;;  %v494_v32 = vrot.slane %v12182_v27, 5 }
  0xf2   : > { %v647_v43 = vpop.f32.mrf.mxu0  ;;  %v492_v42 = vsel %vm15074_vm2, %v12198_v30, %v491_v25 }
  0xf3   : > { %v648_v57 = vadd.f32 %v15239_v47, %v647_v43  ;;  %12331 = vmatmul.msk.bf16.gmra.mxu2 %vm564_vm3, %v1199_v29  ;;  %v495_v43 = vsel %vm15074_vm2, %v493_v31, %v494_v32  ;;  %v534_v53 = vunpack.c.l.b16 %v492_v42  ;;  %v1382_v25 = vpop.f32.mrf.mxu3  ;;  %v1556_v29 = vsel %vm15074_vm2, %v12411_v21, %v1555_v14  ;;  %v1281_v31 = vpop.f32.mrf.mxu2 }
  0xf4   : > { %v535_v54 = vunpack.c.l.b16 %v495_v43  ;;  %v1670_v43 = vunpack.c.l.b16 %v1556_v29 }
  0xf5   : > { %12220 = vmatmul.msk.bf16.gmra.mxu0 %vm564_vm3, %v15356_v41  ;;  %v712_v3 = vmax.f32 %v648_v57, 0.0  ;;  %v12280_v57 = vld [vmem:[%s15072_s19 + $0x258] sm:$0x3] }
  0xf6   : > { %v1111_v60 = vrot.slane %v12280_v57, 6  ;;  %v15413_v5 = vpack.c.b16 %v535_v54, %v534_v53 }
  0xf8   : > { %20786 = vst [vmem:[#allocation22_spill] sm:$0xff] %v15413_v5 }
  0xfa   : > { %v649_v58 = vpop.f32.mrf.mxu0 }
  0xfb   : > { %v650_v61 = vadd.f32 %v15239_v47, %v649_v58  ;;  %v12308_v58 = vrot.slane %v12278_v56, 10  ;;  %v1384_v56 = vpop.f32.mrf.mxu3  ;;  %12360 = vmatmul.msk.bf16.gmra.mxu3 %vm564_vm3, %v15356_v41  ;;  %v12407_v41 = vld [vmem:[%s15072_s19 + $0x2e8] sm:$0x1] }
  0xfd   : > { %v713_v4 = vmax.f32 %v650_v61, 0.0 }
  0xff   : > { %v739_v15 = vpack.c.bf16 %v713_v4, %v712_v3  ;;  %v1109_v3 = vsel %vm15170_vm6, %v12308_v58, %v1108_v50  ;;  %v1112_v4 = vsel %vm15170_vm6, %v1110_v59, %v1111_v60  ;;  %v12309_v50 = vrot.slane %v12281_v46, 10  ;;  %v14706_v60 = vld [vmem:[%s20725_s2 + $0x58] sm:$0xff] }
 0x100   : > { %v1177_v9 = vunpack.c.l.b16 %v1109_v3  ;;  %v1178_v11 = vunpack.c.l.b16 %v1112_v4  ;;  %v1562_v3 = vrot.slane %v12367_v55, 5  ;;  %v1283_v4 = vpop.f32.mrf.mxu2  ;;  %2790 = vmatpush.bf16.msrb.mxu3 %v14706_v60 }
 0x101   : > { %12236 = vmatmul.msk.bf16.gmra.mxu1 %vm564_vm3, %v739_v15  ;;  %v15418_v15 = vadd.f32 %v1379_v1, %v1278_v7  ;;  %v1116_v57 = vsel %vm15170_vm6, %v12309_v50, %v1115_v36  ;;  %v12366_v7 = vld [vmem:[%s15072_s19 + $0x174] sm:$0xe] }
 0x102   : > { %v652_v24 = vpop.f32.mrf.mxu0  ;;  %v1200_v19 = vpack.c.b16 %v1178_v11, %v1177_v9  ;;  %v15449_v9 = vadd.f32 %v1384_v56, %v1283_v4  ;;  %v1564_v14 = vrot.slane %v1562_v3, 4 }
 0x103   : > { %v653_v33 = vadd.f32 %v15239_v47, %v652_v24  ;;  %v1558_v24 = vrot.slane %v12365_v18, 5  ;;  %v14708_v18 = vld [vmem:[%s20725_s2 + $0x68] sm:$0xff] }
 0x104   : > { %12332 = vmatmul.msk.bf16.gmra.mxu2 %vm564_vm3, %v1200_v19  ;;  %v1387_v19 = vpop.f32.mrf.mxu3  ;;  %3236 = vmatpush.bf16.msra.mxu0 %v14708_v18 }
 0x105   : > { %12221 = vmatmul.msk.bf16.gmra.mxu0 %vm564_vm3, %v15384_v20  ;;  %v714_v48 = vmax.f32 %v653_v33, 0.0  ;;  %v1559_v30 = vsel %vm15074_vm2, %v1557_v22, %v1558_v24  ;;  %v15433_v33 = vadd.f32 %v1382_v25, %v1281_v31  ;;  %v1566_v25 = vsel %vm15074_vm2, %v1564_v14, %v1565_v17 }
 0x10a   : > { %v654_v37 = vpop.f32.mrf.mxu0 }
 0x10b   : > { %v655_v45 = vadd.f32 %v15239_v47, %v654_v37 }
 0x10d   : > { %v715_v51 = vmax.f32 %v655_v45, 0.0  ;;  %v1671_v45 = vunpack.c.l.b16 %v1559_v30  ;;  %v12285_v30 = vld [vmem:[%s15072_s19 + $0x28c] sm:$0xf] }
 0x10e   : > { %v1122_v31 = vrot.slane %v12285_v30, 6 }
 0x10f   : > { %v740_v61 = vpack.c.bf16 %v715_v51, %v714_v48  ;;  %v12283_v48 = vld [vmem:[%s15072_s19 + $0x274] sm:$0x3]  ;;  %v1117_v51 = vrot.slane %v1115_v36, 4  ;;  %v1702_v59 = vpack.c.b16 %v1671_v45, %v1670_v43  ;;  %v12286_v43 = vld [vmem:[%s15072_s19 + $0x290] sm:$0x3] }
 0x110   : > { %v1118_v53 = vrot.slane %v12283_v48, 6  ;;  %v1124_v48 = vrot.slane %v1122_v31, 4  ;;  %v1125_v50 = vrot.slane %v12286_v43, 6 }
 0x111   : > { %12237 = vmatmul.msk.bf16.gmra.mxu1 %vm564_vm3, %v740_v61  ;;  %v1179_v61 = vunpack.c.l.b16 %v1116_v57 }
 0x112   : > { %v657_v12 = vpop.f32.mrf.mxu0  ;;  %v1119_v58 = vsel %vm15170_vm6, %v1117_v51, %v1118_v53  ;;  %v12370_v53 = vld [vmem:[%s15072_s19 + $0x194] sm:$0xf]  ;;  %v1126_v56 = vsel %vm15170_vm6, %v1124_v48, %v1125_v50 }
 0x113   : > { %v658_v26 = vadd.f32 %v15239_v47, %v657_v12  ;;  %v1180_v63 = vunpack.c.l.b16 %v1119_v58  ;;  %v12412_v12 = vrot.slane %v12366_v7, 9 }
 0x115   : > { %12222 = vmatmul.msk.bf16.gmra.mxu0 %vm564_vm3, %v15413_v5  ;;  %v716_v37 = vmax.f32 %v658_v26, 0.0  ;;  %v1201_v11 = vpack.c.b16 %v1180_v63, %v1179_v61  ;;  %v1563_v24 = vsel %vm15074_vm2, %v12412_v12, %v1562_v3  ;;  %v1286_v26 = vpop.f32.mrf.mxu2  ;;  %v1569_v61 = vrot.slane %v12370_v53, 5  ;;  %v12371_v3 = vld [vmem:[%s15072_s19 + $0x198] sm:$0x1]  ;;  %v12373_v53 = vld [vmem:[%s15072_s19 + $0x1b0] sm:$0xf] }
 0x116   : > { %v15464_v29 = vadd.f32 %v1387_v19, %v1286_v26  ;;  %v1672_v36 = vunpack.c.l.b16 %v1563_v24  ;;  %v1572_v14 = vrot.slane %v12371_v3, 5  ;;  %v12374_v3 = vld [vmem:[%s15072_s19 + $0x1b4] sm:$0x1] }
 0x117   : > { %12333 = vmatmul.msk.bf16.gmra.mxu2 %vm564_vm3, %v1201_v11  ;;  %v1571_v12 = vrot.slane %v1569_v61, 4 }
 0x11a   : > { %v659_v27 = vpop.f32.mrf.mxu0 }
 0x11b   : > { %v660_v32 = vadd.f32 %v15239_v47, %v659_v27 }
 0x11d   : > { %v717_v42 = vmax.f32 %v660_v32, 0.0  ;;  %v1288_v63 = vpop.f32.mrf.mxu2 }
 0x11f   : > { %v741_v54 = vpack.c.bf16 %v717_v42, %v716_v37  ;;  %v1673_v37 = vunpack.c.l.b16 %v1566_v25  ;;  %v12284_v42 = vld [vmem:[%s15072_s19 + $0x288] sm:$0xc] }
 0x120   : > { %v12310_v46 = vrot.slane %v12284_v42, 10  ;;  %v12289_v42 = vld [vmem:[%s15072_s19 + $0x2ac] sm:$0x3] }
 0x121   : > { %12238 = vmatmul.msk.bf16.gmra.mxu1 %vm564_vm3, %v741_v54  ;;  %v1389_v54 = vpop.f32.mrf.mxu3  ;;  %v1703_v57 = vpack.c.b16 %v1673_v37, %v1672_v36  ;;  %v12287_v37 = vld [vmem:[%s15072_s19 + $0x2a4] sm:$0xc]  ;;  %v1132_v50 = vrot.slane %v12289_v42, 6  ;;  %12361 = vmatmul.msk.bf16.gmra.mxu3 %vm564_vm3, %v15384_v20 }
 0x122   : > { %v662_v1 = vpop.f32.mrf.mxu0  ;;  %v1123_v55 = vsel %vm15170_vm6, %v12310_v46, %v1122_v31  ;;  %v15479_v4 = vadd.f32 %v1389_v54, %v1288_v63  ;;  %v12311_v46 = vrot.slane %v12287_v37, 10 }
 0x123   : > { %v663_v21 = vadd.f32 %v15239_v47, %v662_v1  ;;  %v1181_v58 = vunpack.c.l.b16 %v1123_v55  ;;  %v12369_v1 = vld [vmem:[%s15072_s19 + $0x190] sm:$0xe] }
 0x124   : > { %v12413_v11 = vrot.slane %v12369_v1, 9  ;;  %v12372_v1 = vld [vmem:[%s15072_s19 + $0x1ac] sm:$0xe] }
 0x125   : > { %12439 = vmatmul.msk.bf16.vlgmr.msrb.gmra.mxu0 %vm564_vm3, %v1702_v59  ;;  %v718_v32 = vmax.f32 %v663_v21, 0.0  ;;  %v1182_v59 = vunpack.c.l.b16 %v1126_v56  ;;  %v1291_v24 = vpop.f32.mrf.mxu2 }
 0x126   : > { %v1570_v21 = vsel %vm15074_vm2, %v12413_v11, %v1569_v61  ;;  %v1576_v61 = vrot.slane %v12373_v53, 5 }
 0x127   : > { %v1202_v7 = vpack.c.b16 %v1182_v59, %v1181_v58 }
 0x129   : > { %12334 = vmatmul.msk.bf16.gmra.mxu2 %vm564_vm3, %v1202_v7  ;;  %v1392_v17 = vpop.f32.mrf.mxu3 }
 0x12a   : > { %v664_v22 = vpop.f32.mrf.mxu0  ;;  %v15493_v26 = vadd.f32 %v1392_v17, %v1291_v24  ;;  %v1578_v17 = vrot.slane %v1576_v61, 4 }
 0x12b   : > { %v665_v27 = vadd.f32 %v15239_v47, %v664_v22  ;;  %v1573_v22 = vsel %vm15074_vm2, %v1571_v12, %v1572_v14  ;;  %v12414_v14 = vrot.slane %v12372_v1, 9 }
 0x12c   : > { %v1675_v36 = vunpack.c.l.b16 %v1573_v22 }
 0x12d   : > { %v719_v34 = vmax.f32 %v665_v27, 0.0  ;;  %v12288_v27 = vld [vmem:[%s15072_s19 + $0x2a8] sm:$0xf]  ;;  %v1293_v63 = vpop.f32.mrf.mxu2  ;;  %v1577_v24 = vsel %vm15074_vm2, %v12414_v14, %v1576_v61 }
 0x12e   : > { %v15469_v45 = vpop.f32.mrf.mxu1  ;;  %v1129_v30 = vrot.slane %v12288_v27, 6  ;;  %v1676_v42 = vunpack.c.l.b16 %v1577_v24 }
 0x12f   : > { %20787 = vst [vmem:[#allocation23_spill] sm:$0xff] %v15469_v45  ;;  %v742_v51 = vpack.c.bf16 %v719_v34, %v718_v32  ;;  %v1674_v34 = vunpack.c.l.b16 %v1570_v21 }
 0x130   : > { %v1131_v48 = vrot.slane %v1129_v30, 4  ;;  %v1130_v55 = vsel %vm15170_vm6, %v12311_v46, %v1129_v30 }
 0x131   : > { %12239 = vmatmul.msk.bf16.gmra.mxu1 %vm564_vm3, %v742_v51  ;;  %v1394_v54 = vpop.f32.mrf.mxu3  ;;  %v1183_v58 = vunpack.c.l.b16 %v1130_v55  ;;  %12362 = vmatmul.msk.bf16.gmra.mxu3 %vm564_vm3, %v15413_v5  ;;  %v12404_v5 = vld [vmem:[%s15072_s19 + $0x2cc] sm:$0x1] }
 0x132   : > { %v667_v60 = vpop.f32.mrf.mxu0  ;;  %v1133_v56 = vsel %vm15170_vm6, %v1131_v48, %v1132_v50  ;;  %v15508_v7 = vadd.f32 %v1394_v54, %v1293_v63  ;;  %v12290_v48 = vld [vmem:[%s15072_s19 + $0x2c0] sm:$0xc]  ;;  %v12292_v50 = vld [vmem:[%s15072_s19 + $0x2c8] sm:$0x3] }
 0x133   : > { %v668_v18 = vadd.f32 %v15239_v47, %v667_v60  ;;  %v1184_v59 = vunpack.c.l.b16 %v1133_v56  ;;  %v12312_v53 = vrot.slane %v12290_v48, 10  ;;  %v1139_v55 = vrot.slane %v12292_v50, 6  ;;  %v12294_v50 = vld [vmem:[%s15072_s19 + $0x2e0] sm:$0xf] }
 0x135   : > { %12440 = vmatmul.msk.bf16.gmra.mxu0 %vm564_vm3, %v1703_v57  ;;  %v720_v31 = vmax.f32 %v668_v18, 0.0  ;;  %v1704_v57 = vpack.c.b16 %v1675_v36, %v1674_v34  ;;  %v1203_v11 = vpack.c.b16 %v1184_v59, %v1183_v58  ;;  %v1579_v18 = vrot.slane %v12374_v3, 5  ;;  %v1296_v27 = vpop.f32.mrf.mxu2 }
 0x136   : > { %v15484_v8 = vpop.f32.mrf.mxu1 }
 0x137   : > { %20788 = vst [vmem:[#allocation24_spill] sm:$0xff] %v15484_v8  ;;  %v12401_v8 = vld [vmem:[%s15072_s19 + $0x2b0] sm:$0x1] }
 0x139   : > { %12335 = vmatmul.msk.bf16.gmra.mxu2 %vm564_vm3, %v1203_v11 }
 0x13a   : > { %v669_v19 = vpop.f32.mrf.mxu0 }
 0x13b   : > { %v670_v25 = vadd.f32 %v15239_v47, %v669_v19  ;;  %v1397_v19 = vpop.f32.mrf.mxu3 }
 0x13d   : > { %v721_v32 = vmax.f32 %v670_v25, 0.0  ;;  %v1580_v25 = vsel %vm15074_vm2, %v1578_v17, %v1579_v18  ;;  %v1298_v14 = vpop.f32.mrf.mxu2  ;;  %v12375_v17 = vld [vmem:[%s15072_s19 + $0x1c8] sm:$0xe]  ;;  %v12377_v18 = vld [vmem:[%s15072_s19 + $0x1d0] sm:$0x1] }
 0x13e   : > { %v15498_v43 = vpop.f32.mrf.mxu1  ;;  %v1677_v46 = vunpack.c.l.b16 %v1580_v25  ;;  %v12415_v24 = vrot.slane %v12375_v17, 9 }
 0x13f   : > { %20789 = vst [vmem:[#allocation25_spill] sm:$0xff] %v15498_v43  ;;  %v743_v51 = vpack.c.bf16 %v721_v32, %v720_v31  ;;  %v15522_v31 = vadd.f32 %v1397_v19, %v1296_v27  ;;  %v12291_v32 = vld [vmem:[%s15072_s19 + $0x2c4] sm:$0xf]  ;;  %v1586_v27 = vrot.slane %v12377_v18, 5 }
 0x140   : > { %v1136_v34 = vrot.slane %v12291_v32, 6  ;;  %v1705_v61 = vpack.c.b16 %v1677_v46, %v1676_v42 }
 0x141   : > { %12240 = vmatmul.msk.bf16.gmra.mxu1 %vm564_vm3, %v743_v51 }
 0x142   : > { %v672_v60 = vpop.f32.mrf.mxu0  ;;  %v1138_v54 = vrot.slane %v1136_v34, 4  ;;  %v1137_v59 = vsel %vm15170_vm6, %v12312_v53, %v1136_v34  ;;  %v1143_v53 = vrot.slane %v12294_v50, 6 }
 0x143   : > { %v673_v21 = vadd.f32 %v15239_v47, %v672_v60  ;;  %v1399_v58 = vpop.f32.mrf.mxu3  ;;  %v1185_v63 = vunpack.c.l.b16 %v1137_v59  ;;  %v12295_v59 = vld [vmem:[%s15072_s19 + $0x2e4] sm:$0x3] }
 0x144   : > { %v1140_v60 = vsel %vm15170_vm6, %v1138_v54, %v1139_v55  ;;  %v15537_v19 = vadd.f32 %v1399_v58, %v1298_v14  ;;  %v12293_v58 = vld [vmem:[%s15072_s19 + $0x2dc] sm:$0xc] }
 0x145   : > { %12441 = vmatmul.msk.bf16.gmra.mxu0 %vm564_vm3, %v1704_v57  ;;  %v722_v36 = vmax.f32 %v673_v21, 0.0  ;;  %v12376_v57 = vld [vmem:[%s15072_s19 + $0x1cc] sm:$0xf]  ;;  %v1186_v1 = vunpack.c.l.b16 %v1140_v60  ;;  %v1301_v42 = vpop.f32.mrf.mxu2 }
 0x146   : > { %v15513_v12 = vpop.f32.mrf.mxu1  ;;  %v1583_v11 = vrot.slane %v12376_v57, 5 }
 0x147   : > { %20790 = vst [vmem:[#allocation26_spill] sm:$0xff] %v15513_v12  ;;  %v1204_v21 = vpack.c.b16 %v1186_v1, %v1185_v63  ;;  %v1145_v63 = vrot.slane %v1143_v53, 4  ;;  %v1146_v1 = vrot.slane %v12295_v59, 6  ;;  %v12398_v12 = vld [vmem:[%s15072_s19 + $0x294] sm:$0x1] }
 0x148   : > { %v1585_v25 = vrot.slane %v1583_v11, 4 }
 0x149   : > { %12336 = vmatmul.msk.bf16.gmra.mxu2 %vm564_vm3, %v1204_v21  ;;  %v1147_v18 = vsel %vm15170_vm6, %v1145_v63, %v1146_v1 }
 0x14a   : > { %v674_v22 = vpop.f32.mrf.mxu0 }
 0x14b   : > { %v675_v30 = vadd.f32 %v15239_v47, %v674_v22 }
 0x14d   : > { %v723_v37 = vmax.f32 %v675_v30, 0.0  ;;  %v1402_v30 = vpop.f32.mrf.mxu3 }
 0x14e   : > { %v15527_v51 = vpop.f32.mrf.mxu1  ;;  %v15551_v48 = vadd.f32 %v1402_v30, %v1301_v42 }
 0x14f   : > { %20791 = vst [vmem:[#allocation27_spill] sm:$0xff] %v15527_v51  ;;  %v744_v56 = vpack.c.bf16 %v723_v37, %v722_v36  ;;  %v1584_v36 = vsel %vm15074_vm2, %v12415_v24, %v1583_v11  ;;  %v1587_v37 = vsel %vm15074_vm2, %v1585_v25, %v1586_v27  ;;  %v12379_v11 = vld [vmem:[%s15072_s19 + $0x1e8] sm:$0xf]  ;;  %v1188_v25 = vunpack.c.l.b16 %v1147_v18 }
 0x150   : > { %v1679_v57 = vunpack.c.l.b16 %v1587_v37  ;;  %v1590_v30 = vrot.slane %v12379_v11, 5 }
 0x151   : > { %12241 = vmatmul.msk.bf16.gmra.mxu1 %vm564_vm3, %v744_v56  ;;  %v1678_v56 = vunpack.c.l.b16 %v1584_v36  ;;  %v12380_v36 = vld [vmem:[%s15072_s19 + $0x1ec] sm:$0x1] }
 0x152   : > { %v677_v3 = vpop.f32.mrf.mxu0 }
 0x153   : > { %v678_v32 = vadd.f32 %v15239_v47, %v677_v3  ;;  %v1706_v21 = vpack.c.b16 %v1679_v57, %v1678_v56 }
 0x155   : > { %12442 = vmatmul.msk.bf16.gmra.mxu0 %vm564_vm3, %v1705_v61  ;;  %v724_v54 = vmax.f32 %v678_v32, 0.0  ;;  %v12313_v61 = vrot.slane %v12293_v58, 10  ;;  %v1404_v14 = vpop.f32.mrf.mxu3  ;;  %v1303_v32 = vpop.f32.mrf.mxu2 }
 0x156   : > { %v15542_v22 = vpop.f32.mrf.mxu1  ;;  %v15566_v37 = vadd.f32 %v1404_v14, %v1303_v32 }
 0x157   : > { %20792 = vst [vmem:[#allocation28_spill] sm:$0xff] %v15542_v22  ;;  %v1144_v17 = vsel %vm15170_vm6, %v12313_v61, %v1143_v53  ;;  %v1592_v53 = vrot.slane %v1590_v30, 4  ;;  %v12395_v22 = vld [vmem:[%s15072_s19 + $0x278] sm:$0x1] }
 0x158   : > { %v1187_v24 = vunpack.c.l.b16 %v1144_v17 }
 0x15a   : > { %v679_v34 = vpop.f32.mrf.mxu0  ;;  %v1205_v42 = vpack.c.b16 %v1188_v25, %v1187_v24  ;;  %v12296_v24 = vld [vmem:[%s15072_s19 + $0x2f8] sm:$0xc]  ;;  %v12298_v25 = vld [vmem:[%s15072_s19 + $0x300] sm:$0x3] }
 0x15b   : > { %v680_v46 = vadd.f32 %v15239_v47, %v679_v34  ;;  %v12378_v34 = vld [vmem:[%s15072_s19 + $0x1e4] sm:$0xe] }
 0x15c   : > { %v12416_v50 = vrot.slane %v12378_v34, 9  ;;  %12337 = vmatmul.msk.bf16.gmra.mxu2 %vm564_vm3, %v1205_v42  ;;  %v1153_v34 = vrot.slane %v12298_v25, 6  ;;  %v12382_v42 = vld [vmem:[%s15072_s19 + $0x204] sm:$0xf]  ;;  %v15606_v25 = vld [vmem:[%s20727_s4] ss:$0 sm:$0xff] }
 0x15d   : > { %v725_v55 = vmax.f32 %v680_v46, 0.0  ;;  %v1306_v61 = vpop.f32.mrf.mxu2 }
 0x15e   : > { %v15556_v60 = vpop.f32.mrf.mxu1  ;;  %v1591_v58 = vsel %vm15074_vm2, %v12416_v50, %v1590_v30  ;;  %v12314_v30 = vrot.slane %v12296_v24, 10 }
 0x15f   : > { %20793 = vst [vmem:[#allocation29_spill] sm:$0xff] %v15556_v60  ;;  %v745_v3 = vpack.c.bf16 %v725_v55, %v724_v54  ;;  %v1593_v54 = vrot.slane %v12380_v36, 5  ;;  %v1407_v55 = vpop.f32.mrf.mxu3  ;;  %v1680_v18 = vunpack.c.l.b16 %v1591_v58  ;;  %v1597_v58 = vrot.slane %v12382_v42, 5  ;;  %v12569_v60 = vld [vmem:[%s15072_s19 + $0x234] sm:$0xc] }
 0x160   : > { %v15580_v1 = vadd.f32 %v1407_v55, %v1306_v61  ;;  %v12381_v61 = vld [vmem:[%s15072_s19 + $0x200] sm:$0xe] }
 0x161   : > { %12242 = vmatmul.msk.bf16.gmra.mxu1 %vm564_vm3, %v745_v3  ;;  %v1594_v59 = vsel %vm15074_vm2, %v1592_v53, %v1593_v54  ;;  %v12297_v3 = vld [vmem:[%s15072_s19 + $0x2fc] sm:$0xf] }
 0x162   : > { %v682_v27 = vpop.f32.mrf.mxu0  ;;  %v1150_v11 = vrot.slane %v12297_v3, 6 }
 0x163   : > { %v683_v56 = vadd.f32 %v15239_v47, %v682_v27 }
 0x164   : > { %v1152_v32 = vrot.slane %v1150_v11, 4  ;;  %v1151_v50 = vsel %vm15170_vm6, %v12314_v30, %v1150_v11 }
 0x165   : > { %12443 = vmatmul.msk.bf16.gmra.mxu0 %vm564_vm3, %v1706_v21  ;;  %v726_v14 = vmax.f32 %v683_v56, 0.0  ;;  %v1681_v21 = vunpack.c.l.b16 %v1594_v59  ;;  %v1189_v55 = vunpack.c.l.b16 %v1151_v50  ;;  %v1308_v59 = vpop.f32.mrf.mxu2 }
 0x166   : > { %v15571_v46 = vpop.f32.mrf.mxu1  ;;  %v1154_v53 = vsel %vm15170_vm6, %v1152_v32, %v1153_v34 }
 0x167   : > { %20794 = vst [vmem:[#allocation30_spill] sm:$0xff] %v15571_v46  ;;  %v1707_v54 = vpack.c.b16 %v1681_v21, %v1680_v18  ;;  %v1190_v56 = vunpack.c.l.b16 %v1154_v53  ;;  %v1599_v18 = vrot.slane %v1597_v58, 4  ;;  %v12564_v53 = vld [vmem:[%s15072_s19 + $0x200] sm:$0xf] }
 0x16a   : > { %v684_v57 = vpop.f32.mrf.mxu0 }
 0x16b   : > { %v685_v63 = vadd.f32 %v15239_v47, %v684_v57  ;;  %v1409_v47 = vpop.f32.mrf.mxu3 }
 0x16c   : > { %v15595_v3 = vadd.f32 %v1409_v47, %v1308_v59 }
 0x16d   : > { %v727_v17 = vmax.f32 %v685_v63, 0.0  ;;  %v12383_v63 = vld [vmem:[%s15072_s19 + $0x208] sm:$0x1]  ;;  %v1311_v42 = vpop.f32.mrf.mxu2 }
 0x16e   : > { %v15585_v27 = vpop.f32.mrf.mxu1  ;;  %v1600_v21 = vrot.slane %v12383_v63, 5  ;;  %v12563_v63 = vld [vmem:[%s15072_s19 + $0x1fc] sm:$0xc] }
 0x16f   : > { %20795 = vst [vmem:[#allocation31_spill] sm:$0xff] %v15585_v27  ;;  %v746_v36 = vpack.c.bf16 %v727_v17, %v726_v14  ;;  %v1206_v14 = vpack.c.b16 %v1190_v56, %v1189_v55  ;;  %v12417_v17 = vrot.slane %v12381_v61, 9 }
 0x171   : > { %12243 = vmatmul.msk.bf16.gmra.mxu1 %vm564_vm3, %v746_v36  ;;  %12338 = vmatmul.msk.bf16.gmra.mxu2 %vm564_vm3, %v1206_v14  ;;  %v1598_v34 = vsel %vm15074_vm2, %v12417_v17, %v1597_v58  ;;  %v1601_v36 = vsel %vm15074_vm2, %v1599_v18, %v1600_v21  ;;  %v12385_v17 = vld [vmem:[%s15072_s19 + $0x220] sm:$0xf]  ;;  %v12565_v18 = vld [vmem:[%s15072_s19 + $0x204] sm:$0x3]  ;;  %v12611_v21 = vrot.slane %v12563_v63, 10 }
 0x172   : > { %v687_v57 = vpop.f32.mrf.mxu0  ;;  %v1682_v59 = vunpack.c.l.b16 %v1598_v34 }
 0x173   : > { %v1412_v24 = vpop.f32.mrf.mxu3  ;;  %v688_v30 = vadd.f32 %v15606_v25, %v687_v57  ;;  %v1683_v57 = vunpack.c.l.b16 %v1601_v36  ;;  %v1604_v36 = vrot.slane %v12385_v17, 5 }
 0x174   : > { %v15614_v50 = vadd.f32 %v1412_v24, %v1311_v42 }
 0x175   : > { %12444 = vmatmul.msk.bf16.gmra.mxu0 %vm564_vm3, %v1707_v54  ;;  %v2263_v54 = vrot.slane %v12564_v53, 6  ;;  %v728_v55 = vmax.f32 %v688_v30, 0.0  ;;  %v1708_v24 = vpack.c.b16 %v1683_v57, %v1682_v59  ;;  %v1313_v42 = vpop.f32.mrf.mxu2 }
 0x176   : > { %v15600_v11 = vpop.f32.mrf.mxu1 }
 0x177   : > { %20796 = vst [vmem:[#allocation32_spill] sm:$0xff] %v15600_v11  ;;  %v2265_v58 = vrot.slane %v2263_v54, 4  ;;  %v2264_v30 = vsel %vm15170_vm6, %v12611_v21, %v2263_v54  ;;  %v1606_v54 = vrot.slane %v1604_v36, 4 }
 0x178   : > { %v2378_v53 = vunpack.c.l.b16 %v2264_v30 }
 0x17a   : > { %v689_v32 = vpop.f32.mrf.mxu0 }
 0x17b   : > { %v690_v47 = vadd.f32 %v15606_v25, %v689_v32  ;;  %v1414_v11 = vpop.f32.mrf.mxu3  ;;  %v2266_v32 = vrot.slane %v12565_v18, 6 }
 0x17d   : > { %v729_v56 = vmax.f32 %v690_v47, 0.0  ;;  %v2267_v47 = vsel %vm15170_vm6, %v2265_v58, %v2266_v32 }
 0x17e   : > { %v15617_v61 = vpop.f32.mrf.mxu1  ;;  %v2379_v63 = vunpack.c.l.b16 %v2267_v47 }
 0x17f   : > { %20797 = vst [vmem:[#allocation33_spill] sm:$0xff] %v15617_v61  ;;  %v747_v14 = vpack.c.bf16 %v729_v56, %v728_v55  ;;  %v12384_v61 = vld [vmem:[%s15072_s19 + $0x21c] sm:$0xe]  ;;  %v12386_v55 = vld [vmem:[%s15072_s19 + $0x224] sm:$0x1]  ;;  %v15629_v56 = vadd.f32 %v1414_v11, %v1313_v42 }
 0x180   : > { %v2410_v18 = vpack.c.b16 %v2379_v63, %v2378_v53  ;;  %v12418_v57 = vrot.slane %v12384_v61, 9  ;;  %v14705_v61 = vld [vmem:[%s20725_s2 + $0x50] sm:$0xff] }
 0x181   : > { %12244 = vmatmul.msk.bf16.gmra.mxu1 %vm564_vm3, %v747_v14  ;;  %v1607_v14 = vrot.slane %v12386_v55, 5  ;;  %2791 = vmatpush.bf16.msrb.mxu3 %v14705_v61 }
 0x182   : > { %v692_v34 = vpop.f32.mrf.mxu0  ;;  %12639 = vmatmul.msk.bf16.vlgmr.msrb.gmra.mxu2 %vm564_vm3, %v2410_v18  ;;  %v1605_v11 = vsel %vm15074_vm2, %v12418_v57, %v1604_v36  ;;  %v12567_v36 = vld [vmem:[%s15072_s19 + $0x21c] sm:$0xf]  ;;  %v14689_v57 = vld [vmem:[%s15072_s19 + $0x204] sm:$0xff] }
 0x183   : > { %v1417_v17 = vpop.f32.mrf.mxu3  ;;  %v693_v58 = vadd.f32 %v15606_v25, %v692_v34  ;;  %v1608_v32 = vsel %vm15074_vm2, %v1606_v54, %v1607_v14  ;;  %v14728_v34 = vld [vmem:[%s20725_s2 + $0x88] sm:$0xff]  ;;  %v2270_v47 = vrot.slane %v12567_v36, 6  ;;  %v1684_v63 = vunpack.c.l.b16 %v1605_v11  ;;  %v12566_v14 = vld [vmem:[%s15072_s19 + $0x218] sm:$0xc] }
 0x184   : > { %v1685_v18 = vunpack.c.l.b16 %v1608_v32  ;;  %3944 = vmatpush.bf16.msra.mxu2 %v14728_v34  ;;  %12763 = vmatmul.msk.bf16.vlgmr.msrb.gmra.mxu3 %vm564_vm3, %v14689_v57  ;;  %v14710_v11 = vld [vmem:[%s20725_s2 + $0x78] sm:$0xff] }
 0x185   : > { %12445 = vmatmul.msk.bf16.gmra.mxu0 %vm564_vm3, %v1708_v24  ;;  %v1316_v24 = vpop.f32.mrf.mxu2  ;;  %v730_v53 = vmax.f32 %v693_v58, 0.0  ;;  %v2272_v27 = vrot.slane %v2270_v47, 4  ;;  %3678 = vmatpush.bf16.msra.mxu1 %v14710_v11 }
 0x186   : > { %v15632_v59 = vpop.f32.mrf.mxu1  ;;  %v15644_v42 = vadd.f32 %v1417_v17, %v1316_v24  ;;  %v12388_v17 = vld [vmem:[%s15072_s19 + $0x23c] sm:$0xf]  ;;  %v12568_v24 = vld [vmem:[%s15072_s19 + $0x220] sm:$0x3]  ;;  %v1709_v58 = vpack.c.b16 %v1685_v18, %v1684_v63 }
 0x187   : > { %20798 = vst [vmem:[#allocation34_spill] sm:$0xff] %v15632_v59  ;;  %v12612_v59 = vrot.slane %v12566_v14, 10  ;;  %v2273_v36 = vrot.slane %v12568_v24, 6  ;;  %v1611_v34 = vrot.slane %v12388_v17, 5  ;;  %v12387_v14 = vld [vmem:[%s15072_s19 + $0x238] sm:$0xe] }
 0x189   : > { %v2271_v32 = vsel %vm15170_vm6, %v12612_v59, %v2270_v47  ;;  %v12419_v59 = vrot.slane %v12387_v14, 9  ;;  %v1613_v47 = vrot.slane %v1611_v34, 4 }
 0x18a   : > { %v694_v21 = vpop.f32.mrf.mxu0  ;;  %v2380_v57 = vunpack.c.l.b16 %v2271_v32 }
 0x18b   : > { %v695_v30 = vadd.f32 %v15606_v25, %v694_v21  ;;  %v1419_v61 = vpop.f32.mrf.mxu3  ;;  %v1612_v11 = vsel %vm15074_vm2, %v12419_v59, %v1611_v34  ;;  %v12391_v59 = vld [vmem:[%s15072_s19 + $0x258] sm:$0xf] }
 0x18d   : > { %v731_v55 = vmax.f32 %v695_v30, 0.0 }
 0x18e   : > { %v15651_v54 = vpop.f32.mrf.mxu1 }
 0x18f   : > { %20799 = vst [vmem:[#allocation35_spill] sm:$0xff] %v15651_v54  ;;  %v748_v21 = vpack.c.bf16 %v731_v55, %v730_v53  ;;  %v1318_v53 = vpop.f32.mrf.mxu2  ;;  %v2274_v55 = vsel %vm15170_vm6, %v2272_v27, %v2273_v36  ;;  %v12389_v54 = vld [vmem:[%s15072_s19 + $0x240] sm:$0x1] }
 0x190   : > { %v15667_v24 = vadd.f32 %v1419_v61, %v1318_v53  ;;  %v2381_v63 = vunpack.c.l.b16 %v2274_v55  ;;  %v1614_v17 = vrot.slane %v12389_v54, 5  ;;  %v12570_v55 = vld [vmem:[%s15072_s19 + $0x238] sm:$0xf] }
 0x191   : > { %12245 = vmatmul.msk.bf16.gmra.mxu1 %vm564_vm3, %v748_v21 }
 0x192   : > { %v697_v30 = vpop.f32.mrf.mxu0  ;;  %v2411_v18 = vpack.c.b16 %v2381_v63, %v2380_v57  ;;  %v2277_v57 = vrot.slane %v12570_v55, 6 }
 0x193   : > { %v1422_v27 = vpop.f32.mrf.mxu3  ;;  %v698_v36 = vadd.f32 %v15606_v25, %v697_v30 }
 0x194   : > { %12640 = vmatmul.msk.bf16.gmra.mxu2 %vm564_vm3, %v2411_v18  ;;  %v1686_v18 = vunpack.c.l.b16 %v1612_v11 }
 0x195   : > { %12446 = vmatmul.msk.bf16.gmra.mxu0 %vm564_vm3, %v1709_v58  ;;  %v1615_v58 = vsel %vm15074_vm2, %v1613_v47, %v1614_v17  ;;  %v732_v14 = vmax.f32 %v698_v36, 0.0  ;;  %v12571_v47 = vld [vmem:[%s15072_s19 + $0x23c] sm:$0x3]  ;;  %v2279_v17 = vrot.slane %v2277_v57, 4 }
 0x196   : > { %v15670_v21 = vpop.f32.mrf.mxu1  ;;  %v1687_v30 = vunpack.c.l.b16 %v1615_v58 }
 0x197   : > { %20800 = vst [vmem:[#allocation36_spill] sm:$0xff] %v15670_v21  ;;  %v1321_v32 = vpop.f32.mrf.mxu2  ;;  %v14690_v21 = vld [vmem:[%s15072_s19 + $0x220] sm:$0xff] }
 0x198   : > { %v15679_v54 = vadd.f32 %v1422_v27, %v1321_v32  ;;  %12764 = vmatmul.msk.bf16.gmra.mxu3 %vm564_vm3, %v14690_v21  ;;  %v1710_v36 = vpack.c.b16 %v1687_v30, %v1686_v18  ;;  %v1618_v32 = vrot.slane %v12391_v59, 5 }
 0x19a   : > { %v699_v61 = vpop.f32.mrf.mxu0 }
 0x19b   : > { %v700_v53 = vadd.f32 %v15606_v25, %v699_v61  ;;  %v12613_v25 = vrot.slane %v12569_v60, 10  ;;  %v1424_v27 = vpop.f32.mrf.mxu3  ;;  %v2280_v61 = vrot.slane %v12571_v47, 6  ;;  %v12390_v60 = vld [vmem:[%s15072_s19 + $0x254] sm:$0xe] }
 0x19c   : > { %v12420_v30 = vrot.slane %v12390_v60, 9 }
 0x19d   : > { %v733_v63 = vmax.f32 %v700_v53, 0.0  ;;  %v2278_v11 = vsel %vm15170_vm6, %v12613_v25, %v2277_v57  ;;  %v2281_v55 = vsel %vm15170_vm6, %v2279_v17, %v2280_v61 }
 0x19e   : > { %v15683_v46 = vpop.f32.mrf.mxu1  ;;  %v2383_v47 = vunpack.c.l.b16 %v2281_v55 }
 0x19f   : > { %20801 = vst [vmem:[#allocation37_spill] sm:$0xff] %v15683_v46  ;;  %v749_v34 = vpack.c.bf16 %v733_v63, %v732_v14  ;;  %v1323_v53 = vpop.f32.mrf.mxu2  ;;  %v2382_v14 = vunpack.c.l.b16 %v2278_v11  ;;  %v12392_v63 = vld [vmem:[%s15072_s19 + $0x25c] sm:$0x1] }
 0x1a0   : > { %v15699_v46 = vadd.f32 %v1424_v27, %v1323_v53  ;;  %v1621_v59 = vrot.slane %v12392_v63, 5  ;;  %v1619_v27 = vsel %vm15074_vm2, %v12420_v30, %v1618_v32  ;;  %v12573_v53 = vld [vmem:[%s15072_s19 + $0x254] sm:$0xf] }
 0x1a1   : > { %12246 = vmatmul.msk.bf16.gmra.mxu1 %vm564_vm3, %v749_v34  ;;  %v2412_v18 = vpack.c.b16 %v2383_v47, %v2382_v14  ;;  %v1620_v34 = vrot.slane %v1618_v32, 4  ;;  %v2284_v55 = vrot.slane %v12573_v53, 6  ;;  %v14669_v14 = vld [vmem:[%s15072_s19 + $0x15c] sm:$0xff]  ;;  %v1688_v60 = vunpack.c.l.b16 %v1619_v27  ;;  %v12574_v32 = vld [vmem:[%s15072_s19 + $0x258] sm:$0x3] }
 0x1a2   : > { %v1787_v58 = vpop.f32.mrf.mxu0  ;;  %v14691_v47 = vld [vmem:[%s15072_s19 + $0x23c] sm:$0xff] }
 0x1a3   : > { %v15695_v21 = vadd.f32 %v1787_v58, %v15398_v44  ;;  %v14707_v44 = vld [vmem:[%s20725_s2 + $0x60] sm:$0xff]  ;;  %v1427_v25 = vpop.f32.mrf.mxu3  ;;  %v1622_v61 = vsel %vm15074_vm2, %v1620_v34, %v1621_v59  ;;  %v2287_v59 = vrot.slane %v12574_v32, 6  ;;  %v1628_v32 = vrot.slane %v12395_v22, 5  ;;  %v12576_v22 = vld [vmem:[%s15072_s19 + $0x270] sm:$0xf] }
 0x1a4   : > { %12641 = vmatmul.msk.bf16.gmra.mxu2 %vm564_vm3, %v2412_v18  ;;  %3237 = vmatpush.bf16.msra.mxu0 %v14707_v44  ;;  %v1689_v63 = vunpack.c.l.b16 %v1622_v61  ;;  %v12572_v44 = vld [vmem:[%s15072_s19 + $0x250] sm:$0xc] }
 0x1a5   : > { %12447 = vmatmul.msk.bf16.gmra.mxu0 %vm564_vm3, %v1710_v36  ;;  %v12614_v30 = vrot.slane %v12572_v44, 10  ;;  %v12393_v44 = vld [vmem:[%s15072_s19 + $0x270] sm:$0xe] }
 0x1a6   : > { %v15702_v57 = vpop.f32.mrf.mxu1 }
 0x1a7   : > { %20802 = vst [vmem:[#allocation38_spill] sm:$0xff] %v15702_v57  ;;  %v1326_v36 = vpop.f32.mrf.mxu2  ;;  %v12394_v57 = vld [vmem:[%s15072_s19 + $0x274] sm:$0xf] }
 0x1a8   : > { %v15715_v58 = vadd.f32 %v1427_v25, %v1326_v36  ;;  %12765 = vmatmul.msk.bf16.gmra.mxu3 %vm564_vm3, %v14691_v47  ;;  %v1711_v25 = vpack.c.b16 %v1689_v63, %v1688_v60  ;;  %v1625_v61 = vrot.slane %v12394_v57, 5  ;;  %v12421_v57 = vrot.slane %v12393_v44, 9  ;;  %v14692_v44 = vld [vmem:[%s15072_s19 + $0x258] sm:$0xff] }
 0x1aa   : > { %v1789_v17 = vpop.f32.mrf.mxu0  ;;  %v1627_v63 = vrot.slane %v1625_v61, 4 }
 0x1ab   : > { %v15713_v11 = vadd.f32 %v1789_v17, %v15418_v15  ;;  %v2286_v15 = vrot.slane %v2284_v55, 4  ;;  %v1429_v34 = vpop.f32.mrf.mxu3  ;;  %v2285_v17 = vsel %vm15170_vm6, %v12614_v30, %v2284_v55 }
 0x1ad   : > { %v2288_v53 = vsel %vm15170_vm6, %v2286_v15, %v2287_v59  ;;  %v1626_v15 = vsel %vm15074_vm2, %v12421_v57, %v1625_v61  ;;  %v12577_v61 = vld [vmem:[%s15072_s19 + $0x274] sm:$0x3] }
 0x1ae   : > { %v15720_v18 = vpop.f32.mrf.mxu1 }
 0x1af   : > { %20803 = vst [vmem:[#allocation39_spill] sm:$0xff] %v15720_v18  ;;  %v1328_v36 = vpop.f32.mrf.mxu2  ;;  %v2384_v18 = vunpack.c.l.b16 %v2285_v17  ;;  %v2291_v17 = vrot.slane %v12576_v22, 6 }
 0x1b0   : > { %v15736_v51 = vadd.f32 %v1429_v34, %v1328_v36  ;;  %v1629_v34 = vsel %vm15074_vm2, %v1627_v63, %v1628_v32  ;;  %v1690_v36 = vunpack.c.l.b16 %v1626_v15  ;;  %v2294_v32 = vrot.slane %v12577_v61, 6 }
 0x1b1   : > { %12547 = vmatmul.msk.bf16.vlgmr.msrb.gmra.mxu1 %vm564_vm3, %v14669_v14  ;;  %v2385_v14 = vunpack.c.l.b16 %v2288_v53  ;;  %v1691_v53 = vunpack.c.l.b16 %v1629_v34  ;;  %v1635_v61 = vrot.slane %v12398_v12, 5  ;;  %v12579_v12 = vld [vmem:[%s15072_s19 + $0x28c] sm:$0xf] }
 0x1b2   : > { %v1792_v27 = vpop.f32.mrf.mxu0 }
 0x1b3   : > { %v15732_v47 = vadd.f32 %v1792_v27, %v15433_v33  ;;  %v2413_v55 = vpack.c.b16 %v2385_v14, %v2384_v18  ;;  %v1432_v33 = vpop.f32.mrf.mxu3  ;;  %v14670_v27 = vld [vmem:[%s15072_s19 + $0x178] sm:$0xff] }
 0x1b5   : > { %12448 = vmatmul.msk.bf16.gmra.mxu0 %vm564_vm3, %v1711_v25  ;;  %12642 = vmatmul.msk.bf16.gmra.mxu2 %vm564_vm3, %v2413_v55  ;;  %v12575_v55 = vld [vmem:[%s15072_s19 + $0x26c] sm:$0xc] }
 0x1b6   : > { %v15739_v60 = vpop.f32.mrf.mxu1  ;;  %v12615_v57 = vrot.slane %v12575_v55, 10  ;;  %v12396_v55 = vld [vmem:[%s15072_s19 + $0x28c] sm:$0xe] }
 0x1b7   : > { %20804 = vst [vmem:[#allocation40_spill] sm:$0xff] %v15739_v60  ;;  %v1331_v18 = vpop.f32.mrf.mxu2  ;;  %v12397_v60 = vld [vmem:[%s15072_s19 + $0x290] sm:$0xf] }
 0x1b8   : > { %v15749_v25 = vadd.f32 %v1432_v33, %v1331_v18  ;;  %12766 = vmatmul.msk.bf16.gmra.mxu3 %vm564_vm3, %v14692_v44  ;;  %v1712_v33 = vpack.c.b16 %v1691_v53, %v1690_v36  ;;  %v1632_v34 = vrot.slane %v12397_v60, 5  ;;  %v12422_v60 = vrot.slane %v12396_v55, 9  ;;  %v14693_v55 = vld [vmem:[%s15072_s19 + $0x274] sm:$0xff] }
 0x1ba   : > { %v1794_v30 = vpop.f32.mrf.mxu0  ;;  %v1634_v53 = vrot.slane %v1632_v34, 4 }
 0x1bb   : > { %v15747_v59 = vadd.f32 %v1794_v30, %v15449_v9  ;;  %v2293_v9 = vrot.slane %v2291_v17, 4  ;;  %v1434_v63 = vpop.f32.mrf.mxu3  ;;  %v2292_v30 = vsel %vm15170_vm6, %v12615_v57, %v2291_v17 }
 0x1bd   : > { %v2295_v22 = vsel %vm15170_vm6, %v2293_v9, %v2294_v32  ;;  %v1633_v9 = vsel %vm15074_vm2, %v12422_v60, %v1632_v34  ;;  %v12580_v34 = vld [vmem:[%s15072_s19 + $0x290] sm:$0x3] }
 0x1be   : > { %v15754_v14 = vpop.f32.mrf.mxu1 }
 0x1bf   : > { %20805 = vst [vmem:[#allocation41_spill] sm:$0xff] %v15754_v14  ;;  %v1333_v18 = vpop.f32.mrf.mxu2  ;;  %v2386_v14 = vunpack.c.l.b16 %v2292_v30  ;;  %v2298_v30 = vrot.slane %v12579_v12, 6 }
 0x1c0   : > { %v15770_v43 = vadd.f32 %v1434_v63, %v1333_v18  ;;  %v1636_v63 = vsel %vm15074_vm2, %v1634_v53, %v1635_v61  ;;  %v1692_v18 = vunpack.c.l.b16 %v1633_v9  ;;  %v2301_v61 = vrot.slane %v12580_v34, 6 }
 0x1c1   : > { %12548 = vmatmul.msk.bf16.gmra.mxu1 %vm564_vm3, %v14670_v27  ;;  %v2387_v27 = vunpack.c.l.b16 %v2295_v22  ;;  %v1693_v22 = vunpack.c.l.b16 %v1636_v63  ;;  %v1642_v34 = vrot.slane %v12401_v8, 5  ;;  %v12582_v8 = vld [vmem:[%s15072_s19 + $0x2a8] sm:$0xf] }
 0x1c2   : > { %v1797_v15 = vpop.f32.mrf.mxu0 }
 0x1c3   : > { %v15766_v44 = vadd.f32 %v1797_v15, %v15464_v29  ;;  %v2414_v17 = vpack.c.b16 %v2387_v27, %v2386_v14  ;;  %v1437_v29 = vpop.f32.mrf.mxu3  ;;  %v14671_v15 = vld [vmem:[%s15072_s19 + $0x194] sm:$0xff] }
 0x1c5   : > { %12449 = vmatmul.msk.bf16.gmra.mxu0 %vm564_vm3, %v1712_v33  ;;  %12643 = vmatmul.msk.bf16.gmra.mxu2 %vm564_vm3, %v2414_v17  ;;  %v12578_v17 = vld [vmem:[%s15072_s19 + $0x288] sm:$0xc] }
 0x1c6   : > { %v15773_v36 = vpop.f32.mrf.mxu1  ;;  %v12616_v60 = vrot.slane %v12578_v17, 10  ;;  %v12399_v17 = vld [vmem:[%s15072_s19 + $0x2a8] sm:$0xe] }
 0x1c7   : > { %20806 = vst [vmem:[#allocation42_spill] sm:$0xff] %v15773_v36  ;;  %v1336_v14 = vpop.f32.mrf.mxu2  ;;  %v12400_v36 = vld [vmem:[%s15072_s19 + $0x2ac] sm:$0xf] }
 0x1c8   : > { %v15783_v33 = vadd.f32 %v1437_v29, %v1336_v14  ;;  %12767 = vmatmul.msk.bf16.gmra.mxu3 %vm564_vm3, %v14693_v55  ;;  %v1713_v29 = vpack.c.b16 %v1693_v22, %v1692_v18  ;;  %v1639_v63 = vrot.slane %v12400_v36, 5  ;;  %v12423_v36 = vrot.slane %v12399_v17, 9  ;;  %v14694_v17 = vld [vmem:[%s15072_s19 + $0x290] sm:$0xff] }
 0x1ca   : > { %v1799_v57 = vpop.f32.mrf.mxu0  ;;  %v1641_v22 = vrot.slane %v1639_v63, 4 }
 0x1cb   : > { %v15781_v32 = vadd.f32 %v1799_v57, %v15479_v4  ;;  %v2300_v4 = vrot.slane %v2298_v30, 4  ;;  %v1439_v53 = vpop.f32.mrf.mxu3  ;;  %v2299_v57 = vsel %vm15170_vm6, %v12616_v60, %v2298_v30 }
 0x1cd   : > { %v2302_v12 = vsel %vm15170_vm6, %v2300_v4, %v2301_v61  ;;  %v1640_v4 = vsel %vm15074_vm2, %v12423_v36, %v1639_v63  ;;  %v12583_v63 = vld [vmem:[%s15072_s19 + $0x2ac] sm:$0x3] }
 0x1ce   : > { %v15788_v27 = vpop.f32.mrf.mxu1 }
 0x1cf   : > { %20807 = vst [vmem:[#allocation43_spill] sm:$0xff] %v15788_v27  ;;  %v1338_v14 = vpop.f32.mrf.mxu2  ;;  %v2388_v27 = vunpack.c.l.b16 %v2299_v57  ;;  %v2305_v57 = vrot.slane %v12582_v8, 6 }
 0x1d0   : > { %v15804_v45 = vadd.f32 %v1439_v53, %v1338_v14  ;;  %v1643_v53 = vsel %vm15074_vm2, %v1641_v22, %v1642_v34  ;;  %v1694_v14 = vunpack.c.l.b16 %v1640_v4  ;;  %v2308_v34 = vrot.slane %v12583_v63, 6 }
 0x1d1   : > { %12549 = vmatmul.msk.bf16.gmra.mxu1 %vm564_vm3, %v14671_v15  ;;  %v2389_v15 = vunpack.c.l.b16 %v2302_v12  ;;  %v1695_v12 = vunpack.c.l.b16 %v1643_v53  ;;  %v1649_v63 = vrot.slane %v12404_v5, 5  ;;  %v12585_v5 = vld [vmem:[%s15072_s19 + $0x2c4] sm:$0xf] }
 0x1d2   : > { %v1802_v9 = vpop.f32.mrf.mxu0 }
 0x1d3   : > { %v15800_v55 = vadd.f32 %v1802_v9, %v15493_v26  ;;  %v2415_v30 = vpack.c.b16 %v2389_v15, %v2388_v27  ;;  %v1442_v26 = vpop.f32.mrf.mxu3  ;;  %v14672_v9 = vld [vmem:[%s15072_s19 + $0x1b0] sm:$0xff] }
 0x1d5   : > { %12450 = vmatmul.msk.bf16.gmra.mxu0 %vm564_vm3, %v1713_v29  ;;  %12644 = vmatmul.msk.bf16.gmra.mxu2 %vm564_vm3, %v2415_v30  ;;  %v12581_v30 = vld [vmem:[%s15072_s19 + $0x2a4] sm:$0xc] }
 0x1d6   : > { %v15807_v18 = vpop.f32.mrf.mxu1  ;;  %v12617_v36 = vrot.slane %v12581_v30, 10  ;;  %v12402_v30 = vld [vmem:[%s15072_s19 + $0x2c4] sm:$0xe] }
 0x1d7   : > { %20808 = vst [vmem:[#allocation44_spill] sm:$0xff] %v15807_v18  ;;  %v1341_v27 = vpop.f32.mrf.mxu2  ;;  %v12403_v18 = vld [vmem:[%s15072_s19 + $0x2c8] sm:$0xf] }
 0x1d8   : > { %v15817_v29 = vadd.f32 %v1442_v26, %v1341_v27  ;;  %12768 = vmatmul.msk.bf16.gmra.mxu3 %vm564_vm3, %v14694_v17  ;;  %v1714_v26 = vpack.c.b16 %v1695_v12, %v1694_v14  ;;  %v1646_v53 = vrot.slane %v12403_v18, 5  ;;  %v12424_v18 = vrot.slane %v12402_v30, 9  ;;  %v14695_v30 = vld [vmem:[%s15072_s19 + $0x2ac] sm:$0xff] }
 0x1da   : > { %v1804_v60 = vpop.f32.mrf.mxu0  ;;  %v1648_v12 = vrot.slane %v1646_v53, 4 }
 0x1db   : > { %v15815_v61 = vadd.f32 %v1804_v60, %v15508_v7  ;;  %v2307_v7 = vrot.slane %v2305_v57, 4  ;;  %v1444_v22 = vpop.f32.mrf.mxu3  ;;  %v2306_v60 = vsel %vm15170_vm6, %v12617_v36, %v2305_v57 }
 0x1dd   : > { %v2309_v8 = vsel %vm15170_vm6, %v2307_v7, %v2308_v34  ;;  %v1647_v7 = vsel %vm15074_vm2, %v12424_v18, %v1646_v53  ;;  %v12586_v53 = vld [vmem:[%s15072_s19 + $0x2c8] sm:$0x3] }
 0x1de   : > { %v15822_v15 = vpop.f32.mrf.mxu1 }
 0x1df   : > { %20809 = vst [vmem:[#allocation45_spill] sm:$0xff] %v15822_v15  ;;  %v1343_v27 = vpop.f32.mrf.mxu2  ;;  %v2390_v15 = vunpack.c.l.b16 %v2306_v60  ;;  %v2312_v60 = vrot.slane %v12585_v5, 6 }
 0x1e0   : > { %v15838_v20 = vadd.f32 %v1444_v22, %v1343_v27  ;;  %v1650_v22 = vsel %vm15074_vm2, %v1648_v12, %v1649_v63  ;;  %v1696_v27 = vunpack.c.l.b16 %v1647_v7  ;;  %v2315_v63 = vrot.slane %v12586_v53, 6 }
 0x1e1   : > { %12550 = vmatmul.msk.bf16.gmra.mxu1 %vm564_vm3, %v14672_v9  ;;  %v2391_v9 = vunpack.c.l.b16 %v2309_v8  ;;  %v1697_v8 = vunpack.c.l.b16 %v1650_v22  ;;  %v1656_v53 = vrot.slane %v12407_v41, 5  ;;  %v14674_v41 = vld [vmem:[%s15072_s19 + $0x1e8] sm:$0xff] }
 0x1e2   : > { %v1807_v4 = vpop.f32.mrf.mxu0 }
 0x1e3   : > { %v15834_v17 = vadd.f32 %v1807_v4, %v15522_v31  ;;  %v2416_v57 = vpack.c.b16 %v2391_v9, %v2390_v15  ;;  %v1447_v31 = vpop.f32.mrf.mxu3  ;;  %v14673_v4 = vld [vmem:[%s15072_s19 + $0x1cc] sm:$0xff] }
 0x1e5   : > { %12451 = vmatmul.msk.bf16.gmra.mxu0 %vm564_vm3, %v1714_v26  ;;  %12645 = vmatmul.msk.bf16.gmra.mxu2 %vm564_vm3, %v2416_v57  ;;  %v12584_v57 = vld [vmem:[%s15072_s19 + $0x2c0] sm:$0xc] }
 0x1e6   : > { %v15841_v14 = vpop.f32.mrf.mxu1  ;;  %v12618_v18 = vrot.slane %v12584_v57, 10  ;;  %v12405_v57 = vld [vmem:[%s15072_s19 + $0x2e0] sm:$0xe] }
 0x1e7   : > { %20810 = vst [vmem:[#allocation46_spill] sm:$0xff] %v15841_v14  ;;  %v1346_v15 = vpop.f32.mrf.mxu2  ;;  %v12406_v14 = vld [vmem:[%s15072_s19 + $0x2e4] sm:$0xf] }
 0x1e8   : > { %v15851_v26 = vadd.f32 %v1447_v31, %v1346_v15  ;;  %12769 = vmatmul.msk.bf16.gmra.mxu3 %vm564_vm3, %v14695_v30  ;;  %v1715_v31 = vpack.c.b16 %v1697_v8, %v1696_v27  ;;  %v1653_v22 = vrot.slane %v12406_v14, 5  ;;  %v12425_v14 = vrot.slane %v12405_v57, 9  ;;  %v14696_v57 = vld [vmem:[%s15072_s19 + $0x2c8] sm:$0xff] }
 0x1ea   : > { %v1809_v36 = vpop.f32.mrf.mxu0  ;;  %v1655_v8 = vrot.slane %v1653_v22, 4 }
 0x1eb   : > { %v15849_v34 = vadd.f32 %v1809_v36, %v15537_v19  ;;  %v2314_v19 = vrot.slane %v2312_v60, 4  ;;  %v1449_v12 = vpop.f32.mrf.mxu3  ;;  %v2313_v36 = vsel %vm15170_vm6, %v12618_v18, %v2312_v60 }
 0x1ed   : > { %v2316_v5 = vsel %vm15170_vm6, %v2314_v19, %v2315_v63  ;;  %v1654_v19 = vsel %vm15074_vm2, %v12425_v14, %v1653_v22 }
 0x1ee   : > { %v15856_v9 = vpop.f32.mrf.mxu1 }
 0x1ef   : > { %20811 = vst [vmem:[#allocation47_spill] sm:$0xff] %v15856_v9  ;;  %v1348_v15 = vpop.f32.mrf.mxu2  ;;  %v2392_v9 = vunpack.c.l.b16 %v2313_v36  ;;  %v12588_v36 = vld [vmem:[%s15072_s19 + $0x2e0] sm:$0xf] }
 0x1f0   : > { %v15872_v62 = vadd.f32 %v1449_v12, %v1348_v15  ;;  %v1657_v12 = vsel %vm15074_vm2, %v1655_v8, %v1656_v53  ;;  %v1698_v15 = vunpack.c.l.b16 %v1654_v19  ;;  %v12409_v53 = vld [vmem:[%s15072_s19 + $0x300] sm:$0xf] }
 0x1f1   : > { %12551 = vmatmul.msk.bf16.gmra.mxu1 %vm564_vm3, %v14673_v4  ;;  %v2393_v4 = vunpack.c.l.b16 %v2316_v5  ;;  %v1699_v5 = vunpack.c.l.b16 %v1657_v12 }
 0x1f2   : > { %v1812_v7 = vpop.f32.mrf.mxu0 }
 0x1f3   : > { %v15868_v30 = vadd.f32 %v1812_v7, %v15551_v48  ;;  %v2417_v60 = vpack.c.b16 %v2393_v4, %v2392_v9  ;;  %v1452_v48 = vpop.f32.mrf.mxu3  ;;  %v2319_v7 = vrot.slane %v12588_v36, 6  ;;  %v12587_v4 = vld [vmem:[%s15072_s19 + $0x2dc] sm:$0xc]  ;;  %v1716_v19 = vpack.c.b16 %v1699_v5, %v1698_v15 }
 0x1f4   : > { %v12619_v22 = vrot.slane %v12587_v4, 10  ;;  %v1660_v4 = vrot.slane %v12409_v53, 5 }
 0x1f5   : > { %12452 = vmatmul.msk.bf16.gmra.mxu0 %vm564_vm3, %v1715_v31  ;;  %12646 = vmatmul.msk.bf16.gmra.mxu2 %vm564_vm3, %v2417_v60  ;;  %v12589_v60 = vld [vmem:[%s15072_s19 + $0x2e4] sm:$0x3]  ;;  %v2321_v14 = vrot.slane %v2319_v7, 4 }
 0x1f6   : > { %v15875_v27 = vpop.f32.mrf.mxu1  ;;  %v2322_v8 = vrot.slane %v12589_v60, 6  ;;  %v1662_v15 = vrot.slane %v1660_v4, 4 }
 0x1f7   : > { %20812 = vst [vmem:[#allocation48_spill] sm:$0xff] %v15875_v27  ;;  %v1351_v9 = vpop.f32.mrf.mxu2 }
 0x1f8   : > { %v15885_v31 = vadd.f32 %v1452_v48, %v1351_v9  ;;  %12770 = vmatmul.msk.bf16.gmra.mxu3 %vm564_vm3, %v14696_v57  ;;  %v2320_v48 = vsel %vm15170_vm6, %v12619_v22, %v2319_v7  ;;  %v12410_v57 = vld [vmem:[%s15072_s19 + $0x304] sm:$0x1] }
 0x1f9   : > { %v2394_v12 = vunpack.c.l.b16 %v2320_v48  ;;  %v1663_v5 = vrot.slane %v12410_v57, 5  ;;  %v14675_v48 = vld [vmem:[%s15072_s19 + $0x204] sm:$0xff] }
 0x1fa   : > { %v1814_v18 = vpop.f32.mrf.mxu0 }
 0x1fb   : > { %v15883_v63 = vadd.f32 %v1814_v18, %v15566_v37  ;;  %v1454_v37 = vpop.f32.mrf.mxu3  ;;  %v2323_v18 = vsel %vm15170_vm6, %v2321_v14, %v2322_v8 }
 0x1fc   : > { %v2395_v9 = vunpack.c.l.b16 %v2323_v18 }
 0x1fe   : > { %v15892_v27 = vpop.f32.mrf.mxu1  ;;  %v2418_v7 = vpack.c.b16 %v2395_v9, %v2394_v12  ;;  %v14697_v9 = vld [vmem:[%s15072_s19 + $0x2e4] sm:$0xff] }
 0x1ff   : > { %20813 = vst [vmem:[#allocation49_spill] sm:$0xff] %v15892_v27  ;;  %v1353_v27 = vpop.f32.mrf.mxu2 }
 0x200   : > { %v15906_v49 = vadd.f32 %v1454_v37, %v1353_v27  ;;  %v1664_v27 = vsel %vm15074_vm2, %v1662_v15, %v1663_v5  ;;  %v12591_v37 = vld [vmem:[%s15072_s19 + $0x2fc] sm:$0xf]  ;;  %v12780_v15 = vld [vmem:[%s15072_s19 + $0x2a8] sm:$0xf] }
 0x201   : > { %12552 = vmatmul.msk.bf16.gmra.mxu1 %vm564_vm3, %v14674_v41  ;;  %v12426_v41 = vrot.slane %v12408_v23, 9  ;;  %v14727_v23 = vld [vmem:[%s20725_s2 + $0x80] sm:$0xff]  ;;  %v2326_v18 = vrot.slane %v12591_v37, 6  ;;  %v1701_v12 = vunpack.c.l.b16 %v1664_v27  ;;  %v14709_v27 = vld [vmem:[%s20725_s2 + $0x70] sm:$0xff] }
 0x202   : > { %v1817_v36 = vpop.f32.mrf.mxu0  ;;  %3945 = vmatpush.bf16.msra.mxu2 %v14727_v23  ;;  %3679 = vmatpush.bf16.msra.mxu1 %v14709_v27 }
 0x203   : > { %v15902_v60 = vadd.f32 %v1817_v36, %v15580_v1  ;;  %v1661_v14 = vsel %vm15074_vm2, %v12426_v41, %v1660_v4  ;;  %v12590_v36 = vld [vmem:[%s15072_s19 + $0x2f8] sm:$0xc]  ;;  %v12592_v4 = vld [vmem:[%s15072_s19 + $0x300] sm:$0x3]  ;;  %v2328_v41 = vrot.slane %v2326_v18, 4 }
 0x205   : > { %12453 = vmatmul.msk.bf16.gmra.mxu0 %vm564_vm3, %v1716_v19  ;;  %12647 = vmatmul.msk.bf16.gmra.mxu2 %vm564_vm3, %v2418_v7  ;;  %v1700_v19 = vunpack.c.l.b16 %v1661_v14  ;;  %v12620_v7 = vrot.slane %v12590_v36, 10 }
 0x206   : > { %v15909_v22 = vpop.f32.mrf.mxu1 }
 0x207   : > { %20814 = vst [vmem:[#allocation50_spill] sm:$0xff] %v15909_v22  ;;  %v15916_v8 = vpop.f32.mrf.mxu2  ;;  %v2327_v5 = vsel %vm15170_vm6, %v12620_v7, %v2326_v18  ;;  %v1717_v14 = vpack.c.b16 %v1701_v12, %v1700_v19  ;;  %v12779_v18 = vld [vmem:[%s15072_s19 + $0x2a4] sm:$0xc]  ;;  %v12781_v7 = vld [vmem:[%s15072_s19 + $0x2ac] sm:$0x3] }
 0x208   : > { %12771 = vmatmul.msk.bf16.gmra.mxu3 %vm564_vm3, %v14697_v9  ;;  %v2396_v23 = vunpack.c.l.b16 %v2327_v5  ;;  %v12593_v22 = vld [vmem:[%s15072_s19 + $0x314] sm:$0xc] }
 0x20a   : > { %v1819_v1 = vpop.f32.mrf.mxu0 }
 0x20b   : > { %v15919_v53 = vadd.f32 %v1819_v1, %v15595_v3  ;;  %v2329_v3 = vrot.slane %v12592_v4, 6  ;;  %v3007_v4 = vrot.slane %v12780_v15, 6  ;;  %v3010_v15 = vrot.slane %v12781_v7, 6 }
 0x20d   : > { %v2330_v1 = vsel %vm15170_vm6, %v2328_v41, %v2329_v3  ;;  %v12827_v41 = vrot.slane %v12779_v18, 10  ;;  %v3009_v3 = vrot.slane %v3007_v4, 4 }
 0x20e   : > { %v15929_v57 = vpop.f32.mrf.mxu1  ;;  %v2397_v37 = vunpack.c.l.b16 %v2330_v1 }
 0x20f   : > { %20815 = vst [vmem:[#allocation51_spill] sm:$0xff] %v15929_v57  ;;  %v15941_v57 = vpop.f32.mrf.mxu2  ;;  %v3008_v5 = vsel %vm15170_vm6, %v12827_v41, %v3007_v4  ;;  %v3011_v1 = vsel %vm15170_vm6, %v3009_v3, %v3010_v15  ;;  %v12621_v41 = vrot.slane %v12593_v22, 10  ;;  %v2336_v15 = vrot.slane %v12595_v10, 6  ;;  %v14730_v22 = vld [vmem:[%s20726_s3 + $0x18] sm:$0xff] }
 0x210   : > { %v2419_v19 = vpack.c.b16 %v2397_v37, %v2396_v23  ;;  %v12594_v37 = vld [vmem:[%s15072_s19 + $0x318] sm:$0xf]  ;;  %v3122_v7 = vunpack.c.l.b16 %v3008_v5  ;;  %v3014_v10 = vrot.slane %v12783_v35, 6  ;;  %4247 = vmatpush.bf16.msra.mxu3 %v14730_v22 }
 0x211   : > { %12553 = vmatmul.msk.bf16.gmra.mxu1 %vm564_vm3, %v14675_v48  ;;  %v15948_v48 = vpop.f32.mrf.mxu3  ;;  %v2333_v18 = vrot.slane %v12594_v37, 6 }
 0x212   : > { %v1822_v36 = vpop.f32.mrf.mxu0 }
 0x213   : > { %v15944_v9 = vadd.f32 %v1822_v36, %v15614_v50  ;;  %v14676_v36 = vld [vmem:[%s15072_s19 + $0x220] sm:$0xff]  ;;  %v2335_v3 = vrot.slane %v2333_v18, 4 }
 0x215   : > { %12454 = vmatmul.msk.bf16.gmra.mxu0 %vm564_vm3, %v1717_v14  ;;  %12648 = vmatmul.msk.bf16.gmra.mxu2 %vm564_vm3, %v2419_v19  ;;  %v3123_v19 = vunpack.c.l.b16 %v3011_v1 }
 0x216   : > { %v15951_v12 = vpop.f32.mrf.mxu1 }
 0x217   : > { %20816 = vst [vmem:[#allocation52_spill] sm:$0xff] %v15951_v12  ;;  %v15958_v27 = vpop.f32.mrf.mxu2  ;;  %v14698_v12 = vld [vmem:[%s15072_s19 + $0x300] sm:$0xff]  ;;  %v3154_v5 = vpack.c.b16 %v3123_v19, %v3122_v7 }
 0x218   : > { %12772 = vmatmul.msk.bf16.gmra.mxu3 %vm564_vm3, %v14698_v12 }
 0x219   : > { %v15963_v23 = vpop.f32.mrf.mxu3 }
 0x21a   : > { %v1824_v50 = vpop.f32.mrf.mxu0 }
 0x21b   : > { %v15961_v14 = vadd.f32 %v1824_v50, %v15629_v56  ;;  %v2334_v56 = vsel %vm15170_vm6, %v12621_v41, %v2333_v18  ;;  %v2337_v50 = vsel %vm15170_vm6, %v2335_v3, %v2336_v15  ;;  %v12782_v18 = vld [vmem:[%s15072_s19 + $0x2c0] sm:$0xc]  ;;  %v12784_v41 = vld [vmem:[%s15072_s19 + $0x2c8] sm:$0x3]  ;;  %v3016_v15 = vrot.slane %v3014_v10, 4 }
 0x21c   : > { %v2398_v1 = vunpack.c.l.b16 %v2334_v56  ;;  %v2399_v37 = vunpack.c.l.b16 %v2337_v50  ;;  %v12828_v19 = vrot.slane %v12782_v18, 10  ;;  %v3017_v35 = vrot.slane %v12784_v41, 6  ;;  %v14677_v18 = vld [vmem:[%s15072_s19 + $0x23c] sm:$0xff] }
 0x21e   : > { %v15970_v4 = vpop.f32.mrf.mxu1  ;;  %v3015_v56 = vsel %vm15170_vm6, %v12828_v19, %v3014_v10  ;;  %v3018_v50 = vsel %vm15170_vm6, %v3016_v15, %v3017_v35  ;;  %v12622_v19 = vrot.slane %v12596_v39, 10  ;;  %v2343_v15 = vrot.slane %v12598_v13, 6 }
 0x21f   : > { %20817 = vst [vmem:[#allocation53_spill] sm:$0xff] %v15970_v4  ;;  %v15982_v6 = vpop.f32.mrf.mxu2 }
 0x221   : > { %12554 = vmatmul.msk.bf16.gmra.mxu1 %vm564_vm3, %v14676_v36  ;;  %v15989_v3 = vpop.f32.mrf.mxu3  ;;  %v2420_v36 = vpack.c.b16 %v2399_v37, %v2398_v1  ;;  %v12597_v37 = vld [vmem:[%s15072_s19 + $0x334] sm:$0xf] }
 0x222   : > { %v1827_v4 = vpop.f32.mrf.mxu0  ;;  %v2340_v41 = vrot.slane %v12597_v37, 6 }
 0x223   : > { %v15985_v12 = vadd.f32 %v1827_v4, %v15644_v42  ;;  %v14734_v42 = vld [vmem:[%s20725_s2 + $0x98] sm:$0xff] }
 0x224   : > { %4733 = vmatpush.bf16.msrb.mxu0 %v14734_v42  ;;  %v3125_v42 = vunpack.c.l.b16 %v3018_v50  ;;  %v2342_v0 = vrot.slane %v2340_v41, 4 }
 0x225   : > { %12855 = vmatmul.msk.bf16.vlgmr.msra.gmra.mxu0 %vm564_vm3, %v3154_v5  ;;  %12649 = vmatmul.msk.bf16.gmra.mxu2 %vm564_vm3, %v2420_v36  ;;  %v3124_v36 = vunpack.c.l.b16 %v3015_v56 }
 0x226   : > { %v15992_v7 = vpop.f32.mrf.mxu1  ;;  %v2344_v56 = vsel %vm15170_vm6, %v2342_v0, %v2343_v15 }
 0x227   : > { %20818 = vst [vmem:[#allocation54_spill] sm:$0xff] %v15992_v7  ;;  %v16002_v5 = vpop.f32.mrf.mxu2  ;;  %v14699_v7 = vld [vmem:[%s15072_s19 + $0x31c] sm:$0xff]  ;;  %v3155_v39 = vpack.c.b16 %v3125_v42, %v3124_v36  ;;  %v2401_v13 = vunpack.c.l.b16 %v2344_v56 }
 0x228   : > { %12773 = vmatmul.msk.bf16.gmra.mxu3 %vm564_vm3, %v14699_v7 }
 0x229   : > { %v16007_v1 = vpop.f32.mrf.mxu3 }
 0x22a   : > { %v1829_v4 = vpop.f32.mrf.mxu0 }
 0x22b   : > { %v16005_v22 = vadd.f32 %v1829_v4, %v15667_v24  ;;  %v12786_v24 = vld [vmem:[%s15072_s19 + $0x2e0] sm:$0xf]  ;;  %v2341_v4 = vsel %vm15170_vm6, %v12622_v19, %v2340_v41  ;;  %v12785_v41 = vld [vmem:[%s15072_s19 + $0x2dc] sm:$0xc]  ;;  %v12787_v19 = vld [vmem:[%s15072_s19 + $0x2e4] sm:$0x3] }
 0x22c   : > { %v2400_v37 = vunpack.c.l.b16 %v2341_v4  ;;  %v3021_v40 = vrot.slane %v12786_v24, 6  ;;  %v12829_v36 = vrot.slane %v12785_v41, 10  ;;  %v3024_v15 = vrot.slane %v12787_v19, 6  ;;  %v12599_v19 = vld [vmem:[%s15072_s19 + $0x34c] sm:$0xc] }
 0x22e   : > { %v2053_v10 = vpop.f32.mrf.mxu1  ;;  %v3023_v42 = vrot.slane %v3021_v40, 4 }
 0x22f   : > { %v2133_v35 = vadd.f32 %v2053_v10, %v15695_v21  ;;  %v16023_v21 = vpop.f32.mrf.mxu2 }
 0x230   : > { %v3025_v24 = vsel %vm15170_vm6, %v3023_v42, %v3024_v15 }
 0x231   : > { %12555 = vmatmul.msk.bf16.gmra.mxu1 %vm564_vm3, %v14677_v18  ;;  %v2575_v50 = vadd.f32 %v15916_v8, %v2133_v35  ;;  %v16033_v0 = vpop.f32.mrf.mxu3  ;;  %v2421_v18 = vpack.c.b16 %v2401_v13, %v2400_v37  ;;  %v3022_v35 = vsel %vm15170_vm6, %v12829_v36, %v3021_v40  ;;  %v3127_v41 = vunpack.c.l.b16 %v3025_v24  ;;  %v14700_v40 = vld [vmem:[%s15072_s19 + $0x338] sm:$0xff] }
 0x232   : > { %v1832_v52 = vpop.f32.mrf.mxu0  ;;  %v3126_v13 = vunpack.c.l.b16 %v3022_v35  ;;  %v12623_v36 = vrot.slane %v12599_v19, 10 }
 0x233   : > { %v16026_v10 = vadd.f32 %v1832_v52, %v15679_v54  ;;  %v16029_v7 = vadd.f32 %v15948_v48, %v2575_v50 }
 0x234   : > { %v3156_v35 = vpack.c.b16 %v3127_v41, %v3126_v13 }
 0x235   : > { %12856 = vmatmul.msk.bf16.gmra.mxu0 %vm564_vm3, %v3155_v39  ;;  %12650 = vmatmul.msk.bf16.gmra.mxu2 %vm564_vm3, %v2421_v18  ;;  %v12600_v39 = vld [vmem:[%s15072_s19 + $0x350] sm:$0xf]  ;;  %v12601_v18 = vld [vmem:[%s15072_s19 + $0x354] sm:$0x3] }
 0x236   : > { %v2055_v8 = vpop.f32.mrf.mxu1  ;;  %v2347_v37 = vrot.slane %v12600_v39, 6  ;;  %v2350_v15 = vrot.slane %v12601_v18, 6 }
 0x237   : > { %v2134_v52 = vadd.f32 %v2055_v8, %v15713_v11 }
 0x238   : > { %v16043_v4 = vpop.f32.mrf.mxu2  ;;  %v2349_v42 = vrot.slane %v2347_v37, 4  ;;  %12774 = vmatmul.msk.bf16.gmra.mxu3 %vm564_vm3, %v14700_v40 }
 0x239   : > { %v2576_v54 = vadd.f32 %v15941_v57, %v2134_v52  ;;  %v16051_v50 = vpop.f32.mrf.mxu3  ;;  %v14678_v57 = vld [vmem:[%s15072_s19 + $0x258] sm:$0xff]  ;;  %v2348_v52 = vsel %vm15170_vm6, %v12623_v36, %v2347_v37  ;;  %v12790_v36 = vld [vmem:[%s15072_s19 + $0x300] sm:$0x3] }
 0x23a   : > { %v1834_v48 = vpop.f32.mrf.mxu0  ;;  %v2402_v24 = vunpack.c.l.b16 %v2348_v52  ;;  %v12788_v37 = vld [vmem:[%s15072_s19 + $0x2f8] sm:$0xc] }
 0x23b   : > { %v16046_v56 = vadd.f32 %v1834_v48, %v15699_v46  ;;  %v16049_v11 = vadd.f32 %v15963_v23, %v2576_v54  ;;  %v12789_v23 = vld [vmem:[%s15072_s19 + $0x2fc] sm:$0xf]  ;;  %v2351_v54 = vsel %vm15170_vm6, %v2349_v42, %v2350_v15  ;;  %v12830_v13 = vrot.slane %v12788_v37, 10 }
 0x23c   : > { %v2403_v39 = vunpack.c.l.b16 %v2351_v54  ;;  %v3028_v18 = vrot.slane %v12789_v23, 6  ;;  %v3031_v15 = vrot.slane %v12790_v36, 6  ;;  %v12602_v36 = vld [vmem:[%s15072_s19 + $0x368] sm:$0xc] }
 0x23e   : > { %v2058_v8 = vpop.f32.mrf.mxu1  ;;  %v3030_v41 = vrot.slane %v3028_v18, 4  ;;  %v3029_v23 = vsel %vm15170_vm6, %v12830_v13, %v3028_v18  ;;  %v14701_v18 = vld [vmem:[%s15072_s19 + $0x354] sm:$0xff]  ;;  %v12624_v13 = vrot.slane %v12602_v36, 10 }
 0x23f   : > { %v2135_v46 = vadd.f32 %v2058_v8, %v15732_v47 }
 0x240   : > { %v16067_v47 = vpop.f32.mrf.mxu2  ;;  %v3032_v52 = vsel %vm15170_vm6, %v3030_v41, %v3031_v15 }
 0x241   : > { %12556 = vmatmul.msk.bf16.gmra.mxu1 %vm564_vm3, %v14678_v57  ;;  %v2577_v48 = vadd.f32 %v15958_v27, %v2135_v46  ;;  %v16077_v42 = vpop.f32.mrf.mxu3  ;;  %v2422_v57 = vpack.c.b16 %v2403_v39, %v2402_v24  ;;  %v12603_v24 = vld [vmem:[%s15072_s19 + $0x36c] sm:$0xf]  ;;  %v3129_v37 = vunpack.c.l.b16 %v3032_v52 }
 0x242   : > { %v1837_v19 = vpop.f32.mrf.mxu0  ;;  %v2354_v39 = vrot.slane %v12603_v24, 6 }
 0x243   : > { %v16070_v8 = vadd.f32 %v1837_v19, %v15715_v58  ;;  %v16073_v40 = vadd.f32 %v15989_v3, %v2577_v48  ;;  %v3128_v19 = vunpack.c.l.b16 %v3029_v23 }
 0x244   : > { %v2356_v41 = vrot.slane %v2354_v39, 4 }
 0x245   : > { %12857 = vmatmul.msk.bf16.gmra.mxu0 %vm564_vm3, %v3156_v35  ;;  %12651 = vmatmul.msk.bf16.gmra.mxu2 %vm564_vm3, %v2422_v57  ;;  %v12604_v57 = vld [vmem:[%s15072_s19 + $0x370] sm:$0x3]  ;;  %v3157_v23 = vpack.c.b16 %v3129_v37, %v3128_v19 }
 0x246   : > { %v2060_v27 = vpop.f32.mrf.mxu1  ;;  %v2357_v15 = vrot.slane %v12604_v57, 6 }
 0x247   : > { %v2136_v58 = vadd.f32 %v2060_v27, %v15747_v59 }
 0x248   : > { %v16087_v54 = vpop.f32.mrf.mxu2  ;;  %12775 = vmatmul.msk.bf16.gmra.mxu3 %vm564_vm3, %v14701_v18 }
 0x249   : > { %v2578_v3 = vadd.f32 %v15982_v6, %v2136_v58  ;;  %v16095_v35 = vpop.f32.mrf.mxu3  ;;  %v14679_v6 = vld [vmem:[%s15072_s19 + $0x274] sm:$0xff]  ;;  %v2355_v58 = vsel %vm15170_vm6, %v12624_v13, %v2354_v39  ;;  %v12793_v13 = vld [vmem:[%s15072_s19 + $0x31c] sm:$0x3] }
 0x24a   : > { %v1839_v46 = vpop.f32.mrf.mxu0  ;;  %v2404_v52 = vunpack.c.l.b16 %v2355_v58  ;;  %v12791_v39 = vld [vmem:[%s15072_s19 + $0x314] sm:$0xc] }
 0x24b   : > { %v16090_v48 = vadd.f32 %v1839_v46, %v15736_v51  ;;  %v16093_v59 = vadd.f32 %v16007_v1, %v2578_v3  ;;  %v12792_v1 = vld [vmem:[%s15072_s19 + $0x318] sm:$0xf]  ;;  %v2358_v3 = vsel %vm15170_vm6, %v2356_v41, %v2357_v15  ;;  %v12831_v19 = vrot.slane %v12791_v39, 10 }
 0x24c   : > { %v2405_v24 = vunpack.c.l.b16 %v2358_v3  ;;  %v3035_v57 = vrot.slane %v12792_v1, 6  ;;  %v3038_v15 = vrot.slane %v12793_v13, 6  ;;  %v12605_v13 = vld [vmem:[%s15072_s19 + $0x384] sm:$0xc] }
 0x24e   : > { %v2063_v27 = vpop.f32.mrf.mxu1  ;;  %v3037_v37 = vrot.slane %v3035_v57, 4  ;;  %v3036_v1 = vsel %vm15170_vm6, %v12831_v19, %v3035_v57  ;;  %v14702_v57 = vld [vmem:[%s15072_s19 + $0x370] sm:$0xff]  ;;  %v12625_v19 = vrot.slane %v12605_v13, 10 }
 0x24f   : > { %v2137_v51 = vadd.f32 %v2063_v27, %v15766_v44 }
 0x250   : > { %v16111_v44 = vpop.f32.mrf.mxu2  ;;  %v3039_v58 = vsel %vm15170_vm6, %v3037_v37, %v3038_v15 }
 0x251   : > { %12557 = vmatmul.msk.bf16.gmra.mxu1 %vm564_vm3, %v14679_v6  ;;  %v2579_v46 = vadd.f32 %v16002_v5, %v2137_v51  ;;  %v16121_v41 = vpop.f32.mrf.mxu3  ;;  %v2423_v6 = vpack.c.b16 %v2405_v24, %v2404_v52  ;;  %v12606_v52 = vld [vmem:[%s15072_s19 + $0x388] sm:$0xf]  ;;  %v3131_v39 = vunpack.c.l.b16 %v3039_v58 }
 0x252   : > { %v1842_v36 = vpop.f32.mrf.mxu0  ;;  %v2361_v24 = vrot.slane %v12606_v52, 6 }
 0x253   : > { %v16114_v27 = vadd.f32 %v1842_v36, %v15749_v25  ;;  %v16117_v18 = vadd.f32 %v16033_v0, %v2579_v46  ;;  %v3130_v36 = vunpack.c.l.b16 %v3036_v1 }
 0x254   : > { %v2363_v37 = vrot.slane %v2361_v24, 4 }
 0x255   : > { %12858 = vmatmul.msk.bf16.gmra.mxu0 %vm564_vm3, %v3157_v23  ;;  %12652 = vmatmul.msk.bf16.gmra.mxu2 %vm564_vm3, %v2423_v6  ;;  %v12607_v6 = vld [vmem:[%s15072_s19 + $0x38c] sm:$0x3]  ;;  %v3158_v1 = vpack.c.b16 %v3131_v39, %v3130_v36 }
 0x256   : > { %v2065_v5 = vpop.f32.mrf.mxu1  ;;  %v2364_v15 = vrot.slane %v12607_v6, 6 }
 0x257   : > { %v2138_v25 = vadd.f32 %v2065_v5, %v15781_v32 }
 0x258   : > { %v16131_v3 = vpop.f32.mrf.mxu2  ;;  %12776 = vmatmul.msk.bf16.gmra.mxu3 %vm564_vm3, %v14702_v57 }
 0x259   : > { %v2580_v0 = vadd.f32 %v16023_v21, %v2138_v25  ;;  %v16139_v23 = vpop.f32.mrf.mxu3  ;;  %v14680_v21 = vld [vmem:[%s15072_s19 + $0x290] sm:$0xff]  ;;  %v2362_v25 = vsel %vm15170_vm6, %v12625_v19, %v2361_v24  ;;  %v12796_v19 = vld [vmem:[%s15072_s19 + $0x338] sm:$0x3] }
 0x25a   : > { %v1844_v51 = vpop.f32.mrf.mxu0  ;;  %v2406_v58 = vunpack.c.l.b16 %v2362_v25  ;;  %v12794_v24 = vld [vmem:[%s15072_s19 + $0x330] sm:$0xc] }
 0x25b   : > { %v16134_v46 = vadd.f32 %v1844_v51, %v15770_v43  ;;  %v16137_v32 = vadd.f32 %v16051_v50, %v2580_v0  ;;  %v12795_v50 = vld [vmem:[%s15072_s19 + $0x334] sm:$0xf]  ;;  %v2365_v0 = vsel %vm15170_vm6, %v2363_v37, %v2364_v15  ;;  %v12832_v36 = vrot.slane %v12794_v24, 10 }
 0x25c   : > { %v2407_v52 = vunpack.c.l.b16 %v2365_v0  ;;  %v3042_v6 = vrot.slane %v12795_v50, 6  ;;  %v3045_v15 = vrot.slane %v12796_v19, 6  ;;  %v12608_v19 = vld [vmem:[%s15072_s19 + $0x3a0] sm:$0xc] }
 0x25e   : > { %v2068_v5 = vpop.f32.mrf.mxu1  ;;  %v3044_v39 = vrot.slane %v3042_v6, 4  ;;  %v3043_v50 = vsel %vm15170_vm6, %v12832_v36, %v3042_v6  ;;  %v14703_v6 = vld [vmem:[%s15072_s19 + $0x38c] sm:$0xff]  ;;  %v12626_v36 = vrot.slane %v12608_v19, 10 }
 0x25f   : > { %v2139_v43 = vadd.f32 %v2068_v5, %v15800_v55 }
 0x260   : > { %v16155_v55 = vpop.f32.mrf.mxu2  ;;  %v3046_v25 = vsel %vm15170_vm6, %v3044_v39, %v3045_v15 }
 0x261   : > { %12558 = vmatmul.msk.bf16.gmra.mxu1 %vm564_vm3, %v14680_v21  ;;  %v2581_v51 = vadd.f32 %v16043_v4, %v2139_v43  ;;  %v16165_v37 = vpop.f32.mrf.mxu3  ;;  %v2424_v21 = vpack.c.b16 %v2407_v52, %v2406_v58  ;;  %v12609_v58 = vld [vmem:[%s15072_s19 + $0x3a4] sm:$0xf]  ;;  %v3133_v24 = vunpack.c.l.b16 %v3046_v25 }
 0x262   : > { %v1847_v13 = vpop.f32.mrf.mxu0  ;;  %v2368_v52 = vrot.slane %v12609_v58, 6 }
 0x263   : > { %v16158_v5 = vadd.f32 %v1847_v13, %v15783_v33  ;;  %v16161_v57 = vadd.f32 %v16077_v42, %v2581_v51  ;;  %v3132_v13 = vunpack.c.l.b16 %v3043_v50 }
 0x264   : > { %v2370_v39 = vrot.slane %v2368_v52, 4 }
 0x265   : > { %12859 = vmatmul.msk.bf16.gmra.mxu0 %vm564_vm3, %v3158_v1  ;;  %12653 = vmatmul.msk.bf16.gmra.mxu2 %vm564_vm3, %v2424_v21  ;;  %v12610_v21 = vld [vmem:[%s15072_s19 + $0x3a8] sm:$0x3]  ;;  %v3159_v50 = vpack.c.b16 %v3133_v24, %v3132_v13 }
 0x266   : > { %v2070_v4 = vpop.f32.mrf.mxu1  ;;  %v2371_v15 = vrot.slane %v12610_v21, 6 }
 0x267   : > { %v2140_v33 = vadd.f32 %v2070_v4, %v15815_v61 }
 0x268   : > { %v16175_v0 = vpop.f32.mrf.mxu2  ;;  %12777 = vmatmul.msk.bf16.gmra.mxu3 %vm564_vm3, %v14703_v6 }
 0x269   : > { %v2582_v42 = vadd.f32 %v16067_v47, %v2140_v33  ;;  %v16183_v1 = vpop.f32.mrf.mxu3  ;;  %v14681_v47 = vld [vmem:[%s15072_s19 + $0x2ac] sm:$0xff]  ;;  %v2369_v33 = vsel %vm15170_vm6, %v12626_v36, %v2368_v52  ;;  %v12799_v36 = vld [vmem:[%s15072_s19 + $0x354] sm:$0x3] }
 0x26a   : > { %v1849_v43 = vpop.f32.mrf.mxu0  ;;  %v2408_v25 = vunpack.c.l.b16 %v2369_v33  ;;  %v12797_v52 = vld [vmem:[%s15072_s19 + $0x34c] sm:$0xc] }
 0x26b   : > { %v16178_v51 = vadd.f32 %v1849_v43, %v15804_v45  ;;  %v16181_v61 = vadd.f32 %v16095_v35, %v2582_v42  ;;  %v12798_v35 = vld [vmem:[%s15072_s19 + $0x350] sm:$0xf]  ;;  %v2372_v42 = vsel %vm15170_vm6, %v2370_v39, %v2371_v15  ;;  %v12833_v13 = vrot.slane %v12797_v52, 10  ;;  %v12801_v52 = vld [vmem:[%s15072_s19 + $0x36c] sm:$0xf] }
 0x26c   : > { %v2409_v58 = vunpack.c.l.b16 %v2372_v42  ;;  %v3049_v21 = vrot.slane %v12798_v35, 6  ;;  %v3052_v15 = vrot.slane %v12799_v36, 6 }
 0x26e   : > { %v2073_v4 = vpop.f32.mrf.mxu1  ;;  %v3051_v24 = vrot.slane %v3049_v21, 4  ;;  %v3050_v35 = vsel %vm15170_vm6, %v12833_v13, %v3049_v21 }
 0x26f   : > { %v2141_v45 = vadd.f32 %v2073_v4, %v15834_v17 }
 0x270   : > { %v16199_v17 = vpop.f32.mrf.mxu2  ;;  %v3053_v33 = vsel %vm15170_vm6, %v3051_v24, %v3052_v15 }
 0x271   : > { %12559 = vmatmul.msk.bf16.gmra.mxu1 %vm564_vm3, %v14681_v47  ;;  %v2583_v43 = vadd.f32 %v16087_v54, %v2141_v45  ;;  %v16209_v39 = vpop.f32.mrf.mxu3  ;;  %v2425_v47 = vpack.c.b16 %v2409_v58, %v2408_v25  ;;  %v3134_v25 = vunpack.c.l.b16 %v3050_v35  ;;  %v14704_v58 = vld [vmem:[%s15072_s19 + $0x3a8] sm:$0xff] }
 0x272   : > { %v1852_v19 = vpop.f32.mrf.mxu0  ;;  %v14711_v35 = vld [vmem:[%s15072_s19 + $0x2ac] sm:$0xff] }
 0x273   : > { %v16202_v4 = vadd.f32 %v1852_v19, %v15817_v29  ;;  %v16205_v6 = vadd.f32 %v16121_v41, %v2583_v43 }
 0x275   : > { %12860 = vmatmul.msk.bf16.gmra.mxu0 %vm564_vm3, %v3159_v50  ;;  %12654 = vmatmul.msk.bf16.gmra.mxu2 %vm564_vm3, %v2425_v47 }
 0x276   : > { %v2075_v54 = vpop.f32.mrf.mxu1 }
 0x277   : > { %v2142_v29 = vadd.f32 %v2075_v54, %v15849_v34  ;;  %v14682_v34 = vld [vmem:[%s15072_s19 + $0x2c8] sm:$0xff]  ;;  %v3056_v54 = vrot.slane %v12801_v52, 6 }
 0x278   : > { %v16221_v42 = vpop.f32.mrf.mxu2  ;;  %12778 = vmatmul.msk.bf16.gmra.mxu3 %vm564_vm3, %v14704_v58 }
 0x279   : > { %v16215_v41 = vadd.f32 %v16111_v44, %v2142_v29  ;;  %v16226_v50 = vpop.f32.mrf.mxu3  ;;  %v3135_v44 = vunpack.c.l.b16 %v3053_v33  ;;  %v12800_v29 = vld [vmem:[%s15072_s19 + $0x368] sm:$0xc] }
 0x27a   : > { %v1854_v45 = vpop.f32.mrf.mxu0  ;;  %v12834_v33 = vrot.slane %v12800_v29, 10 }
 0x27b   : > { %v16224_v43 = vadd.f32 %v1854_v45, %v15838_v20  ;;  %v3160_v36 = vpack.c.b16 %v3135_v44, %v3134_v25 }
 0x27c   : > { %v3057_v58 = vsel %vm15170_vm6, %v12834_v33, %v3056_v54 }
 0x27e   : > { %v2078_v19 = vpop.f32.mrf.mxu1 }
 0x27f   : > { %v2143_v21 = vadd.f32 %v2078_v19, %v15868_v30  ;;  %v12802_v30 = vld [vmem:[%s15072_s19 + $0x370] sm:$0x3] }
 0x280   : > { %v16235_v13 = vpop.f32.mrf.mxu2  ;;  %v3059_v25 = vrot.slane %v12802_v30, 6 }
 0x281   : > { %12560 = vmatmul.msk.bf16.gmra.mxu1 %vm564_vm3, %v14682_v34  ;;  %v2585_v20 = vadd.f32 %v16131_v3, %v2143_v21  ;;  %v16245_v45 = vpop.f32.mrf.mxu3  ;;  %v3058_v34 = vrot.slane %v3056_v54, 4  ;;  %v12804_v54 = vld [vmem:[%s15072_s19 + $0x388] sm:$0xf] }
 0x282   : > { %v1857_v47 = vpop.f32.mrf.mxu0 }
 0x283   : > { %v16238_v24 = vadd.f32 %v1857_v47, %v15851_v26  ;;  %v16241_v15 = vadd.f32 %v16165_v37, %v2585_v20  ;;  %v3060_v19 = vsel %vm15170_vm6, %v3058_v34, %v3059_v25 }
 0x285   : > { %12861 = vmatmul.msk.bf16.gmra.mxu0 %vm564_vm3, %v3160_v36  ;;  %13055 = vmatmul.msk.bf16.vlgmr.msra.gmra.mxu2 %vm564_vm3, %v14711_v35  ;;  %v3136_v36 = vunpack.c.l.b16 %v3057_v58  ;;  %v14712_v58 = vld [vmem:[%s15072_s19 + $0x2c8] sm:$0xff] }
 0x286   : > { %v2080_v3 = vpop.f32.mrf.mxu1 }
 0x287   : > { %v2144_v44 = vadd.f32 %v2080_v3, %v15883_v63  ;;  %v14683_v63 = vld [vmem:[%s15072_s19 + $0x2e4] sm:$0xff] }
 0x288   : > { %v16258_v21 = vpop.f32.mrf.mxu2 }
 0x289   : > { %v16252_v26 = vadd.f32 %v16155_v55, %v2144_v44  ;;  %v16263_v20 = vpop.f32.mrf.mxu3  ;;  %v3137_v55 = vunpack.c.l.b16 %v3060_v19  ;;  %v12803_v44 = vld [vmem:[%s15072_s19 + $0x384] sm:$0xc] }
 0x28a   : > { %v1859_v37 = vpop.f32.mrf.mxu0  ;;  %v12835_v19 = vrot.slane %v12803_v44, 10 }
 0x28b   : > { %v16261_v52 = vadd.f32 %v1859_v37, %v15872_v62  ;;  %v3161_v35 = vpack.c.b16 %v3137_v55, %v3136_v36  ;;  %v3063_v62 = vrot.slane %v12804_v54, 6  ;;  %v12805_v37 = vld [vmem:[%s15072_s19 + $0x38c] sm:$0x3] }
 0x28c   : > { %v3066_v36 = vrot.slane %v12805_v37, 6 }
 0x28e   : > { %v2083_v47 = vpop.f32.mrf.mxu1 }
 0x28f   : > { %v2145_v29 = vadd.f32 %v2083_v47, %v15902_v60  ;;  %v3064_v47 = vsel %vm15170_vm6, %v12835_v19, %v3063_v62  ;;  %v12873_v19 = vld [vmem:[%s15072_s19 + $0x2b0] sm:$0x1] }
 0x290   : > { %v16270_v33 = vpop.f32.mrf.mxu2 }
 0x291   : > { %12561 = vmatmul.msk.bf16.gmra.mxu1 %vm564_vm3, %v14683_v63  ;;  %v2587_v30 = vadd.f32 %v16175_v0, %v2145_v29  ;;  %v16280_v60 = vpop.f32.mrf.mxu3  ;;  %v3065_v63 = vrot.slane %v3063_v62, 4 }
 0x292   : > { %v1862_v3 = vpop.f32.mrf.mxu0 }
 0x293   : > { %v16273_v34 = vadd.f32 %v1862_v3, %v15885_v31  ;;  %v16276_v25 = vadd.f32 %v16209_v39, %v2587_v30  ;;  %v3067_v29 = vsel %vm15170_vm6, %v3065_v63, %v3066_v36  ;;  %v3138_v3 = vunpack.c.l.b16 %v3064_v47  ;;  %v12807_v63 = vld [vmem:[%s15072_s19 + $0x3a4] sm:$0xf] }
 0x294   : > { %v3139_v44 = vunpack.c.l.b16 %v3067_v29  ;;  %v3070_v28 = vrot.slane %v12807_v63, 6 }
 0x295   : > { %12862 = vmatmul.msk.bf16.gmra.mxu0 %vm564_vm3, %v3161_v35  ;;  %13056 = vmatmul.msk.bf16.gmra.mxu2 %vm564_vm3, %v14712_v58  ;;  %v14684_v35 = vld [vmem:[%s15072_s19 + $0x300] sm:$0xff]  ;;  %v12871_v58 = vld [vmem:[%s15072_s19 + $0x2a8] sm:$0xe] }
 0x296   : > { %v2085_v0 = vpop.f32.mrf.mxu1  ;;  %v3162_v36 = vpack.c.b16 %v3139_v44, %v3138_v3  ;;  %v14713_v3 = vld [vmem:[%s15072_s19 + $0x2e4] sm:$0xff] }
 0x297   : > { %v2146_v31 = vadd.f32 %v2085_v0, %v15919_v53  ;;  %v12872_v53 = vld [vmem:[%s15072_s19 + $0x2ac] sm:$0xf] }
 0x298   : > { %v16293_v54 = vpop.f32.mrf.mxu2  ;;  %v3449_v0 = vrot.slane %v12872_v53, 5  ;;  %v3452_v53 = vrot.slane %v12873_v19, 5 }
 0x299   : > { %v16287_v39 = vadd.f32 %v16199_v17, %v2146_v31  ;;  %v16300_v37 = vpop.f32.mrf.mxu3  ;;  %v12919_v31 = vrot.slane %v12871_v58, 9 }
 0x29a   : > { %v1864_v55 = vpop.f32.mrf.mxu0  ;;  %v3451_v29 = vrot.slane %v3449_v0, 4 }
 0x29b   : > { %v16296_v30 = vadd.f32 %v1864_v55, %v15906_v49  ;;  %v14729_v55 = vld [vmem:[%s20726_s3 + $0x10] sm:$0xff]  ;;  %v3450_v44 = vsel %vm15074_vm2, %v12919_v31, %v3449_v0 }
 0x29c   : > { %4248 = vmatpush.bf16.msra.mxu3 %v14729_v55  ;;  %v3564_v31 = vunpack.c.l.b16 %v3450_v44 }
 0x29e   : > { %v2088_v17 = vpop.f32.mrf.mxu1 }
 0x29f   : > { %v2147_v62 = vadd.f32 %v2088_v17, %v15944_v9 }
 0x2a0   : > { %v16311_v16 = vpop.f32.mrf.mxu2 }
 0x2a1   : > { %12562 = vmatmul.msk.bf16.gmra.mxu1 %vm564_vm3, %v14684_v35  ;;  %v2589_v49 = vadd.f32 %v16221_v42, %v2147_v62  ;;  %v12806_v35 = vld [vmem:[%s15072_s19 + $0x3a0] sm:$0xc]  ;;  %v12808_v42 = vld [vmem:[%s15072_s19 + $0x3a8] sm:$0x3]  ;;  %v3453_v62 = vsel %vm15074_vm2, %v3451_v29, %v3452_v53 }
 0x2a2   : > { %v3239_v47 = vpop.f32.mrf.mxu0  ;;  %v12836_v19 = vrot.slane %v12806_v35, 10  ;;  %v3073_v63 = vrot.slane %v12808_v42, 6  ;;  %v3565_v55 = vunpack.c.l.b16 %v3453_v62  ;;  %v12875_v42 = vld [vmem:[%s15072_s19 + $0x2c8] sm:$0xf]  ;;  %v12874_v62 = vld [vmem:[%s15072_s19 + $0x2c4] sm:$0xe] }
 0x2a3   : > { %v16314_v9 = vadd.f32 %v16245_v45, %v2589_v49  ;;  %v16317_v17 = vadd.f32 %v3239_v47, %v16029_v7  ;;  %v3072_v45 = vrot.slane %v3070_v28, 4  ;;  %v16328_v49 = vpop.f32.mrf.mxu3 }
 0x2a5   : > { %12863 = vmatmul.msk.bf16.gmra.mxu0 %vm564_vm3, %v3162_v36  ;;  %13057 = vmatmul.msk.bf16.gmra.mxu2 %vm564_vm3, %v14713_v3  ;;  %v14733_v36 = vld [vmem:[%s20725_s2 + $0x90] sm:$0xff]  ;;  %v3074_v29 = vsel %vm15170_vm6, %v3072_v45, %v3073_v63  ;;  %v12920_v63 = vrot.slane %v12874_v62, 9 }
 0x2a6   : > { %v2090_v58 = vpop.f32.mrf.mxu1  ;;  %4734 = vmatpush.bf16.msrb.mxu0 %v14733_v36  ;;  %v3141_v44 = vunpack.c.l.b16 %v3074_v29  ;;  %v12809_v29 = vld [vmem:[%s15072_s19 + $0x3bc] sm:$0xc] }
 0x2a7   : > { %v2148_v7 = vadd.f32 %v2090_v58, %v15961_v14  ;;  %v3071_v14 = vsel %vm15170_vm6, %v12836_v19, %v3070_v28  ;;  %v12876_v28 = vld [vmem:[%s15072_s19 + $0x2cc] sm:$0x1]  ;;  %v12810_v19 = vld [vmem:[%s15072_s19 + $0x3c0] sm:$0xf] }
 0x2a8   : > { %v16341_v53 = vpop.f32.mrf.mxu2  ;;  %v3140_v3 = vunpack.c.l.b16 %v3071_v14  ;;  %v3459_v14 = vrot.slane %v12876_v28, 5 }
 0x2a9   : > { %v16335_v0 = vadd.f32 %v16235_v13, %v2148_v7  ;;  %v3596_v13 = vpack.c.b16 %v3565_v55, %v3564_v31  ;;  %v3456_v7 = vrot.slane %v12875_v42, 5 }
 0x2aa   : > { %v3241_v47 = vpop.f32.mrf.mxu0 }
 0x2ab   : > { %v16344_v35 = vadd.f32 %v3241_v47, %v16049_v11  ;;  %v3163_v11 = vpack.c.b16 %v3141_v44, %v3140_v3  ;;  %v16353_v47 = vpop.f32.mrf.mxu3  ;;  %v3458_v55 = vrot.slane %v3456_v7, 4  ;;  %v14714_v3 = vld [vmem:[%s15072_s19 + $0x300] sm:$0xff]  ;;  %v3457_v44 = vsel %vm15074_vm2, %v12920_v63, %v3456_v7 }
 0x2ad   : > { %20819 = vst [vmem:[#allocation55_spill] sm:$0xff] %v16344_v35  ;;  %v3077_v35 = vrot.slane %v12810_v19, 6 }
 0x2ae   : > { %v2093_v58 = vpop.f32.mrf.mxu1 }
 0x2af   : > { %v2149_v36 = vadd.f32 %v2093_v58, %v15985_v12 }
 0x2b0   : > { %v16356_v42 = vpop.f32.mrf.mxu2 }
 0x2b1   : > { %12947 = vmatmul.msk.bf16.vlgmr.msra.gmra.mxu1 %vm564_vm3, %v3596_v13  ;;  %v2591_v45 = vadd.f32 %v16258_v21, %v2149_v36  ;;  %v12811_v13 = vld [vmem:[%s15072_s19 + $0x3c4] sm:$0x3]  ;;  %v14736_v21 = vld [vmem:[%s20725_s2 + $0xa8] sm:$0xff]  ;;  %v12837_v36 = vrot.slane %v12809_v29, 10 }
 0x2b2   : > { %v3244_v31 = vpop.f32.mrf.mxu0  ;;  %5244 = vmatpush.bf16.msrb.mxu2 %v14736_v21  ;;  %v3080_v28 = vrot.slane %v12811_v13, 6  ;;  %v12878_v13 = vld [vmem:[%s15072_s19 + $0x2e4] sm:$0xf] }
 0x2b3   : > { %v16359_v12 = vadd.f32 %v16280_v60, %v2591_v45  ;;  %v16362_v58 = vadd.f32 %v3244_v31, %v16073_v40  ;;  %v3460_v60 = vsel %vm15074_vm2, %v3458_v55, %v3459_v14  ;;  %v3079_v40 = vrot.slane %v3077_v35, 4  ;;  %v14732_v45 = vld [vmem:[%s20725_s2 + $0xd8] sm:$0xff] }
 0x2b4   : > { %v3567_v63 = vunpack.c.l.b16 %v3460_v60  ;;  %4834 = vmatpush.bf16.msrb.mxu1 %v14732_v45  ;;  %v3078_v55 = vsel %vm15170_vm6, %v12837_v36, %v3077_v35  ;;  %v12877_v60 = vld [vmem:[%s15072_s19 + $0x2e0] sm:$0xe]  ;;  %v12879_v36 = vld [vmem:[%s15072_s19 + $0x2e8] sm:$0x1] }
 0x2b5   : > { %20820 = vst [vmem:[#allocation56_spill] sm:$0xff] %v16362_v58  ;;  %12864 = vmatmul.msk.bf16.gmra.mxu0 %vm564_vm3, %v3163_v11  ;;  %13058 = vmatmul.msk.bf16.gmra.mxu2 %vm564_vm3, %v14714_v3  ;;  %v3566_v11 = vunpack.c.l.b16 %v3457_v44  ;;  %v3142_v3 = vunpack.c.l.b16 %v3078_v55  ;;  %v12921_v45 = vrot.slane %v12877_v60, 9  ;;  %v14715_v58 = vld [vmem:[%s15072_s19 + $0x31c] sm:$0xff] }
 0x2b6   : > { %v2095_v62 = vpop.f32.mrf.mxu1 }
 0x2b7   : > { %v2150_v19 = vadd.f32 %v2095_v62, %v16005_v22  ;;  %v3081_v22 = vsel %vm15170_vm6, %v3079_v40, %v3080_v28  ;;  %v3597_v21 = vpack.c.b16 %v3567_v63, %v3566_v11  ;;  %v12813_v40 = vld [vmem:[%s15072_s19 + $0x3dc] sm:$0xf]  ;;  %v3466_v63 = vrot.slane %v12879_v36, 5 }
 0x2b8   : > { %v16386_v14 = vpop.f32.mrf.mxu2  ;;  %v3143_v44 = vunpack.c.l.b16 %v3081_v22  ;;  %v3084_v55 = vrot.slane %v12813_v40, 6 }
 0x2b9   : > { %v16380_v7 = vadd.f32 %v16270_v33, %v2150_v19  ;;  %v2843_v33 = vpop.f32.mrf.mxu3  ;;  %v3463_v19 = vrot.slane %v12878_v13, 5 }
 0x2ba   : > { %v3246_v31 = vpop.f32.mrf.mxu0  ;;  %v3164_v28 = vpack.c.b16 %v3143_v44, %v3142_v3  ;;  %v3086_v60 = vrot.slane %v3084_v55, 4 }
 0x2bb   : > { %v16389_v29 = vadd.f32 %v3246_v31, %v16093_v59  ;;  %v3465_v11 = vrot.slane %v3463_v19, 4 }
 0x2bd   : > { %20821 = vst [vmem:[#allocation57_spill] sm:$0xff] %v16389_v29  ;;  %v12814_v29 = vld [vmem:[%s15072_s19 + $0x3e0] sm:$0x3]  ;;  %v3467_v44 = vsel %vm15074_vm2, %v3465_v11, %v3466_v63 }
 0x2be   : > { %v2098_v62 = vpop.f32.mrf.mxu1  ;;  %v3569_v40 = vunpack.c.l.b16 %v3467_v44 }
 0x2bf   : > { %v2151_v35 = vadd.f32 %v2098_v62, %v16026_v10  ;;  %v12812_v62 = vld [vmem:[%s15072_s19 + $0x3d8] sm:$0xc] }
 0x2c0   : > { %v16398_v22 = vpop.f32.mrf.mxu2 }
 0x2c1   : > { %12948 = vmatmul.msk.bf16.gmra.mxu1 %vm564_vm3, %v3597_v21  ;;  %v2593_v59 = vadd.f32 %v16293_v54, %v2151_v35  ;;  %v3464_v54 = vsel %vm15074_vm2, %v12921_v45, %v3463_v19  ;;  %v16412_v21 = vpop.f32.mrf.mxu3  ;;  %v3087_v35 = vrot.slane %v12814_v29, 6 }
 0x2c2   : > { %v3249_v31 = vpop.f32.mrf.mxu0  ;;  %v3568_v19 = vunpack.c.l.b16 %v3464_v54 }
 0x2c3   : > { %v16401_v13 = vadd.f32 %v16328_v49, %v2593_v59  ;;  %v16404_v10 = vadd.f32 %v3249_v31, %v16117_v18  ;;  %v12838_v49 = vrot.slane %v12812_v62, 10  ;;  %v3088_v45 = vsel %vm15170_vm6, %v3086_v60, %v3087_v35  ;;  %v12880_v62 = vld [vmem:[%s15072_s19 + $0x2fc] sm:$0xe] }
 0x2c4   : > { %v3598_v31 = vpack.c.b16 %v3569_v40, %v3568_v19  ;;  %v3145_v11 = vunpack.c.l.b16 %v3088_v45  ;;  %v12922_v35 = vrot.slane %v12880_v62, 9 }
 0x2c5   : > { %12865 = vmatmul.msk.bf16.gmra.mxu0 %vm564_vm3, %v3164_v28  ;;  %13059 = vmatmul.msk.bf16.gmra.mxu2 %vm564_vm3, %v14715_v58  ;;  %v3085_v28 = vsel %vm15170_vm6, %v12838_v49, %v3084_v55  ;;  %v12881_v58 = vld [vmem:[%s15072_s19 + $0x300] sm:$0xf]  ;;  %v12882_v55 = vld [vmem:[%s15072_s19 + $0x304] sm:$0x1]  ;;  %v12816_v49 = vld [vmem:[%s15072_s19 + $0x3f8] sm:$0xf] }
 0x2c6   : > { %v2100_v3 = vpop.f32.mrf.mxu1  ;;  %v3470_v54 = vrot.slane %v12881_v58, 5  ;;  %v3473_v40 = vrot.slane %v12882_v55, 5  ;;  %v12815_v58 = vld [vmem:[%s15072_s19 + $0x3f4] sm:$0xc] }
 0x2c7   : > { %v2152_v18 = vadd.f32 %v2100_v3, %v16046_v56 }
 0x2c8   : > { %v16425_v29 = vpop.f32.mrf.mxu2  ;;  %v3472_v19 = vrot.slane %v3470_v54, 4 }
 0x2c9   : > { %v16419_v36 = vadd.f32 %v16311_v16, %v2152_v18  ;;  %v3144_v16 = vunpack.c.l.b16 %v3085_v28  ;;  %v2848_v44 = vpop.f32.mrf.mxu3 }
 0x2ca   : > { %v3251_v59 = vpop.f32.mrf.mxu0 }
 0x2cb   : > { %v16428_v56 = vadd.f32 %v3251_v59, %v16137_v32  ;;  %v3165_v60 = vpack.c.b16 %v3145_v11, %v3144_v16  ;;  %v3091_v59 = vrot.slane %v12816_v49, 6  ;;  %v3474_v16 = vsel %vm15074_vm2, %v3472_v19, %v3473_v40 }
 0x2cc   : > { %v12839_v11 = vrot.slane %v12815_v58, 10  ;;  %v3571_v49 = vunpack.c.l.b16 %v3474_v16  ;;  %v12819_v16 = vld [vmem:[%s15072_s19 + $0x414] sm:$0xf] }
 0x2cd   : > { %20822 = vst [vmem:[#allocation58_spill] sm:$0xff] %v16428_v56  ;;  %v14716_v56 = vld [vmem:[%s15072_s19 + $0x338] sm:$0xff]  ;;  %v3093_v62 = vrot.slane %v3091_v59, 4 }
 0x2ce   : > { %v2103_v63 = vpop.f32.mrf.mxu1 }
 0x2cf   : > { %v2153_v3 = vadd.f32 %v2103_v63, %v16070_v8  ;;  %v12817_v63 = vld [vmem:[%s15072_s19 + $0x3fc] sm:$0x3] }
 0x2d0   : > { %v16437_v28 = vpop.f32.mrf.mxu2 }
 0x2d1   : > { %12949 = vmatmul.msk.bf16.gmra.mxu1 %vm564_vm3, %v3598_v31  ;;  %v2595_v32 = vadd.f32 %v16341_v53, %v2153_v3  ;;  %v3471_v53 = vsel %vm15074_vm2, %v12922_v35, %v3470_v54  ;;  %v16457_v54 = vpop.f32.mrf.mxu3 }
 0x2d2   : > { %v3254_v18 = vpop.f32.mrf.mxu0  ;;  %v3570_v55 = vunpack.c.l.b16 %v3471_v53 }
 0x2d3   : > { %v16439_v45 = vadd.f32 %v2843_v33, %v2595_v32  ;;  %v16442_v8 = vadd.f32 %v3254_v18, %v16161_v57  ;;  %v3094_v33 = vrot.slane %v12817_v63, 6  ;;  %v12883_v63 = vld [vmem:[%s15072_s19 + $0x318] sm:$0xe] }
 0x2d4   : > { %v3599_v18 = vpack.c.b16 %v3571_v49, %v3570_v55  ;;  %v3098_v49 = vrot.slane %v12819_v16, 6 }
 0x2d5   : > { %12866 = vmatmul.msk.bf16.gmra.mxu0 %vm564_vm3, %v3165_v60  ;;  %13060 = vmatmul.msk.bf16.gmra.mxu2 %vm564_vm3, %v14716_v56  ;;  %v3092_v60 = vsel %vm15170_vm6, %v12839_v11, %v3091_v59  ;;  %v3095_v35 = vsel %vm15170_vm6, %v3093_v62, %v3094_v33  ;;  %v12885_v59 = vld [vmem:[%s15072_s19 + $0x320] sm:$0x1]  ;;  %v12923_v62 = vrot.slane %v12883_v63, 9 }
 0x2d6   : > { %v2105_v31 = vpop.f32.mrf.mxu1  ;;  %v3146_v19 = vunpack.c.l.b16 %v3092_v60  ;;  %v3147_v40 = vunpack.c.l.b16 %v3095_v35  ;;  %v3480_v55 = vrot.slane %v12885_v59, 5 }
 0x2d7   : > { %v2154_v3 = vadd.f32 %v2105_v31, %v16090_v48 }
 0x2d8   : > { %v16463_v48 = vpop.f32.mrf.mxu2 }
 0x2d9   : > { %v16455_v57 = vadd.f32 %v16356_v42, %v2154_v3  ;;  %v12884_v42 = vld [vmem:[%s15072_s19 + $0x31c] sm:$0xf]  ;;  %v2853_v35 = vpop.f32.mrf.mxu3 }
 0x2da   : > { %v3256_v32 = vpop.f32.mrf.mxu0  ;;  %v3477_v53 = vrot.slane %v12884_v42, 5  ;;  %v12818_v42 = vld [vmem:[%s15072_s19 + $0x410] sm:$0xc] }
 0x2db   : > { %v16466_v56 = vadd.f32 %v3256_v32, %v16181_v61  ;;  %v3166_v61 = vpack.c.b16 %v3147_v40, %v3146_v19  ;;  %v12840_v40 = vrot.slane %v12818_v42, 10  ;;  %v12886_v42 = vld [vmem:[%s15072_s19 + $0x334] sm:$0xe] }
 0x2dc   : > { %v3479_v3 = vrot.slane %v3477_v53, 4 }
 0x2dd   : > { %20823 = vst [vmem:[#allocation59_spill] sm:$0xff] %v16466_v56  ;;  %v14717_v56 = vld [vmem:[%s15072_s19 + $0x354] sm:$0xff] }
 0x2de   : > { %v2108_v58 = vpop.f32.mrf.mxu1  ;;  %v3481_v19 = vsel %vm15074_vm2, %v3479_v3, %v3480_v55 }
 0x2df   : > { %v2155_v31 = vadd.f32 %v2108_v58, %v16114_v27  ;;  %v12820_v58 = vld [vmem:[%s15072_s19 + $0x418] sm:$0x3]  ;;  %v3573_v16 = vunpack.c.l.b16 %v3481_v19 }
 0x2e0   : > { %v16475_v32 = vpop.f32.mrf.mxu2  ;;  %v3101_v63 = vrot.slane %v12820_v58, 6 }
 0x2e1   : > { %12950 = vmatmul.msk.bf16.gmra.mxu1 %vm564_vm3, %v3599_v18  ;;  %v2597_v11 = vadd.f32 %v16386_v14, %v2155_v31  ;;  %v3478_v14 = vsel %vm15074_vm2, %v12923_v62, %v3477_v53  ;;  %v2882_v31 = vadd.f32 %v16139_v23, %v16215_v41  ;;  %v16506_v3 = vpop.f32.mrf.mxu3 }
 0x2e2   : > { %v3259_v33 = vpop.f32.mrf.mxu0  ;;  %v3572_v53 = vunpack.c.l.b16 %v3478_v14  ;;  %v12888_v14 = vld [vmem:[%s15072_s19 + $0x33c] sm:$0x1] }
 0x2e3   : > { %v16477_v60 = vadd.f32 %v2848_v44, %v2597_v11  ;;  %v16480_v27 = vadd.f32 %v3259_v33, %v16205_v6  ;;  %v3100_v44 = vrot.slane %v3098_v49, 4  ;;  %v12887_v33 = vld [vmem:[%s15072_s19 + $0x338] sm:$0xf] }
 0x2e4   : > { %v3600_v23 = vpack.c.b16 %v3573_v16, %v3572_v53  ;;  %v3484_v58 = vrot.slane %v12887_v33, 5  ;;  %v14718_v33 = vld [vmem:[%s15072_s19 + $0x370] sm:$0xff] }
 0x2e5   : > { %12867 = vmatmul.msk.bf16.gmra.mxu0 %vm564_vm3, %v3166_v61  ;;  %13061 = vmatmul.msk.bf16.gmra.mxu2 %vm564_vm3, %v14717_v56  ;;  %v3099_v61 = vsel %vm15170_vm6, %v12840_v40, %v3098_v49 }
 0x2e6   : > { %v2110_v18 = vpop.f32.mrf.mxu1  ;;  %v3148_v41 = vunpack.c.l.b16 %v3099_v61 }
 0x2e7   : > { %v2156_v6 = vadd.f32 %v2110_v18, %v16134_v46  ;;  %v3102_v46 = vsel %vm15170_vm6, %v3100_v44, %v3101_v63  ;;  %v12822_v18 = vld [vmem:[%s15072_s19 + $0x430] sm:$0xf]  ;;  %v12924_v44 = vrot.slane %v12886_v42, 9 }
 0x2e8   : > { %v16501_v62 = vpop.f32.mrf.mxu2  ;;  %v3105_v53 = vrot.slane %v12822_v18, 6 }
 0x2e9   : > { %v16495_v59 = vadd.f32 %v16398_v22, %v2156_v6  ;;  %v3149_v22 = vunpack.c.l.b16 %v3102_v46  ;;  %v3486_v6 = vrot.slane %v3484_v58, 4  ;;  %v12823_v46 = vld [vmem:[%s15072_s19 + $0x434] sm:$0x3] }
 0x2ea   : > { %v3261_v11 = vpop.f32.mrf.mxu0 }
 0x2eb   : > { %v16503_v56 = vadd.f32 %v3261_v11, %v2882_v31  ;;  %v3167_v40 = vpack.c.b16 %v3149_v22, %v3148_v41  ;;  %v3487_v31 = vrot.slane %v12888_v14, 5 }
 0x2ed   : > { %v3488_v41 = vsel %vm15074_vm2, %v3486_v6, %v3487_v31  ;;  %v12890_v6 = vld [vmem:[%s15072_s19 + $0x354] sm:$0xf] }
 0x2ee   : > { %v2113_v55 = vpop.f32.mrf.mxu1  ;;  %v3575_v18 = vunpack.c.l.b16 %v3488_v41 }
 0x2ef   : > { %v2157_v49 = vadd.f32 %v2113_v55, %v16158_v5  ;;  %v12821_v5 = vld [vmem:[%s15072_s19 + $0x42c] sm:$0xc]  ;;  %v3107_v55 = vrot.slane %v3105_v53, 4 }
 0x2f0   : > { %v16514_v16 = vpop.f32.mrf.mxu2  ;;  %v12841_v22 = vrot.slane %v12821_v5, 10  ;;  %v12889_v5 = vld [vmem:[%s15072_s19 + $0x350] sm:$0xe] }
 0x2f1   : > { %12951 = vmatmul.msk.bf16.gmra.mxu1 %vm564_vm3, %v3600_v23  ;;  %v2599_v19 = vadd.f32 %v16425_v29, %v2157_v49  ;;  %v3485_v29 = vsel %vm15074_vm2, %v12924_v44, %v3484_v58  ;;  %v2884_v49 = vadd.f32 %v16183_v1, %v16252_v26 }
 0x2f2   : > { %v3264_v63 = vpop.f32.mrf.mxu0  ;;  %v3574_v58 = vunpack.c.l.b16 %v3485_v29  ;;  %v12891_v29 = vld [vmem:[%s15072_s19 + $0x358] sm:$0x1] }
 0x2f3   : > { %v16516_v11 = vadd.f32 %v2853_v35, %v2599_v19  ;;  %v16519_v61 = vadd.f32 %v3264_v63, %v16241_v15  ;;  %v3108_v35 = vrot.slane %v12823_v46, 6  ;;  %v2858_v15 = vpop.f32.mrf.mxu3  ;;  %v3491_v46 = vrot.slane %v12890_v6, 5  ;;  %v14719_v6 = vld [vmem:[%s15072_s19 + $0x38c] sm:$0xff] }
 0x2f4   : > { %v3601_v1 = vpack.c.b16 %v3575_v18, %v3574_v58 }
 0x2f5   : > { %12868 = vmatmul.msk.bf16.gmra.mxu0 %vm564_vm3, %v3167_v40  ;;  %13062 = vmatmul.msk.bf16.gmra.mxu2 %vm564_vm3, %v14718_v33  ;;  %v3106_v40 = vsel %vm15170_vm6, %v12841_v22, %v3105_v53  ;;  %v12825_v53 = vld [vmem:[%s15072_s19 + $0x44c] sm:$0xf] }
 0x2f6   : > { %v2115_v23 = vpop.f32.mrf.mxu1  ;;  %v3150_v26 = vunpack.c.l.b16 %v3106_v40  ;;  %v3112_v58 = vrot.slane %v12825_v53, 6  ;;  %v12824_v40 = vld [vmem:[%s15072_s19 + $0x448] sm:$0xc] }
 0x2f7   : > { %v2158_v42 = vadd.f32 %v2115_v23, %v16178_v51  ;;  %v3109_v51 = vsel %vm15170_vm6, %v3107_v55, %v3108_v35  ;;  %v12925_v55 = vrot.slane %v12889_v5, 9 }
 0x2f8   : > { %v16540_v44 = vpop.f32.mrf.mxu2 }
 0x2f9   : > { %v16534_v14 = vadd.f32 %v16437_v28, %v2158_v42  ;;  %v3151_v28 = vunpack.c.l.b16 %v3109_v51  ;;  %v3493_v42 = vrot.slane %v3491_v46, 4  ;;  %v12826_v51 = vld [vmem:[%s15072_s19 + $0x450] sm:$0x3] }
 0x2fa   : > { %v3266_v19 = vpop.f32.mrf.mxu0 }
 0x2fb   : > { %v16542_v63 = vadd.f32 %v3266_v19, %v2884_v49  ;;  %v3168_v41 = vpack.c.b16 %v3151_v28, %v3150_v26  ;;  %v16551_v22 = vpop.f32.mrf.mxu3  ;;  %v3494_v49 = vrot.slane %v12891_v29, 5  ;;  %v12842_v28 = vrot.slane %v12824_v40, 10 }
 0x2fd   : > { %v3495_v26 = vsel %vm15074_vm2, %v3493_v42, %v3494_v49 }
 0x2fe   : > { %v2118_v31 = vpop.f32.mrf.mxu1  ;;  %v3577_v29 = vunpack.c.l.b16 %v3495_v26 }
 0x2ff   : > { %v2159_v33 = vadd.f32 %v2118_v31, %v16202_v4  ;;  %v3114_v31 = vrot.slane %v3112_v58, 4 }
 0x300   : > { %v16553_v18 = vpop.f32.mrf.mxu2 }
 0x301   : > { %12952 = vmatmul.msk.bf16.gmra.mxu1 %vm564_vm3, %v3601_v1  ;;  %v2601_v23 = vadd.f32 %v16463_v48, %v2159_v33  ;;  %v3492_v48 = vsel %vm15074_vm2, %v12925_v55, %v3491_v46 }
 0x302   : > { %v3269_v35 = vpop.f32.mrf.mxu0  ;;  %v3576_v46 = vunpack.c.l.b16 %v3492_v48  ;;  %v12894_v48 = vld [vmem:[%s15072_s19 + $0x374] sm:$0x1] }
 0x303   : > { %v16555_v19 = vadd.f32 %v2858_v15, %v2601_v23  ;;  %v16558_v4 = vadd.f32 %v3269_v35, %v16276_v25  ;;  %v3115_v15 = vrot.slane %v12826_v51, 6  ;;  %v2886_v25 = vadd.f32 %v16226_v50, %v16287_v39  ;;  %v12893_v35 = vld [vmem:[%s15072_s19 + $0x370] sm:$0xf]  ;;  %v2863_v50 = vpop.f32.mrf.mxu3 }
 0x304   : > { %v3113_v23 = vsel %vm15170_vm6, %v12842_v28, %v3112_v58  ;;  %v3602_v39 = vpack.c.b16 %v3577_v29, %v3576_v46  ;;  %v3498_v40 = vrot.slane %v12893_v35, 5 }
 0x305   : > { %12869 = vmatmul.msk.bf16.gmra.mxu0 %vm564_vm3, %v3168_v41  ;;  %13063 = vmatmul.msk.bf16.gmra.mxu2 %vm564_vm3, %v14719_v6  ;;  %v3116_v41 = vsel %vm15170_vm6, %v3114_v31, %v3115_v15  ;;  %v12892_v6 = vld [vmem:[%s15072_s19 + $0x36c] sm:$0xe]  ;;  %v3501_v15 = vrot.slane %v12894_v48, 5 }
 0x306   : > { %v2120_v1 = vpop.f32.mrf.mxu1  ;;  %v3153_v42 = vunpack.c.l.b16 %v3116_v41  ;;  %v12926_v28 = vrot.slane %v12892_v6, 9  ;;  %v3500_v31 = vrot.slane %v3498_v40, 4  ;;  %v13106_v6 = vld [vmem:[%s15072_s19 + $0xb0] sm:$0x7]  ;;  %v12896_v48 = vld [vmem:[%s15072_s19 + $0x38c] sm:$0xf] }
 0x307   : > { %v2160_v5 = vadd.f32 %v2120_v1, %v16224_v43 }
 0x308   : > { %v16579_v43 = vpop.f32.mrf.mxu2 }
 0x309   : > { %v16573_v33 = vadd.f32 %v16475_v32, %v2160_v5  ;;  %v3152_v32 = vunpack.c.l.b16 %v3113_v23  ;;  %v3502_v23 = vsel %vm15074_vm2, %v3500_v31, %v3501_v15  ;;  %v3505_v31 = vrot.slane %v12896_v48, 5 }
 0x30a   : > { %v3271_v53 = vpop.f32.mrf.mxu0 }
 0x30b   : > { %v16581_v55 = vadd.f32 %v3271_v53, %v2886_v25  ;;  %v3169_v1 = vpack.c.b16 %v3153_v42, %v3152_v32  ;;  %v3499_v53 = vsel %vm15074_vm2, %v12926_v28, %v3498_v40  ;;  %v3579_v42 = vunpack.c.l.b16 %v3502_v23  ;;  %v12897_v23 = vld [vmem:[%s15072_s19 + $0x390] sm:$0x1] }
 0x30c   : > { %v3578_v32 = vunpack.c.l.b16 %v3499_v53  ;;  %v12895_v53 = vld [vmem:[%s15072_s19 + $0x388] sm:$0xe] }
 0x30e   : > { %v2123_v49 = vpop.f32.mrf.mxu1 }
 0x30f   : > { %v2161_v51 = vadd.f32 %v2123_v49, %v16238_v24  ;;  %v14720_v24 = vld [vmem:[%s15072_s19 + $0x3a8] sm:$0xff] }
 0x310   : > { %v16589_v5 = vpop.f32.mrf.mxu2  ;;  %v13104_v49 = vld [vmem:[%s15072_s19 + $0xa8] sm:$0x8] }
 0x311   : > { %12953 = vmatmul.msk.bf16.gmra.mxu1 %vm564_vm3, %v3602_v39  ;;  %v2603_v58 = vadd.f32 %v16501_v62, %v2161_v51  ;;  %v16598_v62 = vpop.f32.mrf.mxu3 }
 0x312   : > { %v3274_v26 = vpop.f32.mrf.mxu0 }
 0x313   : > { %v16591_v25 = vadd.f32 %v2863_v50, %v2603_v58  ;;  %v16594_v46 = vadd.f32 %v3274_v26, %v16314_v9  ;;  %v13105_v9 = vld [vmem:[%s15072_s19 + $0xac] sm:$0xf]  ;;  %v2888_v50 = vadd.f32 %v16263_v20, %v16335_v0  ;;  %v13152_v58 = vrot.slane %v13104_v49, 11 }
 0x314   : > { %v4504_v35 = vrot.slane %v13105_v9, 7  ;;  %v3507_v49 = vrot.slane %v3505_v31, 4 }
 0x315   : > { %12870 = vmatmul.msk.bf16.gmra.mxu0 %vm564_vm3, %v3169_v1  ;;  %13064 = vmatmul.msk.bf16.gmra.mxu2 %vm564_vm3, %v14720_v24  ;;  %v3603_v1 = vpack.c.b16 %v3579_v42, %v3578_v32 }
 0x316   : > { %v2125_v29 = vpop.f32.mrf.mxu1  ;;  %v4506_v0 = vrot.slane %v4504_v35, 4  ;;  %v4505_v26 = vsel %vm16619_vm9, %v13152_v58, %v4504_v35  ;;  %v12927_v35 = vrot.slane %v12895_v53, 9  ;;  %v14721_v58 = vld [vmem:[%s15072_s19 + $0x3c4] sm:$0xff] }
 0x317   : > { %v2162_v41 = vadd.f32 %v2125_v29, %v16261_v52  ;;  %v4619_v24 = vunpack.c.l.b16 %v4505_v26  ;;  %v13108_v26 = vld [vmem:[%s15072_s19 + $0xc8] sm:$0xf] }
 0x318   : > { %v16613_v51 = vpop.f32.mrf.mxu2 }
 0x319   : > { %v16610_v39 = vadd.f32 %v16514_v16, %v2162_v41  ;;  %v4507_v16 = vrot.slane %v13106_v6, 7  ;;  %v2868_v9 = vpop.f32.mrf.mxu3 }
 0x31a   : > { %v3276_v40 = vpop.f32.mrf.mxu0 }
 0x31b   : > { %v16616_v52 = vadd.f32 %v3276_v40, %v2888_v50  ;;  %v4508_v15 = vsel %vm16619_vm9, %v4506_v0, %v4507_v16  ;;  %v3508_v40 = vrot.slane %v12897_v23, 5  ;;  %v3506_v16 = vsel %vm15074_vm2, %v12927_v35, %v3505_v31  ;;  %v13107_v31 = vld [vmem:[%s15072_s19 + $0xc4] sm:$0x8] }
 0x31c   : > { %v4620_v41 = vunpack.c.l.b16 %v4508_v15  ;;  %v2890_v15 = vadd.f32 %v16300_v37, %v16380_v7 }
 0x31e   : > { %v2128_v28 = vpop.f32.mrf.mxu1  ;;  %v4651_v32 = vpack.c.b16 %v4620_v41, %v4619_v24  ;;  %v12899_v41 = vld [vmem:[%s15072_s19 + $0x3a8] sm:$0xf] }
 0x31f   : > { %v2163_v29 = vadd.f32 %v2128_v28, %v16273_v34  ;;  %v4511_v28 = vrot.slane %v13108_v26, 7 }
 0x320   : > { %v16632_v6 = vpop.f32.mrf.mxu2 }
 0x321   : > { %12954 = vmatmul.msk.bf16.gmra.mxu1 %vm564_vm3, %v3603_v1  ;;  %v2605_v50 = vadd.f32 %v16540_v44, %v2163_v29  ;;  %v14738_v44 = vld [vmem:[%s20725_s2 + $0xb8] sm:$0xff]  ;;  %v3509_v1 = vsel %vm15074_vm2, %v3507_v49, %v3508_v40  ;;  %v3580_v29 = vunpack.c.l.b16 %v3506_v16  ;;  %v3512_v49 = vrot.slane %v12899_v41, 5  ;;  %v14740_v40 = vld [vmem:[%s20725_s2 + $0xc8] sm:$0xff]  ;;  %v14722_v41 = vld [vmem:[%s15072_s19 + $0x3e0] sm:$0xff] }
 0x322   : > { %v3279_v42 = vpop.f32.mrf.mxu0  ;;  %5686 = vmatpush.bf16.msrb.mxu3 %v14738_v44  ;;  %v3581_v53 = vunpack.c.l.b16 %v3509_v1  ;;  %v12900_v16 = vld [vmem:[%s15072_s19 + $0x3ac] sm:$0x1]  ;;  %6128 = vmatpush.bf16.msra.mxu0 %v14740_v40 }
 0x323   : > { %v16634_v48 = vadd.f32 %v2868_v9, %v2605_v50  ;;  %v16637_v34 = vadd.f32 %v3279_v42, %v16359_v12  ;;  %v13153_v50 = vrot.slane %v13107_v31, 11  ;;  %v4513_v42 = vrot.slane %v4511_v28, 4 }
 0x324   : > { %v3604_v7 = vpack.c.b16 %v3581_v53, %v3580_v29 }
 0x325   : > { %13180 = vmatmul.msk.bf16.vlgmr.msrb.gmra.mxu0 %vm564_vm3, %v4651_v32  ;;  %13065 = vmatmul.msk.bf16.gmra.mxu2 %vm564_vm3, %v14721_v58  ;;  %v4512_v37 = vsel %vm16619_vm9, %v13153_v50, %v4511_v28  ;;  %v3514_v28 = vrot.slane %v3512_v49, 4  ;;  %v16684_v50 = vld [vmem:[%s20727_s4 + $0x1] ss:$0 sm:$0xff] }
 0x326   : > { %v2130_v0 = vpop.f32.mrf.mxu1  ;;  %v4621_v44 = vunpack.c.l.b16 %v4512_v37 }
 0x327   : > { %v2164_v12 = vadd.f32 %v2130_v0, %v16296_v30  ;;  %v13109_v30 = vld [vmem:[%s15072_s19 + $0xcc] sm:$0x7] }
 0x328   : > { %v16658_v9 = vpop.f32.mrf.mxu2  ;;  %v4514_v35 = vrot.slane %v13109_v30, 7 }
 0x329   : > { %v16654_v24 = vadd.f32 %v16553_v18, %v2164_v12  ;;  %v12898_v18 = vld [vmem:[%s15072_s19 + $0x3a4] sm:$0xe] }
 0x32a   : > { %v3281_v23 = vpop.f32.mrf.mxu0  ;;  %v4515_v58 = vsel %vm16619_vm9, %v4513_v42, %v4514_v35  ;;  %v12928_v12 = vrot.slane %v12898_v18, 9  ;;  %v20826_v35 = vld [vmem:[#allocation55_spill] sm:$0xff] }
 0x32b   : > { %v16661_v32 = vadd.f32 %v3281_v23, %v2890_v15  ;;  %v4622_v1 = vunpack.c.l.b16 %v4515_v58  ;;  %v3515_v15 = vrot.slane %v12900_v16, 5  ;;  %v2892_v58 = vadd.f32 %v16353_v47, %v16419_v36  ;;  %v13110_v16 = vld [vmem:[%s15072_s19 + $0xe0] sm:$0x8] }
 0x32d   : > { %v4652_v29 = vpack.c.b16 %v4622_v1, %v4621_v44  ;;  %v3516_v42 = vsel %vm15074_vm2, %v3514_v28, %v3515_v15  ;;  %v13112_v28 = vld [vmem:[%s15072_s19 + $0xe8] sm:$0x7]  ;;  %v13154_v15 = vrot.slane %v13110_v16, 11 }
 0x32e   : > { %v3681_v0 = vpop.f32.mrf.mxu1  ;;  %v3583_v40 = vunpack.c.l.b16 %v3516_v42  ;;  %v12901_v42 = vld [vmem:[%s15072_s19 + $0x3c0] sm:$0xe] }
 0x32f   : > { %v3761_v26 = vadd.f32 %v3681_v0, %v16317_v17  ;;  %v3513_v17 = vsel %vm15074_vm2, %v12928_v12, %v3512_v49  ;;  %v12902_v12 = vld [vmem:[%s15072_s19 + $0x3c4] sm:$0xf] }
 0x330   : > { %v16674_v31 = vpop.f32.mrf.mxu2  ;;  %v3582_v18 = vunpack.c.l.b16 %v3513_v17  ;;  %v4521_v17 = vrot.slane %v13112_v28, 7 }
 0x331   : > { %12955 = vmatmul.msk.bf16.gmra.mxu1 %vm564_vm3, %v3604_v7  ;;  %v4027_v30 = vadd.f32 %v16579_v43, %v3761_v26  ;;  %v13111_v7 = vld [vmem:[%s15072_s19 + $0xe4] sm:$0xf] }
 0x332   : > { %v3284_v53 = vpop.f32.mrf.mxu0  ;;  %v4518_v49 = vrot.slane %v13111_v7, 7  ;;  %v3605_v47 = vpack.c.b16 %v3583_v40, %v3582_v18  ;;  %v12903_v7 = vld [vmem:[%s15072_s19 + $0x3c8] sm:$0x1]  ;;  %v12929_v40 = vrot.slane %v12901_v42, 9 }
 0x333   : > { %v16677_v23 = vadd.f32 %v3284_v53, %v16401_v13  ;;  %v14735_v13 = vld [vmem:[%s20725_s2 + $0xa0] sm:$0xff]  ;;  %v4096_v44 = vadd.f32 %v16684_v50, %v4027_v30 }
 0x334   : > { %5245 = vmatpush.bf16.msrb.mxu2 %v14735_v13  ;;  %v4519_v36 = vsel %vm16619_vm9, %v13154_v15, %v4518_v49  ;;  %v3519_v13 = vrot.slane %v12902_v12, 5 }
 0x335   : > { %13181 = vmatmul.msk.bf16.gmra.mxu0 %vm564_vm3, %v4652_v29  ;;  %13066 = vmatmul.msk.bf16.gmra.mxu2 %vm564_vm3, %v14722_v41  ;;  %v4520_v41 = vrot.slane %v4518_v49, 4  ;;  %v4128_v30 = vmax.f32 %v4096_v44, 0.0  ;;  %v20827_v49 = vld [vmem:[#allocation56_spill] sm:$0xff] }
 0x336   : > { %v3683_v43 = vpop.f32.mrf.mxu1  ;;  %v3521_v16 = vrot.slane %v3519_v13, 4 }
 0x337   : > { %v3762_v37 = vadd.f32 %v3683_v43, %v20826_v35  ;;  %v14731_v43 = vld [vmem:[%s20725_s2 + $0xd0] sm:$0xff]  ;;  %v4522_v35 = vsel %vm16619_vm9, %v4520_v41, %v4521_v17  ;;  %v14723_v41 = vld [vmem:[%s15072_s19 + $0x3fc] sm:$0xff] }
 0x338   : > { %v16703_v26 = vpop.f32.mrf.mxu2  ;;  %4835 = vmatpush.bf16.msrb.mxu1 %v14731_v43  ;;  %v13114_v43 = vld [vmem:[%s15072_s19 + $0x100] sm:$0xf] }
 0x339   : > { %v4028_v0 = vadd.f32 %v16589_v5, %v3762_v37 }
 0x33a   : > { %v3286_v1 = vpop.f32.mrf.mxu0 }
 0x33b   : > { %v4097_v29 = vadd.f32 %v16684_v50, %v4028_v0  ;;  %v16707_v53 = vadd.f32 %v3286_v1, %v2892_v58  ;;  %v4623_v58 = vunpack.c.l.b16 %v4519_v36  ;;  %v4624_v0 = vunpack.c.l.b16 %v4522_v35 }
 0x33c   : > { %v3522_v1 = vrot.slane %v12903_v7, 5  ;;  %v3520_v36 = vsel %vm15074_vm2, %v12929_v40, %v3519_v13 }
 0x33d   : > { %v4129_v5 = vmax.f32 %v4097_v29, 0.0  ;;  %v4653_v12 = vpack.c.b16 %v4624_v0, %v4623_v58  ;;  %v13113_v58 = vld [vmem:[%s15072_s19 + $0xfc] sm:$0x8] }
 0x33e   : > { %v3686_v37 = vpop.f32.mrf.mxu1 }
 0x33f   : > { %v4160_v18 = vpack.c.bf16 %v4129_v5, %v4128_v30  ;;  %v3763_v44 = vadd.f32 %v3686_v37, %v20827_v49  ;;  %v20828_v5 = vld [vmem:[#allocation57_spill] sm:$0xff]  ;;  %v4525_v37 = vrot.slane %v13114_v43, 7  ;;  %v13115_v49 = vld [vmem:[%s15072_s19 + $0x104] sm:$0x7] }
 0x340   : > { %v16721_v15 = vpop.f32.mrf.mxu2 }
 0x341   : > { %12956 = vmatmul.msk.bf16.gmra.mxu1 %vm564_vm3, %v3605_v47  ;;  %13084 = vmatmul.msk.bf16.vlgmr.msra.gmra.mxu3 %vm564_vm3, %v4160_v18  ;;  %v4029_v17 = vadd.f32 %v16613_v51, %v3763_v44  ;;  %v3523_v47 = vsel %vm15074_vm2, %v3521_v16, %v3522_v1  ;;  %v2894_v51 = vadd.f32 %v16412_v21, %v16455_v57  ;;  %v12905_v18 = vld [vmem:[%s15072_s19 + $0x3e0] sm:$0xf]  ;;  %v13155_v44 = vrot.slane %v13113_v58, 11 }
 0x342   : > { %v3289_v28 = vpop.f32.mrf.mxu0  ;;  %v3585_v35 = vunpack.c.l.b16 %v3523_v47 }
 0x343   : > { %v16724_v29 = vadd.f32 %v3289_v28, %v16439_v45  ;;  %v3584_v45 = vunpack.c.l.b16 %v3520_v36  ;;  %v4098_v13 = vadd.f32 %v16684_v50, %v4029_v17  ;;  %v4528_v28 = vrot.slane %v13115_v49, 7  ;;  %v12904_v17 = vld [vmem:[%s15072_s19 + $0x3dc] sm:$0xe] }
 0x344   : > { %v4526_v57 = vsel %vm16619_vm9, %v13155_v44, %v4525_v37  ;;  %v3526_v36 = vrot.slane %v12905_v18, 5  ;;  %v14724_v49 = vld [vmem:[%s15072_s19 + $0x418] sm:$0xff] }
 0x345   : > { %13182 = vmatmul.msk.bf16.gmra.mxu0 %vm564_vm3, %v4653_v12  ;;  %13067 = vmatmul.msk.bf16.gmra.mxu2 %vm564_vm3, %v14723_v41  ;;  %v4527_v12 = vrot.slane %v4525_v37, 4  ;;  %v3606_v21 = vpack.c.b16 %v3585_v35, %v3584_v45  ;;  %v4130_v41 = vmax.f32 %v4098_v13, 0.0 }
 0x346   : > { %v3688_v30 = vpop.f32.mrf.mxu1  ;;  %v3528_v45 = vrot.slane %v3526_v36, 4 }
 0x347   : > { %v3764_v42 = vadd.f32 %v3688_v30, %v20828_v5  ;;  %v4529_v47 = vsel %vm16619_vm9, %v4527_v12, %v4528_v28  ;;  %v12906_v5 = vld [vmem:[%s15072_s19 + $0x3e4] sm:$0x1] }
 0x348   : > { %v16742_v40 = vpop.f32.mrf.mxu2  ;;  %v4626_v43 = vunpack.c.l.b16 %v4529_v47  ;;  %v3529_v35 = vrot.slane %v12906_v5, 5  ;;  %v20829_v28 = vld [vmem:[#allocation58_spill] sm:$0xff]  ;;  %v13116_v47 = vld [vmem:[%s15072_s19 + $0x118] sm:$0x8]  ;;  %v12908_v5 = vld [vmem:[%s15072_s19 + $0x3fc] sm:$0xf] }
 0x349   : > { %v4030_v7 = vadd.f32 %v16632_v6, %v3764_v42  ;;  %v4625_v42 = vunpack.c.l.b16 %v4526_v57  ;;  %v13117_v57 = vld [vmem:[%s15072_s19 + $0x11c] sm:$0xf] }
 0x34a   : > { %v3291_v0 = vpop.f32.mrf.mxu0 }
 0x34b   : > { %v4099_v16 = vadd.f32 %v16684_v50, %v4030_v7  ;;  %v16746_v1 = vadd.f32 %v3291_v0, %v2894_v51  ;;  %v12930_v7 = vrot.slane %v12904_v17, 9  ;;  %v4654_v37 = vpack.c.b16 %v4626_v43, %v4625_v42  ;;  %v13118_v43 = vld [vmem:[%s15072_s19 + $0x120] sm:$0x7] }
 0x34d   : > { %v4131_v6 = vmax.f32 %v4099_v16, 0.0  ;;  %v3530_v16 = vsel %vm15074_vm2, %v3528_v45, %v3529_v35  ;;  %v4535_v35 = vrot.slane %v13118_v43, 7 }
 0x34e   : > { %v3691_v30 = vpop.f32.mrf.mxu1 }
 0x34f   : > { %v4161_v51 = vpack.c.bf16 %v4131_v6, %v4130_v41  ;;  %v3765_v58 = vadd.f32 %v3691_v30, %v16404_v10  ;;  %v3527_v10 = vsel %vm15074_vm2, %v12930_v7, %v3526_v36  ;;  %v3587_v41 = vunpack.c.l.b16 %v3530_v16  ;;  %v12909_v16 = vld [vmem:[%s15072_s19 + $0x400] sm:$0x1] }
 0x350   : > { %v16757_v0 = vpop.f32.mrf.mxu2  ;;  %v4532_v6 = vrot.slane %v13117_v57, 7 }
 0x351   : > { %12957 = vmatmul.msk.bf16.gmra.mxu1 %vm564_vm3, %v3606_v21  ;;  %13085 = vmatmul.msk.bf16.gmra.mxu3 %vm564_vm3, %v4161_v51  ;;  %v4031_v44 = vadd.f32 %v16658_v9, %v3765_v58  ;;  %v2896_v9 = vadd.f32 %v16457_v54, %v16495_v59  ;;  %v13156_v51 = vrot.slane %v13116_v47, 11 }
 0x352   : > { %v3294_v13 = vpop.f32.mrf.mxu0  ;;  %v4534_v45 = vrot.slane %v4532_v6, 4 }
 0x353   : > { %v16760_v18 = vadd.f32 %v3294_v13, %v16477_v60  ;;  %v3586_v60 = vunpack.c.l.b16 %v3527_v10  ;;  %v4100_v17 = vadd.f32 %v16684_v50, %v4031_v44  ;;  %v4533_v59 = vsel %vm16619_vm9, %v13156_v51, %v4532_v6  ;;  %v12907_v13 = vld [vmem:[%s15072_s19 + $0x3f8] sm:$0xe] }
 0x354   : > { %v4536_v44 = vsel %vm16619_vm9, %v4534_v45, %v4535_v35  ;;  %v12931_v57 = vrot.slane %v12907_v13, 9  ;;  %v13120_v35 = vld [vmem:[%s15072_s19 + $0x138] sm:$0xf]  ;;  %v13119_v13 = vld [vmem:[%s15072_s19 + $0x134] sm:$0x8] }
 0x355   : > { %13183 = vmatmul.msk.bf16.gmra.mxu0 %vm564_vm3, %v4654_v37  ;;  %13068 = vmatmul.msk.bf16.gmra.mxu2 %vm564_vm3, %v14724_v49  ;;  %v3607_v54 = vpack.c.b16 %v3587_v41, %v3586_v60  ;;  %v4132_v37 = vmax.f32 %v4100_v17, 0.0  ;;  %v3533_v49 = vrot.slane %v12908_v5, 5  ;;  %v3536_v41 = vrot.slane %v12909_v16, 5  ;;  %v13121_v16 = vld [vmem:[%s15072_s19 + $0x13c] sm:$0x7] }
 0x356   : > { %v3693_v12 = vpop.f32.mrf.mxu1 }
 0x357   : > { %v3766_v21 = vadd.f32 %v3693_v12, %v20829_v28  ;;  %v4627_v12 = vunpack.c.l.b16 %v4533_v59  ;;  %v4628_v28 = vunpack.c.l.b16 %v4536_v44  ;;  %v3535_v60 = vrot.slane %v3533_v49, 4  ;;  %v12911_v44 = vld [vmem:[%s15072_s19 + $0x418] sm:$0xf] }
 0x358   : > { %v16778_v42 = vpop.f32.mrf.mxu2  ;;  %v4539_v59 = vrot.slane %v13120_v35, 7 }
 0x359   : > { %v4032_v36 = vadd.f32 %v16674_v31, %v3766_v21  ;;  %v4655_v6 = vpack.c.b16 %v4628_v28, %v4627_v12  ;;  %v3537_v43 = vsel %vm15074_vm2, %v3535_v60, %v3536_v41  ;;  %v13157_v12 = vrot.slane %v13119_v13, 11  ;;  %v12910_v41 = vld [vmem:[%s15072_s19 + $0x414] sm:$0xe] }
 0x35a   : > { %v3296_v30 = vpop.f32.mrf.mxu0 }
 0x35b   : > { %v4101_v7 = vadd.f32 %v16684_v50, %v4032_v36  ;;  %v16782_v58 = vadd.f32 %v3296_v30, %v2896_v9  ;;  %v14725_v30 = vld [vmem:[%s15072_s19 + $0x434] sm:$0xff] }
 0x35d   : > { %v4133_v31 = vmax.f32 %v4101_v7, 0.0  ;;  %v20830_v7 = vld [vmem:[#allocation59_spill] sm:$0xff] }
 0x35e   : > { %v3696_v10 = vpop.f32.mrf.mxu1 }
 0x35f   : > { %v4162_v21 = vpack.c.bf16 %v4133_v31, %v4132_v37  ;;  %v3767_v9 = vadd.f32 %v3696_v10, %v16442_v8  ;;  %v3534_v8 = vsel %vm15074_vm2, %v12931_v57, %v3533_v49  ;;  %v4541_v57 = vrot.slane %v4539_v59, 4 }
 0x360   : > { %v16793_v36 = vpop.f32.mrf.mxu2 }
 0x361   : > { %12958 = vmatmul.msk.bf16.gmra.mxu1 %vm564_vm3, %v3607_v54  ;;  %13086 = vmatmul.msk.bf16.gmra.mxu3 %vm564_vm3, %v4162_v21  ;;  %v4033_v5 = vadd.f32 %v16703_v26, %v3767_v9  ;;  %v3589_v54 = vunpack.c.l.b16 %v3537_v43  ;;  %v2898_v26 = vadd.f32 %v16506_v3, %v16534_v14  ;;  %v4542_v9 = vrot.slane %v13121_v16, 7 }
 0x362   : > { %v3299_v17 = vpop.f32.mrf.mxu0  ;;  %v4540_v14 = vsel %vm16619_vm9, %v13157_v12, %v4539_v59  ;;  %v13123_v12 = vld [vmem:[%s15072_s19 + $0x154] sm:$0xf] }
 0x363   : > { %v16796_v47 = vadd.f32 %v3299_v17, %v16516_v11  ;;  %v3588_v11 = vunpack.c.l.b16 %v3534_v8  ;;  %v4102_v37 = vadd.f32 %v16684_v50, %v4033_v5  ;;  %v4543_v17 = vsel %vm16619_vm9, %v4541_v57, %v4542_v9  ;;  %v12912_v5 = vld [vmem:[%s15072_s19 + $0x41c] sm:$0x1] }
 0x364   : > { %v4629_v8 = vunpack.c.l.b16 %v4540_v14  ;;  %v4630_v43 = vunpack.c.l.b16 %v4543_v17  ;;  %v4546_v57 = vrot.slane %v13123_v12, 7  ;;  %v13122_v14 = vld [vmem:[%s15072_s19 + $0x150] sm:$0x8] }
 0x365   : > { %13184 = vmatmul.msk.bf16.gmra.mxu0 %vm564_vm3, %v4655_v6  ;;  %13069 = vmatmul.msk.bf16.gmra.mxu2 %vm564_vm3, %v14725_v30  ;;  %v3608_v3 = vpack.c.b16 %v3589_v54, %v3588_v11  ;;  %v4134_v60 = vmax.f32 %v4102_v37, 0.0  ;;  %v3540_v6 = vrot.slane %v12911_v44, 5  ;;  %v3543_v11 = vrot.slane %v12912_v5, 5 }
 0x366   : > { %v3698_v51 = vpop.f32.mrf.mxu1  ;;  %v4656_v54 = vpack.c.b16 %v4630_v43, %v4629_v8  ;;  %v4548_v5 = vrot.slane %v4546_v57, 4 }
 0x367   : > { %v3768_v45 = vadd.f32 %v3698_v51, %v20830_v7  ;;  %v12932_v7 = vrot.slane %v12910_v41, 9  ;;  %v3542_v35 = vrot.slane %v3540_v6, 4 }
 0x368   : > { %v16814_v10 = vpop.f32.mrf.mxu2 }
 0x369   : > { %v4034_v31 = vadd.f32 %v16721_v15, %v3768_v45 }
 0x36a   : > { %v3301_v49 = vpop.f32.mrf.mxu0 }
 0x36b   : > { %v4103_v28 = vadd.f32 %v16684_v50, %v4034_v31  ;;  %v16818_v21 = vadd.f32 %v3301_v49, %v2898_v26  ;;  %v14726_v31 = vld [vmem:[%s15072_s19 + $0x450] sm:$0xff]  ;;  %v3544_v49 = vsel %vm15074_vm2, %v3542_v35, %v3543_v11  ;;  %v12915_v11 = vld [vmem:[%s15072_s19 + $0x438] sm:$0x1] }
 0x36d   : > { %v4135_v15 = vmax.f32 %v4103_v28, 0.0  ;;  %v3591_v28 = vunpack.c.l.b16 %v3544_v49 }
 0x36e   : > { %v3701_v30 = vpop.f32.mrf.mxu1 }
 0x36f   : > { %v4163_v51 = vpack.c.bf16 %v4135_v15, %v4134_v60  ;;  %v3769_v45 = vadd.f32 %v3701_v30, %v16480_v27  ;;  %v3541_v27 = vsel %vm15074_vm2, %v12932_v7, %v3540_v6  ;;  %v12914_v15 = vld [vmem:[%s15072_s19 + $0x434] sm:$0xf]  ;;  %v13158_v6 = vrot.slane %v13122_v14, 11  ;;  %v13220_v14 = vld [vmem:[%s15072_s19 + $0xb0] sm:$0xe] }
 0x370   : > { %v16829_v26 = vpop.f32.mrf.mxu2  ;;  %v3547_v7 = vrot.slane %v12914_v15, 5 }
 0x371   : > { %12959 = vmatmul.msk.bf16.gmra.mxu1 %vm564_vm3, %v3608_v3  ;;  %13087 = vmatmul.msk.bf16.gmra.mxu3 %vm564_vm3, %v4163_v51  ;;  %v4035_v13 = vadd.f32 %v16742_v40, %v3769_v45  ;;  %v2900_v40 = vadd.f32 %v16551_v22, %v16573_v33  ;;  %v4547_v33 = vsel %vm16619_vm9, %v13158_v6, %v4546_v57  ;;  %v12913_v51 = vld [vmem:[%s15072_s19 + $0x430] sm:$0xe]  ;;  %v13221_v57 = vld [vmem:[%s15072_s19 + $0xb4] sm:$0xf] }
 0x372   : > { %v3304_v59 = vpop.f32.mrf.mxu0  ;;  %v3549_v49 = vrot.slane %v3547_v7, 4 }
 0x373   : > { %v16832_v37 = vadd.f32 %v3304_v59, %v16555_v19  ;;  %v3590_v19 = vunpack.c.l.b16 %v3541_v27  ;;  %v4104_v9 = vadd.f32 %v16684_v50, %v4035_v13  ;;  %v12933_v13 = vrot.slane %v12913_v51, 9 }
 0x375   : > { %13185 = vmatmul.msk.bf16.gmra.mxu0 %vm564_vm3, %v4656_v54  ;;  %13070 = vmatmul.msk.bf16.gmra.mxu2 %vm564_vm3, %v14726_v31  ;;  %v3609_v22 = vpack.c.b16 %v3591_v28, %v3590_v19  ;;  %v4136_v43 = vmax.f32 %v4104_v9, 0.0  ;;  %v4631_v54 = vunpack.c.l.b16 %v4547_v33 }
 0x376   : > { %v3703_v44 = vpop.f32.mrf.mxu1 }
 0x377   : > { %v3770_v16 = vadd.f32 %v3703_v44, %v16503_v56  ;;  %v13124_v56 = vld [vmem:[%s15072_s19 + $0x158] sm:$0x7]  ;;  %v3550_v44 = vrot.slane %v12915_v11, 5 }
 0x378   : > { %v16850_v41 = vpop.f32.mrf.mxu2  ;;  %v4549_v8 = vrot.slane %v13124_v56, 7  ;;  %v13268_v56 = vrot.slane %v13220_v14, 9 }
 0x379   : > { %v4036_v3 = vadd.f32 %v16757_v0, %v3770_v16 }
 0x37a   : > { %v3306_v60 = vpop.f32.mrf.mxu0  ;;  %v4550_v45 = vsel %vm16619_vm9, %v4548_v5, %v4549_v8  ;;  %v13126_v8 = vld [vmem:[%s15072_s19 + $0x170] sm:$0xf] }
 0x37b   : > { %v4105_v17 = vadd.f32 %v16684_v50, %v4036_v3  ;;  %v16854_v30 = vadd.f32 %v3306_v60, %v2900_v40  ;;  %v4632_v59 = vunpack.c.l.b16 %v4550_v45  ;;  %v3548_v40 = vsel %vm15074_vm2, %v12933_v13, %v3547_v7  ;;  %v13222_v60 = vld [vmem:[%s15072_s19 + $0xb8] sm:$0x1]  ;;  %v12917_v45 = vld [vmem:[%s15072_s19 + $0x450] sm:$0xf] }
 0x37c   : > { %v3551_v3 = vsel %vm15074_vm2, %v3549_v49, %v3550_v44  ;;  %v5018_v6 = vrot.slane %v13222_v60, 5 }
 0x37d   : > { %v4137_v0 = vmax.f32 %v4105_v17, 0.0  ;;  %v4657_v16 = vpack.c.b16 %v4632_v59, %v4631_v54  ;;  %v2902_v17 = vadd.f32 %v16598_v62, %v16610_v39  ;;  %v13125_v62 = vld [vmem:[%s15072_s19 + $0x16c] sm:$0x8] }
 0x37e   : > { %v3706_v35 = vpop.f32.mrf.mxu1  ;;  %v13159_v59 = vrot.slane %v13125_v62, 11 }
 0x37f   : > { %v4164_v31 = vpack.c.bf16 %v4137_v0, %v4136_v43  ;;  %v3771_v27 = vadd.f32 %v3706_v35, %v16519_v61  ;;  %v5015_v61 = vrot.slane %v13221_v57, 5  ;;  %v4553_v0 = vrot.slane %v13126_v8, 7 }
 0x380   : > { %v16865_v19 = vpop.f32.mrf.mxu2 }
 0x381   : > { %12960 = vmatmul.msk.bf16.gmra.mxu1 %vm564_vm3, %v3609_v22  ;;  %13088 = vmatmul.msk.bf16.gmra.mxu3 %vm564_vm3, %v4164_v31  ;;  %v4037_v9 = vadd.f32 %v16778_v42, %v3771_v27  ;;  %v3592_v42 = vunpack.c.l.b16 %v3548_v40  ;;  %v3593_v22 = vunpack.c.l.b16 %v3551_v3  ;;  %v5016_v33 = vsel %vm15074_vm2, %v13268_v56, %v5015_v61 }
 0x382   : > { %v3309_v12 = vpop.f32.mrf.mxu0  ;;  %v5130_v35 = vunpack.c.l.b16 %v5016_v33  ;;  %v4555_v31 = vrot.slane %v4553_v0, 4 }
 0x383   : > { %v16868_v28 = vadd.f32 %v3309_v12, %v16591_v25  ;;  %v5017_v25 = vrot.slane %v5015_v61, 4  ;;  %v4106_v51 = vadd.f32 %v16684_v50, %v4037_v9  ;;  %v4554_v12 = vsel %vm16619_vm9, %v13159_v59, %v4553_v0  ;;  %v12916_v9 = vld [vmem:[%s15072_s19 + $0x44c] sm:$0xe]  ;;  %v2870_v0 = vpop.f32.mrf.mxu3 }
 0x384   : > { %v4633_v3 = vunpack.c.l.b16 %v4554_v12  ;;  %v2904_v59 = vadd.f32 %v2870_v0, %v16654_v24  ;;  %v13130_v24 = vld [vmem:[%s15072_s19 + $0x190] sm:$0x7] }
 0x385   : > { %13186 = vmatmul.msk.bf16.gmra.mxu0 %vm564_vm3, %v4657_v16  ;;  %v5019_v43 = vsel %vm15074_vm2, %v5017_v25, %v5018_v6  ;;  %v3610_v16 = vpack.c.b16 %v3593_v22, %v3592_v42  ;;  %v4138_v40 = vmax.f32 %v4106_v51, 0.0  ;;  %v12934_v25 = vrot.slane %v12916_v9, 9  ;;  %v13128_v9 = vld [vmem:[%s15072_s19 + $0x188] sm:$0x8] }
 0x386   : > { %v3708_v15 = vpop.f32.mrf.mxu1  ;;  %v5131_v11 = vunpack.c.l.b16 %v5019_v43  ;;  %v13224_v43 = vld [vmem:[%s15072_s19 + $0xd0] sm:$0xf] }
 0x387   : > { %v3772_v5 = vadd.f32 %v3708_v15, %v16542_v63  ;;  %v13127_v63 = vld [vmem:[%s15072_s19 + $0x174] sm:$0x7]  ;;  %v5022_v51 = vrot.slane %v13224_v43, 5 }
 0x388   : > { %v16892_v54 = vpop.f32.mrf.mxu2  ;;  %v4556_v13 = vrot.slane %v13127_v63, 7  ;;  %v5162_v44 = vpack.c.b16 %v5131_v11, %v5130_v35  ;;  %v12918_v15 = vld [vmem:[%s15072_s19 + $0x454] sm:$0x1]  ;;  %v13223_v35 = vld [vmem:[%s15072_s19 + $0xcc] sm:$0xe] }
 0x389   : > { %v4038_v7 = vadd.f32 %v16793_v36, %v3772_v5  ;;  %v3554_v36 = vrot.slane %v12917_v45, 5  ;;  %v3557_v5 = vrot.slane %v12918_v15, 5  ;;  %v13225_v11 = vld [vmem:[%s15072_s19 + $0xd4] sm:$0x1]  ;;  %v5024_v63 = vrot.slane %v5022_v51, 4 }
 0x38a   : > { %v3311_v39 = vpop.f32.mrf.mxu0  ;;  %v4557_v57 = vsel %vm16619_vm9, %v4555_v31, %v4556_v13  ;;  %13296 = vmatmul.msk.bf16.vlgmr.msrb.gmra.mxu2 %vm564_vm3, %v5162_v44  ;;  %v4563_v15 = vrot.slane %v13130_v24, 7  ;;  %v13131_v24 = vld [vmem:[%s15072_s19 + $0x1a4] sm:$0x8] }
 0x38b   : > { %v4107_v27 = vadd.f32 %v16684_v50, %v4038_v7  ;;  %v16895_v49 = vadd.f32 %v3311_v39, %v2902_v17  ;;  %v4634_v14 = vunpack.c.l.b16 %v4557_v57  ;;  %v3556_v17 = vrot.slane %v3554_v36, 4 }
 0x38c   : > { %v5025_v39 = vrot.slane %v13225_v11, 5 }
 0x38d   : > { %v4139_v61 = vmax.f32 %v4107_v27, 0.0  ;;  %v4658_v42 = vpack.c.b16 %v4634_v14, %v4633_v3  ;;  %v3558_v45 = vsel %vm15074_vm2, %v3556_v17, %v3557_v5  ;;  %v13129_v27 = vld [vmem:[%s15072_s19 + $0x18c] sm:$0xf]  ;;  %v13160_v14 = vrot.slane %v13128_v9, 11 }
 0x38e   : > { %v3711_v60 = vpop.f32.mrf.mxu1 }
 0x38f   : > { %v4165_v56 = vpack.c.bf16 %v4139_v61, %v4138_v40  ;;  %v3773_v6 = vadd.f32 %v3711_v60, %v16558_v4  ;;  %v3555_v4 = vsel %vm15074_vm2, %v12934_v25, %v3554_v36  ;;  %v4560_v36 = vrot.slane %v13129_v27, 7 }
 0x390   : > { %v16907_v22 = vpop.f32.mrf.mxu2  ;;  %v3594_v13 = vunpack.c.l.b16 %v3555_v4 }
 0x391   : > { %12961 = vmatmul.msk.bf16.gmra.mxu1 %vm564_vm3, %v3610_v16  ;;  %13089 = vmatmul.msk.bf16.gmra.mxu3 %vm564_vm3, %v4165_v56  ;;  %v4039_v7 = vadd.f32 %v16814_v10, %v3773_v6  ;;  %v3595_v10 = vunpack.c.l.b16 %v3558_v45  ;;  %v5026_v16 = vsel %vm15074_vm2, %v5024_v63, %v5025_v39  ;;  %v4562_v60 = vrot.slane %v4560_v36, 4  ;;  %v13226_v39 = vld [vmem:[%s15072_s19 + $0xe8] sm:$0xe] }
 0x392   : > { %v3314_v8 = vpop.f32.mrf.mxu0  ;;  %v5133_v61 = vunpack.c.l.b16 %v5026_v16  ;;  %v13132_v16 = vld [vmem:[%s15072_s19 + $0x1a8] sm:$0xf] }
 0x393   : > { %v16910_v33 = vadd.f32 %v3314_v8, %v16634_v48  ;;  %v13269_v48 = vrot.slane %v13223_v35, 9  ;;  %v4108_v12 = vadd.f32 %v16684_v50, %v4039_v7  ;;  %v3611_v17 = vpack.c.b16 %v3595_v10, %v3594_v13 }
 0x394   : > { %v4564_v5 = vsel %vm16619_vm9, %v4562_v60, %v4563_v15  ;;  %v13270_v13 = vrot.slane %v13226_v39, 9  ;;  %v13161_v60 = vrot.slane %v13131_v24, 11 }
 0x395   : > { %13187 = vmatmul.msk.bf16.gmra.mxu0 %vm564_vm3, %v4658_v42  ;;  %v5023_v44 = vsel %vm15074_vm2, %v13269_v48, %v5022_v51  ;;  %v4140_v42 = vmax.f32 %v4108_v12, 0.0  ;;  %v4636_v0 = vunpack.c.l.b16 %v4564_v5  ;;  %v4567_v12 = vrot.slane %v13132_v16, 7 }
 0x396   : > { %v3713_v62 = vpop.f32.mrf.mxu1  ;;  %v5132_v40 = vunpack.c.l.b16 %v5023_v44 }
 0x397   : > { %v3774_v31 = vadd.f32 %v3713_v62, %v16581_v55  ;;  %v13227_v62 = vld [vmem:[%s15072_s19 + $0xec] sm:$0xf]  ;;  %v4569_v15 = vrot.slane %v4567_v12, 4 }
 0x398   : > { %v16932_v55 = vpop.f32.mrf.mxu2  ;;  %v5163_v6 = vpack.c.b16 %v5133_v61, %v5132_v40  ;;  %v5029_v48 = vrot.slane %v13227_v62, 5 }
 0x399   : > { %v4040_v57 = vadd.f32 %v16829_v26, %v3774_v31  ;;  %v4561_v26 = vsel %vm16619_vm9, %v13160_v14, %v4560_v36 }
 0x39a   : > { %v3316_v3 = vpop.f32.mrf.mxu0  ;;  %13297 = vmatmul.msk.bf16.gmra.mxu2 %vm564_vm3, %v5163_v6  ;;  %v4635_v43 = vunpack.c.l.b16 %v4561_v26  ;;  %v5031_v27 = vrot.slane %v5029_v48, 4  ;;  %v4568_v26 = vsel %vm16619_vm9, %v13161_v60, %v4567_v12  ;;  %v13136_v60 = vld [vmem:[%s15072_s19 + $0x1c8] sm:$0x7] }
 0x39b   : > { %v4109_v56 = vadd.f32 %v16684_v50, %v4040_v57  ;;  %v16935_v25 = vadd.f32 %v3316_v3, %v2904_v59  ;;  %v13228_v59 = vld [vmem:[%s15072_s19 + $0xf0] sm:$0x1]  ;;  %v13133_v3 = vld [vmem:[%s15072_s19 + $0x1ac] sm:$0x7] }
 0x39c   : > { %v4659_v45 = vpack.c.b16 %v4636_v0, %v4635_v43  ;;  %v5032_v10 = vrot.slane %v13228_v59, 5  ;;  %v4637_v43 = vunpack.c.l.b16 %v4568_v26 }
 0x39d   : > { %v4141_v8 = vmax.f32 %v4109_v56, 0.0  ;;  %v4570_v56 = vrot.slane %v13133_v3, 7  ;;  %v13134_v3 = vld [vmem:[%s15072_s19 + $0x1c0] sm:$0x8] }
 0x39e   : > { %v3716_v4 = vpop.f32.mrf.mxu1  ;;  %v5033_v36 = vsel %vm15074_vm2, %v5031_v27, %v5032_v10 }
 0x39f   : > { %v4166_v51 = vpack.c.bf16 %v4141_v8, %v4140_v42  ;;  %v3775_v7 = vadd.f32 %v3716_v4, %v16594_v46  ;;  %v14737_v46 = vld [vmem:[%s20725_s2 + $0xb0] sm:$0xff]  ;;  %v5135_v9 = vunpack.c.l.b16 %v5033_v36  ;;  %v14739_v8 = vld [vmem:[%s20725_s2 + $0xc0] sm:$0xff] }
 0x3a0   : > { %v16947_v11 = vpop.f32.mrf.mxu2  ;;  %5687 = vmatpush.bf16.msrb.mxu3 %v14737_v46  ;;  %6129 = vmatpush.bf16.msra.mxu0 %v14739_v8  ;;  %v13230_v46 = vld [vmem:[%s15072_s19 + $0x108] sm:$0xf]  ;;  %v13135_v36 = vld [vmem:[%s15072_s19 + $0x1c4] sm:$0xf] }
 0x3a1   : > { %12962 = vmatmul.msk.bf16.gmra.mxu1 %vm564_vm3, %v3611_v17  ;;  %13090 = vmatmul.msk.bf16.gmra.mxu3 %vm564_vm3, %v4166_v51  ;;  %v4041_v63 = vadd.f32 %v16850_v41, %v3775_v7  ;;  %v5030_v41 = vsel %vm15074_vm2, %v13270_v13, %v5029_v48  ;;  %v5036_v39 = vrot.slane %v13230_v46, 5  ;;  %v13231_v13 = vld [vmem:[%s15072_s19 + $0x10c] sm:$0x1] }
 0x3a2   : > { %v16945_v35 = vpop.f32.mrf.mxu0  ;;  %v5134_v61 = vunpack.c.l.b16 %v5030_v41  ;;  %v5039_v16 = vrot.slane %v13231_v13, 5  ;;  %v20832_v46 = vld [vmem:[#allocation7_spill] sm:$0xff] }
 0x3a3   : > { %v4110_v57 = vadd.f32 %v16684_v50, %v4041_v63 }
 0x3a4   : > { %v5164_v17 = vpack.c.b16 %v5135_v9, %v5134_v61 }
 0x3a5   : > { %13188 = vmatmul.msk.bf16.gmra.mxu0 %vm564_vm3, %v4659_v45  ;;  %v4142_v5 = vmax.f32 %v4110_v57, 0.0  ;;  %v20831_v45 = vld [vmem:[#allocation6_spill] sm:$0xff]  ;;  %v4574_v57 = vrot.slane %v13135_v36, 7 }
 0x3a6   : > { %v3718_v31 = vpop.f32.mrf.mxu1 }
 0x3a7   : > { %v3776_v44 = vadd.f32 %v3718_v31, %v16616_v52  ;;  %v13229_v31 = vld [vmem:[%s15072_s19 + $0x104] sm:$0xe] }
 0x3a8   : > { %v16969_v52 = vpop.f32.mrf.mxu2  ;;  %v13271_v10 = vrot.slane %v13229_v31, 9  ;;  %v13233_v31 = vld [vmem:[%s15072_s19 + $0x124] sm:$0xf] }
 0x3a9   : > { %v4042_v40 = vadd.f32 %v16865_v19, %v3776_v44  ;;  %v4571_v19 = vsel %vm16619_vm9, %v4569_v15, %v4570_v56  ;;  %v5038_v44 = vrot.slane %v5036_v39, 4  ;;  %v4576_v56 = vrot.slane %v4574_v57, 4 }
 0x3aa   : > { %v16967_v14 = vpop.f32.mrf.mxu0  ;;  %13298 = vmatmul.msk.bf16.gmra.mxu2 %vm564_vm3, %v5164_v17  ;;  %v4638_v0 = vunpack.c.l.b16 %v4571_v19 }
 0x3ab   : > { %v4111_v6 = vadd.f32 %v16684_v50, %v4042_v40  ;;  %v5040_v12 = vsel %vm15074_vm2, %v5038_v44, %v5039_v16  ;;  %v13234_v44 = vld [vmem:[%s15072_s19 + $0x128] sm:$0x1] }
 0x3ac   : > { %v4660_v62 = vpack.c.b16 %v4638_v0, %v4637_v43  ;;  %v5137_v24 = vunpack.c.l.b16 %v5040_v12  ;;  %v14742_v43 = vld [vmem:[%s20725_s2 + $0xe8] sm:$0xff] }
 0x3ad   : > { %v4143_v42 = vmax.f32 %v4111_v6, 0.0  ;;  %v4577_v6 = vrot.slane %v13136_v60, 7  ;;  %6570 = vmatpush.bf16.msra.mxu1 %v14742_v43 }
 0x3ae   : > { %v3721_v4 = vpop.f32.mrf.mxu1 }
 0x3af   : > { %v4167_v51 = vpack.c.bf16 %v4143_v42, %v4142_v5  ;;  %v3777_v7 = vadd.f32 %v3721_v4, %v16637_v34  ;;  %v14744_v34 = vld [vmem:[%s20725_s2 + $0xf8] sm:$0xff] }
 0x3b0   : > { %v16986_v63 = vpop.f32.mrf.mxu2  ;;  %7016 = vmatpush.bf16.msra.mxu2 %v14744_v34 }
 0x3b1   : > { %13091 = vmatmul.msk.bf16.gmra.mxu3 %vm564_vm3, %v4167_v51  ;;  %13204 = vmatmul.msk.bf16.vlgmr.msrb.gmra.mxu1 %vm564_vm3, %v20831_v45  ;;  %v4043_v59 = vadd.f32 %v16892_v54, %v3777_v7  ;;  %v5037_v54 = vsel %vm15074_vm2, %v13271_v10, %v5036_v39 }
 0x3b2   : > { %v16984_v48 = vpop.f32.mrf.mxu0  ;;  %v5136_v9 = vunpack.c.l.b16 %v5037_v54  ;;  %v5046_v54 = vrot.slane %v13234_v44, 5 }
 0x3b3   : > { %v4112_v40 = vadd.f32 %v16684_v50, %v4043_v59 }
 0x3b4   : > { %v5165_v19 = vpack.c.b16 %v5137_v24, %v5136_v9 }
 0x3b5   : > { %13189 = vmatmul.msk.bf16.gmra.mxu0 %vm564_vm3, %v4660_v62  ;;  %v4144_v42 = vmax.f32 %v4112_v40, 0.0 }
 0x3b6   : > { %v3723_v27 = vpop.f32.mrf.mxu1 }
 0x3b7   : > { %v3778_v41 = vadd.f32 %v3723_v27, %v16661_v32  ;;  %v13162_v32 = vrot.slane %v13134_v3, 11  ;;  %v5043_v27 = vrot.slane %v13233_v31, 5 }
 0x3b8   : > { %v17009_v26 = vpop.f32.mrf.mxu2 }
 0x3b9   : > { %v4044_v61 = vadd.f32 %v16907_v22, %v3778_v41  ;;  %v4575_v5 = vsel %vm16619_vm9, %v13162_v32, %v4574_v57  ;;  %v4578_v22 = vsel %vm16619_vm9, %v4576_v56, %v4577_v6  ;;  %v5045_v36 = vrot.slane %v5043_v27, 4  ;;  %v13138_v57 = vld [vmem:[%s15072_s19 + $0x1e0] sm:$0xf]  ;;  %v13137_v32 = vld [vmem:[%s15072_s19 + $0x1dc] sm:$0x8] }
 0x3ba   : > { %v17006_v15 = vpop.f32.mrf.mxu0  ;;  %13299 = vmatmul.msk.bf16.gmra.mxu2 %vm564_vm3, %v5165_v19  ;;  %v4639_v0 = vunpack.c.l.b16 %v4575_v5  ;;  %v4640_v4 = vunpack.c.l.b16 %v4578_v22  ;;  %v13139_v56 = vld [vmem:[%s15072_s19 + $0x1e4] sm:$0x7] }
 0x3bb   : > { %v4113_v17 = vadd.f32 %v16684_v50, %v4044_v61  ;;  %v5047_v61 = vsel %vm15074_vm2, %v5045_v36, %v5046_v54  ;;  %v4584_v19 = vrot.slane %v13139_v56, 7 }
 0x3bc   : > { %v4661_v39 = vpack.c.b16 %v4640_v4, %v4639_v0  ;;  %v5139_v60 = vunpack.c.l.b16 %v5047_v61 }
 0x3bd   : > { %v4145_v8 = vmax.f32 %v4113_v17, 0.0  ;;  %v13163_v17 = vrot.slane %v13137_v32, 11 }
 0x3be   : > { %v3726_v51 = vpop.f32.mrf.mxu1 }
 0x3bf   : > { %v4168_v7 = vpack.c.bf16 %v4145_v8, %v4144_v42  ;;  %v3779_v62 = vadd.f32 %v3726_v51, %v16677_v23  ;;  %v13232_v23 = vld [vmem:[%s15072_s19 + $0x120] sm:$0xe] }
 0x3c0   : > { %v17025_v34 = vpop.f32.mrf.mxu2  ;;  %v13272_v41 = vrot.slane %v13232_v23, 9 }
 0x3c1   : > { %13092 = vmatmul.msk.bf16.gmra.mxu3 %vm564_vm3, %v4168_v7  ;;  %13205 = vmatmul.msk.bf16.gmra.mxu1 %vm564_vm3, %v20832_v46  ;;  %v4045_v10 = vadd.f32 %v16932_v55, %v3779_v62  ;;  %v4581_v55 = vrot.slane %v13138_v57, 7  ;;  %v13338_v46 = vld [vmem:[%s15072_s19 + $0x19c] sm:$0x7] }
 0x3c2   : > { %v17023_v59 = vpop.f32.mrf.mxu0  ;;  %v5044_v40 = vsel %vm15074_vm2, %v13272_v41, %v5043_v27  ;;  %v20835_v27 = vld [vmem:[#allocation8_spill] sm:$0xff] }
 0x3c3   : > { %v4114_v9 = vadd.f32 %v16684_v50, %v4045_v10  ;;  %v5138_v3 = vunpack.c.l.b16 %v5044_v40 }
 0x3c4   : > { %v17028_v13 = vpop.f32.mrf.mxu3 }
 0x3c5   : > { %20833 = vst [vmem:[#allocation55_spill] sm:$0xff] %v17028_v13  ;;  %13190 = vmatmul.msk.bf16.gmra.mxu0 %vm564_vm3, %v4661_v39  ;;  %v5166_v42 = vpack.c.b16 %v5139_v60, %v5138_v3  ;;  %v4146_v0 = vmax.f32 %v4114_v9, 0.0 }
 0x3c6   : > { %v3728_v16 = vpop.f32.mrf.mxu1 }
 0x3c7   : > { %v3780_v12 = vadd.f32 %v3728_v16, %v16707_v53  ;;  %v4583_v53 = vrot.slane %v4581_v55, 4  ;;  %v13236_v16 = vld [vmem:[%s15072_s19 + $0x140] sm:$0xf] }
 0x3c8   : > { %v17047_v22 = vpop.f32.mrf.mxu2  ;;  %v5050_v36 = vrot.slane %v13236_v16, 5 }
 0x3c9   : > { %v4046_v24 = vadd.f32 %v16947_v11, %v3780_v12  ;;  %v4582_v11 = vsel %vm16619_vm9, %v13163_v17, %v4581_v55  ;;  %v4585_v43 = vsel %vm16619_vm9, %v4583_v53, %v4584_v19  ;;  %v13237_v12 = vld [vmem:[%s15072_s19 + $0x144] sm:$0x1]  ;;  %v13140_v19 = vld [vmem:[%s15072_s19 + $0x1f8] sm:$0x8] }
 0x3ca   : > { %v17044_v6 = vpop.f32.mrf.mxu0  ;;  %13300 = vmatmul.msk.bf16.gmra.mxu2 %vm564_vm3, %v5166_v42  ;;  %v4641_v51 = vunpack.c.l.b16 %v4582_v11  ;;  %v4642_v7 = vunpack.c.l.b16 %v4585_v43  ;;  %v5052_v61 = vrot.slane %v5050_v36, 4  ;;  %v5053_v55 = vrot.slane %v13237_v12, 5  ;;  %v20838_v12 = vld [vmem:[#allocation9_spill] sm:$0xff] }
 0x3cb   : > { %v4115_v5 = vadd.f32 %v16684_v50, %v4046_v24  ;;  %v13141_v24 = vld [vmem:[%s15072_s19 + $0x1fc] sm:$0xf]  ;;  %v13164_v11 = vrot.slane %v13140_v19, 11  ;;  %v13144_v19 = vld [vmem:[%s15072_s19 + $0x218] sm:$0xf] }
 0x3cc   : > { %v17049_v8 = vpop.f32.mrf.mxu3  ;;  %v4662_v10 = vpack.c.b16 %v4642_v7, %v4641_v51  ;;  %v5054_v60 = vsel %vm15074_vm2, %v5052_v61, %v5053_v55  ;;  %v13239_v55 = vld [vmem:[%s15072_s19 + $0x15c] sm:$0xf] }
 0x3cd   : > { %20834 = vst [vmem:[#allocation56_spill] sm:$0xff] %v17049_v8  ;;  %v4147_v4 = vmax.f32 %v4115_v5, 0.0  ;;  %v5141_v53 = vunpack.c.l.b16 %v5054_v60  ;;  %v13142_v5 = vld [vmem:[%s15072_s19 + $0x200] sm:$0x7] }
 0x3ce   : > { %v3731_v62 = vpop.f32.mrf.mxu1  ;;  %v4591_v43 = vrot.slane %v13142_v5, 7  ;;  %v13240_v60 = vld [vmem:[%s15072_s19 + $0x160] sm:$0x1] }
 0x3cf   : > { %v4169_v39 = vpack.c.bf16 %v4147_v4, %v4146_v0  ;;  %v3781_v31 = vadd.f32 %v3731_v62, %v16724_v29  ;;  %v13235_v29 = vld [vmem:[%s15072_s19 + $0x13c] sm:$0xe]  ;;  %v17086_v0 = vld [vmem:[%s20727_s4 + $0x1] ss:$0 sm:$0xff] }
 0x3d0   : > { %v17062_v44 = vpop.f32.mrf.mxu2  ;;  %v13273_v40 = vrot.slane %v13235_v29, 9 }
 0x3d1   : > { %13093 = vmatmul.msk.bf16.gmra.mxu3 %vm564_vm3, %v4169_v39  ;;  %13206 = vmatmul.msk.bf16.gmra.mxu1 %vm564_vm3, %v20835_v27  ;;  %v4047_v54 = vadd.f32 %v16969_v52, %v3781_v31  ;;  %v4588_v52 = vrot.slane %v13141_v24, 7  ;;  %v5057_v24 = vrot.slane %v13239_v55, 5 }
 0x3d2   : > { %v17060_v23 = vpop.f32.mrf.mxu0  ;;  %v5051_v3 = vsel %vm15074_vm2, %v13273_v40, %v5050_v36 }
 0x3d3   : > { %v4116_v32 = vadd.f32 %v16684_v50, %v4047_v54  ;;  %v5140_v17 = vunpack.c.l.b16 %v5051_v3  ;;  %v4589_v7 = vsel %vm16619_vm9, %v13164_v11, %v4588_v52 }
 0x3d4   : > { %v17065_v41 = vpop.f32.mrf.mxu3 }
 0x3d5   : > { %20836 = vst [vmem:[#allocation57_spill] sm:$0xff] %v17065_v41  ;;  %13191 = vmatmul.msk.bf16.gmra.mxu0 %vm564_vm3, %v4662_v10  ;;  %v5167_v50 = vpack.c.b16 %v5141_v53, %v5140_v17  ;;  %v4148_v39 = vmax.f32 %v4116_v32, 0.0  ;;  %v4643_v10 = vunpack.c.l.b16 %v4589_v7  ;;  %v5060_v17 = vrot.slane %v13240_v60, 5  ;;  %v13143_v7 = vld [vmem:[%s15072_s19 + $0x214] sm:$0x8] }
 0x3d6   : > { %v3733_v57 = vpop.f32.mrf.mxu1  ;;  %v13496_v41 = vld [vmem:[%s15072_s19 + $0x204] sm:$0x8] }
 0x3d7   : > { %v3782_v9 = vadd.f32 %v3733_v57, %v16746_v1  ;;  %v4590_v1 = vrot.slane %v4588_v52, 4 }
 0x3d8   : > { %v17089_v51 = vpop.f32.mrf.mxu2 }
 0x3d9   : > { %v4048_v56 = vadd.f32 %v16986_v63, %v3782_v9  ;;  %v4592_v62 = vsel %vm16619_vm9, %v4590_v1, %v4591_v43 }
 0x3da   : > { %v17081_v42 = vpop.f32.mrf.mxu0  ;;  %13301 = vmatmul.msk.bf16.gmra.mxu2 %vm564_vm3, %v5167_v50  ;;  %v4644_v16 = vunpack.c.l.b16 %v4592_v62  ;;  %v13145_v62 = vld [vmem:[%s15072_s19 + $0x21c] sm:$0x7] }
 0x3db   : > { %v4117_v4 = vadd.f32 %v17086_v0, %v4048_v56  ;;  %v5059_v56 = vrot.slane %v5057_v24, 4 }
 0x3dc   : > { %v17091_v63 = vpop.f32.mrf.mxu3  ;;  %v4663_v57 = vpack.c.b16 %v4644_v16, %v4643_v10  ;;  %v4598_v10 = vrot.slane %v13145_v62, 7 }
 0x3dd   : > { %20837 = vst [vmem:[#allocation58_spill] sm:$0xff] %v17091_v63  ;;  %v4149_v31 = vmax.f32 %v4117_v4, 0.0  ;;  %v5061_v11 = vsel %vm15074_vm2, %v5059_v56, %v5060_v17  ;;  %v20841_v56 = vld [vmem:[#allocation10_spill] sm:$0xff] }
 0x3de   : > { %v3736_v36 = vpop.f32.mrf.mxu1  ;;  %v5143_v50 = vunpack.c.l.b16 %v5061_v11 }
 0x3df   : > { %v4170_v54 = vpack.c.bf16 %v4149_v31, %v4148_v39  ;;  %v3783_v29 = vadd.f32 %v3736_v36, %v16760_v18  ;;  %v13238_v18 = vld [vmem:[%s15072_s19 + $0x158] sm:$0xe]  ;;  %v13165_v31 = vrot.slane %v13143_v7, 11 }
 0x3e0   : > { %v17104_v61 = vpop.f32.mrf.mxu2  ;;  %v13274_v32 = vrot.slane %v13238_v18, 9 }
 0x3e1   : > { %13094 = vmatmul.msk.bf16.gmra.mxu3 %vm564_vm3, %v4170_v54  ;;  %13207 = vmatmul.msk.bf16.gmra.mxu1 %vm564_vm3, %v20838_v12  ;;  %v4049_v3 = vadd.f32 %v17009_v26, %v3783_v29  ;;  %v4595_v26 = vrot.slane %v13144_v19, 7  ;;  %v13242_v19 = vld [vmem:[%s15072_s19 + $0x178] sm:$0xf] }
 0x3e2   : > { %v17102_v40 = vpop.f32.mrf.mxu0  ;;  %v5058_v5 = vsel %vm15074_vm2, %v13274_v32, %v5057_v24 }
 0x3e3   : > { %v4118_v1 = vadd.f32 %v17086_v0, %v4049_v3  ;;  %v5142_v4 = vunpack.c.l.b16 %v5058_v5 }
 0x3e4   : > { %v17107_v9 = vpop.f32.mrf.mxu3 }
 0x3e5   : > { %20839 = vst [vmem:[#allocation59_spill] sm:$0xff] %v17107_v9  ;;  %13192 = vmatmul.msk.bf16.gmra.mxu0 %vm564_vm3, %v4663_v57  ;;  %v5168_v54 = vpack.c.b16 %v5143_v50, %v5142_v4  ;;  %v4150_v55 = vmax.f32 %v4118_v1, 0.0 }
 0x3e6   : > { %v3738_v52 = vpop.f32.mrf.mxu1 }
 0x3e7   : > { %v3784_v53 = vadd.f32 %v3738_v52, %v16782_v58  ;;  %v4597_v58 = vrot.slane %v4595_v26, 4 }
 0x3e8   : > { %v17126_v36 = vpop.f32.mrf.mxu2 }
 0x3e9   : > { %v4050_v43 = vadd.f32 %v17025_v34, %v3784_v53  ;;  %v4596_v34 = vsel %vm16619_vm9, %v13165_v31, %v4595_v26  ;;  %v4599_v57 = vsel %vm16619_vm9, %v4597_v58, %v4598_v10  ;;  %v5064_v26 = vrot.slane %v13242_v19, 5  ;;  %v13147_v58 = vld [vmem:[%s15072_s19 + $0x234] sm:$0xf] }
 0x3ea   : > { %v17123_v39 = vpop.f32.mrf.mxu0  ;;  %13302 = vmatmul.msk.bf16.gmra.mxu2 %vm564_vm3, %v5168_v54  ;;  %v4645_v3 = vunpack.c.l.b16 %v4596_v34  ;;  %v4646_v18 = vunpack.c.l.b16 %v4599_v57 }
 0x3eb   : > { %v4119_v16 = vadd.f32 %v17086_v0, %v4050_v43  ;;  %v13243_v43 = vld [vmem:[%s15072_s19 + $0x17c] sm:$0x1]  ;;  %v5066_v7 = vrot.slane %v5064_v26, 4 }
 0x3ec   : > { %v17128_v29 = vpop.f32.mrf.mxu3  ;;  %v4664_v17 = vpack.c.b16 %v4646_v18, %v4645_v3  ;;  %v5067_v62 = vrot.slane %v13243_v43, 5  ;;  %v13148_v3 = vld [vmem:[%s15072_s19 + $0x238] sm:$0x7] }
 0x3ed   : > { %20840 = vst [vmem:[#allocation60_spill] sm:$0xff] %v17128_v29  ;;  %v4151_v24 = vmax.f32 %v4119_v16, 0.0 }
 0x3ee   : > { %v3741_v60 = vpop.f32.mrf.mxu1  ;;  %v5068_v16 = vsel %vm15074_vm2, %v5066_v7, %v5067_v62 }
 0x3ef   : > { %v4171_v52 = vpack.c.bf16 %v4151_v24, %v4150_v55  ;;  %v3785_v32 = vadd.f32 %v3741_v60, %v16796_v47  ;;  %v13241_v47 = vld [vmem:[%s15072_s19 + $0x174] sm:$0xe]  ;;  %v5145_v55 = vunpack.c.l.b16 %v5068_v16  ;;  %v13146_v24 = vld [vmem:[%s15072_s19 + $0x230] sm:$0x8] }
 0x3f0   : > { %v17144_v11 = vpop.f32.mrf.mxu2  ;;  %v13275_v50 = vrot.slane %v13241_v47, 9  ;;  %v13166_v60 = vrot.slane %v13146_v24, 11 }
 0x3f1   : > { %13095 = vmatmul.msk.bf16.gmra.mxu3 %vm564_vm3, %v4171_v52  ;;  %13208 = vmatmul.msk.bf16.gmra.mxu1 %vm564_vm3, %v20841_v56  ;;  %v4051_v1 = vadd.f32 %v17047_v22, %v3785_v32  ;;  %v4602_v22 = vrot.slane %v13147_v58, 7  ;;  %v4605_v52 = vrot.slane %v13148_v3, 7  ;;  %v20844_v58 = vld [vmem:[#allocation11_spill] sm:$0xff] }
 0x3f2   : > { %v17139_v53 = vpop.f32.mrf.mxu0  ;;  %v5065_v10 = vsel %vm15074_vm2, %v13275_v50, %v5064_v26 }
 0x3f3   : > { %v4120_v54 = vadd.f32 %v17086_v0, %v4051_v1  ;;  %v5144_v57 = vunpack.c.l.b16 %v5065_v10  ;;  %v4603_v26 = vsel %vm16619_vm9, %v13166_v60, %v4602_v22 }
 0x3f4   : > { %v17142_v5 = vpop.f32.mrf.mxu3  ;;  %v4647_v43 = vunpack.c.l.b16 %v4603_v26 }
 0x3f5   : > { %20842 = vst [vmem:[#allocation61_spill] sm:$0xff] %v17142_v5  ;;  %13193 = vmatmul.msk.bf16.gmra.mxu0 %vm564_vm3, %v4664_v17  ;;  %v5169_v17 = vpack.c.b16 %v5145_v55, %v5144_v57  ;;  %v4152_v1 = vmax.f32 %v4120_v54, 0.0  ;;  %v13244_v55 = vld [vmem:[%s15072_s19 + $0x190] sm:$0xe] }
 0x3f6   : > { %v3743_v4 = vpop.f32.mrf.mxu1  ;;  %v13276_v3 = vrot.slane %v13244_v55, 9 }
 0x3f7   : > { %v3786_v31 = vadd.f32 %v3743_v4, %v16818_v21  ;;  %v4604_v21 = vrot.slane %v4602_v22, 4  ;;  %v13245_v22 = vld [vmem:[%s15072_s19 + $0x194] sm:$0xf] }
 0x3f8   : > { %v17170_v7 = vpop.f32.mrf.mxu2 }
 0x3f9   : > { %v4052_v34 = vadd.f32 %v17062_v44, %v3786_v31  ;;  %v4606_v44 = vsel %vm16619_vm9, %v4604_v21, %v4605_v52 }
 0x3fa   : > { %v17160_v18 = vpop.f32.mrf.mxu0  ;;  %13303 = vmatmul.msk.bf16.gmra.mxu2 %vm564_vm3, %v5169_v17  ;;  %v4648_v4 = vunpack.c.l.b16 %v4606_v44 }
 0x3fb   : > { %v4121_v32 = vadd.f32 %v17086_v0, %v4052_v34  ;;  %v5071_v34 = vrot.slane %v13245_v22, 5 }
 0x3fc   : > { %v17163_v19 = vpop.f32.mrf.mxu3  ;;  %v4665_v10 = vpack.c.b16 %v4648_v4, %v4647_v43 }
 0x3fd   : > { %20843 = vst [vmem:[#allocation62_spill] sm:$0xff] %v17163_v19  ;;  %v4153_v47 = vmax.f32 %v4121_v32, 0.0  ;;  %v5073_v60 = vrot.slane %v5071_v34, 4  ;;  %v13150_v32 = vld [vmem:[%s15072_s19 + $0x250] sm:$0xf]  ;;  %v5072_v26 = vsel %vm15074_vm2, %v13276_v3, %v5071_v34 }
 0x3fe   : > { %v3746_v50 = vpop.f32.mrf.mxu1  ;;  %v4609_v44 = vrot.slane %v13150_v32, 7  ;;  %v5146_v43 = vunpack.c.l.b16 %v5072_v26 }
 0x3ff   : > { %v4172_v62 = vpack.c.bf16 %v4153_v47, %v4152_v1  ;;  %v3787_v31 = vadd.f32 %v3746_v50, %v16832_v37  ;;  %v13246_v37 = vld [vmem:[%s15072_s19 + $0x198] sm:$0x1]  ;;  %v13149_v50 = vld [vmem:[%s15072_s19 + $0x24c] sm:$0x8] }
 0x400   : > { %v5074_v21 = vrot.slane %v13246_v37, 5  ;;  %v17187_v17 = vpop.f32.mrf.mxu2 }
 0x401   : > { %13096 = vmatmul.msk.bf16.gmra.mxu3 %vm564_vm3, %v4172_v62  ;;  %13209 = vmatmul.msk.bf16.gmra.mxu1 %vm564_vm3, %v20844_v58  ;;  %v4053_v57 = vadd.f32 %v17089_v51, %v3787_v31  ;;  %v13151_v62 = vld [vmem:[%s15072_s19 + $0x254] sm:$0x7] }
 0x402   : > { %v17176_v16 = vpop.f32.mrf.mxu0  ;;  %v5075_v51 = vsel %vm15074_vm2, %v5073_v60, %v5074_v21  ;;  %v4612_v22 = vrot.slane %v13151_v62, 7 }
 0x403   : > { %v4122_v1 = vadd.f32 %v17086_v0, %v4053_v57  ;;  %v5147_v4 = vunpack.c.l.b16 %v5075_v51 }
 0x404   : > { %v17179_v54 = vpop.f32.mrf.mxu3 }
 0x405   : > { %20845 = vst [vmem:[#allocation63_spill] sm:$0xff] %v17179_v54  ;;  %13194 = vmatmul.msk.bf16.gmra.mxu0 %vm564_vm3, %v4665_v10  ;;  %v4611_v10 = vrot.slane %v4609_v44, 4  ;;  %v5170_v34 = vpack.c.b16 %v5147_v4, %v5146_v43  ;;  %v13248_v43 = vld [vmem:[%s15072_s19 + $0x1b0] sm:$0xf] }
 0x406   : > { %v3748_v24 = vpop.f32.mrf.mxu1 }
 0x407   : > { %v3788_v52 = vadd.f32 %v3748_v24, %v16854_v30  ;;  %v13167_v30 = vrot.slane %v13149_v50, 11  ;;  %v4154_v24 = vmax.f32 %v4122_v1, 0.0  ;;  %v5078_v50 = vrot.slane %v13248_v43, 5 }
 0x409   : > { %v4054_v47 = vadd.f32 %v17104_v61, %v3788_v52  ;;  %v4610_v57 = vsel %vm16619_vm9, %v13167_v30, %v4609_v44  ;;  %v4613_v61 = vsel %vm16619_vm9, %v4611_v10, %v4612_v22  ;;  %v20847_v44 = vld [vmem:[#allocation13_spill] sm:$0xff]  ;;  %v13247_v30 = vld [vmem:[%s15072_s19 + $0x1ac] sm:$0xe] }
 0x40a   : > { %v17197_v31 = vpop.f32.mrf.mxu0  ;;  %13304 = vmatmul.msk.bf16.gmra.mxu2 %vm564_vm3, %v5170_v34  ;;  %v4649_v60 = vunpack.c.l.b16 %v4610_v57  ;;  %v4650_v21 = vunpack.c.l.b16 %v4613_v61  ;;  %v13277_v22 = vrot.slane %v13247_v30, 9  ;;  %v13405_v61 = vld [vmem:[%s15072_s19 + $0x1fc] sm:$0xf] }
 0x40b   : > { %v4123_v55 = vadd.f32 %v17086_v0, %v4054_v47 }
 0x40c   : > { %v17200_v37 = vpop.f32.mrf.mxu3  ;;  %v4666_v1 = vpack.c.b16 %v4650_v21, %v4649_v60  ;;  %v5899_v60 = vrot.slane %v13405_v61, 7 }
 0x40d   : > { %20846 = vst [vmem:[#allocation64_spill] sm:$0xff] %v17200_v37  ;;  %v4155_v3 = vmax.f32 %v4123_v55, 0.0  ;;  %v17207_v26 = vpop.f32.mrf.mxu2  ;;  %v5080_v55 = vrot.slane %v5078_v50, 4 }
 0x40e   : > { %v3751_v52 = vpop.f32.mrf.mxu1  ;;  %v5901_v38 = vrot.slane %v5899_v60, 4 }
 0x40f   : > { %v4173_v32 = vpack.c.bf16 %v4155_v3, %v4154_v24  ;;  %v3789_v51 = vadd.f32 %v3751_v52, %v16868_v28  ;;  %v13249_v28 = vld [vmem:[%s15072_s19 + $0x1b4] sm:$0x1]  ;;  %v5079_v3 = vsel %vm15074_vm2, %v13277_v22, %v5078_v50 }
 0x410   : > { %v5081_v34 = vrot.slane %v13249_v28, 5 }
 0x411   : > { %13097 = vmatmul.msk.bf16.gmra.mxu3 %vm564_vm3, %v4173_v32  ;;  %13210 = vmatmul.msk.bf16.gmra.mxu1 %vm564_vm3, %v20847_v44  ;;  %v4055_v62 = vadd.f32 %v17126_v36, %v3789_v51  ;;  %v5148_v32 = vunpack.c.l.b16 %v5079_v3 }
 0x412   : > { %v17213_v47 = vpop.f32.mrf.mxu0  ;;  %v5082_v36 = vsel %vm15074_vm2, %v5080_v55, %v5081_v34 }
 0x413   : > { %v4124_v21 = vadd.f32 %v17086_v0, %v4055_v62  ;;  %v5149_v51 = vunpack.c.l.b16 %v5082_v36 }
 0x414   : > { %v17216_v4 = vpop.f32.mrf.mxu3 }
 0x415   : > { %20848 = vst [vmem:[#allocation65_spill] sm:$0xff] %v17216_v4  ;;  %13195 = vmatmul.msk.bf16.gmra.mxu0 %vm564_vm3, %v4666_v1  ;;  %v17224_v24 = vpop.f32.mrf.mxu2  ;;  %v13404_v1 = vld [vmem:[%s15072_s19 + $0x1f8] sm:$0x8]  ;;  %v4156_v62 = vmax.f32 %v4124_v21, 0.0 }
 0x416   : > { %v3753_v10 = vpop.f32.mrf.mxu1  ;;  %v13452_v30 = vrot.slane %v13404_v1, 11  ;;  %v13251_v1 = vld [vmem:[%s15072_s19 + $0x1cc] sm:$0xf] }
 0x417   : > { %v3790_v57 = vadd.f32 %v3753_v10, %v16895_v49  ;;  %v13406_v49 = vld [vmem:[%s15072_s19 + $0x200] sm:$0x7]  ;;  %v5171_v10 = vpack.c.b16 %v5149_v51, %v5148_v32 }
 0x418   : > { %v5902_v50 = vrot.slane %v13406_v49, 7  ;;  %v5900_v55 = vsel %vm16619_vm9, %v13452_v30, %v5899_v60  ;;  %v20850_v60 = vld [vmem:[#allocation14_spill] sm:$0xff]  ;;  %v5085_v30 = vrot.slane %v13251_v1, 5 }
 0x419   : > { %v4056_v52 = vadd.f32 %v17144_v11, %v3790_v57  ;;  %v6014_v61 = vunpack.c.l.b16 %v5900_v55 }
 0x41a   : > { %v17233_v43 = vpop.f32.mrf.mxu0  ;;  %13305 = vmatmul.msk.bf16.gmra.mxu2 %vm564_vm3, %v5171_v10  ;;  %v5903_v57 = vsel %vm16619_vm9, %v5901_v38, %v5902_v50  ;;  %v14746_v38 = vld [vmem:[%s20725_s2 + $0x108] sm:$0xff]  ;;  %v13252_v10 = vld [vmem:[%s15072_s19 + $0x1d0] sm:$0x1] }
 0x41b   : > { %v4125_v28 = vadd.f32 %v17086_v0, %v4056_v52  ;;  %v6015_v36 = vunpack.c.l.b16 %v5903_v57  ;;  %7458 = vmatpush.bf16.msra.mxu3 %v14746_v38  ;;  %v13408_v57 = vld [vmem:[%s15072_s19 + $0x218] sm:$0xf] }
 0x41c   : > { %v17237_v22 = vpop.f32.mrf.mxu3  ;;  %v14748_v38 = vld [vmem:[%s20725_s2 + $0x118] sm:$0xff] }
 0x41d   : > { %20849 = vst [vmem:[#allocation66_spill] sm:$0xff] %v17237_v22  ;;  %v4157_v11 = vmax.f32 %v4125_v28, 0.0  ;;  %v17244_v52 = vpop.f32.mrf.mxu2  ;;  %v6046_v21 = vpack.c.b16 %v6015_v36, %v6014_v61  ;;  %v13250_v28 = vld [vmem:[%s15072_s19 + $0x1c8] sm:$0xe]  ;;  %v5906_v36 = vrot.slane %v13408_v57, 7  ;;  %7900 = vmatpush.bf16.msrb.mxu0 %v14748_v38 }
 0x41e   : > { %v3756_v34 = vpop.f32.mrf.mxu1  ;;  %v13278_v55 = vrot.slane %v13250_v28, 9 }
 0x41f   : > { %v4174_v3 = vpack.c.bf16 %v4157_v11, %v4156_v62  ;;  %v3791_v32 = vadd.f32 %v3756_v34, %v16910_v33  ;;  %v5087_v62 = vrot.slane %v5085_v30, 4  ;;  %v5088_v11 = vrot.slane %v13252_v10, 5  ;;  %v13407_v10 = vld [vmem:[%s15072_s19 + $0x214] sm:$0x8] }
 0x421   : > { %13098 = vmatmul.msk.bf16.gmra.mxu3 %vm564_vm3, %v4174_v3  ;;  %13211 = vmatmul.msk.bf16.gmra.mxu1 %vm564_vm3, %v20850_v60  ;;  %v4057_v33 = vadd.f32 %v17170_v7, %v3791_v32  ;;  %v5086_v3 = vsel %vm15074_vm2, %v13278_v55, %v5085_v30  ;;  %v5089_v7 = vsel %vm15074_vm2, %v5087_v62, %v5088_v11  ;;  %v13313_v55 = vld [vmem:[%s15072_s19 + $0xb8] sm:$0xf]  ;;  %v13453_v11 = vrot.slane %v13407_v10, 11 }
 0x422   : > { %v17253_v51 = vpop.f32.mrf.mxu0  ;;  %v5151_v1 = vunpack.c.l.b16 %v5089_v7  ;;  %v13312_v7 = vld [vmem:[%s15072_s19 + $0xb4] sm:$0x8]  ;;  %v5457_v60 = vrot.slane %v13313_v55, 7 }
 0x423   : > { %v4126_v32 = vadd.f32 %v17086_v0, %v4057_v33  ;;  %v13409_v33 = vld [vmem:[%s15072_s19 + $0x21c] sm:$0x7]  ;;  %v5907_v22 = vsel %vm16619_vm9, %v13453_v11, %v5906_v36 }
 0x424   : > { %v17256_v49 = vpop.f32.mrf.mxu3 }
 0x425   : > { %20851 = vst [vmem:[#allocation67_spill] sm:$0xff] %v17256_v49  ;;  %13480 = vmatmul.msk.bf16.vlgmr.msra.gmra.mxu0 %vm564_vm3, %v6046_v21  ;;  %v17264_v61 = vpop.f32.mrf.mxu2  ;;  %v4158_v57 = vmax.f32 %v4126_v32, 0.0 }
 0x426   : > { %v3758_v50 = vpop.f32.mrf.mxu1 }
 0x427   : > { %v3792_v34 = vadd.f32 %v3758_v50, %v16935_v25  ;;  %v5150_v25 = vunpack.c.l.b16 %v5086_v3  ;;  %v5908_v50 = vrot.slane %v5906_v36, 4  ;;  %v20853_v36 = vld [vmem:[#allocation15_spill] sm:$0xff] }
 0x429   : > { %v4058_v21 = vadd.f32 %v17187_v17, %v3792_v34  ;;  %v5172_v62 = vpack.c.b16 %v5151_v1, %v5150_v25  ;;  %v5909_v34 = vrot.slane %v13409_v33, 7  ;;  %v13314_v25 = vld [vmem:[%s15072_s19 + $0xbc] sm:$0x7]  ;;  %v6016_v1 = vunpack.c.l.b16 %v5907_v22 }
 0x42a   : > { %v17275_v28 = vpop.f32.mrf.mxu0  ;;  %v5460_v22 = vrot.slane %v13314_v25, 7 }
 0x42b   : > { %v4127_v30 = vadd.f32 %v17086_v0, %v4058_v21  ;;  %13306 = vmatmul.msk.bf16.gmra.mxu2 %vm564_vm3, %v5172_v62  ;;  %v5910_v0 = vsel %vm16619_vm9, %v5908_v50, %v5909_v34  ;;  %v13360_v50 = vrot.slane %v13312_v7, 11 }
 0x42c   : > { %v17281_v17 = vpop.f32.mrf.mxu3  ;;  %v6017_v32 = vunpack.c.l.b16 %v5910_v0 }
 0x42d   : > { %20852 = vst [vmem:[#allocation68_spill] sm:$0xff] %v17281_v17  ;;  %v4159_v49 = vmax.f32 %v4127_v30, 0.0  ;;  %v17291_v10 = vpop.f32.mrf.mxu2  ;;  %v5458_v34 = vsel %vm16619_vm9, %v13360_v50, %v5457_v60  ;;  %v13316_v17 = vld [vmem:[%s15072_s19 + $0xd4] sm:$0xf] }
 0x42e   : > { %v4837_v3 = vpop.f32.mrf.mxu1  ;;  %v6047_v62 = vpack.c.b16 %v6017_v32, %v6016_v1  ;;  %v14741_v32 = vld [vmem:[%s20725_s2 + $0xe0] sm:$0xff]  ;;  %v5572_v50 = vunpack.c.l.b16 %v5458_v34  ;;  %v13412_v34 = vld [vmem:[%s15072_s19 + $0x238] sm:$0x7] }
 0x42f   : > { %v4838_v21 = vadd.f32 %v4837_v3, %v16945_v35  ;;  %v4175_v38 = vpack.c.bf16 %v4159_v49, %v4158_v57  ;;  %v14743_v35 = vld [vmem:[%s20725_s2 + $0xf0] sm:$0xff]  ;;  %v5459_v49 = vrot.slane %v5457_v60, 4  ;;  %v13253_v57 = vld [vmem:[%s15072_s19 + $0x1e4] sm:$0xe]  ;;  %v13255_v3 = vld [vmem:[%s15072_s19 + $0x1ec] sm:$0x1]  ;;  %6571 = vmatpush.bf16.msra.mxu1 %v14741_v32 }
 0x430   : > { %7017 = vmatpush.bf16.msra.mxu2 %v14743_v35  ;;  %v5095_v25 = vrot.slane %v13255_v3, 5  ;;  %v13411_v60 = vld [vmem:[%s15072_s19 + $0x234] sm:$0xf]  ;;  %v5916_v4 = vrot.slane %v13412_v34, 7  ;;  %v13315_v32 = vld [vmem:[%s15072_s19 + $0xd0] sm:$0x8] }
 0x431   : > { %v17294_v30 = vadd.f32 %v17207_v26, %v4838_v21  ;;  %13099 = vmatmul.msk.bf16.gmra.mxu3 %vm564_vm3, %v4175_v38  ;;  %13212 = vmatmul.msk.bf16.gmra.mxu1 %vm564_vm3, %v20853_v36  ;;  %v13254_v26 = vld [vmem:[%s15072_s19 + $0x1e8] sm:$0xf]  ;;  %v5461_v0 = vsel %vm16619_vm9, %v5459_v49, %v5460_v22  ;;  %v13279_v21 = vrot.slane %v13253_v57, 9  ;;  %v5913_v22 = vrot.slane %v13411_v60, 7 }
 0x432   : > { %v17302_v55 = vpop.f32.mrf.mxu0  ;;  %v5092_v11 = vrot.slane %v13254_v26, 5  ;;  %v5464_v60 = vrot.slane %v13316_v17, 7 }
 0x434   : > { %v17305_v33 = vpop.f32.mrf.mxu3  ;;  %v5094_v38 = vrot.slane %v5092_v11, 4  ;;  %v5466_v17 = vrot.slane %v5464_v60, 4 }
 0x435   : > { %20854 = vst [vmem:[#allocation69_spill] sm:$0xff] %v17305_v33  ;;  %13481 = vmatmul.msk.bf16.gmra.mxu0 %vm564_vm3, %v6047_v62  ;;  %v17319_v35 = vpop.f32.mrf.mxu2  ;;  %v5093_v62 = vsel %vm15074_vm2, %v13279_v21, %v5092_v11  ;;  %v5915_v21 = vrot.slane %v5913_v22, 4 }
 0x436   : > { %v4839_v7 = vpop.f32.mrf.mxu1  ;;  %v5096_v49 = vsel %vm15074_vm2, %v5094_v38, %v5095_v25  ;;  %v5152_v57 = vunpack.c.l.b16 %v5093_v62 }
 0x437   : > { %v4840_v1 = vadd.f32 %v4839_v7, %v16967_v14  ;;  %v5573_v14 = vunpack.c.l.b16 %v5461_v0  ;;  %v5153_v3 = vunpack.c.l.b16 %v5096_v49  ;;  %v13410_v7 = vld [vmem:[%s15072_s19 + $0x230] sm:$0x8]  ;;  %v5917_v25 = vsel %vm16619_vm9, %v5915_v21, %v5916_v4 }
 0x438   : > { %v13454_v36 = vrot.slane %v13410_v7, 11  ;;  %v6019_v49 = vunpack.c.l.b16 %v5917_v25  ;;  %v13361_v4 = vrot.slane %v13315_v32, 11  ;;  %v13258_v25 = vld [vmem:[%s15072_s19 + $0x208] sm:$0x1] }
 0x439   : > { %v17326_v26 = vadd.f32 %v17224_v24, %v4840_v1  ;;  %v5173_v11 = vpack.c.b16 %v5153_v3, %v5152_v57  ;;  %v5604_v0 = vpack.c.b16 %v5573_v14, %v5572_v50  ;;  %v13317_v3 = vld [vmem:[%s15072_s19 + $0xd8] sm:$0x7]  ;;  %v20856_v50 = vld [vmem:[#allocation16_spill] sm:$0xff] }
 0x43a   : > { %v17329_v33 = vpop.f32.mrf.mxu0  ;;  %v5914_v24 = vsel %vm16619_vm9, %v13454_v36, %v5913_v22  ;;  %v5467_v14 = vrot.slane %v13317_v3, 7  ;;  %v13414_v3 = vld [vmem:[%s15072_s19 + $0x250] sm:$0xf] }
 0x43b   : > { %13307 = vmatmul.msk.bf16.gmra.mxu2 %vm564_vm3, %v5173_v11  ;;  %v6018_v62 = vunpack.c.l.b16 %v5914_v24  ;;  %v13256_v24 = vld [vmem:[%s15072_s19 + $0x200] sm:$0xe] }
 0x43c   : > { %v17333_v38 = vpop.f32.mrf.mxu3  ;;  %v13280_v32 = vrot.slane %v13256_v24, 9 }
 0x43d   : > { %20855 = vst [vmem:[#allocation70_spill] sm:$0xff] %v17333_v38  ;;  %v17343_v7 = vpop.f32.mrf.mxu2  ;;  %v6048_v22 = vpack.c.b16 %v6019_v49, %v6018_v62  ;;  %v5102_v49 = vrot.slane %v13258_v25, 5  ;;  %v13319_v38 = vld [vmem:[%s15072_s19 + $0xf0] sm:$0xf] }
 0x43e   : > { %v4842_v1 = vpop.f32.mrf.mxu1 }
 0x43f   : > { %v4843_v57 = vadd.f32 %v4842_v1, %v16984_v48  ;;  %v13257_v48 = vld [vmem:[%s15072_s19 + $0x204] sm:$0xf] }
 0x440   : > { %v5099_v21 = vrot.slane %v13257_v48, 5 }
 0x441   : > { %v17346_v36 = vadd.f32 %v17244_v52, %v4843_v57  ;;  %13213 = vmatmul.msk.bf16.gmra.mxu1 %vm564_vm3, %v20856_v50  ;;  %13388 = vmatmul.msk.bf16.vlgmr.msrb.gmra.mxu3 %vm564_vm3, %v5604_v0  ;;  %v5465_v52 = vsel %vm16619_vm9, %v13361_v4, %v5464_v60  ;;  %v5468_v0 = vsel %vm16619_vm9, %v5466_v17, %v5467_v14  ;;  %v13413_v50 = vld [vmem:[%s15072_s19 + $0x24c] sm:$0x8] }
 0x442   : > { %v17351_v34 = vpop.f32.mrf.mxu0  ;;  %v5101_v62 = vrot.slane %v5099_v21, 4  ;;  %v5574_v48 = vunpack.c.l.b16 %v5465_v52  ;;  %v5100_v60 = vsel %vm15074_vm2, %v13280_v32, %v5099_v21  ;;  %v5575_v14 = vunpack.c.l.b16 %v5468_v0  ;;  %v13415_v52 = vld [vmem:[%s15072_s19 + $0x254] sm:$0x7] }
 0x443   : > { %v5154_v24 = vunpack.c.l.b16 %v5100_v60  ;;  %v5923_v32 = vrot.slane %v13415_v52, 7 }
 0x444   : > { %v17354_v11 = vpop.f32.mrf.mxu3  ;;  %v5103_v4 = vsel %vm15074_vm2, %v5101_v62, %v5102_v49  ;;  %v5605_v62 = vpack.c.b16 %v5575_v14, %v5574_v48 }
 0x445   : > { %20857 = vst [vmem:[#allocation71_spill] sm:$0xff] %v17354_v11  ;;  %13482 = vmatmul.msk.bf16.gmra.mxu0 %vm564_vm3, %v6048_v22  ;;  %v17365_v11 = vpop.f32.mrf.mxu2  ;;  %v5920_v22 = vrot.slane %v13414_v3, 7  ;;  %v5155_v25 = vunpack.c.l.b16 %v5103_v4 }
 0x446   : > { %v4844_v1 = vpop.f32.mrf.mxu1 }
 0x447   : > { %v4845_v57 = vadd.f32 %v4844_v1, %v17006_v15  ;;  %v13455_v1 = vrot.slane %v13413_v50, 11  ;;  %v5174_v44 = vpack.c.b16 %v5155_v25, %v5154_v24  ;;  %v5922_v21 = vrot.slane %v5920_v22, 4  ;;  %v13320_v24 = vld [vmem:[%s15072_s19 + $0xf4] sm:$0x7] }
 0x448   : > { %v5471_v50 = vrot.slane %v13319_v38, 7  ;;  %v5474_v52 = vrot.slane %v13320_v24, 7  ;;  %v13417_v24 = vld [vmem:[%s15072_s19 + $0x26c] sm:$0xf] }
 0x449   : > { %v17372_v17 = vadd.f32 %v17264_v61, %v4845_v57  ;;  %v5921_v61 = vsel %vm16619_vm9, %v13455_v1, %v5920_v22  ;;  %v5924_v0 = vsel %vm16619_vm9, %v5922_v21, %v5923_v32  ;;  %v13318_v57 = vld [vmem:[%s15072_s19 + $0xec] sm:$0x8] }
 0x44a   : > { %v17375_v15 = vpop.f32.mrf.mxu0  ;;  %v6020_v3 = vunpack.c.l.b16 %v5921_v61  ;;  %v6021_v60 = vunpack.c.l.b16 %v5924_v0  ;;  %v13362_v22 = vrot.slane %v13318_v57, 11  ;;  %v5473_v38 = vrot.slane %v5471_v50, 4  ;;  %v13259_v61 = vld [vmem:[%s15072_s19 + $0x21c] sm:$0xe]  ;;  %v13261_v0 = vld [vmem:[%s15072_s19 + $0x224] sm:$0x1] }
 0x44b   : > { %13308 = vmatmul.msk.bf16.gmra.mxu2 %vm564_vm3, %v5174_v44  ;;  %v20859_v44 = vld [vmem:[#allocation17_spill] sm:$0xff]  ;;  %v13281_v57 = vrot.slane %v13259_v61, 9 }
 0x44c   : > { %v17379_v37 = vpop.f32.mrf.mxu3  ;;  %v6049_v14 = vpack.c.b16 %v6021_v60, %v6020_v3  ;;  %v5109_v60 = vrot.slane %v13261_v0, 5 }
 0x44d   : > { %20858 = vst [vmem:[#allocation72_spill] sm:$0xff] %v17379_v37  ;;  %v17389_v25 = vpop.f32.mrf.mxu2  ;;  %v13322_v37 = vld [vmem:[%s15072_s19 + $0x10c] sm:$0xf] }
 0x44e   : > { %v4847_v49 = vpop.f32.mrf.mxu1 }
 0x44f   : > { %v4848_v4 = vadd.f32 %v4847_v49, %v17023_v59  ;;  %v13260_v59 = vld [vmem:[%s15072_s19 + $0x220] sm:$0xf] }
 0x450   : > { %v5106_v32 = vrot.slane %v13260_v59, 5 }
 0x451   : > { %v17392_v48 = vadd.f32 %v17291_v10, %v4848_v4  ;;  %13214 = vmatmul.msk.bf16.gmra.mxu1 %vm564_vm3, %v20859_v44  ;;  %13389 = vmatmul.msk.bf16.gmra.mxu3 %vm564_vm3, %v5605_v62  ;;  %v5472_v10 = vsel %vm16619_vm9, %v13362_v22, %v5471_v50  ;;  %v5475_v62 = vsel %vm16619_vm9, %v5473_v38, %v5474_v52  ;;  %v13416_v44 = vld [vmem:[%s15072_s19 + $0x268] sm:$0x8] }
 0x452   : > { %v17397_v1 = vpop.f32.mrf.mxu0  ;;  %v5108_v3 = vrot.slane %v5106_v32, 4  ;;  %v5576_v59 = vunpack.c.l.b16 %v5472_v10  ;;  %v5107_v50 = vsel %vm15074_vm2, %v13281_v57, %v5106_v32  ;;  %v5577_v52 = vunpack.c.l.b16 %v5475_v62  ;;  %v13418_v10 = vld [vmem:[%s15072_s19 + $0x270] sm:$0x7] }
 0x453   : > { %v5156_v61 = vunpack.c.l.b16 %v5107_v50  ;;  %v5930_v57 = vrot.slane %v13418_v10, 7 }
 0x454   : > { %v17400_v21 = vpop.f32.mrf.mxu3  ;;  %v5110_v22 = vsel %vm15074_vm2, %v5108_v3, %v5109_v60  ;;  %v5606_v3 = vpack.c.b16 %v5577_v52, %v5576_v59 }
 0x455   : > { %20860 = vst [vmem:[#allocation73_spill] sm:$0xff] %v17400_v21  ;;  %13483 = vmatmul.msk.bf16.gmra.mxu0 %vm564_vm3, %v6049_v14  ;;  %v17411_v21 = vpop.f32.mrf.mxu2  ;;  %v5927_v14 = vrot.slane %v13417_v24, 7  ;;  %v5157_v0 = vunpack.c.l.b16 %v5110_v22 }
 0x456   : > { %v4849_v49 = vpop.f32.mrf.mxu1 }
 0x457   : > { %v4850_v4 = vadd.f32 %v4849_v49, %v17044_v6  ;;  %v13456_v49 = vrot.slane %v13416_v44, 11  ;;  %v5175_v54 = vpack.c.b16 %v5157_v0, %v5156_v61  ;;  %v5929_v32 = vrot.slane %v5927_v14, 4  ;;  %v13323_v61 = vld [vmem:[%s15072_s19 + $0x110] sm:$0x7] }
 0x458   : > { %v5478_v44 = vrot.slane %v13322_v37, 7  ;;  %v5481_v10 = vrot.slane %v13323_v61, 7  ;;  %v13420_v61 = vld [vmem:[%s15072_s19 + $0x288] sm:$0xf] }
 0x459   : > { %v17418_v38 = vadd.f32 %v17319_v35, %v4850_v4  ;;  %v5928_v35 = vsel %vm16619_vm9, %v13456_v49, %v5927_v14  ;;  %v5931_v62 = vsel %vm16619_vm9, %v5929_v32, %v5930_v57  ;;  %v13321_v4 = vld [vmem:[%s15072_s19 + $0x108] sm:$0x8] }
 0x45a   : > { %v17421_v6 = vpop.f32.mrf.mxu0  ;;  %v6022_v24 = vunpack.c.l.b16 %v5928_v35  ;;  %v6023_v50 = vunpack.c.l.b16 %v5931_v62  ;;  %v13363_v14 = vrot.slane %v13321_v4, 11  ;;  %v5480_v37 = vrot.slane %v5478_v44, 4  ;;  %v13262_v35 = vld [vmem:[%s15072_s19 + $0x238] sm:$0xe]  ;;  %v13264_v62 = vld [vmem:[%s15072_s19 + $0x240] sm:$0x1] }
 0x45b   : > { %13309 = vmatmul.msk.bf16.gmra.mxu2 %vm564_vm3, %v5175_v54  ;;  %v20862_v54 = vld [vmem:[#allocation18_spill] sm:$0xff]  ;;  %v13282_v4 = vrot.slane %v13262_v35, 9 }
 0x45c   : > { %v17425_v58 = vpop.f32.mrf.mxu3  ;;  %v6050_v52 = vpack.c.b16 %v6023_v50, %v6022_v24  ;;  %v5116_v50 = vrot.slane %v13264_v62, 5 }
 0x45d   : > { %20861 = vst [vmem:[#allocation74_spill] sm:$0xff] %v17425_v58  ;;  %v17435_v0 = vpop.f32.mrf.mxu2  ;;  %v13325_v58 = vld [vmem:[%s15072_s19 + $0x128] sm:$0xf] }
 0x45e   : > { %v4852_v60 = vpop.f32.mrf.mxu1 }
 0x45f   : > { %v4853_v22 = vadd.f32 %v4852_v60, %v17060_v23  ;;  %v13263_v23 = vld [vmem:[%s15072_s19 + $0x23c] sm:$0xf] }
 0x460   : > { %v5113_v57 = vrot.slane %v13263_v23, 5 }
 0x461   : > { %v17438_v59 = vadd.f32 %v17343_v7, %v4853_v22  ;;  %13215 = vmatmul.msk.bf16.gmra.mxu1 %vm564_vm3, %v20862_v54  ;;  %13390 = vmatmul.msk.bf16.gmra.mxu3 %vm564_vm3, %v5606_v3  ;;  %v5479_v7 = vsel %vm16619_vm9, %v13363_v14, %v5478_v44  ;;  %v5482_v3 = vsel %vm16619_vm9, %v5480_v37, %v5481_v10  ;;  %v13419_v54 = vld [vmem:[%s15072_s19 + $0x284] sm:$0x8] }
 0x462   : > { %v17443_v49 = vpop.f32.mrf.mxu0  ;;  %v5115_v24 = vrot.slane %v5113_v57, 4  ;;  %v5578_v23 = vunpack.c.l.b16 %v5479_v7  ;;  %v5114_v44 = vsel %vm15074_vm2, %v13282_v4, %v5113_v57  ;;  %v5579_v10 = vunpack.c.l.b16 %v5482_v3  ;;  %v13421_v7 = vld [vmem:[%s15072_s19 + $0x28c] sm:$0x7] }
 0x463   : > { %v5158_v35 = vunpack.c.l.b16 %v5114_v44  ;;  %v5937_v4 = vrot.slane %v13421_v7, 7 }
 0x464   : > { %v17446_v32 = vpop.f32.mrf.mxu3  ;;  %v5117_v14 = vsel %vm15074_vm2, %v5115_v24, %v5116_v50  ;;  %v5607_v24 = vpack.c.b16 %v5579_v10, %v5578_v23 }
 0x465   : > { %20863 = vst [vmem:[#allocation75_spill] sm:$0xff] %v17446_v32  ;;  %13484 = vmatmul.msk.bf16.gmra.mxu0 %vm564_vm3, %v6050_v52  ;;  %v17457_v32 = vpop.f32.mrf.mxu2  ;;  %v5934_v52 = vrot.slane %v13420_v61, 7  ;;  %v5159_v62 = vunpack.c.l.b16 %v5117_v14 }
 0x466   : > { %v4854_v60 = vpop.f32.mrf.mxu1 }
 0x467   : > { %v4855_v22 = vadd.f32 %v4854_v60, %v17081_v42  ;;  %v13457_v60 = vrot.slane %v13419_v54, 11  ;;  %v5176_v19 = vpack.c.b16 %v5159_v62, %v5158_v35  ;;  %v5936_v57 = vrot.slane %v5934_v52, 4  ;;  %v13326_v35 = vld [vmem:[%s15072_s19 + $0x12c] sm:$0x7] }
 0x468   : > { %v5485_v54 = vrot.slane %v13325_v58, 7  ;;  %v5488_v7 = vrot.slane %v13326_v35, 7  ;;  %v13423_v35 = vld [vmem:[%s15072_s19 + $0x2a4] sm:$0xf] }
 0x469   : > { %v17464_v37 = vadd.f32 %v17365_v11, %v4855_v22  ;;  %v5935_v11 = vsel %vm16619_vm9, %v13457_v60, %v5934_v52  ;;  %v5938_v3 = vsel %vm16619_vm9, %v5936_v57, %v5937_v4  ;;  %v13324_v22 = vld [vmem:[%s15072_s19 + $0x124] sm:$0x8] }
 0x46a   : > { %v17467_v42 = vpop.f32.mrf.mxu0  ;;  %v6024_v61 = vunpack.c.l.b16 %v5935_v11  ;;  %v6025_v44 = vunpack.c.l.b16 %v5938_v3  ;;  %v13364_v52 = vrot.slane %v13324_v22, 11  ;;  %v5487_v58 = vrot.slane %v5485_v54, 4  ;;  %v13265_v11 = vld [vmem:[%s15072_s19 + $0x254] sm:$0xe]  ;;  %v13267_v3 = vld [vmem:[%s15072_s19 + $0x25c] sm:$0x1] }
 0x46b   : > { %13310 = vmatmul.msk.bf16.gmra.mxu2 %vm564_vm3, %v5176_v19  ;;  %v20865_v19 = vld [vmem:[#allocation19_spill] sm:$0xff]  ;;  %v13283_v22 = vrot.slane %v13265_v11, 9 }
 0x46c   : > { %v17471_v5 = vpop.f32.mrf.mxu3  ;;  %v6051_v10 = vpack.c.b16 %v6025_v44, %v6024_v61  ;;  %v5123_v44 = vrot.slane %v13267_v3, 5 }
 0x46d   : > { %20864 = vst [vmem:[#allocation76_spill] sm:$0xff] %v17471_v5  ;;  %v17481_v62 = vpop.f32.mrf.mxu2  ;;  %v13328_v5 = vld [vmem:[%s15072_s19 + $0x144] sm:$0xf] }
 0x46e   : > { %v4857_v50 = vpop.f32.mrf.mxu1 }
 0x46f   : > { %v4858_v14 = vadd.f32 %v4857_v50, %v17102_v40  ;;  %v13266_v40 = vld [vmem:[%s15072_s19 + $0x258] sm:$0xf] }
 0x470   : > { %v5120_v4 = vrot.slane %v13266_v40, 5 }
 0x471   : > { %v17484_v23 = vadd.f32 %v17389_v25, %v4858_v14  ;;  %13216 = vmatmul.msk.bf16.gmra.mxu1 %vm564_vm3, %v20865_v19  ;;  %13391 = vmatmul.msk.bf16.gmra.mxu3 %vm564_vm3, %v5607_v24  ;;  %v5486_v25 = vsel %vm16619_vm9, %v13364_v52, %v5485_v54  ;;  %v5489_v24 = vsel %vm16619_vm9, %v5487_v58, %v5488_v7  ;;  %v13422_v19 = vld [vmem:[%s15072_s19 + $0x2a0] sm:$0x8] }
 0x472   : > { %v17489_v60 = vpop.f32.mrf.mxu0  ;;  %v5122_v61 = vrot.slane %v5120_v4, 4  ;;  %v5580_v40 = vunpack.c.l.b16 %v5486_v25  ;;  %v5121_v54 = vsel %vm15074_vm2, %v13283_v22, %v5120_v4  ;;  %v5581_v7 = vunpack.c.l.b16 %v5489_v24  ;;  %v13424_v25 = vld [vmem:[%s15072_s19 + $0x2a8] sm:$0x7] }
 0x473   : > { %v5160_v11 = vunpack.c.l.b16 %v5121_v54  ;;  %v5944_v22 = vrot.slane %v13424_v25, 7 }
 0x474   : > { %v17492_v57 = vpop.f32.mrf.mxu3  ;;  %v5124_v52 = vsel %vm15074_vm2, %v5122_v61, %v5123_v44  ;;  %v5608_v61 = vpack.c.b16 %v5581_v7, %v5580_v40 }
 0x475   : > { %20866 = vst [vmem:[#allocation77_spill] sm:$0xff] %v17492_v57  ;;  %13485 = vmatmul.msk.bf16.gmra.mxu0 %vm564_vm3, %v6051_v10  ;;  %v17503_v57 = vpop.f32.mrf.mxu2  ;;  %v5941_v10 = vrot.slane %v13423_v35, 7  ;;  %v5161_v3 = vunpack.c.l.b16 %v5124_v52 }
 0x476   : > { %v4859_v50 = vpop.f32.mrf.mxu1 }
 0x477   : > { %v4860_v14 = vadd.f32 %v4859_v50, %v17123_v39  ;;  %v13458_v50 = vrot.slane %v13422_v19, 11  ;;  %v5177_v56 = vpack.c.b16 %v5161_v3, %v5160_v11  ;;  %v5943_v4 = vrot.slane %v5941_v10, 4  ;;  %v13329_v11 = vld [vmem:[%s15072_s19 + $0x148] sm:$0x7] }
 0x478   : > { %v5492_v19 = vrot.slane %v13328_v5, 7  ;;  %v5495_v25 = vrot.slane %v13329_v11, 7  ;;  %v13426_v11 = vld [vmem:[%s15072_s19 + $0x2c0] sm:$0xf] }
 0x479   : > { %v17510_v58 = vadd.f32 %v17411_v21, %v4860_v14  ;;  %v5942_v21 = vsel %vm16619_vm9, %v13458_v50, %v5941_v10  ;;  %v5945_v24 = vsel %vm16619_vm9, %v5943_v4, %v5944_v22  ;;  %v13327_v14 = vld [vmem:[%s15072_s19 + $0x140] sm:$0x8] }
 0x47a   : > { %v17513_v39 = vpop.f32.mrf.mxu0  ;;  %v6026_v35 = vunpack.c.l.b16 %v5942_v21  ;;  %v6027_v54 = vunpack.c.l.b16 %v5945_v24  ;;  %v13365_v10 = vrot.slane %v13327_v14, 11  ;;  %v5494_v5 = vrot.slane %v5492_v19, 4  ;;  %v13588_v21 = vld [vmem:[%s15072_s19 + $0x348] sm:$0x8]  ;;  %v13590_v24 = vld [vmem:[%s15072_s19 + $0x350] sm:$0x7] }
 0x47b   : > { %13311 = vmatmul.msk.bf16.gmra.mxu2 %vm564_vm3, %v5177_v56  ;;  %v20868_v56 = vld [vmem:[#allocation20_spill] sm:$0xff]  ;;  %v13636_v14 = vrot.slane %v13588_v21, 11 }
 0x47c   : > { %v17517_v29 = vpop.f32.mrf.mxu3  ;;  %v6052_v7 = vpack.c.b16 %v6027_v54, %v6026_v35  ;;  %v6790_v54 = vrot.slane %v13590_v24, 7 }
 0x47d   : > { %20867 = vst [vmem:[#allocation78_spill] sm:$0xff] %v17517_v29  ;;  %v17527_v3 = vpop.f32.mrf.mxu2  ;;  %v13331_v29 = vld [vmem:[%s15072_s19 + $0x160] sm:$0xf] }
 0x47e   : > { %v4862_v44 = vpop.f32.mrf.mxu1 }
 0x47f   : > { %v4863_v52 = vadd.f32 %v4862_v44, %v17139_v53  ;;  %v13589_v53 = vld [vmem:[%s15072_s19 + $0x34c] sm:$0xf] }
 0x480   : > { %v6787_v22 = vrot.slane %v13589_v53, 7 }
 0x481   : > { %v17530_v40 = vadd.f32 %v17435_v0, %v4863_v52  ;;  %13217 = vmatmul.msk.bf16.gmra.mxu1 %vm564_vm3, %v20868_v56  ;;  %13392 = vmatmul.msk.bf16.gmra.mxu3 %vm564_vm3, %v5608_v61  ;;  %v5493_v0 = vsel %vm16619_vm9, %v13365_v10, %v5492_v19  ;;  %v5496_v61 = vsel %vm16619_vm9, %v5494_v5, %v5495_v25  ;;  %v13425_v56 = vld [vmem:[%s15072_s19 + $0x2bc] sm:$0x8] }
 0x482   : > { %v17535_v50 = vpop.f32.mrf.mxu0  ;;  %v6789_v35 = vrot.slane %v6787_v22, 4  ;;  %v5582_v53 = vunpack.c.l.b16 %v5493_v0  ;;  %v6788_v19 = vsel %vm16619_vm9, %v13636_v14, %v6787_v22  ;;  %v5583_v25 = vunpack.c.l.b16 %v5496_v61  ;;  %v13427_v0 = vld [vmem:[%s15072_s19 + $0x2c4] sm:$0x7] }
 0x483   : > { %v6902_v21 = vunpack.c.l.b16 %v6788_v19  ;;  %v5951_v14 = vrot.slane %v13427_v0, 7 }
 0x484   : > { %v17538_v4 = vpop.f32.mrf.mxu3  ;;  %v6791_v10 = vsel %vm16619_vm9, %v6789_v35, %v6790_v54  ;;  %v5609_v35 = vpack.c.b16 %v5583_v25, %v5582_v53 }
 0x485   : > { %20869 = vst [vmem:[#allocation79_spill] sm:$0xff] %v17538_v4  ;;  %13486 = vmatmul.msk.bf16.gmra.mxu0 %vm564_vm3, %v6052_v7  ;;  %v17549_v4 = vpop.f32.mrf.mxu2  ;;  %v5948_v7 = vrot.slane %v13426_v11, 7  ;;  %v6903_v24 = vunpack.c.l.b16 %v6791_v10 }
 0x486   : > { %v4864_v44 = vpop.f32.mrf.mxu1 }
 0x487   : > { %v4865_v52 = vadd.f32 %v4864_v44, %v17160_v18  ;;  %v13459_v44 = vrot.slane %v13425_v56, 11  ;;  %v6934_v9 = vpack.c.b16 %v6903_v24, %v6902_v21  ;;  %v5950_v22 = vrot.slane %v5948_v7, 4  ;;  %v13332_v21 = vld [vmem:[%s15072_s19 + $0x164] sm:$0x7] }
 0x488   : > { %v5499_v56 = vrot.slane %v13331_v29, 7  ;;  %v5502_v0 = vrot.slane %v13332_v21, 7  ;;  %v13429_v21 = vld [vmem:[%s15072_s19 + $0x2dc] sm:$0xf] }
 0x489   : > { %v17556_v5 = vadd.f32 %v17457_v32, %v4865_v52  ;;  %v5949_v32 = vsel %vm16619_vm9, %v13459_v44, %v5948_v7  ;;  %v5952_v61 = vsel %vm16619_vm9, %v5950_v22, %v5951_v14  ;;  %v13330_v52 = vld [vmem:[%s15072_s19 + $0x15c] sm:$0x8] }
 0x48a   : > { %v17559_v18 = vpop.f32.mrf.mxu0  ;;  %v6028_v11 = vunpack.c.l.b16 %v5949_v32  ;;  %v6029_v19 = vunpack.c.l.b16 %v5952_v61  ;;  %v13366_v7 = vrot.slane %v13330_v52, 11  ;;  %v5501_v29 = vrot.slane %v5499_v56, 4  ;;  %v13591_v32 = vld [vmem:[%s15072_s19 + $0x364] sm:$0x8]  ;;  %v13593_v61 = vld [vmem:[%s15072_s19 + $0x36c] sm:$0x7] }
 0x48b   : > { %13664 = vmatmul.msk.bf16.vlgmr.msra.gmra.mxu2 %vm564_vm3, %v6934_v9  ;;  %v20871_v9 = vld [vmem:[#allocation21_spill] sm:$0xff]  ;;  %v13637_v52 = vrot.slane %v13591_v32, 11 }
 0x48c   : > { %v17563_v12 = vpop.f32.mrf.mxu3  ;;  %v6053_v25 = vpack.c.b16 %v6029_v19, %v6028_v11  ;;  %v6797_v19 = vrot.slane %v13593_v61, 7  ;;  %v13334_v32 = vld [vmem:[%s15072_s19 + $0x17c] sm:$0xf] }
 0x48d   : > { %20870 = vst [vmem:[#allocation80_spill] sm:$0xff] %v17563_v12  ;;  %v17573_v24 = vpop.f32.mrf.mxu2 }
 0x48e   : > { %v4867_v54 = vpop.f32.mrf.mxu1 }
 0x48f   : > { %v4868_v10 = vadd.f32 %v4867_v54, %v17176_v16  ;;  %v13592_v16 = vld [vmem:[%s15072_s19 + $0x368] sm:$0xf]  ;;  %v5503_v54 = vsel %vm16619_vm9, %v5501_v29, %v5502_v0 }
 0x490   : > { %v6794_v14 = vrot.slane %v13592_v16, 7  ;;  %v5585_v0 = vunpack.c.l.b16 %v5503_v54 }
 0x491   : > { %v17576_v53 = vadd.f32 %v17481_v62, %v4868_v10  ;;  %13218 = vmatmul.msk.bf16.gmra.mxu1 %vm564_vm3, %v20871_v9  ;;  %13393 = vmatmul.msk.bf16.gmra.mxu3 %vm564_vm3, %v5609_v35  ;;  %v5500_v62 = vsel %vm16619_vm9, %v13366_v7, %v5499_v56  ;;  %v13430_v9 = vld [vmem:[%s15072_s19 + $0x2e0] sm:$0x7] }
 0x492   : > { %v17581_v44 = vpop.f32.mrf.mxu0  ;;  %v6796_v11 = vrot.slane %v6794_v14, 4  ;;  %v5584_v16 = vunpack.c.l.b16 %v5500_v62  ;;  %v6795_v7 = vsel %vm16619_vm9, %v13637_v52, %v6794_v14  ;;  %v13497_v14 = vld [vmem:[%s15072_s19 + $0x208] sm:$0xf] }
 0x494   : > { %v17584_v22 = vpop.f32.mrf.mxu3 }
 0x495   : > { %20872 = vst [vmem:[#allocation81_spill] sm:$0xff] %v17584_v22  ;;  %13487 = vmatmul.msk.bf16.gmra.mxu0 %vm564_vm3, %v6053_v25  ;;  %v17595_v56 = vpop.f32.mrf.mxu2  ;;  %v6798_v25 = vsel %vm16619_vm9, %v6796_v11, %v6797_v19  ;;  %v5955_v22 = vrot.slane %v13429_v21, 7  ;;  %v5958_v11 = vrot.slane %v13430_v9, 7  ;;  %v13333_v21 = vld [vmem:[%s15072_s19 + $0x178] sm:$0x8] }
 0x496   : > { %v4869_v35 = vpop.f32.mrf.mxu1  ;;  %v6905_v61 = vunpack.c.l.b16 %v6798_v25 }
 0x497   : > { %v4870_v10 = vadd.f32 %v4869_v35, %v17197_v31  ;;  %v6904_v31 = vunpack.c.l.b16 %v6795_v7  ;;  %v13428_v35 = vld [vmem:[%s15072_s19 + $0x2d8] sm:$0x8]  ;;  %v5957_v63 = vrot.slane %v5955_v22, 4  ;;  %v13335_v7 = vld [vmem:[%s15072_s19 + $0x180] sm:$0x7] }
 0x498   : > { %v13460_v12 = vrot.slane %v13428_v35, 11 }
 0x499   : > { %v17602_v29 = vadd.f32 %v17503_v57, %v4870_v10  ;;  %v6935_v52 = vpack.c.b16 %v6905_v61, %v6904_v31  ;;  %v5506_v57 = vrot.slane %v13334_v32, 7  ;;  %v5610_v10 = vpack.c.b16 %v5585_v0, %v5584_v16  ;;  %v13498_v32 = vld [vmem:[%s15072_s19 + $0x20c] sm:$0x7]  ;;  %v20874_v0 = vld [vmem:[#allocation22_spill] sm:$0xff] }
 0x49a   : > { %v17606_v62 = vpop.f32.mrf.mxu0  ;;  %v5956_v54 = vsel %vm16619_vm9, %v13460_v12, %v5955_v22  ;;  %v5959_v25 = vsel %vm16619_vm9, %v5957_v63, %v5958_v11  ;;  %v6341_v31 = vrot.slane %v13497_v14, 7  ;;  %v5509_v12 = vrot.slane %v13335_v7, 7 }
 0x49b   : > { %13665 = vmatmul.msk.bf16.gmra.mxu2 %vm564_vm3, %v6935_v52  ;;  %v6030_v61 = vunpack.c.l.b16 %v5956_v54  ;;  %v6031_v27 = vunpack.c.l.b16 %v5959_v25  ;;  %v5508_v8 = vrot.slane %v5506_v57, 4  ;;  %v13544_v63 = vrot.slane %v13496_v41, 11  ;;  %v13594_v25 = vld [vmem:[%s15072_s19 + $0x380] sm:$0x8] }
 0x49c   : > { %v17610_v19 = vpop.f32.mrf.mxu3  ;;  %v6343_v52 = vrot.slane %v6341_v31, 4  ;;  %v6344_v11 = vrot.slane %v13498_v32, 7  ;;  %v13638_v32 = vrot.slane %v13594_v25, 11  ;;  %v13337_v25 = vld [vmem:[%s15072_s19 + $0x198] sm:$0xf] }
 0x49d   : > { %20873 = vst [vmem:[#allocation82_spill] sm:$0xff] %v17610_v19  ;;  %v13367_v19 = vrot.slane %v13333_v21, 11  ;;  %v17622_v22 = vpop.f32.mrf.mxu2  ;;  %v6054_v14 = vpack.c.b16 %v6031_v27, %v6030_v61  ;;  %v5510_v41 = vsel %vm16619_vm9, %v5508_v8, %v5509_v12  ;;  %v13432_v12 = vld [vmem:[%s15072_s19 + $0x2f8] sm:$0xf] }
 0x49e   : > { %v4872_v35 = vpop.f32.mrf.mxu1 }
 0x49f   : > { %v4873_v9 = vadd.f32 %v4872_v35, %v17213_v47  ;;  %v14745_v47 = vld [vmem:[%s20725_s2 + $0x100] sm:$0xff]  ;;  %v5507_v7 = vsel %vm16619_vm9, %v13367_v19, %v5506_v57  ;;  %v13596_v35 = vld [vmem:[%s15072_s19 + $0x388] sm:$0x7]  ;;  %v5587_v57 = vunpack.c.l.b16 %v5510_v41 }
 0x4a0   : > { %7459 = vmatpush.bf16.msra.mxu3 %v14745_v47  ;;  %v5586_v8 = vunpack.c.l.b16 %v5507_v7  ;;  %v14747_v7 = vld [vmem:[%s20725_s2 + $0x110] sm:$0xff] }
 0x4a1   : > { %v17625_v16 = vadd.f32 %v17527_v3, %v4873_v9  ;;  %13219 = vmatmul.msk.bf16.gmra.mxu1 %vm564_vm3, %v20874_v0  ;;  %13394 = vmatmul.msk.bf16.gmra.mxu3 %vm564_vm3, %v5610_v10  ;;  %v13595_v3 = vld [vmem:[%s15072_s19 + $0x384] sm:$0xf]  ;;  %v6342_v10 = vsel %vm16619_vm9, %v13544_v63, %v6341_v31  ;;  %v6345_v9 = vsel %vm16619_vm9, %v6343_v52, %v6344_v11  ;;  %v5962_v11 = vrot.slane %v13432_v12, 7 }
 0x4a2   : > { %v17633_v54 = vpop.f32.mrf.mxu0  ;;  %v6801_v27 = vrot.slane %v13595_v3, 7  ;;  %v6456_v31 = vunpack.c.l.b16 %v6342_v10  ;;  %7901 = vmatpush.bf16.msrb.mxu0 %v14747_v7  ;;  %v5611_v0 = vpack.c.b16 %v5587_v57, %v5586_v8 }
 0x4a4   : > { %v17636_v21 = vpop.f32.mrf.mxu3  ;;  %v6803_v47 = vrot.slane %v6801_v27, 4 }
 0x4a5   : > { %20875 = vst [vmem:[#allocation83_spill] sm:$0xff] %v17636_v21  ;;  %13488 = vmatmul.msk.bf16.gmra.mxu0 %vm564_vm3, %v6054_v14  ;;  %v6804_v21 = vrot.slane %v13596_v35, 7  ;;  %v17651_v63 = vpop.f32.mrf.mxu2  ;;  %v6802_v14 = vsel %vm16619_vm9, %v13638_v32, %v6801_v27  ;;  %v13431_v27 = vld [vmem:[%s15072_s19 + $0x2f4] sm:$0x8] }
 0x4a6   : > { %v4874_v61 = vpop.f32.mrf.mxu1  ;;  %v6906_v41 = vunpack.c.l.b16 %v6802_v14  ;;  %v13336_v14 = vld [vmem:[%s15072_s19 + $0x194] sm:$0x8] }
 0x4a7   : > { %v4875_v19 = vadd.f32 %v4874_v61, %v17233_v43  ;;  %v6805_v52 = vsel %vm16619_vm9, %v6803_v47, %v6804_v21  ;;  %v6457_v43 = vunpack.c.l.b16 %v6345_v9  ;;  %v5964_v61 = vrot.slane %v5962_v11, 4  ;;  %v13500_v21 = vld [vmem:[%s15072_s19 + $0x224] sm:$0xf] }
 0x4a8   : > { %v6907_v10 = vunpack.c.l.b16 %v6805_v52  ;;  %v13461_v47 = vrot.slane %v13431_v27, 11  ;;  %v6348_v7 = vrot.slane %v13500_v21, 7  ;;  %v13368_v57 = vrot.slane %v13336_v14, 11  ;;  %v13597_v14 = vld [vmem:[%s15072_s19 + $0x39c] sm:$0x8] }
 0x4a9   : > { %v17658_v3 = vadd.f32 %v17549_v4, %v4875_v19  ;;  %v13433_v4 = vld [vmem:[%s15072_s19 + $0x2fc] sm:$0x7]  ;;  %v5513_v19 = vrot.slane %v13337_v25, 7  ;;  %v6488_v13 = vpack.c.b16 %v6457_v43, %v6456_v31  ;;  %v13501_v25 = vld [vmem:[%s15072_s19 + $0x228] sm:$0x7]  ;;  %v5516_v43 = vrot.slane %v13338_v46, 7 }
 0x4aa   : > { %v17664_v35 = vpop.f32.mrf.mxu0  ;;  %v6936_v32 = vpack.c.b16 %v6907_v10, %v6906_v41  ;;  %v5965_v12 = vrot.slane %v13433_v4, 7  ;;  %v5963_v52 = vsel %vm16619_vm9, %v13461_v47, %v5962_v11  ;;  %v6351_v21 = vrot.slane %v13501_v25, 7  ;;  %v13598_v47 = vld [vmem:[%s15072_s19 + $0x3a0] sm:$0xf] }
 0x4ab   : > { %20876 = vst [vmem:[#allocation84_spill] sm:$0xff] %v17658_v3  ;;  %v13499_v3 = vld [vmem:[%s15072_s19 + $0x220] sm:$0x8]  ;;  %v6032_v10 = vunpack.c.l.b16 %v5963_v52  ;;  %v5515_v31 = vrot.slane %v5513_v19, 4  ;;  %v13599_v52 = vld [vmem:[%s15072_s19 + $0x3a4] sm:$0x7] }
 0x4ac   : > { %v17669_v9 = vpop.f32.mrf.mxu3  ;;  %13666 = vmatmul.msk.bf16.gmra.mxu2 %vm564_vm3, %v6936_v32  ;;  %v5966_v41 = vsel %vm16619_vm9, %v5964_v61, %v5965_v12  ;;  %v13545_v11 = vrot.slane %v13499_v3, 11  ;;  %v6808_v3 = vrot.slane %v13598_v47, 7 }
 0x4ad   : > { %20877 = vst [vmem:[#allocation85_spill] sm:$0xff] %v17669_v9  ;;  %v6033_v8 = vunpack.c.l.b16 %v5966_v41 }
 0x4ae   : > { %v4877_v45 = vpop.f32.mrf.mxu1  ;;  %v17681_v4 = vpop.f32.mrf.mxu2  ;;  %v6349_v12 = vsel %vm16619_vm9, %v13545_v11, %v6348_v7  ;;  %v6810_v25 = vrot.slane %v6808_v3, 4 }
 0x4af   : > { %v4878_v27 = vadd.f32 %v4877_v45, %v17253_v51  ;;  %v6055_v61 = vpack.c.b16 %v6033_v8, %v6032_v10  ;;  %v14770_v45 = vld [vmem:[%s20725_s2 + $0x128] sm:$0xff]  ;;  %v6350_v51 = vrot.slane %v6348_v7, 4  ;;  %v6458_v11 = vunpack.c.l.b16 %v6349_v12  ;;  %v13434_v12 = vld [vmem:[%s15072_s19 + $0x310] sm:$0x8] }
 0x4b0   : > { %8541 = vmatpush.bf16.msrb.mxu2 %v14770_v45  ;;  %v14750_v7 = vld [vmem:[%s20726_s3 + $0x28] sm:$0xff] }
 0x4b1   : > { %v17684_v32 = vadd.f32 %v17573_v24, %v4878_v27  ;;  %13395 = vmatmul.msk.bf16.gmra.mxu3 %vm564_vm3, %v5611_v0  ;;  %13572 = vmatmul.msk.bf16.vlgmr.msra.gmra.mxu1 %vm564_vm3, %v6488_v13  ;;  %v5514_v0 = vsel %vm16619_vm9, %v13368_v57, %v5513_v19  ;;  %v5517_v13 = vsel %vm16619_vm9, %v5515_v31, %v5516_v43  ;;  %v13639_v27 = vrot.slane %v13597_v14, 11  ;;  %v13435_v43 = vld [vmem:[%s15072_s19 + $0x314] sm:$0xf] }
 0x4b2   : > { %v17691_v46 = vpop.f32.mrf.mxu0  ;;  %v6352_v10 = vsel %vm16619_vm9, %v6350_v51, %v6351_v21  ;;  %v6811_v19 = vrot.slane %v13599_v52, 7  ;;  %v5588_v57 = vunpack.c.l.b16 %v5514_v0  ;;  %v5589_v31 = vunpack.c.l.b16 %v5517_v13  ;;  %v13340_v0 = vld [vmem:[%s15072_s19 + $0x1b4] sm:$0xf]  ;;  %8203 = vmatpush.bf16.msrb.mxu1 %v14750_v7 }
 0x4b3   : > { %20878 = vst [vmem:[#allocation86_spill] sm:$0xff] %v17684_v32  ;;  %v6809_v45 = vsel %vm16619_vm9, %v13639_v27, %v6808_v3  ;;  %v6459_v47 = vunpack.c.l.b16 %v6352_v10  ;;  %v13462_v3 = vrot.slane %v13434_v12, 11  ;;  %v13503_v27 = vld [vmem:[%s15072_s19 + $0x240] sm:$0xf]  ;;  %v5520_v10 = vrot.slane %v13340_v0, 7 }
 0x4b4   : > { %v17694_v24 = vpop.f32.mrf.mxu3  ;;  %v6812_v51 = vsel %vm16619_vm9, %v6810_v25, %v6811_v19  ;;  %v6908_v13 = vunpack.c.l.b16 %v6809_v45  ;;  %v5612_v7 = vpack.c.b16 %v5589_v31, %v5588_v57  ;;  %v13339_v45 = vld [vmem:[%s15072_s19 + $0x1b0] sm:$0x8] }
 0x4b5   : > { %20879 = vst [vmem:[#allocation87_spill] sm:$0xff] %v17694_v24  ;;  %13489 = vmatmul.msk.bf16.gmra.mxu0 %vm564_vm3, %v6055_v61  ;;  %v6909_v14 = vunpack.c.l.b16 %v6812_v51  ;;  %v13341_v51 = vld [vmem:[%s15072_s19 + $0x1b8] sm:$0x7]  ;;  %v13369_v32 = vrot.slane %v13339_v45, 11 }
 0x4b6   : > { %v4879_v41 = vpop.f32.mrf.mxu1  ;;  %v17712_v61 = vpop.f32.mrf.mxu2  ;;  %v5523_v57 = vrot.slane %v13341_v51, 7 }
 0x4b7   : > { %v4880_v8 = vadd.f32 %v4879_v41, %v17275_v28  ;;  %v5969_v28 = vrot.slane %v13435_v43, 7  ;;  %v13436_v41 = vld [vmem:[%s15072_s19 + $0x318] sm:$0x7]  ;;  %v6937_v24 = vpack.c.b16 %v6909_v14, %v6908_v13  ;;  %v6489_v43 = vpack.c.b16 %v6459_v47, %v6458_v11  ;;  %v13502_v13 = vld [vmem:[%s15072_s19 + $0x23c] sm:$0x8] }
 0x4b8   : > { %v5972_v19 = vrot.slane %v13436_v41, 7  ;;  %v6355_v14 = vrot.slane %v13503_v27, 7 }
 0x4b9   : > { %v17719_v21 = vadd.f32 %v17595_v56, %v4880_v8  ;;  %v5971_v25 = vrot.slane %v5969_v28, 4  ;;  %v5970_v8 = vsel %vm16619_vm9, %v13462_v3, %v5969_v28  ;;  %v5522_v28 = vrot.slane %v5520_v10, 4 }
 0x4ba   : > { %v17723_v52 = vpop.f32.mrf.mxu0  ;;  %v6034_v41 = vunpack.c.l.b16 %v5970_v8  ;;  %v6357_v3 = vrot.slane %v6355_v14, 4 }
 0x4bb   : > { %20880 = vst [vmem:[#allocation88_spill] sm:$0xff] %v17719_v21  ;;  %v5973_v12 = vsel %vm16619_vm9, %v5971_v25, %v5972_v19  ;;  %v5521_v19 = vsel %vm16619_vm9, %v13369_v32, %v5520_v10 }
 0x4bc   : > { %v17727_v56 = vpop.f32.mrf.mxu3  ;;  %13667 = vmatmul.msk.bf16.gmra.mxu2 %vm564_vm3, %v6937_v24  ;;  %v6035_v21 = vunpack.c.l.b16 %v5973_v12  ;;  %v13546_v24 = vrot.slane %v13502_v13, 11 }
 0x4bd   : > { %20881 = vst [vmem:[#allocation89_spill] sm:$0xff] %v17727_v56  ;;  %v13504_v56 = vld [vmem:[%s15072_s19 + $0x244] sm:$0x7] }
 0x4be   : > { %v4882_v9 = vpop.f32.mrf.mxu1  ;;  %v17739_v31 = vpop.f32.mrf.mxu2  ;;  %v6056_v47 = vpack.c.b16 %v6035_v21, %v6034_v41  ;;  %v6358_v27 = vrot.slane %v13504_v56, 7  ;;  %v13600_v21 = vld [vmem:[%s15072_s19 + $0x3b8] sm:$0x8]  ;;  %v13602_v56 = vld [vmem:[%s15072_s19 + $0x3c0] sm:$0x7]  ;;  %v5590_v41 = vunpack.c.l.b16 %v5521_v19 }
 0x4bf   : > { %v4883_v0 = vadd.f32 %v4882_v9, %v17302_v55  ;;  %v13601_v9 = vld [vmem:[%s15072_s19 + $0x3bc] sm:$0xf]  ;;  %v13640_v32 = vrot.slane %v13600_v21, 11  ;;  %v6818_v12 = vrot.slane %v13602_v56, 7 }
 0x4c0   : > { %v6815_v8 = vrot.slane %v13601_v9, 7  ;;  %v6359_v51 = vsel %vm16619_vm9, %v6357_v3, %v6358_v27  ;;  %v13343_v9 = vld [vmem:[%s15072_s19 + $0x1d0] sm:$0xf] }
 0x4c1   : > { %v17742_v11 = vadd.f32 %v17622_v22, %v4883_v0  ;;  %13396 = vmatmul.msk.bf16.gmra.mxu3 %vm564_vm3, %v5612_v7  ;;  %13573 = vmatmul.msk.bf16.gmra.mxu1 %vm564_vm3, %v6489_v43  ;;  %v5524_v22 = vsel %vm16619_vm9, %v5522_v28, %v5523_v57  ;;  %v6356_v43 = vsel %vm16619_vm9, %v13546_v24, %v6355_v14  ;;  %v13438_v0 = vld [vmem:[%s15072_s19 + $0x330] sm:$0xf]  ;;  %v6461_v27 = vunpack.c.l.b16 %v6359_v51 }
 0x4c2   : > { %v17746_v55 = vpop.f32.mrf.mxu0  ;;  %v6817_v10 = vrot.slane %v6815_v8, 4  ;;  %v6460_v28 = vunpack.c.l.b16 %v6356_v43  ;;  %v6816_v24 = vsel %vm16619_vm9, %v13640_v32, %v6815_v8  ;;  %v5976_v3 = vrot.slane %v13438_v0, 7  ;;  %v13506_v8 = vld [vmem:[%s15072_s19 + $0x25c] sm:$0xf]  ;;  %v13342_v0 = vld [vmem:[%s15072_s19 + $0x1cc] sm:$0x8] }
 0x4c4   : > { %v5689_v25 = vpop.f32.mrf.mxu3  ;;  %v5978_v56 = vrot.slane %v5976_v3, 4 }
 0x4c5   : > { %v5769_v7 = vadd.f32 %v5689_v25, %v17294_v30  ;;  %13490 = vmatmul.msk.bf16.gmra.mxu0 %vm564_vm3, %v6056_v47  ;;  %v5591_v30 = vunpack.c.l.b16 %v5524_v22  ;;  %v6819_v47 = vsel %vm16619_vm9, %v6817_v10, %v6818_v12  ;;  %v6910_v25 = vunpack.c.l.b16 %v6816_v24  ;;  %v13344_v24 = vld [vmem:[%s15072_s19 + $0x1d4] sm:$0x7] }
 0x4c6   : > { %v4884_v45 = vpop.f32.mrf.mxu1  ;;  %v17766_v57 = vpop.f32.mrf.mxu2  ;;  %v6911_v19 = vunpack.c.l.b16 %v6819_v47 }
 0x4c7   : > { %v4885_v13 = vadd.f32 %v4884_v45, %v17329_v33  ;;  %v17764_v14 = vadd.f32 %v17633_v54, %v5769_v7  ;;  %v13437_v54 = vld [vmem:[%s15072_s19 + $0x32c] sm:$0x8]  ;;  %v13439_v7 = vld [vmem:[%s15072_s19 + $0x334] sm:$0x7]  ;;  %v5613_v12 = vpack.c.b16 %v5591_v30, %v5590_v41  ;;  %v13370_v41 = vrot.slane %v13342_v0, 11 }
 0x4c8   : > { %v13463_v43 = vrot.slane %v13437_v54, 11  ;;  %v6938_v21 = vpack.c.b16 %v6911_v19, %v6910_v25  ;;  %v5979_v45 = vrot.slane %v13439_v7, 7  ;;  %v13505_v19 = vld [vmem:[%s15072_s19 + $0x258] sm:$0x8]  ;;  %v6362_v54 = vrot.slane %v13506_v8, 7 }
 0x4c9   : > { %v17773_v33 = vadd.f32 %v17651_v63, %v4885_v13  ;;  %v5527_v63 = vrot.slane %v13343_v9, 7  ;;  %v6490_v13 = vpack.c.b16 %v6461_v27, %v6460_v28  ;;  %v5530_v28 = vrot.slane %v13344_v24, 7  ;;  %v13605_v0 = vld [vmem:[%s15072_s19 + $0x3dc] sm:$0x7] }
 0x4ca   : > { %v17777_v22 = vpop.f32.mrf.mxu0  ;;  %v5977_v51 = vsel %vm16619_vm9, %v13463_v43, %v5976_v3  ;;  %v5980_v47 = vsel %vm16619_vm9, %v5978_v56, %v5979_v45  ;;  %v13507_v3 = vld [vmem:[%s15072_s19 + $0x260] sm:$0x7]  ;;  %v13547_v8 = vrot.slane %v13505_v19, 11  ;;  %v13604_v45 = vld [vmem:[%s15072_s19 + $0x3d8] sm:$0xf]  ;;  %v6825_v19 = vrot.slane %v13605_v0, 7 }
 0x4cb   : > { %20882 = vst [vmem:[#allocation90_spill] sm:$0xff] %v17773_v33  ;;  %v6036_v7 = vunpack.c.l.b16 %v5977_v51  ;;  %v6037_v33 = vunpack.c.l.b16 %v5980_v47  ;;  %v5529_v30 = vrot.slane %v5527_v63, 4  ;;  %v6365_v56 = vrot.slane %v13507_v3, 7  ;;  %v13441_v3 = vld [vmem:[%s15072_s19 + $0x34c] sm:$0xf] }
 0x4cc   : > { %v5691_v32 = vpop.f32.mrf.mxu3  ;;  %13668 = vmatmul.msk.bf16.gmra.mxu2 %vm564_vm3, %v6938_v21  ;;  %v6364_v21 = vrot.slane %v6362_v54, 4  ;;  %v5528_v51 = vsel %vm16619_vm9, %v13370_v41, %v5527_v63 }
 0x4cd   : > { %v5770_v10 = vadd.f32 %v5691_v32, %v17326_v26 }
 0x4ce   : > { %v4887_v25 = vpop.f32.mrf.mxu1  ;;  %v17795_v27 = vpop.f32.mrf.mxu2  ;;  %v6366_v47 = vsel %vm16619_vm9, %v6364_v21, %v6365_v56  ;;  %v13346_v56 = vld [vmem:[%s15072_s19 + $0x1ec] sm:$0xf] }
 0x4cf   : > { %v4888_v9 = vadd.f32 %v4887_v25, %v17351_v34  ;;  %v17793_v26 = vadd.f32 %v17664_v35, %v5770_v10  ;;  %v6057_v34 = vpack.c.b16 %v6037_v33, %v6036_v7  ;;  %v6822_v10 = vrot.slane %v13604_v45, 7  ;;  %v13603_v33 = vld [vmem:[%s15072_s19 + $0x3d4] sm:$0x8] }
 0x4d0   : > { %v13641_v63 = vrot.slane %v13603_v33, 11  ;;  %v6463_v21 = vunpack.c.l.b16 %v6366_v47 }
 0x4d1   : > { %v17798_v43 = vadd.f32 %v17681_v4, %v4888_v9  ;;  %13397 = vmatmul.msk.bf16.gmra.mxu3 %vm564_vm3, %v5613_v12  ;;  %13574 = vmatmul.msk.bf16.gmra.mxu1 %vm564_vm3, %v6490_v13  ;;  %v5531_v4 = vsel %vm16619_vm9, %v5529_v30, %v5530_v28  ;;  %v6363_v13 = vsel %vm16619_vm9, %v13547_v8, %v6362_v54  ;;  %v6824_v25 = vrot.slane %v6822_v10, 4 }
 0x4d2   : > { %v17802_v35 = vpop.f32.mrf.mxu0  ;;  %v5592_v9 = vunpack.c.l.b16 %v5528_v51  ;;  %v6462_v41 = vunpack.c.l.b16 %v6363_v13  ;;  %v6823_v28 = vsel %vm16619_vm9, %v13641_v63, %v6822_v10  ;;  %v13509_v10 = vld [vmem:[%s15072_s19 + $0x278] sm:$0xf] }
 0x4d3   : > { %v6826_v8 = vsel %vm16619_vm9, %v6824_v25, %v6825_v19  ;;  %v6912_v45 = vunpack.c.l.b16 %v6823_v28 }
 0x4d4   : > { %v5694_v32 = vpop.f32.mrf.mxu3  ;;  %v6491_v19 = vpack.c.b16 %v6463_v21, %v6462_v41 }
 0x4d5   : > { %v5771_v12 = vadd.f32 %v5694_v32, %v17346_v36  ;;  %13491 = vmatmul.msk.bf16.gmra.mxu0 %vm564_vm3, %v6057_v34  ;;  %v5593_v36 = vunpack.c.l.b16 %v5531_v4  ;;  %v5983_v34 = vrot.slane %v13441_v3, 7  ;;  %v6913_v32 = vunpack.c.l.b16 %v6826_v8  ;;  %v13442_v4 = vld [vmem:[%s15072_s19 + $0x350] sm:$0x7] }
 0x4d6   : > { %v4889_v24 = vpop.f32.mrf.mxu1  ;;  %v17822_v30 = vpop.f32.mrf.mxu2  ;;  %v5986_v0 = vrot.slane %v13442_v4, 7  ;;  %v13347_v3 = vld [vmem:[%s15072_s19 + $0x1f0] sm:$0x7] }
 0x4d7   : > { %v4890_v7 = vadd.f32 %v4889_v24, %v17375_v15  ;;  %v17820_v54 = vadd.f32 %v17691_v46, %v5771_v12  ;;  %v13440_v46 = vld [vmem:[%s15072_s19 + $0x348] sm:$0x8]  ;;  %v6939_v13 = vpack.c.b16 %v6913_v32, %v6912_v45  ;;  %v5985_v33 = vrot.slane %v5983_v34, 4  ;;  %v13508_v45 = vld [vmem:[%s15072_s19 + $0x274] sm:$0x8] }
 0x4d8   : > { %v13464_v12 = vrot.slane %v13440_v46, 11  ;;  %v5614_v25 = vpack.c.b16 %v5593_v36, %v5592_v9  ;;  %v6369_v32 = vrot.slane %v13509_v10, 7  ;;  %v5537_v41 = vrot.slane %v13347_v3, 7  ;;  %v13608_v3 = vld [vmem:[%s15072_s19 + $0x3f8] sm:$0x7] }
 0x4d9   : > { %v17829_v15 = vadd.f32 %v17712_v61, %v4890_v7  ;;  %v5534_v61 = vrot.slane %v13346_v56, 7  ;;  %v13345_v7 = vld [vmem:[%s15072_s19 + $0x1e8] sm:$0x8]  ;;  %v5987_v28 = vsel %vm16619_vm9, %v5985_v33, %v5986_v0  ;;  %v13548_v10 = vrot.slane %v13508_v45, 11  ;;  %v13607_v0 = vld [vmem:[%s15072_s19 + $0x3f4] sm:$0xf] }
 0x4da   : > { %v17833_v51 = vpop.f32.mrf.mxu0  ;;  %v5984_v47 = vsel %vm16619_vm9, %v13464_v12, %v5983_v34  ;;  %v6039_v4 = vunpack.c.l.b16 %v5987_v28  ;;  %v13510_v34 = vld [vmem:[%s15072_s19 + $0x27c] sm:$0x7]  ;;  %v13371_v9 = vrot.slane %v13345_v7, 11  ;;  %v13606_v7 = vld [vmem:[%s15072_s19 + $0x3f0] sm:$0x8] }
 0x4db   : > { %v6038_v46 = vunpack.c.l.b16 %v5984_v47  ;;  %v5536_v36 = vrot.slane %v5534_v61, 4  ;;  %v6372_v33 = vrot.slane %v13510_v34, 7  ;;  %v13444_v34 = vld [vmem:[%s15072_s19 + $0x368] sm:$0xf] }
 0x4dc   : > { %v5696_v24 = vpop.f32.mrf.mxu3  ;;  %13669 = vmatmul.msk.bf16.gmra.mxu2 %vm564_vm3, %v6939_v13  ;;  %v6371_v13 = vrot.slane %v6369_v32, 4  ;;  %v5535_v47 = vsel %vm16619_vm9, %v13371_v9, %v5534_v61  ;;  %v13642_v61 = vrot.slane %v13606_v7, 11 }
 0x4dd   : > { %v5772_v63 = vadd.f32 %v5696_v24, %v17372_v17 }
 0x4de   : > { %v4892_v8 = vpop.f32.mrf.mxu1  ;;  %v17851_v21 = vpop.f32.mrf.mxu2 }
 0x4df   : > { %v4893_v56 = vadd.f32 %v4892_v8, %v17397_v1  ;;  %v17849_v17 = vadd.f32 %v17723_v52, %v5772_v63  ;;  %v6058_v1 = vpack.c.b16 %v6039_v4, %v6038_v46  ;;  %v6829_v63 = vrot.slane %v13607_v0, 7 }
 0x4e0   : > { %v6373_v8 = vsel %vm16619_vm9, %v6371_v13, %v6372_v33  ;;  %v6832_v46 = vrot.slane %v13608_v3, 7  ;;  %v13349_v33 = vld [vmem:[%s15072_s19 + $0x208] sm:$0xf] }
 0x4e1   : > { %v17854_v12 = vadd.f32 %v17739_v31, %v4893_v56  ;;  %13398 = vmatmul.msk.bf16.gmra.mxu3 %vm564_vm3, %v5614_v25  ;;  %13575 = vmatmul.msk.bf16.gmra.mxu1 %vm564_vm3, %v6491_v19  ;;  %v5538_v31 = vsel %vm16619_vm9, %v5536_v36, %v5537_v41  ;;  %v6370_v19 = vsel %vm16619_vm9, %v13548_v10, %v6369_v32  ;;  %v6831_v45 = vrot.slane %v6829_v63, 4 }
 0x4e2   : > { %v17858_v52 = vpop.f32.mrf.mxu0  ;;  %v5594_v56 = vunpack.c.l.b16 %v5535_v47  ;;  %v6464_v9 = vunpack.c.l.b16 %v6370_v19  ;;  %v6830_v41 = vsel %vm16619_vm9, %v13642_v61, %v6829_v63  ;;  %v6465_v13 = vunpack.c.l.b16 %v6373_v8  ;;  %v13512_v63 = vld [vmem:[%s15072_s19 + $0x294] sm:$0xf] }
 0x4e3   : > { %v6833_v10 = vsel %vm16619_vm9, %v6831_v45, %v6832_v46  ;;  %v6914_v0 = vunpack.c.l.b16 %v6830_v41 }
 0x4e4   : > { %v5699_v24 = vpop.f32.mrf.mxu3  ;;  %v6492_v46 = vpack.c.b16 %v6465_v13, %v6464_v9 }
 0x4e5   : > { %v5773_v25 = vadd.f32 %v5699_v24, %v17392_v48  ;;  %13492 = vmatmul.msk.bf16.gmra.mxu0 %vm564_vm3, %v6058_v1  ;;  %v5595_v48 = vunpack.c.l.b16 %v5538_v31  ;;  %v5990_v1 = vrot.slane %v13444_v34, 7  ;;  %v6915_v24 = vunpack.c.l.b16 %v6833_v10  ;;  %v13445_v31 = vld [vmem:[%s15072_s19 + $0x36c] sm:$0x7] }
 0x4e6   : > { %v4894_v28 = vpop.f32.mrf.mxu1  ;;  %v17878_v36 = vpop.f32.mrf.mxu2  ;;  %v5993_v3 = vrot.slane %v13445_v31, 7  ;;  %v13350_v34 = vld [vmem:[%s15072_s19 + $0x20c] sm:$0x7] }
 0x4e7   : > { %v4895_v4 = vadd.f32 %v4894_v28, %v17421_v6  ;;  %v17876_v32 = vadd.f32 %v17746_v55, %v5773_v25  ;;  %v13443_v55 = vld [vmem:[%s15072_s19 + $0x364] sm:$0x8]  ;;  %v6940_v19 = vpack.c.b16 %v6915_v24, %v6914_v0  ;;  %v5992_v7 = vrot.slane %v5990_v1, 4  ;;  %v13511_v0 = vld [vmem:[%s15072_s19 + $0x290] sm:$0x8] }
 0x4e8   : > { %v13465_v25 = vrot.slane %v13443_v55, 11  ;;  %v5615_v45 = vpack.c.b16 %v5595_v48, %v5594_v56  ;;  %v6376_v24 = vrot.slane %v13512_v63, 7  ;;  %v5544_v9 = vrot.slane %v13350_v34, 7  ;;  %v13611_v34 = vld [vmem:[%s15072_s19 + $0x414] sm:$0x7] }
 0x4e9   : > { %v17885_v6 = vadd.f32 %v17766_v57, %v4895_v4  ;;  %v5541_v57 = vrot.slane %v13349_v33, 7  ;;  %v13348_v4 = vld [vmem:[%s15072_s19 + $0x204] sm:$0x8]  ;;  %v5994_v41 = vsel %vm16619_vm9, %v5992_v7, %v5993_v3  ;;  %v13549_v63 = vrot.slane %v13511_v0, 11  ;;  %v13610_v3 = vld [vmem:[%s15072_s19 + $0x410] sm:$0xf] }
 0x4ea   : > { %v17889_v47 = vpop.f32.mrf.mxu0  ;;  %v5991_v8 = vsel %vm16619_vm9, %v13465_v25, %v5990_v1  ;;  %v6041_v31 = vunpack.c.l.b16 %v5994_v41  ;;  %v13513_v1 = vld [vmem:[%s15072_s19 + $0x298] sm:$0x7]  ;;  %v13372_v56 = vrot.slane %v13348_v4, 11  ;;  %v13609_v4 = vld [vmem:[%s15072_s19 + $0x40c] sm:$0x8] }
 0x4eb   : > { %v6040_v55 = vunpack.c.l.b16 %v5991_v8  ;;  %v5543_v48 = vrot.slane %v5541_v57, 4  ;;  %v6379_v7 = vrot.slane %v13513_v1, 7  ;;  %v13447_v1 = vld [vmem:[%s15072_s19 + $0x384] sm:$0xf] }
 0x4ec   : > { %v5701_v28 = vpop.f32.mrf.mxu3  ;;  %13670 = vmatmul.msk.bf16.gmra.mxu2 %vm564_vm3, %v6940_v19  ;;  %v6378_v19 = vrot.slane %v6376_v24, 4  ;;  %v5542_v8 = vsel %vm16619_vm9, %v13372_v56, %v5541_v57  ;;  %v13643_v57 = vrot.slane %v13609_v4, 11 }
 0x4ed   : > { %v5774_v61 = vadd.f32 %v5701_v28, %v17418_v38 }
 0x4ee   : > { %v4897_v10 = vpop.f32.mrf.mxu1  ;;  %v17907_v13 = vpop.f32.mrf.mxu2 }
 0x4ef   : > { %v4898_v33 = vadd.f32 %v4897_v10, %v17443_v49  ;;  %v17905_v38 = vadd.f32 %v17777_v22, %v5774_v61  ;;  %v6059_v49 = vpack.c.b16 %v6041_v31, %v6040_v55  ;;  %v6836_v61 = vrot.slane %v13610_v3, 7 }
 0x4f0   : > { %v6380_v10 = vsel %vm16619_vm9, %v6378_v19, %v6379_v7  ;;  %v6839_v55 = vrot.slane %v13611_v34, 7  ;;  %v13352_v7 = vld [vmem:[%s15072_s19 + $0x224] sm:$0xf] }
 0x4f1   : > { %v17910_v25 = vadd.f32 %v17795_v27, %v4898_v33  ;;  %13399 = vmatmul.msk.bf16.gmra.mxu3 %vm564_vm3, %v5615_v45  ;;  %13576 = vmatmul.msk.bf16.gmra.mxu1 %vm564_vm3, %v6492_v46  ;;  %v5545_v27 = vsel %vm16619_vm9, %v5543_v48, %v5544_v9  ;;  %v6377_v46 = vsel %vm16619_vm9, %v13549_v63, %v6376_v24  ;;  %v6838_v0 = vrot.slane %v6836_v61, 4 }
 0x4f2   : > { %v17914_v22 = vpop.f32.mrf.mxu0  ;;  %v5596_v33 = vunpack.c.l.b16 %v5542_v8  ;;  %v6466_v56 = vunpack.c.l.b16 %v6377_v46  ;;  %v6837_v9 = vsel %vm16619_vm9, %v13643_v57, %v6836_v61  ;;  %v6467_v19 = vunpack.c.l.b16 %v6380_v10  ;;  %v13515_v61 = vld [vmem:[%s15072_s19 + $0x2b0] sm:$0xf] }
 0x4f3   : > { %v6840_v63 = vsel %vm16619_vm9, %v6838_v0, %v6839_v55  ;;  %v6916_v3 = vunpack.c.l.b16 %v6837_v9 }
 0x4f4   : > { %v5704_v28 = vpop.f32.mrf.mxu3  ;;  %v6493_v55 = vpack.c.b16 %v6467_v19, %v6466_v56 }
 0x4f5   : > { %v5775_v45 = vadd.f32 %v5704_v28, %v17438_v59  ;;  %13493 = vmatmul.msk.bf16.gmra.mxu0 %vm564_vm3, %v6059_v49  ;;  %v5597_v59 = vunpack.c.l.b16 %v5545_v27  ;;  %v5997_v49 = vrot.slane %v13447_v1, 7  ;;  %v6917_v28 = vunpack.c.l.b16 %v6840_v63  ;;  %v13448_v27 = vld [vmem:[%s15072_s19 + $0x388] sm:$0x7] }
 0x4f6   : > { %v4899_v41 = vpop.f32.mrf.mxu1  ;;  %v17934_v48 = vpop.f32.mrf.mxu2  ;;  %v6000_v34 = vrot.slane %v13448_v27, 7  ;;  %v13353_v1 = vld [vmem:[%s15072_s19 + $0x228] sm:$0x7] }
 0x4f7   : > { %v4900_v31 = vadd.f32 %v4899_v41, %v17467_v42  ;;  %v17932_v24 = vadd.f32 %v17802_v35, %v5775_v45  ;;  %v13446_v35 = vld [vmem:[%s15072_s19 + $0x380] sm:$0x8]  ;;  %v6941_v46 = vpack.c.b16 %v6917_v28, %v6916_v3  ;;  %v5999_v4 = vrot.slane %v5997_v49, 4  ;;  %v13514_v3 = vld [vmem:[%s15072_s19 + $0x2ac] sm:$0x8] }
 0x4f8   : > { %v13466_v45 = vrot.slane %v13446_v35, 11  ;;  %v5616_v0 = vpack.c.b16 %v5597_v59, %v5596_v33  ;;  %v6383_v28 = vrot.slane %v13515_v61, 7  ;;  %v5551_v56 = vrot.slane %v13353_v1, 7  ;;  %v13614_v1 = vld [vmem:[%s15072_s19 + $0x430] sm:$0x7] }
 0x4f9   : > { %v17941_v42 = vadd.f32 %v17822_v30, %v4900_v31  ;;  %v5548_v30 = vrot.slane %v13352_v7, 7  ;;  %v13351_v31 = vld [vmem:[%s15072_s19 + $0x220] sm:$0x8]  ;;  %v6001_v9 = vsel %vm16619_vm9, %v5999_v4, %v6000_v34  ;;  %v13550_v61 = vrot.slane %v13514_v3, 11  ;;  %v13613_v34 = vld [vmem:[%s15072_s19 + $0x42c] sm:$0xf] }
 0x4fa   : > { %v17945_v8 = vpop.f32.mrf.mxu0  ;;  %v5998_v10 = vsel %vm16619_vm9, %v13466_v45, %v5997_v49  ;;  %v6043_v27 = vunpack.c.l.b16 %v6001_v9  ;;  %v13516_v49 = vld [vmem:[%s15072_s19 + $0x2b4] sm:$0x7]  ;;  %v13373_v33 = vrot.slane %v13351_v31, 11  ;;  %v13612_v31 = vld [vmem:[%s15072_s19 + $0x428] sm:$0x8] }
 0x4fb   : > { %v6042_v35 = vunpack.c.l.b16 %v5998_v10  ;;  %v5550_v59 = vrot.slane %v5548_v30, 4  ;;  %v6386_v4 = vrot.slane %v13516_v49, 7  ;;  %v13450_v49 = vld [vmem:[%s15072_s19 + $0x3a0] sm:$0xf] }
 0x4fc   : > { %v5706_v41 = vpop.f32.mrf.mxu3  ;;  %13671 = vmatmul.msk.bf16.gmra.mxu2 %vm564_vm3, %v6941_v46  ;;  %v6385_v46 = vrot.slane %v6383_v28, 4  ;;  %v5549_v10 = vsel %vm16619_vm9, %v13373_v33, %v5548_v30  ;;  %v13644_v30 = vrot.slane %v13612_v31, 11 }
 0x4fd   : > { %v5776_v57 = vadd.f32 %v5706_v41, %v17464_v37 }
 0x4fe   : > { %v4902_v63 = vpop.f32.mrf.mxu1  ;;  %v17963_v19 = vpop.f32.mrf.mxu2 }
 0x4ff   : > { %v4903_v7 = vadd.f32 %v4902_v63, %v17489_v60  ;;  %v17961_v37 = vadd.f32 %v17833_v51, %v5776_v57  ;;  %v6060_v60 = vpack.c.b16 %v6043_v27, %v6042_v35  ;;  %v6843_v57 = vrot.slane %v13613_v34, 7 }
 0x500   : > { %v6387_v63 = vsel %vm16619_vm9, %v6385_v46, %v6386_v4  ;;  %v6846_v35 = vrot.slane %v13614_v1, 7  ;;  %v13355_v4 = vld [vmem:[%s15072_s19 + $0x240] sm:$0xf] }
 0x501   : > { %v17966_v45 = vadd.f32 %v17851_v21, %v4903_v7  ;;  %13400 = vmatmul.msk.bf16.gmra.mxu3 %vm564_vm3, %v5616_v0  ;;  %13577 = vmatmul.msk.bf16.gmra.mxu1 %vm564_vm3, %v6493_v55  ;;  %v5552_v21 = vsel %vm16619_vm9, %v5550_v59, %v5551_v56  ;;  %v6384_v55 = vsel %vm16619_vm9, %v13550_v61, %v6383_v28  ;;  %v6845_v3 = vrot.slane %v6843_v57, 4 }
 0x502   : > { %v17970_v51 = vpop.f32.mrf.mxu0  ;;  %v5598_v7 = vunpack.c.l.b16 %v5549_v10  ;;  %v6468_v33 = vunpack.c.l.b16 %v6384_v55  ;;  %v6844_v56 = vsel %vm16619_vm9, %v13644_v30, %v6843_v57  ;;  %v6469_v46 = vunpack.c.l.b16 %v6387_v63  ;;  %v13518_v57 = vld [vmem:[%s15072_s19 + $0x2cc] sm:$0xf] }
 0x503   : > { %v6847_v61 = vsel %vm16619_vm9, %v6845_v3, %v6846_v35  ;;  %v6918_v34 = vunpack.c.l.b16 %v6844_v56 }
 0x504   : > { %v5709_v41 = vpop.f32.mrf.mxu3  ;;  %v6494_v35 = vpack.c.b16 %v6469_v46, %v6468_v33 }
 0x505   : > { %v5777_v0 = vadd.f32 %v5709_v41, %v17484_v23  ;;  %13494 = vmatmul.msk.bf16.gmra.mxu0 %vm564_vm3, %v6060_v60  ;;  %v5599_v23 = vunpack.c.l.b16 %v5552_v21  ;;  %v6004_v60 = vrot.slane %v13450_v49, 7  ;;  %v6919_v41 = vunpack.c.l.b16 %v6847_v61  ;;  %v13451_v21 = vld [vmem:[%s15072_s19 + $0x3a4] sm:$0x7] }
 0x506   : > { %v4904_v9 = vpop.f32.mrf.mxu1  ;;  %v17990_v59 = vpop.f32.mrf.mxu2  ;;  %v6007_v1 = vrot.slane %v13451_v21, 7  ;;  %v13356_v61 = vld [vmem:[%s15072_s19 + $0x244] sm:$0x7] }
 0x507   : > { %v4905_v27 = vadd.f32 %v4904_v9, %v17513_v39  ;;  %v17988_v28 = vadd.f32 %v17858_v52, %v5777_v0  ;;  %v13449_v52 = vld [vmem:[%s15072_s19 + $0x39c] sm:$0x8]  ;;  %v6942_v55 = vpack.c.b16 %v6919_v41, %v6918_v34  ;;  %v6006_v31 = vrot.slane %v6004_v60, 4  ;;  %v13517_v34 = vld [vmem:[%s15072_s19 + $0x2c8] sm:$0x8] }
 0x508   : > { %v13467_v0 = vrot.slane %v13449_v52, 11  ;;  %v5617_v3 = vpack.c.b16 %v5599_v23, %v5598_v7  ;;  %v6390_v41 = vrot.slane %v13518_v57, 7  ;;  %v13551_v57 = vrot.slane %v13517_v34, 11 }
 0x509   : > { %v17997_v39 = vadd.f32 %v17878_v36, %v4905_v27  ;;  %v5555_v36 = vrot.slane %v13355_v4, 7  ;;  %v13354_v27 = vld [vmem:[%s15072_s19 + $0x23c] sm:$0x8]  ;;  %v6008_v49 = vsel %vm16619_vm9, %v6006_v31, %v6007_v1  ;;  %v13616_v1 = vld [vmem:[%s15072_s19 + $0x448] sm:$0xf] }
 0x50a   : > { %v18001_v10 = vpop.f32.mrf.mxu0  ;;  %v6005_v63 = vsel %vm16619_vm9, %v13467_v0, %v6004_v60  ;;  %v6045_v21 = vunpack.c.l.b16 %v6008_v49  ;;  %v13519_v60 = vld [vmem:[%s15072_s19 + $0x2d0] sm:$0x7]  ;;  %v13374_v7 = vrot.slane %v13354_v27, 11  ;;  %v5558_v0 = vrot.slane %v13356_v61, 7  ;;  %v13615_v27 = vld [vmem:[%s15072_s19 + $0x444] sm:$0x8] }
 0x50b   : > { %v6044_v52 = vunpack.c.l.b16 %v6005_v63  ;;  %v5557_v23 = vrot.slane %v5555_v36, 4  ;;  %v6393_v31 = vrot.slane %v13519_v60, 7  ;;  %v13617_v49 = vld [vmem:[%s15072_s19 + $0x44c] sm:$0x7]  ;;  %v13645_v34 = vrot.slane %v13615_v27, 11 }
 0x50c   : > { %v5711_v9 = vpop.f32.mrf.mxu3  ;;  %13672 = vmatmul.msk.bf16.gmra.mxu2 %vm564_vm3, %v6942_v55  ;;  %v6392_v55 = vrot.slane %v6390_v41, 4  ;;  %v5556_v63 = vsel %vm16619_vm9, %v13374_v7, %v5555_v36 }
 0x50d   : > { %v5778_v30 = vadd.f32 %v5711_v9, %v17510_v58 }
 0x50e   : > { %v4907_v56 = vpop.f32.mrf.mxu1  ;;  %v18019_v33 = vpop.f32.mrf.mxu2  ;;  %v6394_v61 = vsel %vm16619_vm9, %v6392_v55, %v6393_v31  ;;  %v13521_v31 = vld [vmem:[%s15072_s19 + $0x2e8] sm:$0xf] }
 0x50f   : > { %v4908_v4 = vadd.f32 %v4907_v56, %v17535_v50  ;;  %v18017_v58 = vadd.f32 %v17889_v47, %v5778_v30  ;;  %v6061_v50 = vpack.c.b16 %v6045_v21, %v6044_v52  ;;  %v6853_v52 = vrot.slane %v13617_v49, 7 }
 0x510   : > { %v5600_v21 = vunpack.c.l.b16 %v5556_v63  ;;  %v13772_v63 = vld [vmem:[%s15072_s19 + $0x354] sm:$0x8] }
 0x511   : > { %20883 = vst [vmem:[#allocation91_spill] sm:$0xff] %v18017_v58  ;;  %v18022_v46 = vadd.f32 %v17907_v13, %v4908_v4  ;;  %13401 = vmatmul.msk.bf16.gmra.mxu3 %vm564_vm3, %v5617_v3  ;;  %13578 = vmatmul.msk.bf16.gmra.mxu1 %vm564_vm3, %v6494_v35  ;;  %v6850_v13 = vrot.slane %v13616_v1, 7  ;;  %v5559_v3 = vsel %vm16619_vm9, %v5557_v23, %v5558_v0  ;;  %v13820_v27 = vrot.slane %v13772_v63, 11 }
 0x512   : > { %v18026_v47 = vpop.f32.mrf.mxu0  ;;  %v6391_v35 = vsel %vm16619_vm9, %v13551_v57, %v6390_v41  ;;  %v5601_v4 = vunpack.c.l.b16 %v5559_v3 }
 0x513   : > { %v6852_v36 = vrot.slane %v6850_v13, 4  ;;  %v6470_v60 = vunpack.c.l.b16 %v6391_v35  ;;  %v6851_v23 = vsel %vm16619_vm9, %v13645_v34, %v6850_v13  ;;  %v13774_v13 = vld [vmem:[%s15072_s19 + $0x35c] sm:$0x7]  ;;  %v13359_v34 = vld [vmem:[%s15072_s19 + $0x260] sm:$0x7] }
 0x514   : > { %v5714_v9 = vpop.f32.mrf.mxu3  ;;  %v5618_v49 = vpack.c.b16 %v5601_v4, %v5600_v21 }
 0x515   : > { %v5779_v30 = vadd.f32 %v5714_v9, %v17530_v40  ;;  %13495 = vmatmul.msk.bf16.gmra.mxu0 %vm564_vm3, %v6061_v50  ;;  %v6854_v0 = vsel %vm16619_vm9, %v6852_v36, %v6853_v52  ;;  %v13358_v50 = vld [vmem:[%s15072_s19 + $0x25c] sm:$0xf]  ;;  %v13520_v52 = vld [vmem:[%s15072_s19 + $0x2e4] sm:$0x8] }
 0x516   : > { %v4909_v56 = vpop.f32.mrf.mxu1  ;;  %v18045_v7 = vpop.f32.mrf.mxu2  ;;  %v6921_v55 = vunpack.c.l.b16 %v6854_v0  ;;  %v5562_v35 = vrot.slane %v13358_v50, 7  ;;  %v7674_v0 = vrot.slane %v13774_v13, 7 }
 0x517   : > { %v4910_v40 = vadd.f32 %v4909_v56, %v17559_v18  ;;  %v18043_v41 = vadd.f32 %v17914_v22, %v5779_v30  ;;  %v6471_v18 = vunpack.c.l.b16 %v6394_v61  ;;  %v6920_v22 = vunpack.c.l.b16 %v6851_v23  ;;  %v13773_v30 = vld [vmem:[%s15072_s19 + $0x358] sm:$0xf] }
 0x518   : > { %v13357_v61 = vld [vmem:[%s15072_s19 + $0x258] sm:$0x8]  ;;  %v7671_v23 = vrot.slane %v13773_v30, 7 }
 0x519   : > { %v18052_v57 = vadd.f32 %v17934_v48, %v4910_v40  ;;  %v6943_v9 = vpack.c.b16 %v6921_v55, %v6920_v22  ;;  %v6495_v56 = vpack.c.b16 %v6471_v18, %v6470_v60  ;;  %v6397_v40 = vrot.slane %v13521_v31, 7  ;;  %v13522_v55 = vld [vmem:[%s15072_s19 + $0x2ec] sm:$0x7] }
 0x51a   : > { %v18056_v1 = vpop.f32.mrf.mxu0  ;;  %v13375_v50 = vrot.slane %v13357_v61, 11  ;;  %v7672_v4 = vsel %vm16619_vm9, %v13820_v27, %v7671_v23  ;;  %v7673_v60 = vrot.slane %v7671_v23, 4  ;;  %v6400_v63 = vrot.slane %v13522_v55, 7  ;;  %v13619_v27 = vld [vmem:[%s15072_s19 + $0x464] sm:$0xf] }
 0x51b   : > { %v7786_v31 = vunpack.c.l.b16 %v7672_v4  ;;  %v13620_v23 = vld [vmem:[%s15072_s19 + $0x468] sm:$0x7] }
 0x51c   : > { %v5716_v3 = vpop.f32.mrf.mxu3  ;;  %13673 = vmatmul.msk.bf16.gmra.mxu2 %vm564_vm3, %v6943_v9  ;;  %v6399_v9 = vrot.slane %v6397_v40, 4  ;;  %v7675_v13 = vsel %vm16619_vm9, %v7673_v60, %v7674_v0 }
 0x51d   : > { %v5780_v48 = vadd.f32 %v5716_v3, %v17556_v5  ;;  %v5564_v5 = vrot.slane %v5562_v35, 4  ;;  %v7787_v3 = vunpack.c.l.b16 %v7675_v13 }
 0x51e   : > { %v4912_v36 = vpop.f32.mrf.mxu1  ;;  %v18071_v21 = vpop.f32.mrf.mxu2  ;;  %v6401_v0 = vsel %vm16619_vm9, %v6399_v9, %v6400_v63  ;;  %v13524_v63 = vld [vmem:[%s15072_s19 + $0x304] sm:$0xf] }
 0x51f   : > { %v4913_v22 = vadd.f32 %v4912_v36, %v17581_v44  ;;  %v18069_v58 = vadd.f32 %v17945_v8, %v5780_v48  ;;  %v5565_v44 = vrot.slane %v13359_v34, 7  ;;  %v13552_v8 = vrot.slane %v13520_v52, 11  ;;  %v13618_v52 = vld [vmem:[%s15072_s19 + $0x460] sm:$0x8] }
 0x520   : > { %v5563_v48 = vsel %vm16619_vm9, %v13375_v50, %v5562_v35  ;;  %v7818_v36 = vpack.c.b16 %v7787_v3, %v7786_v31  ;;  %v13646_v55 = vrot.slane %v13618_v52, 11  ;;  %v6860_v35 = vrot.slane %v13620_v23, 7  ;;  %v13681_v3 = vld [vmem:[%s15072_s19 + $0x354] sm:$0xf] }
 0x521   : > { %20884 = vst [vmem:[#allocation92_spill] sm:$0xff] %v18069_v58  ;;  %v18076_v18 = vadd.f32 %v17963_v19, %v4913_v22  ;;  %13402 = vmatmul.msk.bf16.gmra.mxu3 %vm564_vm3, %v5618_v49  ;;  %13579 = vmatmul.msk.bf16.gmra.mxu1 %vm564_vm3, %v6495_v56  ;;  %v6857_v49 = vrot.slane %v13619_v27, 7  ;;  %v5566_v61 = vsel %vm16619_vm9, %v5564_v5, %v5565_v44  ;;  %v5602_v50 = vunpack.c.l.b16 %v5563_v48  ;;  %v13775_v48 = vld [vmem:[%s15072_s19 + $0x370] sm:$0x8] }
 0x522   : > { %v18080_v30 = vpop.f32.mrf.mxu0  ;;  %v6398_v34 = vsel %vm16619_vm9, %v13552_v8, %v6397_v40  ;;  %v5603_v5 = vunpack.c.l.b16 %v5566_v61  ;;  %v6473_v9 = vunpack.c.l.b16 %v6401_v0  ;;  %v7229_v0 = vrot.slane %v13681_v3, 5  ;;  %v14769_v3 = vld [vmem:[%s20725_s2 + $0x120] sm:$0xff] }
 0x523   : > { %v6859_v4 = vrot.slane %v6857_v49, 4  ;;  %v6472_v60 = vunpack.c.l.b16 %v6398_v34  ;;  %v6858_v8 = vsel %vm16619_vm9, %v13646_v55, %v6857_v49  ;;  %v13777_v49 = vld [vmem:[%s15072_s19 + $0x378] sm:$0x7]  ;;  %v6404_v34 = vrot.slane %v13524_v63, 7  ;;  %8542 = vmatpush.bf16.msrb.mxu2 %v14769_v3 }
 0x524   : > { %v5719_v19 = vpop.f32.mrf.mxu3  ;;  %v6922_v13 = vunpack.c.l.b16 %v6858_v8  ;;  %v5619_v52 = vpack.c.b16 %v5603_v5, %v5602_v50  ;;  %v7681_v8 = vrot.slane %v13777_v49, 7 }
 0x525   : > { %v5781_v56 = vadd.f32 %v5719_v19, %v17576_v53  ;;  %13848 = vmatmul.msk.bf16.vlgmr.msrb.gmra.mxu0 %vm564_vm3, %v7818_v36  ;;  %v6861_v31 = vsel %vm16619_vm9, %v6859_v4, %v6860_v35  ;;  %v13821_v36 = vrot.slane %v13775_v48, 11  ;;  %v6496_v23 = vpack.c.b16 %v6473_v9, %v6472_v60  ;;  %v13525_v4 = vld [vmem:[%s15072_s19 + $0x308] sm:$0x7]  ;;  %v13680_v35 = vld [vmem:[%s15072_s19 + $0x350] sm:$0xe] }
 0x526   : > { %v4914_v22 = vpop.f32.mrf.mxu1  ;;  %v18101_v44 = vpop.f32.mrf.mxu2  ;;  %v6406_v48 = vrot.slane %v6404_v34, 4  ;;  %v13728_v9 = vrot.slane %v13680_v35, 9 }
 0x527   : > { %v4915_v53 = vadd.f32 %v4914_v22, %v17606_v62  ;;  %v18099_v40 = vadd.f32 %v17970_v51, %v5781_v56  ;;  %v6923_v51 = vunpack.c.l.b16 %v6861_v31  ;;  %v13776_v56 = vld [vmem:[%s15072_s19 + $0x374] sm:$0xf]  ;;  %v13523_v22 = vld [vmem:[%s15072_s19 + $0x300] sm:$0x8] }
 0x528   : > { %v13553_v63 = vrot.slane %v13523_v22, 11 }
 0x529   : > { %v18108_v62 = vadd.f32 %v17990_v59, %v4915_v53  ;;  %v6944_v19 = vpack.c.b16 %v6923_v51, %v6922_v13  ;;  %v7678_v53 = vrot.slane %v13776_v56, 7  ;;  %v13682_v13 = vld [vmem:[%s15072_s19 + $0x358] sm:$0x1] }
 0x52a   : > { %v18112_v27 = vpop.f32.mrf.mxu0  ;;  %v7232_v56 = vrot.slane %v13682_v13, 5 }
 0x52b   : > { %v7679_v50 = vsel %vm16619_vm9, %v13821_v36, %v7678_v53  ;;  %v7680_v5 = vrot.slane %v7678_v53, 4  ;;  %v13622_v36 = vld [vmem:[%s15072_s19 + $0x480] sm:$0xf]  ;;  %v13621_v53 = vld [vmem:[%s15072_s19 + $0x47c] sm:$0x8] }
 0x52c   : > { %v5721_v61 = vpop.f32.mrf.mxu3  ;;  %13674 = vmatmul.msk.bf16.gmra.mxu2 %vm564_vm3, %v6944_v19  ;;  %v7231_v19 = vrot.slane %v7229_v0, 4 }
 0x52d   : > { %v5782_v59 = vadd.f32 %v5721_v61, %v17602_v29 }
 0x52e   : > { %v6573_v55 = vpop.f32.mrf.mxu1  ;;  %v7233_v13 = vsel %vm15074_vm2, %v7231_v19, %v7232_v56 }
 0x52f   : > { %v6653_v31 = vadd.f32 %v6573_v55, %v17764_v14  ;;  %v18125_v51 = vadd.f32 %v18001_v10, %v5782_v59  ;;  %v18127_v29 = vpop.f32.mrf.mxu2  ;;  %v6407_v14 = vrot.slane %v13525_v4, 7  ;;  %v7788_v10 = vunpack.c.l.b16 %v7679_v50 }
 0x530   : > { %v7230_v4 = vsel %vm15074_vm2, %v13728_v9, %v7229_v0  ;;  %v13647_v50 = vrot.slane %v13621_v53, 11  ;;  %v14749_v0 = vld [vmem:[%s20726_s3 + $0x20] sm:$0xff]  ;;  %v7345_v56 = vunpack.c.l.b16 %v7233_v13  ;;  %v20886_v53 = vld [vmem:[#allocation84_spill] sm:$0xff] }
 0x531   : > { %20885 = vst [vmem:[#allocation93_spill] sm:$0xff] %v18125_v51  ;;  %v18132_v60 = vadd.f32 %v18019_v33, %v6653_v31  ;;  %13403 = vmatmul.msk.bf16.gmra.mxu3 %vm564_vm3, %v5619_v52  ;;  %13580 = vmatmul.msk.bf16.gmra.mxu1 %vm564_vm3, %v6496_v23  ;;  %v7682_v33 = vsel %vm16619_vm9, %v7680_v5, %v7681_v8  ;;  %v6864_v23 = vrot.slane %v13622_v36, 7  ;;  %v13623_v31 = vld [vmem:[%s15072_s19 + $0x484] sm:$0x7]  ;;  %v7344_v9 = vunpack.c.l.b16 %v7230_v4  ;;  %v13684_v36 = vld [vmem:[%s15072_s19 + $0x370] sm:$0xf] }
 0x532   : > { %v18139_v49 = vpop.f32.mrf.mxu0  ;;  %v7789_v61 = vunpack.c.l.b16 %v7682_v33  ;;  %v6405_v52 = vsel %vm16619_vm9, %v13553_v63, %v6404_v34  ;;  %v6408_v55 = vsel %vm16619_vm9, %v6406_v48, %v6407_v14  ;;  %v6867_v34 = vrot.slane %v13623_v31, 7  ;;  %v13527_v33 = vld [vmem:[%s15072_s19 + $0x320] sm:$0xf]  ;;  %8204 = vmatpush.bf16.msrb.mxu1 %v14749_v0  ;;  %v13683_v0 = vld [vmem:[%s15072_s19 + $0x36c] sm:$0xe] }
 0x533   : > { %v6866_v5 = vrot.slane %v6864_v23, 4  ;;  %v6475_v14 = vunpack.c.l.b16 %v6408_v55  ;;  %v13780_v55 = vld [vmem:[%s15072_s19 + $0x394] sm:$0x7]  ;;  %v7376_v13 = vpack.c.b16 %v7345_v56, %v7344_v9 }
 0x534   : > { %v5724_v59 = vpop.f32.mrf.mxu3  ;;  %v7819_v35 = vpack.c.b16 %v7789_v61, %v7788_v10 }
 0x535   : > { %v5783_v22 = vadd.f32 %v5724_v59, %v17625_v16  ;;  %v6474_v16 = vunpack.c.l.b16 %v6405_v52  ;;  %v6868_v3 = vsel %vm16619_vm9, %v6866_v5, %v6867_v34  ;;  %v7236_v5 = vrot.slane %v13684_v36, 5 }
 0x536   : > { %v6575_v8 = vpop.f32.mrf.mxu1  ;;  %13849 = vmatmul.msk.bf16.gmra.mxu0 %vm564_vm3, %v7819_v35  ;;  %v6925_v61 = vunpack.c.l.b16 %v6868_v3  ;;  %v6411_v35 = vrot.slane %v13527_v33, 7  ;;  %v7688_v3 = vrot.slane %v13780_v55, 7 }
 0x537   : > { %v6654_v63 = vadd.f32 %v6575_v8, %v17793_v26  ;;  %v18161_v48 = vadd.f32 %v18026_v47, %v5783_v22  ;;  %v18163_v10 = vpop.f32.mrf.mxu2  ;;  %v6865_v26 = vsel %vm16619_vm9, %v13647_v50, %v6864_v23  ;;  %v13778_v22 = vld [vmem:[%s15072_s19 + $0x38c] sm:$0x8]  ;;  %v13779_v23 = vld [vmem:[%s15072_s19 + $0x390] sm:$0xf]  ;;  %v6497_v8 = vpack.c.b16 %v6475_v14, %v6474_v16  ;;  %v13526_v50 = vld [vmem:[%s15072_s19 + $0x31c] sm:$0x8] }
 0x538   : > { %v6924_v47 = vunpack.c.l.b16 %v6865_v26  ;;  %v7685_v26 = vrot.slane %v13779_v23, 7  ;;  %v13554_v33 = vrot.slane %v13526_v50, 11 }
 0x539   : > { %v18170_v19 = vadd.f32 %v18045_v7, %v6654_v63  ;;  %v13822_v7 = vrot.slane %v13778_v22, 11  ;;  %v13528_v63 = vld [vmem:[%s15072_s19 + $0x324] sm:$0x7]  ;;  %v6413_v22 = vrot.slane %v6411_v35, 4 }
 0x53a   : > { %v18174_v59 = vpop.f32.mrf.mxu0  ;;  %v6945_v52 = vpack.c.b16 %v6925_v61, %v6924_v47  ;;  %v13685_v61 = vld [vmem:[%s15072_s19 + $0x374] sm:$0x1]  ;;  %v7687_v9 = vrot.slane %v7685_v26, 4 }
 0x53b   : > { %v7686_v14 = vsel %vm16619_vm9, %v13822_v7, %v7685_v26  ;;  %v7239_v23 = vrot.slane %v13685_v61, 5  ;;  %v13624_v26 = vld [vmem:[%s15072_s19 + $0x498] sm:$0x8] }
 0x53c   : > { %v5726_v4 = vpop.f32.mrf.mxu3  ;;  %13675 = vmatmul.msk.bf16.gmra.mxu2 %vm564_vm3, %v6945_v52  ;;  %v7790_v36 = vunpack.c.l.b16 %v7686_v14  ;;  %v7238_v52 = vrot.slane %v7236_v5, 4  ;;  %v13648_v14 = vrot.slane %v13624_v26, 11 }
 0x53d   : > { %v5784_v31 = vadd.f32 %v5726_v4, %v20886_v53  ;;  %v7689_v4 = vsel %vm16619_vm9, %v7687_v9, %v7688_v3  ;;  %v13625_v53 = vld [vmem:[%s15072_s19 + $0x49c] sm:$0xf] }
 0x53e   : > { %v6578_v34 = vpop.f32.mrf.mxu1  ;;  %v7791_v7 = vunpack.c.l.b16 %v7689_v4  ;;  %v7240_v3 = vsel %vm15074_vm2, %v7238_v52, %v7239_v23 }
 0x53f   : > { %v6655_v47 = vadd.f32 %v6578_v34, %v17820_v54  ;;  %v18187_v51 = vadd.f32 %v18056_v1, %v5784_v31  ;;  %v18189_v16 = vpop.f32.mrf.mxu2  ;;  %v6414_v54 = vrot.slane %v13528_v63, 7  ;;  %v13729_v1 = vrot.slane %v13683_v0, 9 }
 0x540   : > { %v6412_v31 = vsel %vm16619_vm9, %v13554_v33, %v6411_v35  ;;  %v7820_v0 = vpack.c.b16 %v7791_v7, %v7790_v36  ;;  %v7347_v7 = vunpack.c.l.b16 %v7240_v3 }
 0x541   : > { %20887 = vst [vmem:[#allocation84_spill] sm:$0xff] %v18187_v51  ;;  %v18194_v56 = vadd.f32 %v18071_v21, %v6655_v47  ;;  %13581 = vmatmul.msk.bf16.gmra.mxu1 %vm564_vm3, %v6497_v8  ;;  %13756 = vmatmul.msk.bf16.vlgmr.msra.gmra.mxu3 %vm564_vm3, %v7376_v13  ;;  %v6871_v8 = vrot.slane %v13625_v53, 7  ;;  %v20888_v13 = vld [vmem:[#allocation86_spill] sm:$0xff]  ;;  %v6415_v34 = vsel %vm16619_vm9, %v6413_v22, %v6414_v54  ;;  %v6476_v4 = vunpack.c.l.b16 %v6412_v31  ;;  %v13530_v53 = vld [vmem:[%s15072_s19 + $0x33c] sm:$0xf] }
 0x542   : > { %v18198_v55 = vpop.f32.mrf.mxu0  ;;  %v7237_v63 = vsel %vm15074_vm2, %v13729_v1, %v7236_v5  ;;  %v13626_v47 = vld [vmem:[%s15072_s19 + $0x4a0] sm:$0x7]  ;;  %v14752_v5 = vld [vmem:[%s20725_s2 + $0x168] sm:$0xff]  ;;  %v6477_v54 = vunpack.c.l.b16 %v6415_v34  ;;  %v6418_v26 = vrot.slane %v13530_v53, 7  ;;  %v13688_v51 = vld [vmem:[%s15072_s19 + $0x390] sm:$0x1] }
 0x543   : > { %v6873_v9 = vrot.slane %v6871_v8, 4  ;;  %v6874_v35 = vrot.slane %v13626_v47, 7  ;;  %v7346_v1 = vunpack.c.l.b16 %v7237_v63  ;;  %8642 = vmatpush.bf16.msrb.mxu3 %v14752_v5  ;;  %v13687_v31 = vld [vmem:[%s15072_s19 + $0x38c] sm:$0xf]  ;;  %v13781_v34 = vld [vmem:[%s15072_s19 + $0x3a8] sm:$0x8] }
 0x544   : > { %v5729_v21 = vpop.f32.mrf.mxu3  ;;  %v13783_v63 = vld [vmem:[%s15072_s19 + $0x3b0] sm:$0x7]  ;;  %v6498_v3 = vpack.c.b16 %v6477_v54, %v6476_v4  ;;  %v13531_v5 = vld [vmem:[%s15072_s19 + $0x340] sm:$0x7] }
 0x545   : > { %v5785_v50 = vadd.f32 %v5729_v21, %v20888_v13  ;;  %v6875_v52 = vsel %vm16619_vm9, %v6873_v9, %v6874_v35  ;;  %v20889_v47 = vld [vmem:[#allocation88_spill] sm:$0xff]  ;;  %v13529_v9 = vld [vmem:[%s15072_s19 + $0x338] sm:$0x8]  ;;  %v7243_v35 = vrot.slane %v13687_v31, 5 }
 0x546   : > { %v6580_v61 = vpop.f32.mrf.mxu1  ;;  %13850 = vmatmul.msk.bf16.gmra.mxu0 %vm564_vm3, %v7820_v0  ;;  %v6927_v21 = vunpack.c.l.b16 %v6875_v52  ;;  %v13555_v53 = vrot.slane %v13529_v9, 11 }
 0x547   : > { %v6656_v33 = vadd.f32 %v6580_v61, %v17849_v17  ;;  %v18220_v22 = vadd.f32 %v18080_v30, %v5785_v50  ;;  %v18222_v36 = vpop.f32.mrf.mxu2  ;;  %v6872_v17 = vsel %vm16619_vm9, %v13648_v14, %v6871_v8  ;;  %v13782_v8 = vld [vmem:[%s15072_s19 + $0x3ac] sm:$0xf]  ;;  %v7377_v14 = vpack.c.b16 %v7347_v7, %v7346_v1 }
 0x548   : > { %v6926_v30 = vunpack.c.l.b16 %v6872_v17  ;;  %v13686_v17 = vld [vmem:[%s15072_s19 + $0x388] sm:$0xe]  ;;  %v7692_v52 = vrot.slane %v13782_v8, 7  ;;  %v7246_v8 = vrot.slane %v13688_v51, 5 }
 0x549   : > { %v18229_v23 = vadd.f32 %v18101_v44, %v6656_v33  ;;  %v13823_v44 = vrot.slane %v13781_v34, 11  ;;  %v6420_v34 = vrot.slane %v6418_v26, 4 }
 0x54a   : > { %v18233_v13 = vpop.f32.mrf.mxu0  ;;  %v6946_v50 = vpack.c.b16 %v6927_v21, %v6926_v30  ;;  %v7695_v30 = vrot.slane %v13783_v63, 7  ;;  %v7694_v1 = vrot.slane %v7692_v52, 4 }
 0x54b   : > { %v7693_v54 = vsel %vm16619_vm9, %v13823_v44, %v7692_v52 }
 0x54c   : > { %v5731_v0 = vpop.f32.mrf.mxu3  ;;  %13676 = vmatmul.msk.bf16.gmra.mxu2 %vm564_vm3, %v6946_v50  ;;  %v7792_v31 = vunpack.c.l.b16 %v7693_v54  ;;  %v7245_v50 = vrot.slane %v7243_v35, 4 }
 0x54d   : > { %v5786_v61 = vadd.f32 %v5731_v0, %v20889_v47  ;;  %v7696_v0 = vsel %vm16619_vm9, %v7694_v1, %v7695_v30  ;;  %v13628_v47 = vld [vmem:[%s15072_s19 + $0x4b8] sm:$0xf] }
 0x54e   : > { %v6583_v33 = vpop.f32.mrf.mxu1  ;;  %v7793_v44 = vunpack.c.l.b16 %v7696_v0  ;;  %v7247_v30 = vsel %vm15074_vm2, %v7245_v50, %v7246_v8  ;;  %v13533_v8 = vld [vmem:[%s15072_s19 + $0x358] sm:$0xf] }
 0x54f   : > { %v6657_v21 = vadd.f32 %v6583_v33, %v17876_v32  ;;  %v18246_v58 = vadd.f32 %v18112_v27, %v5786_v61  ;;  %v18248_v4 = vpop.f32.mrf.mxu2  ;;  %v6421_v32 = vrot.slane %v13531_v5, 7  ;;  %v13730_v27 = vrot.slane %v13686_v17, 9  ;;  %v13627_v5 = vld [vmem:[%s15072_s19 + $0x4b4] sm:$0x8]  ;;  %v13629_v17 = vld [vmem:[%s15072_s19 + $0x4bc] sm:$0x7] }
 0x550   : > { %v6419_v61 = vsel %vm16619_vm9, %v13555_v53, %v6418_v26  ;;  %v7821_v33 = vpack.c.b16 %v7793_v44, %v7792_v31  ;;  %v6881_v26 = vrot.slane %v13629_v17, 7  ;;  %v7349_v50 = vunpack.c.l.b16 %v7247_v30  ;;  %v13690_v44 = vld [vmem:[%s15072_s19 + $0x3a8] sm:$0xf]  ;;  %v13532_v30 = vld [vmem:[%s15072_s19 + $0x354] sm:$0x8] }
 0x551   : > { %20890 = vst [vmem:[#allocation86_spill] sm:$0xff] %v18246_v58  ;;  %v18253_v7 = vadd.f32 %v18127_v29, %v6657_v21  ;;  %13582 = vmatmul.msk.bf16.gmra.mxu1 %vm564_vm3, %v6498_v3  ;;  %13757 = vmatmul.msk.bf16.gmra.mxu3 %vm564_vm3, %v7377_v14  ;;  %v6878_v3 = vrot.slane %v13628_v47, 7  ;;  %v6422_v9 = vsel %vm16619_vm9, %v6420_v34, %v6421_v32  ;;  %v13649_v21 = vrot.slane %v13627_v5, 11 }
 0x552   : > { %v18257_v63 = vpop.f32.mrf.mxu0  ;;  %v7244_v51 = vsel %vm15074_vm2, %v13730_v27, %v7243_v35  ;;  %v6478_v53 = vunpack.c.l.b16 %v6419_v61  ;;  %v6479_v34 = vunpack.c.l.b16 %v6422_v9  ;;  %v13784_v61 = vld [vmem:[%s15072_s19 + $0x3c4] sm:$0x8] }
 0x553   : > { %v6880_v54 = vrot.slane %v6878_v3, 4  ;;  %v7348_v1 = vunpack.c.l.b16 %v7244_v51  ;;  %v6879_v27 = vsel %vm16619_vm9, %v13649_v21, %v6878_v3  ;;  %v13786_v3 = vld [vmem:[%s15072_s19 + $0x3cc] sm:$0x7]  ;;  %v6425_v51 = vrot.slane %v13533_v8, 7 }
 0x554   : > { %v5734_v29 = vpop.f32.mrf.mxu3  ;;  %v6928_v0 = vunpack.c.l.b16 %v6879_v27  ;;  %v6499_v17 = vpack.c.b16 %v6479_v34, %v6478_v53  ;;  %v7250_v21 = vrot.slane %v13690_v44, 5  ;;  %v13556_v8 = vrot.slane %v13532_v30, 11 }
 0x555   : > { %v5787_v14 = vadd.f32 %v5734_v29, %v17742_v11  ;;  %v6882_v31 = vsel %vm16619_vm9, %v6880_v54, %v6881_v26  ;;  %v13534_v26 = vld [vmem:[%s15072_s19 + $0x35c] sm:$0x7] }
 0x556   : > { %v6585_v52 = vpop.f32.mrf.mxu1  ;;  %13851 = vmatmul.msk.bf16.gmra.mxu0 %vm564_vm3, %v7821_v33  ;;  %v13824_v33 = vrot.slane %v13784_v61, 11  ;;  %v6427_v61 = vrot.slane %v6425_v51, 4 }
 0x557   : > { %v6658_v11 = vadd.f32 %v6585_v52, %v17905_v38  ;;  %v18276_v35 = vadd.f32 %v18139_v49, %v5787_v14  ;;  %v18278_v32 = vpop.f32.mrf.mxu2  ;;  %v6929_v49 = vunpack.c.l.b16 %v6882_v31  ;;  %v13785_v14 = vld [vmem:[%s15072_s19 + $0x3c8] sm:$0xf]  ;;  %v7378_v52 = vpack.c.b16 %v7349_v50, %v7348_v1 }
 0x558   : > { %v7699_v27 = vrot.slane %v13785_v14, 7  ;;  %v7702_v31 = vrot.slane %v13786_v3, 7 }
 0x559   : > { %v18285_v38 = vadd.f32 %v18163_v10, %v6658_v11  ;;  %v6947_v29 = vpack.c.b16 %v6929_v49, %v6928_v0  ;;  %v20891_v10 = vld [vmem:[#allocation90_spill] sm:$0xff]  ;;  %v13691_v49 = vld [vmem:[%s15072_s19 + $0x3ac] sm:$0x1] }
 0x55a   : > { %v18289_v47 = vpop.f32.mrf.mxu0  ;;  %v13689_v11 = vld [vmem:[%s15072_s19 + $0x3a4] sm:$0xe]  ;;  %v7700_v34 = vsel %vm16619_vm9, %v13824_v33, %v7699_v27  ;;  %v7701_v1 = vrot.slane %v7699_v27, 4  ;;  %v7253_v14 = vrot.slane %v13691_v49, 5  ;;  %v13632_v27 = vld [vmem:[%s15072_s19 + $0x4d8] sm:$0x7] }
 0x55b   : > { %v7794_v44 = vunpack.c.l.b16 %v7700_v34 }
 0x55c   : > { %v5736_v9 = vpop.f32.mrf.mxu3  ;;  %13677 = vmatmul.msk.bf16.gmra.mxu2 %vm564_vm3, %v6947_v29  ;;  %v7252_v29 = vrot.slane %v7250_v21, 4 }
 0x55d   : > { %v5788_v5 = vadd.f32 %v5736_v9, %v20891_v10  ;;  %v7703_v9 = vsel %vm16619_vm9, %v7701_v1, %v7702_v31  ;;  %v13631_v10 = vld [vmem:[%s15072_s19 + $0x4d4] sm:$0xf] }
 0x55e   : > { %v6588_v54 = vpop.f32.mrf.mxu1  ;;  %v7795_v33 = vunpack.c.l.b16 %v7703_v9  ;;  %v7254_v31 = vsel %vm15074_vm2, %v7252_v29, %v7253_v14  ;;  %v13536_v14 = vld [vmem:[%s15072_s19 + $0x374] sm:$0xf] }
 0x55f   : > { %v6659_v0 = vadd.f32 %v6588_v54, %v17932_v24  ;;  %v18302_v58 = vadd.f32 %v18174_v59, %v5788_v5  ;;  %v18304_v53 = vpop.f32.mrf.mxu2  ;;  %v6428_v24 = vrot.slane %v13534_v26, 7  ;;  %v13731_v59 = vrot.slane %v13689_v11, 9  ;;  %v13630_v11 = vld [vmem:[%s15072_s19 + $0x4d0] sm:$0x8] }
 0x560   : > { %v6426_v5 = vsel %vm16619_vm9, %v13556_v8, %v6425_v51  ;;  %v7822_v26 = vpack.c.b16 %v7795_v33, %v7794_v44  ;;  %v13650_v49 = vrot.slane %v13630_v11, 11  ;;  %v6888_v51 = vrot.slane %v13632_v27, 7  ;;  %v13693_v33 = vld [vmem:[%s15072_s19 + $0x3c4] sm:$0xf] }
 0x561   : > { %20892 = vst [vmem:[#allocation88_spill] sm:$0xff] %v18302_v58  ;;  %v18309_v50 = vadd.f32 %v18189_v16, %v6659_v0  ;;  %13583 = vmatmul.msk.bf16.gmra.mxu1 %vm564_vm3, %v6499_v17  ;;  %13758 = vmatmul.msk.bf16.gmra.mxu3 %vm564_vm3, %v7378_v52  ;;  %v6885_v17 = vrot.slane %v13631_v10, 7  ;;  %v6429_v30 = vsel %vm16619_vm9, %v6427_v61, %v6428_v24  ;;  %v6480_v8 = vunpack.c.l.b16 %v6426_v5  ;;  %v13787_v5 = vld [vmem:[%s15072_s19 + $0x3e0] sm:$0x8] }
 0x562   : > { %v18313_v3 = vpop.f32.mrf.mxu0  ;;  %v7251_v54 = vsel %vm15074_vm2, %v13731_v59, %v7250_v21  ;;  %v6481_v61 = vunpack.c.l.b16 %v6429_v30  ;;  %v7351_v29 = vunpack.c.l.b16 %v7254_v31  ;;  %v7257_v31 = vrot.slane %v13693_v33, 5 }
 0x563   : > { %v6887_v34 = vrot.slane %v6885_v17, 4  ;;  %v7350_v1 = vunpack.c.l.b16 %v7251_v54  ;;  %v6886_v59 = vsel %vm16619_vm9, %v13650_v49, %v6885_v17  ;;  %v13789_v17 = vld [vmem:[%s15072_s19 + $0x3e8] sm:$0x7]  ;;  %v6432_v54 = vrot.slane %v13536_v14, 7 }
 0x564   : > { %v5739_v16 = vpop.f32.mrf.mxu3  ;;  %v6930_v9 = vunpack.c.l.b16 %v6886_v59  ;;  %v6500_v11 = vpack.c.b16 %v6481_v61, %v6480_v8  ;;  %v7709_v59 = vrot.slane %v13789_v17, 7 }
 0x565   : > { %v5789_v52 = vadd.f32 %v5739_v16, %v17798_v43  ;;  %v6889_v44 = vsel %vm16619_vm9, %v6887_v34, %v6888_v51  ;;  %v7379_v27 = vpack.c.b16 %v7351_v29, %v7350_v1  ;;  %v13537_v34 = vld [vmem:[%s15072_s19 + $0x378] sm:$0x7]  ;;  %v13692_v51 = vld [vmem:[%s15072_s19 + $0x3c0] sm:$0xe] }
 0x566   : > { %v6590_v0 = vpop.f32.mrf.mxu1  ;;  %13852 = vmatmul.msk.bf16.gmra.mxu0 %vm564_vm3, %v7822_v26  ;;  %v13825_v26 = vrot.slane %v13787_v5, 11 }
 0x567   : > { %v6660_v43 = vadd.f32 %v6590_v0, %v17961_v37  ;;  %v18332_v21 = vadd.f32 %v18198_v55, %v5789_v52  ;;  %v18334_v24 = vpop.f32.mrf.mxu2  ;;  %v6931_v55 = vunpack.c.l.b16 %v6889_v44  ;;  %v13788_v52 = vld [vmem:[%s15072_s19 + $0x3e4] sm:$0xf]  ;;  %v13535_v0 = vld [vmem:[%s15072_s19 + $0x370] sm:$0x8] }
 0x568   : > { %v13557_v14 = vrot.slane %v13535_v0, 11 }
 0x569   : > { %v18341_v37 = vadd.f32 %v18222_v36, %v6660_v43  ;;  %v6948_v16 = vpack.c.b16 %v6931_v55, %v6930_v9  ;;  %v7706_v43 = vrot.slane %v13788_v52, 7  ;;  %v13694_v9 = vld [vmem:[%s15072_s19 + $0x3c8] sm:$0x1] }
 0x56a   : > { %v18345_v10 = vpop.f32.mrf.mxu0  ;;  %v7260_v5 = vrot.slane %v13694_v9, 5 }
 0x56b   : > { %v7707_v61 = vsel %vm16619_vm9, %v13825_v26, %v7706_v43  ;;  %v7708_v1 = vrot.slane %v7706_v43, 4  ;;  %v13634_v26 = vld [vmem:[%s15072_s19 + $0x4f0] sm:$0xf]  ;;  %v13635_v43 = vld [vmem:[%s15072_s19 + $0x4f4] sm:$0x7] }
 0x56c   : > { %v5741_v30 = vpop.f32.mrf.mxu3  ;;  %13678 = vmatmul.msk.bf16.gmra.mxu2 %vm564_vm3, %v6948_v16  ;;  %v7796_v33 = vunpack.c.l.b16 %v7707_v61  ;;  %v7259_v16 = vrot.slane %v7257_v31, 4 }
 0x56d   : > { %v5790_v36 = vadd.f32 %v5741_v30, %v17829_v15  ;;  %v6434_v15 = vrot.slane %v6432_v54, 4  ;;  %v7710_v17 = vsel %vm16619_vm9, %v7708_v1, %v7709_v59 }
 0x56e   : > { %v6593_v49 = vpop.f32.mrf.mxu1  ;;  %v7797_v30 = vunpack.c.l.b16 %v7710_v17  ;;  %v7261_v59 = vsel %vm15074_vm2, %v7259_v16, %v7260_v5  ;;  %v13539_v17 = vld [vmem:[%s15072_s19 + $0x390] sm:$0xf] }
 0x56f   : > { %v6661_v44 = vadd.f32 %v6593_v49, %v17988_v28  ;;  %v18358_v55 = vadd.f32 %v18233_v13, %v5790_v36  ;;  %v18360_v8 = vpop.f32.mrf.mxu2  ;;  %v6435_v28 = vrot.slane %v13537_v34, 7  ;;  %v13732_v13 = vrot.slane %v13692_v51, 9  ;;  %v13633_v51 = vld [vmem:[%s15072_s19 + $0x4ec] sm:$0x8] }
 0x570   : > { %v6433_v36 = vsel %vm16619_vm9, %v13557_v14, %v6432_v54  ;;  %v7823_v34 = vpack.c.b16 %v7797_v30, %v7796_v33  ;;  %v13651_v54 = vrot.slane %v13633_v51, 11  ;;  %v6895_v14 = vrot.slane %v13635_v43, 7  ;;  %v13538_v43 = vld [vmem:[%s15072_s19 + $0x38c] sm:$0x8] }
 0x571   : > { %20893 = vst [vmem:[#allocation90_spill] sm:$0xff] %v18358_v55  ;;  %v18365_v29 = vadd.f32 %v18248_v4, %v6661_v44  ;;  %13584 = vmatmul.msk.bf16.gmra.mxu1 %vm564_vm3, %v6500_v11  ;;  %13759 = vmatmul.msk.bf16.gmra.mxu3 %vm564_vm3, %v7379_v27  ;;  %v6892_v11 = vrot.slane %v13634_v26, 7  ;;  %v6436_v0 = vsel %vm16619_vm9, %v6434_v15, %v6435_v28  ;;  %v7353_v33 = vunpack.c.l.b16 %v7261_v59  ;;  %v13697_v55 = vld [vmem:[%s15072_s19 + $0x3e4] sm:$0x1] }
 0x572   : > { %v18369_v52 = vpop.f32.mrf.mxu0  ;;  %v7258_v49 = vsel %vm15074_vm2, %v13732_v13, %v7257_v31  ;;  %v6482_v31 = vunpack.c.l.b16 %v6433_v36  ;;  %v6483_v15 = vunpack.c.l.b16 %v6436_v0  ;;  %v13791_v36 = vld [vmem:[%s15072_s19 + $0x400] sm:$0xf]  ;;  %v6439_v59 = vrot.slane %v13539_v17, 7 }
 0x573   : > { %v6894_v9 = vrot.slane %v6892_v11, 4  ;;  %v6893_v1 = vsel %vm16619_vm9, %v13651_v54, %v6892_v11  ;;  %v7352_v13 = vunpack.c.l.b16 %v7258_v49 }
 0x574   : > { %v5744_v4 = vpop.f32.mrf.mxu3  ;;  %v6932_v16 = vunpack.c.l.b16 %v6893_v1  ;;  %v6501_v49 = vpack.c.b16 %v6483_v15, %v6482_v31  ;;  %v7713_v1 = vrot.slane %v13791_v36, 7 }
 0x575   : > { %v5791_v27 = vadd.f32 %v5744_v4, %v17854_v12  ;;  %v6896_v28 = vsel %vm16619_vm9, %v6894_v9, %v6895_v14  ;;  %v13790_v4 = vld [vmem:[%s15072_s19 + $0x3fc] sm:$0x8]  ;;  %v7380_v51 = vpack.c.b16 %v7353_v33, %v7352_v13  ;;  %v13540_v9 = vld [vmem:[%s15072_s19 + $0x394] sm:$0x7] }
 0x576   : > { %v18383_v44 = vpop.f32.mrf.mxu1  ;;  %13853 = vmatmul.msk.bf16.gmra.mxu0 %vm564_vm3, %v7823_v34  ;;  %v6933_v5 = vunpack.c.l.b16 %v6896_v28  ;;  %v13826_v0 = vrot.slane %v13790_v4, 11  ;;  %v13558_v4 = vrot.slane %v13538_v43, 11  ;;  %v7715_v15 = vrot.slane %v7713_v1, 4 }
 0x577   : > { %v18389_v12 = vadd.f32 %v18257_v63, %v5791_v27  ;;  %v18391_v61 = vpop.f32.mrf.mxu2  ;;  %v13696_v63 = vld [vmem:[%s15072_s19 + $0x3e0] sm:$0xf]  ;;  %v13792_v27 = vld [vmem:[%s15072_s19 + $0x404] sm:$0x7]  ;;  %v6442_v33 = vrot.slane %v13540_v9, 7 }
 0x578   : > { %v6949_v26 = vpack.c.b16 %v6933_v5, %v6932_v16  ;;  %v7264_v14 = vrot.slane %v13696_v63, 5  ;;  %v7716_v28 = vrot.slane %v13792_v27, 7  ;;  %v13695_v5 = vld [vmem:[%s15072_s19 + $0x3dc] sm:$0xe]  ;;  %v7714_v31 = vsel %vm16619_vm9, %v13826_v0, %v7713_v1 }
 0x579   : > { %v7798_v17 = vunpack.c.l.b16 %v7714_v31  ;;  %v13793_v31 = vld [vmem:[%s15072_s19 + $0x418] sm:$0x8] }
 0x57a   : > { %v18399_v30 = vpop.f32.mrf.mxu0  ;;  %v7266_v63 = vrot.slane %v7264_v14, 4  ;;  %v7717_v27 = vsel %vm16619_vm9, %v7715_v15, %v7716_v28 }
 0x57c   : > { %v5746_v11 = vpop.f32.mrf.mxu3  ;;  %13679 = vmatmul.msk.bf16.gmra.mxu2 %vm564_vm3, %v6949_v26  ;;  %v7267_v26 = vrot.slane %v13697_v55, 5 }
 0x57d   : > { %v5792_v34 = vadd.f32 %v5746_v11, %v17885_v6  ;;  %v7799_v11 = vunpack.c.l.b16 %v7717_v27 }
 0x57e   : > { %v6598_v54 = vpop.f32.mrf.mxu1 }
 0x57f   : > { %v6663_v16 = vadd.f32 %v6598_v54, %v18043_v41  ;;  %v18412_v58 = vadd.f32 %v18289_v47, %v5792_v34  ;;  %v18414_v6 = vpop.f32.mrf.mxu2  ;;  %v6441_v41 = vrot.slane %v6439_v59, 4  ;;  %v13733_v47 = vrot.slane %v13695_v5, 9 }
 0x580   : > { %v6440_v34 = vsel %vm16619_vm9, %v13558_v4, %v6439_v59  ;;  %v7268_v54 = vsel %vm15074_vm2, %v7266_v63, %v7267_v26 }
 0x581   : > { %20894 = vst [vmem:[#allocation94_spill] sm:$0xff] %v18412_v58  ;;  %v18419_v13 = vadd.f32 %v18304_v53, %v6663_v16  ;;  %13585 = vmatmul.msk.bf16.gmra.mxu1 %vm564_vm3, %v6501_v49  ;;  %13760 = vmatmul.msk.bf16.gmra.mxu3 %vm564_vm3, %v7380_v51  ;;  %v6443_v49 = vsel %vm16619_vm9, %v6441_v41, %v6442_v33  ;;  %v6484_v9 = vunpack.c.l.b16 %v6440_v34  ;;  %v7355_v4 = vunpack.c.l.b16 %v7268_v54  ;;  %v13795_v41 = vld [vmem:[%s15072_s19 + $0x420] sm:$0x7] }
 0x582   : > { %v18423_v36 = vpop.f32.mrf.mxu0  ;;  %v7824_v51 = vpack.c.b16 %v7799_v11, %v7798_v17  ;;  %v7265_v43 = vsel %vm15074_vm2, %v13733_v47, %v7264_v14  ;;  %v6485_v1 = vunpack.c.l.b16 %v6443_v49  ;;  %v13542_v14 = vld [vmem:[%s15072_s19 + $0x3ac] sm:$0xf]  ;;  %v13827_v33 = vrot.slane %v13793_v31, 11  ;;  %v13699_v17 = vld [vmem:[%s15072_s19 + $0x3fc] sm:$0xf] }
 0x583   : > { %v7354_v5 = vunpack.c.l.b16 %v7265_v43  ;;  %v7723_v47 = vrot.slane %v13795_v41, 7  ;;  %v7271_v43 = vrot.slane %v13699_v17, 5  ;;  %v13698_v31 = vld [vmem:[%s15072_s19 + $0x3f8] sm:$0xe]  ;;  %v13700_v41 = vld [vmem:[%s15072_s19 + $0x400] sm:$0x1] }
 0x584   : > { %v5749_v0 = vpop.f32.mrf.mxu3  ;;  %v6502_v26 = vpack.c.b16 %v6485_v1, %v6484_v9  ;;  %v7274_v17 = vrot.slane %v13700_v41, 5 }
 0x585   : > { %v5793_v53 = vadd.f32 %v5749_v0, %v17910_v25  ;;  %v13794_v25 = vld [vmem:[%s15072_s19 + $0x41c] sm:$0xf]  ;;  %v7381_v0 = vpack.c.b16 %v7355_v4, %v7354_v5 }
 0x586   : > { %v18432_v55 = vpop.f32.mrf.mxu1  ;;  %13854 = vmatmul.msk.bf16.gmra.mxu0 %vm564_vm3, %v7824_v51  ;;  %v7720_v16 = vrot.slane %v13794_v25, 7  ;;  %v13541_v51 = vld [vmem:[%s15072_s19 + $0x3a8] sm:$0x8]  ;;  %v13543_v25 = vld [vmem:[%s15072_s19 + $0x3b0] sm:$0x7] }
 0x587   : > { %v18441_v59 = vadd.f32 %v18313_v3, %v5793_v53  ;;  %v18443_v28 = vpop.f32.mrf.mxu2  ;;  %v6446_v53 = vrot.slane %v13542_v14, 7  ;;  %v13559_v5 = vrot.slane %v13541_v51, 11  ;;  %v6449_v4 = vrot.slane %v13543_v25, 7 }
 0x588   : > { %v7722_v3 = vrot.slane %v7720_v16, 4  ;;  %v7721_v27 = vsel %vm16619_vm9, %v13827_v33, %v7720_v16  ;;  %v13734_v14 = vrot.slane %v13698_v31, 9  ;;  %v7273_v33 = vrot.slane %v7271_v43, 4  ;;  %v13796_v31 = vld [vmem:[%s15072_s19 + $0x434] sm:$0x8] }
 0x589   : > { %v7800_v58 = vunpack.c.l.b16 %v7721_v27 }
 0x58a   : > { %v18447_v15 = vpop.f32.mrf.mxu0  ;;  %v7724_v34 = vsel %vm16619_vm9, %v7722_v3, %v7723_v47 }
 0x58b   : > { %v7801_v9 = vunpack.c.l.b16 %v7724_v34 }
 0x58c   : > { %v5751_v63 = vpop.f32.mrf.mxu3 }
 0x58d   : > { %v5794_v11 = vadd.f32 %v5751_v63, %v17941_v42 }
 0x58e   : > { %v6603_v49 = vpop.f32.mrf.mxu1 }
 0x58f   : > { %v6665_v54 = vadd.f32 %v6603_v49, %v18099_v40  ;;  %v18462_v1 = vadd.f32 %v18345_v10, %v5794_v11  ;;  %v18464_v16 = vpop.f32.mrf.mxu2  ;;  %v6448_v40 = vrot.slane %v6446_v53, 4  ;;  %v7825_v10 = vpack.c.b16 %v7801_v9, %v7800_v58 }
 0x590   : > { %v7272_v11 = vsel %vm15074_vm2, %v13734_v14, %v7271_v43  ;;  %v7275_v58 = vsel %vm15074_vm2, %v7273_v33, %v7274_v17  ;;  %v13798_v43 = vld [vmem:[%s15072_s19 + $0x43c] sm:$0x7]  ;;  %v13828_v9 = vrot.slane %v13796_v31, 11 }
 0x591   : > { %20895 = vst [vmem:[#allocation95_spill] sm:$0xff] %v18462_v1  ;;  %v18467_v42 = vadd.f32 %v18360_v8, %v6665_v54  ;;  %13586 = vmatmul.msk.bf16.gmra.mxu1 %vm564_vm3, %v6502_v26  ;;  %13761 = vmatmul.msk.bf16.gmra.mxu3 %vm564_vm3, %v7381_v0  ;;  %v6447_v26 = vsel %vm16619_vm9, %v13559_v5, %v6446_v53  ;;  %v13797_v0 = vld [vmem:[%s15072_s19 + $0x438] sm:$0xf]  ;;  %v7356_v53 = vunpack.c.l.b16 %v7272_v11  ;;  %v7357_v54 = vunpack.c.l.b16 %v7275_v58  ;;  %v13701_v11 = vld [vmem:[%s15072_s19 + $0x414] sm:$0xe] }
 0x592   : > { %v18471_v3 = vpop.f32.mrf.mxu0  ;;  %v6450_v27 = vsel %vm16619_vm9, %v6448_v40, %v6449_v4  ;;  %v7727_v34 = vrot.slane %v13797_v0, 7  ;;  %v6486_v49 = vunpack.c.l.b16 %v6447_v26  ;;  %v13702_v5 = vld [vmem:[%s15072_s19 + $0x418] sm:$0xf]  ;;  %v7730_v4 = vrot.slane %v13798_v43, 7  ;;  %v13703_v58 = vld [vmem:[%s15072_s19 + $0x41c] sm:$0x1] }
 0x593   : > { %v6487_v51 = vunpack.c.l.b16 %v6450_v27  ;;  %v7278_v26 = vrot.slane %v13702_v5, 5  ;;  %v13710_v1 = vld [vmem:[%s15072_s19 + $0x468] sm:$0xe] }
 0x594   : > { %v5754_v47 = vpop.f32.mrf.mxu3  ;;  %v7729_v40 = vrot.slane %v7727_v34, 4 }
 0x595   : > { %v5795_v63 = vadd.f32 %v5754_v47, %v17966_v45  ;;  %v6503_v17 = vpack.c.b16 %v6487_v51, %v6486_v49  ;;  %v7280_v49 = vrot.slane %v7278_v26, 4  ;;  %v7281_v51 = vrot.slane %v13703_v58, 5 }
 0x596   : > { %v18474_v8 = vpop.f32.mrf.mxu1  ;;  %13855 = vmatmul.msk.bf16.gmra.mxu0 %vm564_vm3, %v7825_v10  ;;  %v7382_v10 = vpack.c.b16 %v7357_v54, %v7356_v53  ;;  %v7731_v47 = vsel %vm16619_vm9, %v7729_v40, %v7730_v4  ;;  %v13800_v4 = vld [vmem:[%s15072_s19 + $0x454] sm:$0xf] }
 0x597   : > { %v18487_v45 = vadd.f32 %v18369_v52, %v5795_v63  ;;  %v18489_v25 = vpop.f32.mrf.mxu2  ;;  %v7728_v52 = vsel %vm16619_vm9, %v13828_v9, %v7727_v34  ;;  %v7803_v31 = vunpack.c.l.b16 %v7731_v47  ;;  %v7282_v40 = vsel %vm15074_vm2, %v7280_v49, %v7281_v51  ;;  %v13799_v47 = vld [vmem:[%s15072_s19 + $0x450] sm:$0x8] }
 0x598   : > { %v7802_v0 = vunpack.c.l.b16 %v7728_v52  ;;  %v7734_v52 = vrot.slane %v13800_v4, 7 }
 0x59a   : > { %v18492_v41 = vpop.f32.mrf.mxu0  ;;  %v7826_v53 = vpack.c.b16 %v7803_v31, %v7802_v0 }
 0x59c   : > { %v5756_v14 = vpop.f32.mrf.mxu3 }
 0x59d   : > { %v5796_v33 = vadd.f32 %v5756_v14, %v17997_v39  ;;  %v13735_v39 = vrot.slane %v13701_v11, 9 }
 0x59e   : > { %v6608_v63 = vpop.f32.mrf.mxu1 }
 0x59f   : > { %v6667_v27 = vadd.f32 %v6608_v63, %v18161_v48  ;;  %v18505_v43 = vadd.f32 %v18399_v30, %v5796_v33  ;;  %v18512_v48 = vpop.f32.mrf.mxu2  ;;  %v7279_v5 = vsel %vm15074_vm2, %v13735_v39, %v7278_v26  ;;  %v13705_v63 = vld [vmem:[%s15072_s19 + $0x434] sm:$0xf]  ;;  %v13801_v26 = vld [vmem:[%s15072_s19 + $0x458] sm:$0x7] }
 0x5a0   : > { %v7358_v33 = vunpack.c.l.b16 %v7279_v5  ;;  %v7737_v0 = vrot.slane %v13801_v26, 7  ;;  %v13704_v5 = vld [vmem:[%s15072_s19 + $0x430] sm:$0xe] }
 0x5a1   : > { %20896 = vst [vmem:[#allocation96_spill] sm:$0xff] %v18505_v43  ;;  %v18508_v34 = vadd.f32 %v18414_v6, %v6667_v27  ;;  %13587 = vmatmul.msk.bf16.gmra.mxu1 %vm564_vm3, %v6503_v17  ;;  %13762 = vmatmul.msk.bf16.gmra.mxu3 %vm564_vm3, %v7382_v10  ;;  %v7359_v17 = vunpack.c.l.b16 %v7282_v40  ;;  %v14753_v10 = vld [vmem:[%s15072_s19] sm:$0xff]  ;;  %v13829_v27 = vrot.slane %v13799_v47, 11  ;;  %v13706_v40 = vld [vmem:[%s15072_s19 + $0x438] sm:$0x1] }
 0x5a2   : > { %v18514_v30 = vpop.f32.mrf.mxu0  ;;  %13973 = vmatmul.msk.bf16.vlgmr.msrb.gmra.mxu2 %vm564_vm3, %v14753_v10 }
 0x5a3   : > { %v7383_v31 = vpack.c.b16 %v7359_v17, %v7358_v33  ;;  %v7735_v49 = vsel %vm16619_vm9, %v13829_v27, %v7734_v52  ;;  %v7288_v17 = vrot.slane %v13706_v40, 5  ;;  %v14772_v40 = vld [vmem:[%s20725_s2 + $0x138] sm:$0xff] }
 0x5a4   : > { %v5759_v54 = vpop.f32.mrf.mxu3  ;;  %v7804_v4 = vunpack.c.l.b16 %v7735_v49  ;;  %9052 = vmatpush.bf16.msra.mxu0 %v14772_v40 }
 0x5a5   : > { %v5797_v6 = vadd.f32 %v5759_v54, %v18022_v46  ;;  %v7736_v46 = vrot.slane %v7734_v52, 4  ;;  %v13736_v52 = vrot.slane %v13704_v5, 9  ;;  %v13802_v5 = vld [vmem:[%s15072_s19 + $0x46c] sm:$0x8] }
 0x5a6   : > { %v18517_v9 = vpop.f32.mrf.mxu1  ;;  %13856 = vmatmul.msk.bf16.gmra.mxu0 %vm564_vm3, %v7826_v53  ;;  %v7285_v53 = vrot.slane %v13705_v63, 5 }
 0x5a7   : > { %v18526_v14 = vadd.f32 %v18423_v36, %v5797_v6  ;;  %v18536_v39 = vpop.f32.mrf.mxu2  ;;  %v7738_v54 = vsel %vm16619_vm9, %v7736_v46, %v7737_v0 }
 0x5a8   : > { %v7805_v10 = vunpack.c.l.b16 %v7738_v54  ;;  %v7287_v33 = vrot.slane %v7285_v53, 4  ;;  %v7286_v27 = vsel %vm15074_vm2, %v13736_v52, %v7285_v53  ;;  %v14754_v54 = vld [vmem:[%s15072_s19 + $0x1c] sm:$0xff] }
 0x5a9   : > { %v7360_v49 = vunpack.c.l.b16 %v7286_v27 }
 0x5aa   : > { %v18533_v58 = vpop.f32.mrf.mxu0  ;;  %v7827_v63 = vpack.c.b16 %v7805_v10, %v7804_v4  ;;  %v14774_v4 = vld [vmem:[%s20725_s2 + $0x148] sm:$0xff]  ;;  %v13830_v10 = vrot.slane %v13802_v5, 11  ;;  %v13709_v5 = vld [vmem:[%s15072_s19 + $0x454] sm:$0x1] }
 0x5ab   : > { %9494 = vmatpush.bf16.msra.mxu1 %v14774_v4 }
 0x5ac   : > { %v5761_v11 = vpop.f32.mrf.mxu3 }
 0x5ad   : > { %v5798_v36 = vadd.f32 %v5761_v11, %v18052_v57  ;;  %v7289_v11 = vsel %vm15074_vm2, %v7287_v33, %v7288_v17 }
 0x5ae   : > { %v6613_v51 = vpop.f32.mrf.mxu1 }
 0x5af   : > { %v6669_v6 = vadd.f32 %v6613_v51, %v18220_v22  ;;  %v18546_v47 = vadd.f32 %v18447_v15, %v5798_v36  ;;  %v14792_v15 = vld [vmem:[%s20725_s2 + $0x158] sm:$0xff]  ;;  %v18564_v0 = vpop.f32.mrf.mxu2  ;;  %v13803_v36 = vld [vmem:[%s15072_s19 + $0x470] sm:$0xf]  ;;  %v7361_v51 = vunpack.c.l.b16 %v7289_v11 }
 0x5b0   : > { %9792 = vmatpush.bf16.msra.mxu2 %v14792_v15 }
 0x5b1   : > { %20897 = vst [vmem:[#allocation97_spill] sm:$0xff] %v18546_v47  ;;  %v18549_v57 = vadd.f32 %v18464_v16, %v6669_v6  ;;  %13763 = vmatmul.msk.bf16.gmra.mxu3 %vm564_vm3, %v7383_v31  ;;  %v7741_v31 = vrot.slane %v13803_v36, 7  ;;  %v13708_v6 = vld [vmem:[%s15072_s19 + $0x450] sm:$0xf] }
 0x5b2   : > { %13974 = vmatmul.msk.bf16.gmra.mxu2 %vm564_vm3, %v14754_v54  ;;  %v7292_v27 = vrot.slane %v13708_v6, 5  ;;  %v13707_v54 = vld [vmem:[%s15072_s19 + $0x44c] sm:$0xe] }
 0x5b3   : > { %v18552_v22 = vpop.f32.mrf.mxu0  ;;  %v7743_v53 = vrot.slane %v7741_v31, 4 }
 0x5b4   : > { %v5764_v46 = vpop.f32.mrf.mxu3  ;;  %v7294_v6 = vrot.slane %v7292_v27, 4 }
 0x5b5   : > { %v5799_v26 = vadd.f32 %v5764_v46, %v18076_v18  ;;  %v7384_v46 = vpack.c.b16 %v7361_v51, %v7360_v49  ;;  %v13737_v51 = vrot.slane %v13707_v54, 9  ;;  %v13807_v54 = vld [vmem:[%s15072_s19 + $0x490] sm:$0x7] }
 0x5b6   : > { %v18558_v16 = vpop.f32.mrf.mxu1  ;;  %13857 = vmatmul.msk.bf16.gmra.mxu0 %vm564_vm3, %v7827_v63 }
 0x5b7   : > { %v18569_v18 = vadd.f32 %v18471_v3, %v5799_v26  ;;  %v13804_v3 = vld [vmem:[%s15072_s19 + $0x474] sm:$0x7]  ;;  %v7742_v26 = vsel %vm16619_vm9, %v13830_v10, %v7741_v31  ;;  %v18599_v31 = vpop.f32.mrf.mxu2 }
 0x5b8   : > { %v7744_v17 = vrot.slane %v13804_v3, 7  ;;  %v7806_v47 = vunpack.c.l.b16 %v7742_v26  ;;  %20898 = vst [vmem:[#allocation98_spill] sm:$0xff] %v18599_v31  ;;  %v13805_v26 = vld [vmem:[%s15072_s19 + $0x488] sm:$0x8] }
 0x5ba   : > { %v7745_v11 = vsel %vm16619_vm9, %v7743_v53, %v7744_v17  ;;  %v7295_v53 = vrot.slane %v13709_v5, 5 }
 0x5bb   : > { %v18582_v33 = vpop.f32.mrf.mxu0  ;;  %v7807_v43 = vunpack.c.l.b16 %v7745_v11  ;;  %v13711_v11 = vld [vmem:[%s15072_s19 + $0x46c] sm:$0xf] }
 0x5bc   : > { %v5766_v52 = vpop.f32.mrf.mxu3  ;;  %v7296_v10 = vsel %vm15074_vm2, %v7294_v6, %v7295_v53  ;;  %v7751_v6 = vrot.slane %v13807_v54, 7  ;;  %v13712_v54 = vld [vmem:[%s15072_s19 + $0x470] sm:$0x1] }
 0x5bd   : > { %v5800_v63 = vadd.f32 %v5766_v52, %v18108_v62  ;;  %v13806_v52 = vld [vmem:[%s15072_s19 + $0x48c] sm:$0xf] }
 0x5be   : > { %v6618_v15 = vpop.f32.mrf.mxu1  ;;  %v7748_v17 = vrot.slane %v13806_v52, 7 }
 0x5bf   : > { %v6671_v36 = vadd.f32 %v6618_v15, %v18276_v35  ;;  %v18593_v62 = vadd.f32 %v18492_v41, %v5800_v63  ;;  %v7828_v35 = vpack.c.b16 %v7807_v43, %v7806_v47  ;;  %v7363_v47 = vunpack.c.l.b16 %v7296_v10  ;;  %v14755_v63 = vld [vmem:[%s15072_s19 + $0x38] sm:$0xff] }
 0x5c0   : > { %v7750_v15 = vrot.slane %v7748_v17, 4  ;;  %v7299_v10 = vrot.slane %v13711_v11, 5  ;;  %v7302_v11 = vrot.slane %v13712_v54, 5  ;;  %v13714_v54 = vld [vmem:[%s15072_s19 + $0x488] sm:$0xf] }
 0x5c1   : > { %v18596_v49 = vadd.f32 %v18512_v48, %v6671_v36  ;;  %13764 = vmatmul.msk.bf16.gmra.mxu3 %vm564_vm3, %v7384_v46  ;;  %v7293_v48 = vsel %vm15074_vm2, %v13737_v51, %v7292_v27  ;;  %v18620_v27 = vpop.f32.mrf.mxu2  ;;  %v14751_v36 = vld [vmem:[%s20725_s2 + $0x160] sm:$0xff] }
 0x5c2   : > { %v7362_v43 = vunpack.c.l.b16 %v7293_v48  ;;  %13975 = vmatmul.msk.bf16.gmra.mxu2 %vm564_vm3, %v14755_v63  ;;  %8643 = vmatpush.bf16.msrb.mxu3 %v14751_v36  ;;  %v7752_v52 = vsel %vm16619_vm9, %v7750_v15, %v7751_v6 }
 0x5c3   : > { %v18601_v4 = vpop.f32.mrf.mxu0 }
 0x5c4   : > { %v7461_v40 = vpop.f32.mrf.mxu3 }
 0x5c5   : > { %v7541_v41 = vadd.f32 %v7461_v40, %v18132_v60  ;;  %v18617_v60 = vld [vmem:[%s20727_s4 + $0x2] ss:$0 sm:$0xff] }
 0x5c6   : > { %v18604_v3 = vpop.f32.mrf.mxu1  ;;  %13858 = vmatmul.msk.bf16.gmra.mxu0 %vm564_vm3, %v7828_v35  ;;  %v7385_v35 = vpack.c.b16 %v7363_v47, %v7362_v43 }
 0x5c7   : > { %v7983_v46 = vadd.f32 %v18514_v30, %v7541_v41  ;;  %v13831_v30 = vrot.slane %v13805_v26, 11 }
 0x5c9   : > { %v7749_v40 = vsel %vm16619_vm9, %v13831_v30, %v7748_v17  ;;  %v8052_v41 = vadd.f32 %v18617_v60, %v7983_v46  ;;  %v13738_v17 = vrot.slane %v13710_v1, 9  ;;  %v7301_v46 = vrot.slane %v7299_v10, 4  ;;  %v18647_v6 = vpop.f32.mrf.mxu2 }
 0x5ca   : > { %v7808_v31 = vunpack.c.l.b16 %v7749_v40 }
 0x5cb   : > { %v18628_v51 = vpop.f32.mrf.mxu0  ;;  %v8084_v15 = vmax.f32 %v8052_v41, 0.0  ;;  %v7300_v1 = vsel %vm15074_vm2, %v13738_v17, %v7299_v10  ;;  %v13810_v10 = vld [vmem:[%s15072_s19 + $0x4ac] sm:$0x7] }
 0x5cc   : > { %v7463_v5 = vpop.f32.mrf.mxu3  ;;  %v7364_v41 = vunpack.c.l.b16 %v7300_v1 }
 0x5cd   : > { %v7542_v53 = vadd.f32 %v7463_v5, %v18170_v19  ;;  %v7809_v19 = vunpack.c.l.b16 %v7752_v52  ;;  %v14756_v52 = vld [vmem:[%s15072_s19 + $0x54] sm:$0xff] }
 0x5ce   : > { %v6623_v48 = vpop.f32.mrf.mxu1 }
 0x5cf   : > { %v7984_v63 = vadd.f32 %v18533_v58, %v7542_v53  ;;  %v6673_v26 = vadd.f32 %v6623_v48, %v18332_v21  ;;  %v7829_v58 = vpack.c.b16 %v7809_v19, %v7808_v31  ;;  %v13809_v31 = vld [vmem:[%s15072_s19 + $0x4a8] sm:$0xf] }
 0x5d0   : > { %v7755_v40 = vrot.slane %v13809_v31, 7  ;;  %v13713_v31 = vld [vmem:[%s15072_s19 + $0x484] sm:$0xe] }
 0x5d1   : > { %v8053_v43 = vadd.f32 %v18617_v60, %v7984_v63  ;;  %v18642_v47 = vadd.f32 %v18564_v0, %v6673_v26  ;;  %13765 = vmatmul.msk.bf16.gmra.mxu3 %vm564_vm3, %v7385_v35  ;;  %v7303_v35 = vsel %vm15074_vm2, %v7301_v46, %v7302_v11  ;;  %v13808_v63 = vld [vmem:[%s15072_s19 + $0x4a4] sm:$0x8]  ;;  %v7758_v46 = vrot.slane %v13810_v10, 7 }
 0x5d2   : > { %v7365_v48 = vunpack.c.l.b16 %v7303_v35  ;;  %v7757_v26 = vrot.slane %v7755_v40, 4  ;;  %13976 = vmatmul.msk.bf16.gmra.mxu2 %vm564_vm3, %v14756_v52  ;;  %v13832_v19 = vrot.slane %v13808_v63, 11  ;;  %v7079_v35 = vpop.f32.mrf.mxu2  ;;  %v13715_v52 = vld [vmem:[%s15072_s19 + $0x48c] sm:$0x1] }
 0x5d3   : > { %v8085_v36 = vmax.f32 %v8053_v43, 0.0  ;;  %v18645_v30 = vpop.f32.mrf.mxu0 }
 0x5d4   : > { %v7466_v21 = vpop.f32.mrf.mxu3 }
 0x5d5   : > { %v8116_v5 = vpack.c.bf16 %v8085_v36, %v8084_v15  ;;  %v7543_v0 = vadd.f32 %v7466_v21, %v18194_v56  ;;  %v7386_v15 = vpack.c.b16 %v7365_v48, %v7364_v41  ;;  %v7756_v36 = vsel %vm16619_vm9, %v13832_v19, %v7755_v40 }
 0x5d6   : > { %v18650_v53 = vpop.f32.mrf.mxu1  ;;  %13859 = vmatmul.msk.bf16.gmra.mxu0 %vm564_vm3, %v7829_v58  ;;  %v7306_v21 = vrot.slane %v13714_v54, 5  ;;  %v7810_v63 = vunpack.c.l.b16 %v7756_v36  ;;  %v13739_v48 = vrot.slane %v13713_v31, 9  ;;  %v13812_v36 = vld [vmem:[%s15072_s19 + $0x4c4] sm:$0xf]  ;;  %v13811_v31 = vld [vmem:[%s15072_s19 + $0x4c0] sm:$0x8] }
 0x5d7   : > { %13877 = vmatmul.msk.bf16.vlgmr.msrb.gmra.mxu1 %vm564_vm3, %v8116_v5  ;;  %v7985_v56 = vadd.f32 %v18552_v22, %v7543_v0  ;;  %v7759_v5 = vsel %vm16619_vm9, %v7757_v26, %v7758_v46  ;;  %v7309_v26 = vrot.slane %v13715_v52, 5 }
 0x5d9   : > { %v8054_v22 = vadd.f32 %v18617_v60, %v7985_v56  ;;  %v7308_v56 = vrot.slane %v7306_v21, 4 }
 0x5db   : > { %v18665_v17 = vpop.f32.mrf.mxu0  ;;  %v8086_v54 = vmax.f32 %v8054_v22, 0.0  ;;  %v7762_v22 = vrot.slane %v13812_v36, 7  ;;  %v13718_v36 = vld [vmem:[%s15072_s19 + $0x4a8] sm:$0x1] }
 0x5dc   : > { %v7468_v43 = vpop.f32.mrf.mxu3 }
 0x5dd   : > { %v7544_v11 = vadd.f32 %v7468_v43, %v18229_v23  ;;  %v7811_v23 = vunpack.c.l.b16 %v7759_v5  ;;  %v7764_v52 = vrot.slane %v7762_v22, 4 }
 0x5de   : > { %v6628_v58 = vpop.f32.mrf.mxu1 }
 0x5df   : > { %v7986_v0 = vadd.f32 %v18582_v33, %v7544_v11  ;;  %v6675_v1 = vadd.f32 %v6628_v58, %v18389_v12  ;;  %v7830_v12 = vpack.c.b16 %v7811_v23, %v7810_v63  ;;  %v7307_v11 = vsel %vm15074_vm2, %v13739_v48, %v7306_v21  ;;  %v13717_v63 = vld [vmem:[%s15072_s19 + $0x4a4] sm:$0xf]  ;;  %v13813_v21 = vld [vmem:[%s15072_s19 + $0x4c8] sm:$0x7] }
 0x5e0   : > { %v7366_v58 = vunpack.c.l.b16 %v7307_v11  ;;  %v13833_v23 = vrot.slane %v13811_v31, 11 }
 0x5e1   : > { %v8055_v41 = vadd.f32 %v18617_v60, %v7986_v0  ;;  %v18679_v40 = vadd.f32 %v18620_v27, %v6675_v1  ;;  %13766 = vmatmul.msk.bf16.gmra.mxu3 %vm564_vm3, %v7386_v15  ;;  %v7310_v15 = vsel %vm15074_vm2, %v7308_v56, %v7309_v26  ;;  %v18694_v0 = vpop.f32.mrf.mxu2  ;;  %v7765_v56 = vrot.slane %v13813_v21, 7 }
 0x5e2   : > { %v7367_v5 = vunpack.c.l.b16 %v7310_v15  ;;  %v13716_v15 = vld [vmem:[%s15072_s19 + $0x4a0] sm:$0xe] }
 0x5e3   : > { %v8087_v33 = vmax.f32 %v8055_v41, 0.0  ;;  %v18682_v19 = vpop.f32.mrf.mxu0 }
 0x5e4   : > { %v7471_v10 = vpop.f32.mrf.mxu3 }
 0x5e5   : > { %v8117_v43 = vpack.c.bf16 %v8087_v33, %v8086_v54  ;;  %v7545_v46 = vadd.f32 %v7471_v10, %v18253_v7  ;;  %v14757_v7 = vld [vmem:[%s15072_s19 + $0x70] sm:$0xff]  ;;  %v7387_v54 = vpack.c.b16 %v7367_v5, %v7366_v58  ;;  %v7763_v33 = vsel %vm16619_vm9, %v13833_v23, %v7762_v22 }
 0x5e6   : > { %v18685_v27 = vpop.f32.mrf.mxu1  ;;  %13860 = vmatmul.msk.bf16.gmra.mxu0 %vm564_vm3, %v7830_v12  ;;  %13977 = vmatmul.msk.bf16.gmra.mxu2 %vm564_vm3, %v14757_v7  ;;  %v7313_v10 = vrot.slane %v13717_v63, 5  ;;  %v7812_v7 = vunpack.c.l.b16 %v7763_v33  ;;  %v13740_v22 = vrot.slane %v13716_v15, 9  ;;  %v13815_v33 = vld [vmem:[%s15072_s19 + $0x4e0] sm:$0xf] }
 0x5e7   : > { %13878 = vmatmul.msk.bf16.gmra.mxu1 %vm564_vm3, %v8117_v43  ;;  %v7987_v1 = vadd.f32 %v18601_v4, %v7545_v46  ;;  %v7766_v43 = vsel %vm16619_vm9, %v7764_v52, %v7765_v56 }
 0x5e8   : > { %v7813_v31 = vunpack.c.l.b16 %v7766_v43  ;;  %v7315_v5 = vrot.slane %v7313_v10, 4 }
 0x5e9   : > { %v8056_v4 = vadd.f32 %v18617_v60, %v7987_v1  ;;  %v7316_v1 = vrot.slane %v13718_v36, 5  ;;  %v13720_v36 = vld [vmem:[%s15072_s19 + $0x4c0] sm:$0xf] }
 0x5ea   : > { %v7831_v21 = vpack.c.b16 %v7813_v31, %v7812_v7 }
 0x5eb   : > { %v18702_v48 = vpop.f32.mrf.mxu0  ;;  %v8088_v63 = vmax.f32 %v8056_v4, 0.0  ;;  %v7769_v4 = vrot.slane %v13815_v33, 7  ;;  %v13721_v33 = vld [vmem:[%s15072_s19 + $0x4c4] sm:$0x1] }
 0x5ec   : > { %v7473_v41 = vpop.f32.mrf.mxu3 }
 0x5ed   : > { %v7546_v26 = vadd.f32 %v7473_v41, %v18285_v38  ;;  %v7771_v15 = vrot.slane %v7769_v4, 4 }
 0x5ee   : > { %v6633_v12 = vpop.f32.mrf.mxu1 }
 0x5ef   : > { %v7988_v46 = vadd.f32 %v18628_v51, %v7546_v26  ;;  %v6677_v11 = vadd.f32 %v6633_v12, %v18441_v59  ;;  %v7084_v51 = vpop.f32.mrf.mxu2  ;;  %v7314_v26 = vsel %vm15074_vm2, %v13740_v22, %v7313_v10  ;;  %v13816_v10 = vld [vmem:[%s15072_s19 + $0x4e4] sm:$0x7] }
 0x5f0   : > { %v7368_v12 = vunpack.c.l.b16 %v7314_v26  ;;  %v7772_v22 = vrot.slane %v13816_v10, 7 }
 0x5f1   : > { %v8057_v38 = vadd.f32 %v18617_v60, %v7988_v46  ;;  %v18715_v58 = vadd.f32 %v7079_v35, %v6677_v11  ;;  %13767 = vmatmul.msk.bf16.gmra.mxu3 %vm564_vm3, %v7387_v54  ;;  %v7317_v54 = vsel %vm15074_vm2, %v7315_v5, %v7316_v1  ;;  %v14758_v46 = vld [vmem:[%s15072_s19 + $0x8c] sm:$0xff]  ;;  %v13814_v11 = vld [vmem:[%s15072_s19 + $0x4dc] sm:$0x8] }
 0x5f2   : > { %v7369_v43 = vunpack.c.l.b16 %v7317_v54  ;;  %v13834_v7 = vrot.slane %v13814_v11, 11  ;;  %v13719_v54 = vld [vmem:[%s15072_s19 + $0x4bc] sm:$0xe]  ;;  %v7323_v11 = vrot.slane %v13721_v33, 5 }
 0x5f3   : > { %v8089_v52 = vmax.f32 %v8057_v38, 0.0  ;;  %v18718_v23 = vpop.f32.mrf.mxu0 }
 0x5f4   : > { %v7476_v59 = vpop.f32.mrf.mxu3  ;;  %v7388_v1 = vpack.c.b16 %v7369_v43, %v7368_v12 }
 0x5f5   : > { %v8118_v41 = vpack.c.bf16 %v8089_v52, %v8088_v63  ;;  %v7547_v35 = vadd.f32 %v7476_v59, %v18309_v50  ;;  %v7320_v59 = vrot.slane %v13720_v36, 5 }
 0x5f6   : > { %v18721_v56 = vpop.f32.mrf.mxu1  ;;  %13861 = vmatmul.msk.bf16.gmra.mxu0 %vm564_vm3, %v7831_v21  ;;  %13978 = vmatmul.msk.bf16.gmra.mxu2 %vm564_vm3, %v14758_v46 }
 0x5f7   : > { %13879 = vmatmul.msk.bf16.gmra.mxu1 %vm564_vm3, %v8118_v41  ;;  %v7989_v50 = vadd.f32 %v18645_v30, %v7547_v35  ;;  %v18739_v63 = vpop.f32.mrf.mxu2  ;;  %v7770_v30 = vsel %vm16619_vm9, %v13834_v7, %v7769_v4  ;;  %v7773_v41 = vsel %vm16619_vm9, %v7771_v15, %v7772_v22  ;;  %v13741_v4 = vrot.slane %v13719_v54, 9 }
 0x5f8   : > { %v7815_v12 = vunpack.c.l.b16 %v7773_v41 }
 0x5f9   : > { %v8058_v52 = vadd.f32 %v18617_v60, %v7989_v50  ;;  %v7322_v50 = vrot.slane %v7320_v59, 4 }
 0x5fb   : > { %v18736_v38 = vpop.f32.mrf.mxu0  ;;  %v8090_v36 = vmax.f32 %v8058_v52, 0.0 }
 0x5fc   : > { %v7478_v31 = vpop.f32.mrf.mxu3 }
 0x5fd   : > { %v7548_v5 = vadd.f32 %v7478_v31, %v18341_v37  ;;  %v7814_v37 = vunpack.c.l.b16 %v7770_v30 }
 0x5fe   : > { %v6638_v21 = vpop.f32.mrf.mxu1 }
 0x5ff   : > { %v7990_v35 = vadd.f32 %v18665_v17, %v7548_v5  ;;  %v6679_v26 = vadd.f32 %v6638_v21, %v18487_v45  ;;  %v7832_v10 = vpack.c.b16 %v7815_v12, %v7814_v37  ;;  %v7324_v5 = vsel %vm15074_vm2, %v7322_v50, %v7323_v11  ;;  %v7089_v52 = vpop.f32.mrf.mxu2  ;;  %v13818_v21 = vld [vmem:[%s15072_s19 + $0x4fc] sm:$0xf] }
 0x600   : > { %v13723_v12 = vld [vmem:[%s15072_s19 + $0x4dc] sm:$0xf] }
 0x601   : > { %v8059_v43 = vadd.f32 %v18617_v60, %v7990_v35  ;;  %v18751_v46 = vadd.f32 %v7084_v51, %v6679_v26  ;;  %13768 = vmatmul.msk.bf16.gmra.mxu3 %vm564_vm3, %v7388_v1  ;;  %v7321_v51 = vsel %vm15074_vm2, %v13741_v4, %v7320_v59  ;;  %v20899_v1 = vld [vmem:[#allocation91_spill] sm:$0xff]  ;;  %v7371_v35 = vunpack.c.l.b16 %v7324_v5  ;;  %v13817_v59 = vld [vmem:[%s15072_s19 + $0x4f8] sm:$0x8] }
 0x602   : > { %v6662_v30 = vadd.f32 %v18383_v44, %v20899_v1  ;;  %v7370_v41 = vunpack.c.l.b16 %v7321_v51  ;;  %v14759_v26 = vld [vmem:[%s15072_s19 + $0xa8] sm:$0xff]  ;;  %v13819_v44 = vld [vmem:[%s15072_s19 + $0x500] sm:$0x7]  ;;  %v13722_v5 = vld [vmem:[%s15072_s19 + $0x4d8] sm:$0xe] }
 0x603   : > { %v8091_v15 = vmax.f32 %v8059_v43, 0.0  ;;  %v18754_v45 = vpop.f32.mrf.mxu0  ;;  %v13835_v43 = vrot.slane %v13817_v59, 11  ;;  %v7779_v11 = vrot.slane %v13819_v44, 7  ;;  %v13724_v1 = vld [vmem:[%s15072_s19 + $0x4e0] sm:$0x1] }
 0x604   : > { %v7481_v17 = vpop.f32.mrf.mxu3  ;;  %v7108_v37 = vadd.f32 %v18278_v32, %v6662_v30  ;;  %v7327_v32 = vrot.slane %v13723_v12, 5  ;;  %v7330_v20 = vrot.slane %v13724_v1, 5 }
 0x605   : > { %v8119_v7 = vpack.c.bf16 %v8091_v15, %v8090_v36  ;;  %v7549_v31 = vadd.f32 %v7481_v17, %v18365_v29  ;;  %v7776_v29 = vrot.slane %v13818_v21, 7  ;;  %v7389_v15 = vpack.c.b16 %v7371_v35, %v7370_v41 }
 0x606   : > { %v18757_v22 = vpop.f32.mrf.mxu1  ;;  %13862 = vmatmul.msk.bf16.gmra.mxu0 %vm564_vm3, %v7832_v10  ;;  %13979 = vmatmul.msk.bf16.gmra.mxu2 %vm564_vm3, %v14759_v26  ;;  %v13742_v26 = vrot.slane %v13722_v5, 9 }
 0x607   : > { %13880 = vmatmul.msk.bf16.gmra.mxu1 %vm564_vm3, %v8119_v7  ;;  %v7991_v54 = vadd.f32 %v18682_v19, %v7549_v31  ;;  %v7778_v33 = vrot.slane %v7776_v29, 4  ;;  %v7777_v19 = vsel %vm16619_vm9, %v13835_v43, %v7776_v29  ;;  %v18790_v29 = vpop.f32.mrf.mxu2 }
 0x608   : > { %v7816_v30 = vunpack.c.l.b16 %v7777_v19 }
 0x609   : > { %v8060_v10 = vadd.f32 %v18617_v60, %v7991_v54  ;;  %v7780_v7 = vsel %vm16619_vm9, %v7778_v33, %v7779_v11  ;;  %v7329_v54 = vrot.slane %v7327_v32, 4 }
 0x60a   : > { %v7817_v21 = vunpack.c.l.b16 %v7780_v7 }
 0x60b   : > { %v18775_v50 = vpop.f32.mrf.mxu0  ;;  %v8092_v59 = vmax.f32 %v8060_v10, 0.0  ;;  %v7331_v43 = vsel %vm15074_vm2, %v7329_v54, %v7330_v20  ;;  %v14760_v10 = vld [vmem:[%s15072_s19 + $0xc4] sm:$0xff]  ;;  %v8726_v54 = vld [vmem:[%s15072_s19 + $0xc] sm:$0xf] }
 0x60c   : > { %v7483_v4 = vpop.f32.mrf.mxu3  ;;  %v7373_v19 = vunpack.c.l.b16 %v7331_v43  ;;  %v8823_v20 = vrot.slane %v8726_v54, 5 }
 0x60d   : > { %v7550_v36 = vadd.f32 %v7483_v4, %v7108_v37  ;;  %v20900_v4 = vld [vmem:[#allocation92_spill] sm:$0xff] }
 0x60e   : > { %v6643_v17 = vpop.f32.mrf.mxu1  ;;  %v6664_v11 = vadd.f32 %v18432_v55, %v20900_v4 }
 0x60f   : > { %v7992_v31 = vadd.f32 %v18702_v48, %v7550_v36  ;;  %v6681_v51 = vadd.f32 %v6643_v17, %v18526_v14  ;;  %v7833_v14 = vpack.c.b16 %v7817_v21, %v7816_v30  ;;  %v13726_v17 = vld [vmem:[%s15072_s19 + $0x4f8] sm:$0xf]  ;;  %v13725_v21 = vld [vmem:[%s15072_s19 + $0x4f4] sm:$0xe] }
 0x610   : > { %v7334_v1 = vrot.slane %v13726_v17, 5 }
 0x611   : > { %v8061_v41 = vadd.f32 %v18617_v60, %v7992_v31  ;;  %v18787_v35 = vadd.f32 %v7089_v52, %v6681_v51  ;;  %13769 = vmatmul.msk.bf16.gmra.mxu3 %vm564_vm3, %v7389_v15  ;;  %v7328_v52 = vsel %vm15074_vm2, %v13742_v26, %v7327_v32  ;;  %v7110_v32 = vadd.f32 %v18334_v24, %v6664_v11  ;;  %v7094_v31 = vpop.f32.mrf.mxu2 }
 0x612   : > { %v7372_v15 = vunpack.c.l.b16 %v7328_v52  ;;  %v8727_v52 = vld [vmem:[%s15072_s19 + $0x10] sm:$0x1]  ;;  %v8825_v11 = vrot.slane %v8823_v20, 4 }
 0x613   : > { %v8093_v48 = vmax.f32 %v8061_v41, 0.0  ;;  %v18792_v37 = vpop.f32.mrf.mxu0 }
 0x614   : > { %v7486_v33 = vpop.f32.mrf.mxu3  ;;  %v7390_v5 = vpack.c.b16 %v7373_v19, %v7372_v15 }
 0x615   : > { %v8120_v12 = vpack.c.bf16 %v8093_v48, %v8092_v59  ;;  %v7551_v36 = vadd.f32 %v7486_v33, %v18419_v13  ;;  %v7336_v33 = vrot.slane %v7334_v1, 4 }
 0x616   : > { %v18794_v44 = vpop.f32.mrf.mxu1  ;;  %13863 = vmatmul.msk.bf16.gmra.mxu0 %vm564_vm3, %v7833_v14  ;;  %13980 = vmatmul.msk.bf16.gmra.mxu2 %vm564_vm3, %v14760_v10  ;;  %v13743_v14 = vrot.slane %v13725_v21, 9  ;;  %v14771_v10 = vld [vmem:[%s20725_s2 + $0x130] sm:$0xff] }
 0x617   : > { %13881 = vmatmul.msk.bf16.gmra.mxu1 %vm564_vm3, %v8120_v12  ;;  %v7993_v7 = vadd.f32 %v18718_v23, %v7551_v36  ;;  %v13727_v23 = vld [vmem:[%s15072_s19 + $0x4fc] sm:$0x1]  ;;  %v8725_v12 = vld [vmem:[%s15072_s19 + $0x8] sm:$0xe]  ;;  %v8826_v36 = vrot.slane %v8727_v52, 5  ;;  %9053 = vmatpush.bf16.msra.mxu0 %v14771_v10 }
 0x618   : > { %v7337_v43 = vrot.slane %v13727_v23, 5  ;;  %v14013_v4 = vrot.slane %v8725_v12, 9 }
 0x619   : > { %v8062_v41 = vadd.f32 %v18617_v60, %v7993_v7 }
 0x61a   : > { %v8824_v17 = vsel %vm15074_vm2, %v14013_v4, %v8823_v20  ;;  %v7338_v21 = vsel %vm15074_vm2, %v7336_v33, %v7337_v43 }
 0x61b   : > { %v18810_v13 = vpop.f32.mrf.mxu0  ;;  %v7375_v12 = vunpack.c.l.b16 %v7338_v21 }
 0x61c   : > { %v7488_v55 = vpop.f32.mrf.mxu3 }
 0x61d   : > { %v7552_v51 = vadd.f32 %v7488_v55, %v7110_v32  ;;  %v8827_v32 = vsel %vm15074_vm2, %v8825_v11, %v8826_v36  ;;  %v8729_v36 = vld [vmem:[%s15072_s19 + $0x28] sm:$0xf] }
 0x61e   : > { %v6648_v30 = vpop.f32.mrf.mxu1  ;;  %v8939_v55 = vunpack.c.l.b16 %v8827_v32 }
 0x61f   : > { %v7994_v26 = vadd.f32 %v18736_v38, %v7552_v51  ;;  %v6683_v24 = vadd.f32 %v6648_v30, %v18569_v18  ;;  %v8094_v38 = vmax.f32 %v8062_v41, 0.0  ;;  %v7335_v30 = vsel %vm15074_vm2, %v13743_v14, %v7334_v1  ;;  %v20901_v41 = vld [vmem:[#allocation93_spill] sm:$0xff]  ;;  %v14761_v1 = vld [vmem:[%s15072_s19 + $0xe0] sm:$0xff] }
 0x621   : > { %v8063_v59 = vadd.f32 %v18617_v60, %v7994_v26  ;;  %v18819_v48 = vadd.f32 %v7094_v31, %v6683_v24  ;;  %13770 = vmatmul.msk.bf16.gmra.mxu3 %vm564_vm3, %v7390_v5  ;;  %v8938_v31 = vunpack.c.l.b16 %v8824_v17  ;;  %v7096_v5 = vpop.f32.mrf.mxu2  ;;  %v6666_v26 = vadd.f32 %v18474_v8, %v20901_v41 }
 0x623   : > { %v8095_v15 = vmax.f32 %v8063_v59, 0.0  ;;  %v18824_v19 = vpop.f32.mrf.mxu0  ;;  %v8970_v54 = vpack.c.b16 %v8939_v55, %v8938_v31  ;;  %v7374_v59 = vunpack.c.l.b16 %v7335_v30  ;;  %v7112_v14 = vadd.f32 %v18391_v61, %v6666_v26  ;;  %v8728_v61 = vld [vmem:[%s15072_s19 + $0x24] sm:$0xe]  ;;  %v14791_v31 = vld [vmem:[%s20725_s2 + $0x150] sm:$0xff] }
 0x624   : > { %v7491_v18 = vpop.f32.mrf.mxu3  ;;  %9793 = vmatpush.bf16.msra.mxu2 %v14791_v31 }
 0x625   : > { %v8121_v7 = vpack.c.bf16 %v8095_v15, %v8094_v38  ;;  %v7553_v24 = vadd.f32 %v7491_v18, %v18467_v42  ;;  %v7391_v52 = vpack.c.b16 %v7375_v12, %v7374_v59  ;;  %v8830_v38 = vrot.slane %v8729_v36, 5  ;;  %v14762_v12 = vld [vmem:[%s15072_s19 + $0xfc] sm:$0xff] }
 0x626   : > { %v6650_v51 = vpop.f32.mrf.mxu1  ;;  %14041 = vmatmul.msk.bf16.vlgmr.msra.gmra.mxu0 %vm564_vm3, %v8970_v54  ;;  %13981 = vmatmul.msk.bf16.gmra.mxu2 %vm564_vm3, %v14761_v1  ;;  %v14014_v18 = vrot.slane %v8728_v61, 9  ;;  %v20903_v36 = vld [vmem:[#allocation6_spill] sm:$0xff] }
 0x627   : > { %v6684_v23 = vadd.f32 %v6650_v51, %v18593_v62  ;;  %13882 = vmatmul.msk.bf16.gmra.mxu1 %vm564_vm3, %v8121_v7  ;;  %v7995_v8 = vadd.f32 %v18754_v45, %v7553_v24  ;;  %v8730_v45 = vld [vmem:[%s15072_s19 + $0x2c] sm:$0x1]  ;;  %v8832_v10 = vrot.slane %v8830_v38, 4  ;;  %v20902_v24 = vld [vmem:[#allocation84_spill] sm:$0xff] }
 0x628   : > { %v8833_v17 = vrot.slane %v8730_v45, 5  ;;  %v8831_v51 = vsel %vm15074_vm2, %v14014_v18, %v8830_v38  ;;  %v8731_v38 = vld [vmem:[%s15072_s19 + $0x40] sm:$0xe] }
 0x629   : > { %v18842_v20 = vadd.f32 %v7096_v5, %v6684_v23  ;;  %v18851_v43 = vpop.f32.mrf.mxu2  ;;  %v8064_v4 = vadd.f32 %v18617_v60, %v7995_v8  ;;  %v8940_v21 = vunpack.c.l.b16 %v8831_v51  ;;  %v6668_v23 = vadd.f32 %v18517_v9, %v20902_v24  ;;  %v14773_v8 = vld [vmem:[%s20725_s2 + $0x140] sm:$0xff] }
 0x62a   : > { %v8834_v5 = vsel %vm15074_vm2, %v8832_v10, %v8833_v17  ;;  %9495 = vmatpush.bf16.msra.mxu1 %v14773_v8  ;;  %v14015_v61 = vrot.slane %v8731_v38, 9 }
 0x62b   : > { %v18849_v62 = vpop.f32.mrf.mxu0  ;;  %v8096_v32 = vmax.f32 %v8064_v4, 0.0  ;;  %v8941_v41 = vunpack.c.l.b16 %v8834_v5  ;;  %v7114_v1 = vadd.f32 %v18443_v28, %v6668_v23  ;;  %v8732_v4 = vld [vmem:[%s15072_s19 + $0x44] sm:$0xf] }
 0x62c   : > { %v7493_v42 = vpop.f32.mrf.mxu3 }
 0x62d   : > { %v7554_v33 = vadd.f32 %v7493_v42, %v7112_v14  ;;  %v8971_v59 = vpack.c.b16 %v8941_v41, %v8940_v21  ;;  %v20904_v21 = vld [vmem:[#allocation86_spill] sm:$0xff] }
 0x62e   : > { %v6670_v41 = vadd.f32 %v18558_v16, %v20904_v21 }
 0x62f   : > { %v7996_v11 = vadd.f32 %v18775_v50, %v7554_v33 }
 0x631   : > { %v8065_v15 = vadd.f32 %v18617_v60, %v7996_v11  ;;  %13771 = vmatmul.msk.bf16.gmra.mxu3 %vm564_vm3, %v7391_v52  ;;  %v18869_v26 = vpop.f32.mrf.mxu2  ;;  %v8837_v11 = vrot.slane %v8732_v4, 5  ;;  %v8734_v4 = vld [vmem:[%s15072_s19 + $0x5c] sm:$0xe] }
 0x633   : > { %v8097_v7 = vmax.f32 %v8065_v15, 0.0  ;;  %v18863_v50 = vpop.f32.mrf.mxu0  ;;  %v8733_v15 = vld [vmem:[%s15072_s19 + $0x48] sm:$0x1]  ;;  %v8839_v45 = vrot.slane %v8837_v11, 4 }
 0x634   : > { %v7496_v55 = vpop.f32.mrf.mxu3  ;;  %v8840_v18 = vrot.slane %v8733_v15, 5  ;;  %v20906_v15 = vld [vmem:[#allocation23_spill] sm:$0xff] }
 0x635   : > { %v8122_v30 = vpack.c.bf16 %v8097_v7, %v8096_v32  ;;  %v7555_v54 = vadd.f32 %v7496_v55, %v18508_v34 }
 0x636   : > { %14042 = vmatmul.msk.bf16.gmra.mxu0 %vm564_vm3, %v8971_v59  ;;  %13982 = vmatmul.msk.bf16.gmra.mxu2 %vm564_vm3, %v14762_v12  ;;  %v8841_v31 = vsel %vm15074_vm2, %v8839_v45, %v8840_v18  ;;  %v7116_v59 = vadd.f32 %v18489_v25, %v6670_v41 }
 0x637   : > { %13883 = vmatmul.msk.bf16.gmra.mxu1 %vm564_vm3, %v8122_v30  ;;  %v7997_v14 = vadd.f32 %v18792_v37, %v7555_v54  ;;  %v8943_v5 = vunpack.c.l.b16 %v8841_v31  ;;  %v14763_v54 = vld [vmem:[%s15072_s19 + $0x118] sm:$0xff] }
 0x639   : > { %v18885_v33 = vpop.f32.mrf.mxu2  ;;  %v8066_v52 = vadd.f32 %v18617_v60, %v7997_v14 }
 0x63b   : > { %v18883_v9 = vpop.f32.mrf.mxu0  ;;  %v8098_v10 = vmax.f32 %v8066_v52, 0.0 }
 0x63c   : > { %v7498_v34 = vpop.f32.mrf.mxu3 }
 0x63d   : > { %v7556_v42 = vadd.f32 %v7498_v34, %v7114_v1  ;;  %v14794_v1 = vld [vmem:[%s20725_s2 + $0x178] sm:$0xff] }
 0x63e   : > { %10234 = vmatpush.bf16.msra.mxu3 %v14794_v1  ;;  %v20910_v1 = vld [vmem:[#allocation24_spill] sm:$0xff] }
 0x63f   : > { %v7998_v28 = vadd.f32 %v18810_v13, %v7556_v42  ;;  %v8838_v13 = vsel %vm15074_vm2, %v14015_v61, %v8837_v11  ;;  %v8735_v42 = vld [vmem:[%s15072_s19 + $0x60] sm:$0xf]  ;;  %v8736_v11 = vld [vmem:[%s15072_s19 + $0x64] sm:$0x1]  ;;  %v20907_v61 = vld [vmem:[#allocation55_spill] sm:$0xff] }
 0x640   : > { %v8942_v51 = vunpack.c.l.b16 %v8838_v13  ;;  %v8844_v52 = vrot.slane %v8735_v42, 5  ;;  %v8847_v38 = vrot.slane %v8736_v11, 5  ;;  %v4330_v45 = vadd.f32 %v20907_v61, %v20906_v15  ;;  %v8739_v15 = vld [vmem:[%s15072_s19 + $0x80] sm:$0x1] }
 0x641   : > { %v8067_v37 = vadd.f32 %v18617_v60, %v7998_v28  ;;  %13997 = vmatmul.msk.bf16.vlgmr.msrb.gmra.mxu3 %vm564_vm3, %v20903_v36  ;;  %v18901_v30 = vpop.f32.mrf.mxu2  ;;  %v20905_v28 = vld [vmem:[#allocation7_spill] sm:$0xff] }
 0x642   : > { %v8972_v23 = vpack.c.b16 %v8943_v5, %v8942_v51  ;;  %v8846_v36 = vrot.slane %v8844_v52, 4 }
 0x643   : > { %v8099_v17 = vmax.f32 %v8067_v37, 0.0  ;;  %v18895_v7 = vpop.f32.mrf.mxu0  ;;  %v14016_v37 = vrot.slane %v8734_v4, 9 }
 0x644   : > { %v7501_v32 = vpop.f32.mrf.mxu3  ;;  %v8848_v13 = vsel %vm15074_vm2, %v8846_v36, %v8847_v38  ;;  %v8737_v38 = vld [vmem:[%s15072_s19 + $0x78] sm:$0xe] }
 0x645   : > { %v8123_v55 = vpack.c.bf16 %v8099_v17, %v8098_v10  ;;  %v7557_v24 = vadd.f32 %v7501_v32, %v18549_v57  ;;  %v8845_v32 = vsel %vm15074_vm2, %v14016_v37, %v8844_v52  ;;  %v8945_v41 = vunpack.c.l.b16 %v8848_v13  ;;  %v8738_v37 = vld [vmem:[%s15072_s19 + $0x7c] sm:$0xf] }
 0x646   : > { %14043 = vmatmul.msk.bf16.gmra.mxu0 %vm564_vm3, %v8972_v23  ;;  %13983 = vmatmul.msk.bf16.gmra.mxu2 %vm564_vm3, %v14763_v54  ;;  %v8944_v5 = vunpack.c.l.b16 %v8845_v32  ;;  %v14017_v61 = vrot.slane %v8737_v38, 9 }
 0x647   : > { %13884 = vmatmul.msk.bf16.gmra.mxu1 %vm564_vm3, %v8123_v55  ;;  %v7999_v12 = vadd.f32 %v18824_v19, %v7557_v24  ;;  %v20909_v24 = vld [vmem:[#allocation88_spill] sm:$0xff] }
 0x648   : > { %v6672_v23 = vadd.f32 %v18604_v3, %v20909_v24 }
 0x649   : > { %v18917_v8 = vpop.f32.mrf.mxu2  ;;  %v8068_v34 = vadd.f32 %v18617_v60, %v7999_v12  ;;  %v14764_v12 = vld [vmem:[%s15072_s19 + $0x134] sm:$0xff] }
 0x64b   : > { %v18915_v16 = vpop.f32.mrf.mxu0  ;;  %v8100_v18 = vmax.f32 %v8068_v34, 0.0  ;;  %v7118_v34 = vadd.f32 %v18536_v39, %v6672_v23  ;;  %v8851_v39 = vrot.slane %v8738_v37, 5 }
 0x64c   : > { %v7503_v57 = vpop.f32.mrf.mxu3 }
 0x64d   : > { %v7558_v14 = vadd.f32 %v7503_v57, %v7116_v59  ;;  %v8973_v59 = vpack.c.b16 %v8945_v41, %v8944_v5  ;;  %v20911_v57 = vld [vmem:[#allocation56_spill] sm:$0xff]  ;;  %v8852_v5 = vsel %vm15074_vm2, %v14017_v61, %v8851_v39 }
 0x64f   : > { %v8000_v25 = vadd.f32 %v18849_v62, %v7558_v14  ;;  %v4331_v14 = vadd.f32 %v20911_v57, %v20910_v1  ;;  %v20917_v57 = vld [vmem:[#allocation90_spill] sm:$0xff] }
 0x651   : > { %v8069_v19 = vadd.f32 %v18617_v60, %v8000_v25  ;;  %13998 = vmatmul.msk.bf16.gmra.mxu3 %vm564_vm3, %v20905_v28  ;;  %v18937_v21 = vpop.f32.mrf.mxu2 }
 0x653   : > { %v8101_v10 = vmax.f32 %v8069_v19, 0.0  ;;  %v18935_v51 = vpop.f32.mrf.mxu0 }
 0x654   : > { %v7506_v17 = vpop.f32.mrf.mxu3  ;;  %v8206_v62 = vpop.f32.mrf.mxu1 }
 0x655   : > { %v18933_v31 = vadd.f32 %v8206_v62, %v4330_v45  ;;  %v8124_v55 = vpack.c.bf16 %v8101_v10, %v8100_v18  ;;  %v7559_v54 = vadd.f32 %v7506_v17, %v18596_v49  ;;  %v8853_v45 = vrot.slane %v8851_v39, 4  ;;  %v20914_v10 = vld [vmem:[#allocation25_spill] sm:$0xff] }
 0x656   : > { %14044 = vmatmul.msk.bf16.gmra.mxu0 %vm564_vm3, %v8973_v59  ;;  %13984 = vmatmul.msk.bf16.gmra.mxu2 %vm564_vm3, %v14764_v12  ;;  %v8854_v18 = vrot.slane %v8739_v15, 5  ;;  %v20915_v17 = vld [vmem:[#allocation57_spill] sm:$0xff]  ;;  %v8946_v59 = vunpack.c.l.b16 %v8852_v5  ;;  %v20923_v5 = vld [vmem:[#allocation27_spill] sm:$0xff] }
 0x657   : > { %20908 = vst [vmem:[#allocation91_spill] sm:$0xff] %v18933_v31  ;;  %13885 = vmatmul.msk.bf16.gmra.mxu1 %vm564_vm3, %v8124_v55  ;;  %v8001_v25 = vadd.f32 %v18863_v50, %v7559_v54  ;;  %v20913_v50 = vld [vmem:[#allocation8_spill] sm:$0xff]  ;;  %v4332_v62 = vadd.f32 %v20915_v17, %v20914_v10 }
 0x658   : > { %v8855_v41 = vsel %vm15074_vm2, %v8853_v45, %v8854_v18  ;;  %v8741_v18 = vld [vmem:[%s15072_s19 + $0x98] sm:$0xf] }
 0x659   : > { %v18954_v28 = vpop.f32.mrf.mxu2  ;;  %v8070_v4 = vadd.f32 %v18617_v60, %v8001_v25  ;;  %v8947_v1 = vunpack.c.l.b16 %v8855_v41  ;;  %v8858_v10 = vrot.slane %v8741_v18, 5  ;;  %v20924_v41 = vld [vmem:[#allocation59_spill] sm:$0xff] }
 0x65b   : > { %v18952_v19 = vpop.f32.mrf.mxu0  ;;  %v8102_v32 = vmax.f32 %v8070_v4, 0.0  ;;  %v8974_v25 = vpack.c.b16 %v8947_v1, %v8946_v59 }
 0x65c   : > { %v7508_v3 = vpop.f32.mrf.mxu3  ;;  %v8208_v49 = vpop.f32.mrf.mxu1 }
 0x65d   : > { %v7560_v42 = vadd.f32 %v7508_v3, %v7118_v34  ;;  %v18950_v52 = vadd.f32 %v8208_v49, %v4331_v14  ;;  %v6674_v14 = vadd.f32 %v18650_v53, %v20917_v57  ;;  %v14765_v3 = vld [vmem:[%s15072_s19 + $0x150] sm:$0xff]  ;;  %v20918_v49 = vld [vmem:[#allocation26_spill] sm:$0xff] }
 0x65f   : > { %20912 = vst [vmem:[#allocation92_spill] sm:$0xff] %v18950_v52  ;;  %v8002_v11 = vadd.f32 %v18883_v9, %v7560_v42  ;;  %v20919_v42 = vld [vmem:[#allocation58_spill] sm:$0xff] }
 0x660   : > { %v4333_v4 = vadd.f32 %v20919_v42, %v20918_v49  ;;  %v14231_v52 = vld [vmem:[%s15072_s19 + $0x240] sm:$0xc] }
 0x661   : > { %v8071_v36 = vadd.f32 %v18617_v60, %v8002_v11  ;;  %13999 = vmatmul.msk.bf16.gmra.mxu3 %vm564_vm3, %v20913_v50  ;;  %v18974_v12 = vpop.f32.mrf.mxu2  ;;  %v20920_v11 = vld [vmem:[#allocation98_spill] sm:$0xff] }
 0x662   : > { %v7120_v37 = vadd.f32 %v20920_v11, %v6674_v14 }
 0x663   : > { %v8103_v13 = vmax.f32 %v8071_v36, 0.0  ;;  %v18972_v54 = vpop.f32.mrf.mxu0 }
 0x664   : > { %v7511_v55 = vpop.f32.mrf.mxu3  ;;  %v8211_v9 = vpop.f32.mrf.mxu1 }
 0x665   : > { %v18970_v24 = vadd.f32 %v8211_v9, %v4332_v62  ;;  %v8125_v23 = vpack.c.bf16 %v8103_v13, %v8102_v32  ;;  %v7561_v34 = vadd.f32 %v7511_v55, %v18642_v47  ;;  %v8740_v62 = vld [vmem:[%s15072_s19 + $0x94] sm:$0xe]  ;;  %v8742_v32 = vld [vmem:[%s15072_s19 + $0x9c] sm:$0x1]  ;;  %v8860_v55 = vrot.slane %v8858_v10, 4 }
 0x666   : > { %14045 = vmatmul.msk.bf16.gmra.mxu0 %vm564_vm3, %v8974_v25  ;;  %13985 = vmatmul.msk.bf16.gmra.mxu2 %vm564_vm3, %v14765_v3  ;;  %v14018_v13 = vrot.slane %v8740_v62, 9  ;;  %v8861_v9 = vrot.slane %v8742_v32, 5 }
 0x667   : > { %20916 = vst [vmem:[#allocation93_spill] sm:$0xff] %v18970_v24  ;;  %13886 = vmatmul.msk.bf16.gmra.mxu1 %vm564_vm3, %v8125_v23  ;;  %v8003_v39 = vadd.f32 %v18895_v7, %v7561_v34  ;;  %v20922_v7 = vld [vmem:[#allocation9_spill] sm:$0xff]  ;;  %v4334_v23 = vadd.f32 %v20924_v41, %v20923_v5  ;;  %v8744_v5 = vld [vmem:[%s15072_s19 + $0xb4] sm:$0xf] }
 0x668   : > { %v8859_v14 = vsel %vm15074_vm2, %v14018_v13, %v8858_v10  ;;  %v8862_v34 = vsel %vm15074_vm2, %v8860_v55, %v8861_v9  ;;  %v9193_v24 = vld [vmem:[%s15072_s19 + $0xf8] sm:$0x3] }
 0x669   : > { %v18991_v15 = vpop.f32.mrf.mxu2  ;;  %v8072_v61 = vadd.f32 %v18617_v60, %v8003_v39  ;;  %v8948_v42 = vunpack.c.l.b16 %v8859_v14  ;;  %v8949_v11 = vunpack.c.l.b16 %v8862_v34  ;;  %v20931_v14 = vld [vmem:[#allocation29_spill] sm:$0xff] }
 0x66a   : > { %v20932_v34 = vld [vmem:[#allocation61_spill] sm:$0xff] }
 0x66b   : > { %v18989_v38 = vpop.f32.mrf.mxu0  ;;  %v8104_v59 = vmax.f32 %v8072_v61, 0.0  ;;  %v20927_v61 = vld [vmem:[#allocation28_spill] sm:$0xff] }
 0x66c   : > { %v7513_v53 = vpop.f32.mrf.mxu3  ;;  %v8213_v47 = vpop.f32.mrf.mxu1 }
 0x66d   : > { %v7562_v36 = vadd.f32 %v7513_v53, %v7120_v37  ;;  %v18987_v50 = vadd.f32 %v8213_v47, %v4333_v4  ;;  %v20926_v37 = vld [vmem:[#allocation94_spill] sm:$0xff]  ;;  %v8975_v47 = vpack.c.b16 %v8949_v11, %v8948_v42 }
 0x66e   : > { %v6676_v39 = vadd.f32 %v18685_v27, %v20926_v37 }
 0x66f   : > { %20921 = vst [vmem:[#allocation84_spill] sm:$0xff] %v18987_v50  ;;  %v8004_v45 = vadd.f32 %v18915_v16, %v7562_v36  ;;  %v14766_v36 = vld [vmem:[%s15072_s19 + $0x16c] sm:$0xff]  ;;  %v14228_v50 = vld [vmem:[%s15072_s19 + $0x224] sm:$0xc] }
 0x670   : > { %v7122_v10 = vadd.f32 %v18647_v6, %v6676_v39  ;;  %v8865_v6 = vrot.slane %v8744_v5, 5 }
 0x671   : > { %v8073_v17 = vadd.f32 %v18617_v60, %v8004_v45  ;;  %14000 = vmatmul.msk.bf16.gmra.mxu3 %vm564_vm3, %v20922_v7  ;;  %v19011_v4 = vpop.f32.mrf.mxu2  ;;  %v20928_v45 = vld [vmem:[#allocation60_spill] sm:$0xff] }
 0x672   : > { %v4335_v18 = vadd.f32 %v20928_v45, %v20927_v61 }
 0x673   : > { %v8105_v1 = vmax.f32 %v8073_v17, 0.0  ;;  %v19009_v49 = vpop.f32.mrf.mxu0 }
 0x674   : > { %v7516_v57 = vpop.f32.mrf.mxu3  ;;  %v8216_v16 = vpop.f32.mrf.mxu1 }
 0x675   : > { %v19007_v25 = vadd.f32 %v8216_v16, %v4334_v23  ;;  %v8126_v3 = vpack.c.bf16 %v8105_v1, %v8104_v59  ;;  %v7563_v53 = vadd.f32 %v7516_v57, %v18679_v40  ;;  %v8743_v23 = vld [vmem:[%s15072_s19 + $0xb0] sm:$0xe]  ;;  %v8745_v59 = vld [vmem:[%s15072_s19 + $0xb8] sm:$0x1]  ;;  %v8867_v57 = vrot.slane %v8865_v6, 4 }
 0x676   : > { %14046 = vmatmul.msk.bf16.gmra.mxu0 %vm564_vm3, %v8975_v47  ;;  %13986 = vmatmul.msk.bf16.gmra.mxu2 %vm564_vm3, %v14766_v36  ;;  %v14019_v1 = vrot.slane %v8743_v23, 9  ;;  %v8868_v16 = vrot.slane %v8745_v59, 5 }
 0x677   : > { %20925 = vst [vmem:[#allocation6_spill] sm:$0xff] %v19007_v25  ;;  %13887 = vmatmul.msk.bf16.gmra.mxu1 %vm564_vm3, %v8126_v3  ;;  %v8005_v17 = vadd.f32 %v18935_v51, %v7563_v53  ;;  %v20930_v51 = vld [vmem:[#allocation10_spill] sm:$0xff]  ;;  %v4336_v3 = vadd.f32 %v20932_v34, %v20931_v14  ;;  %v9190_v25 = vld [vmem:[%s15072_s19 + $0xdc] sm:$0x3] }
 0x678   : > { %v8866_v39 = vsel %vm15074_vm2, %v14019_v1, %v8865_v6 }
 0x679   : > { %v19028_v13 = vpop.f32.mrf.mxu2  ;;  %v8074_v55 = vadd.f32 %v18617_v60, %v8005_v17  ;;  %v8950_v61 = vunpack.c.l.b16 %v8866_v39 }
 0x67b   : > { %v19026_v32 = vpop.f32.mrf.mxu0  ;;  %v8106_v42 = vmax.f32 %v8074_v55, 0.0  ;;  %v20935_v55 = vld [vmem:[#allocation30_spill] sm:$0xff] }
 0x67c   : > { %v7518_v27 = vpop.f32.mrf.mxu3  ;;  %v8218_v40 = vpop.f32.mrf.mxu1 }
 0x67d   : > { %v7564_v7 = vadd.f32 %v7518_v27, %v7122_v10  ;;  %v19024_v62 = vadd.f32 %v8218_v40, %v4335_v18  ;;  %v20934_v10 = vld [vmem:[#allocation95_spill] sm:$0xff] }
 0x67e   : > { %v6678_v17 = vadd.f32 %v18721_v56, %v20934_v10 }
 0x67f   : > { %20929 = vst [vmem:[#allocation86_spill] sm:$0xff] %v19024_v62  ;;  %v8006_v9 = vadd.f32 %v18952_v19, %v7564_v7  ;;  %v14767_v7 = vld [vmem:[%s15072_s19 + $0x188] sm:$0xff]  ;;  %v9188_v62 = vld [vmem:[%s15072_s19 + $0xd4] sm:$0xc] }
 0x680   : > { %v7124_v6 = vadd.f32 %v18694_v0, %v6678_v17 }
 0x681   : > { %v8075_v41 = vadd.f32 %v18617_v60, %v8006_v9  ;;  %14001 = vmatmul.msk.bf16.gmra.mxu3 %vm564_vm3, %v20930_v51  ;;  %v8869_v60 = vsel %vm15074_vm2, %v8867_v57, %v8868_v16  ;;  %v19048_v45 = vpop.f32.mrf.mxu2  ;;  %v20936_v9 = vld [vmem:[#allocation62_spill] sm:$0xff]  ;;  %v8747_v16 = vld [vmem:[%s15072_s19 + $0xd0] sm:$0xf] }
 0x682   : > { %v8951_v18 = vunpack.c.l.b16 %v8869_v60  ;;  %v4337_v5 = vadd.f32 %v20936_v9, %v20935_v55  ;;  %v19070_v57 = vld [vmem:[%s20727_s4 + $0x2] ss:$0 sm:$0xff]  ;;  %v8872_v14 = vrot.slane %v8747_v16, 5  ;;  %v20939_v60 = vld [vmem:[#allocation31_spill] sm:$0xff]  ;;  %v20943_v16 = vld [vmem:[#allocation32_spill] sm:$0xff] }
 0x683   : > { %v8107_v11 = vmax.f32 %v8075_v41, 0.0  ;;  %v19046_v36 = vpop.f32.mrf.mxu0 }
 0x684   : > { %v7521_v37 = vpop.f32.mrf.mxu3  ;;  %v8221_v19 = vpop.f32.mrf.mxu1  ;;  %v8976_v40 = vpack.c.b16 %v8951_v18, %v8950_v61 }
 0x685   : > { %v19044_v53 = vadd.f32 %v8221_v19, %v4336_v3  ;;  %v8127_v47 = vpack.c.bf16 %v8107_v11, %v8106_v42  ;;  %v7565_v27 = vadd.f32 %v7521_v37, %v18715_v58  ;;  %v20938_v3 = vld [vmem:[#allocation11_spill] sm:$0xff]  ;;  %v8748_v11 = vld [vmem:[%s15072_s19 + $0xd4] sm:$0x1]  ;;  %v8874_v19 = vrot.slane %v8872_v14, 4 }
 0x686   : > { %14047 = vmatmul.msk.bf16.gmra.mxu0 %vm564_vm3, %v8976_v40  ;;  %13987 = vmatmul.msk.bf16.gmra.mxu2 %vm564_vm3, %v14767_v7  ;;  %v8746_v42 = vld [vmem:[%s15072_s19 + $0xcc] sm:$0xe]  ;;  %v8875_v39 = vrot.slane %v8748_v11, 5 }
 0x687   : > { %20933 = vst [vmem:[#allocation7_spill] sm:$0xff] %v19044_v53  ;;  %13888 = vmatmul.msk.bf16.gmra.mxu1 %vm564_vm3, %v8127_v47  ;;  %v8007_v41 = vadd.f32 %v18972_v54, %v7565_v27  ;;  %v14020_v37 = vrot.slane %v8746_v42, 9  ;;  %v20940_v47 = vld [vmem:[#allocation63_spill] sm:$0xff] }
 0x688   : > { %v4338_v61 = vadd.f32 %v20940_v47, %v20939_v60  ;;  %v8876_v40 = vsel %vm15074_vm2, %v8874_v19, %v8875_v39 }
 0x689   : > { %v19065_v1 = vpop.f32.mrf.mxu2  ;;  %v8076_v0 = vadd.f32 %v19070_v57, %v8007_v41  ;;  %v8873_v27 = vsel %vm15074_vm2, %v14020_v37, %v8872_v14  ;;  %v8953_v41 = vunpack.c.l.b16 %v8876_v40  ;;  %v20944_v14 = vld [vmem:[#allocation64_spill] sm:$0xff] }
 0x68b   : > { %v19063_v59 = vpop.f32.mrf.mxu0  ;;  %v8108_v18 = vmax.f32 %v8076_v0, 0.0 }
 0x68c   : > { %v7523_v56 = vpop.f32.mrf.mxu3  ;;  %v8223_v58 = vpop.f32.mrf.mxu1 }
 0x68d   : > { %v7566_v51 = vadd.f32 %v7523_v56, %v7124_v6  ;;  %v19061_v23 = vadd.f32 %v8223_v58, %v4337_v5  ;;  %v8952_v5 = vunpack.c.l.b16 %v8873_v27  ;;  %v20942_v56 = vld [vmem:[#allocation96_spill] sm:$0xff] }
 0x68e   : > { %v6680_v58 = vadd.f32 %v18757_v22, %v20942_v56 }
 0x68f   : > { %20937 = vst [vmem:[#allocation23_spill] sm:$0xff] %v19061_v23  ;;  %v8008_v54 = vadd.f32 %v18989_v38, %v7566_v51  ;;  %v8977_v0 = vpack.c.b16 %v8953_v41, %v8952_v5  ;;  %v20948_v5 = vld [vmem:[#allocation65_spill] sm:$0xff] }
 0x691   : > { %v8077_v34 = vadd.f32 %v19070_v57, %v8008_v54  ;;  %14002 = vmatmul.msk.bf16.gmra.mxu3 %vm564_vm3, %v20938_v3  ;;  %v19090_v6 = vpop.f32.mrf.mxu2  ;;  %v14768_v54 = vld [vmem:[%s15072_s19 + $0x1a4] sm:$0xff]  ;;  %v7126_v3 = vadd.f32 %v18739_v63, %v6680_v58 }
 0x693   : > { %v8109_v10 = vmax.f32 %v8077_v34, 0.0  ;;  %v19088_v9 = vpop.f32.mrf.mxu0  ;;  %v4339_v34 = vadd.f32 %v20944_v14, %v20943_v16 }
 0x694   : > { %v7526_v17 = vpop.f32.mrf.mxu3  ;;  %v8226_v38 = vpop.f32.mrf.mxu1 }
 0x695   : > { %v19086_v7 = vadd.f32 %v8226_v38, %v4338_v61  ;;  %v8128_v55 = vpack.c.bf16 %v8109_v10, %v8108_v18  ;;  %v7567_v51 = vadd.f32 %v7526_v17, %v18751_v46  ;;  %v8750_v61 = vld [vmem:[%s15072_s19 + $0xec] sm:$0xf]  ;;  %v8749_v10 = vld [vmem:[%s15072_s19 + $0xe8] sm:$0xe]  ;;  %v8751_v17 = vld [vmem:[%s15072_s19 + $0xf0] sm:$0x1] }
 0x696   : > { %14048 = vmatmul.msk.bf16.gmra.mxu0 %vm564_vm3, %v8977_v0  ;;  %13988 = vmatmul.msk.bf16.gmra.mxu2 %vm564_vm3, %v14768_v54  ;;  %v8879_v63 = vrot.slane %v8750_v61, 5  ;;  %v14021_v38 = vrot.slane %v8749_v10, 9  ;;  %v8882_v40 = vrot.slane %v8751_v17, 5 }
 0x697   : > { %20941 = vst [vmem:[#allocation55_spill] sm:$0xff] %v19086_v7  ;;  %13889 = vmatmul.msk.bf16.gmra.mxu1 %vm564_vm3, %v8128_v55  ;;  %v8009_v42 = vadd.f32 %v19009_v49, %v7567_v51  ;;  %v20946_v49 = vld [vmem:[#allocation13_spill] sm:$0xff]  ;;  %v9184_v7 = vld [vmem:[%s15072_s19 + $0xa4] sm:$0x3] }
 0x698   : > { %v8881_v27 = vrot.slane %v8879_v63, 4  ;;  %v20947_v55 = vld [vmem:[#allocation33_spill] sm:$0xff]  ;;  %v8880_v0 = vsel %vm15074_vm2, %v14021_v38, %v8879_v63  ;;  %v20951_v63 = vld [vmem:[#allocation34_spill] sm:$0xff] }
 0x699   : > { %v19107_v39 = vpop.f32.mrf.mxu2  ;;  %v8078_v60 = vadd.f32 %v19070_v57, %v8009_v42  ;;  %v4340_v41 = vadd.f32 %v20948_v5, %v20947_v55 }
 0x69a   : > { %v8883_v54 = vsel %vm15074_vm2, %v8881_v27, %v8882_v40 }
 0x69b   : > { %v19105_v19 = vpop.f32.mrf.mxu0  ;;  %v8110_v56 = vmax.f32 %v8078_v60, 0.0 }
 0x69c   : > { %v7528_v22 = vpop.f32.mrf.mxu3  ;;  %v8228_v46 = vpop.f32.mrf.mxu1 }
 0x69d   : > { %v7568_v11 = vadd.f32 %v7528_v22, %v7126_v3  ;;  %v19103_v37 = vadd.f32 %v8228_v46, %v4339_v34  ;;  %v8954_v34 = vunpack.c.l.b16 %v8880_v0  ;;  %v8955_v22 = vunpack.c.l.b16 %v8883_v54  ;;  %v20950_v46 = vld [vmem:[#allocation97_spill] sm:$0xff]  ;;  %v8754_v0 = vld [vmem:[%s15072_s19 + $0x10c] sm:$0x1] }
 0x69f   : > { %20945 = vst [vmem:[#allocation88_spill] sm:$0xff] %v19103_v37  ;;  %v8010_v47 = vadd.f32 %v19026_v32, %v7568_v11  ;;  %v6682_v11 = vadd.f32 %v18794_v44, %v20950_v46  ;;  %v8978_v61 = vpack.c.b16 %v8955_v22, %v8954_v34  ;;  %v20955_v34 = vld [vmem:[#allocation35_spill] sm:$0xff] }
 0x6a0   : > { %v20956_v22 = vld [vmem:[#allocation67_spill] sm:$0xff] }
 0x6a1   : > { %v8079_v18 = vadd.f32 %v19070_v57, %v8010_v47  ;;  %14003 = vmatmul.msk.bf16.gmra.mxu3 %vm564_vm3, %v20946_v49  ;;  %v19125_v3 = vpop.f32.mrf.mxu2  ;;  %v14775_v47 = vld [vmem:[%s15072_s19 + $0x1f8] sm:$0xff]  ;;  %v7128_v10 = vadd.f32 %v18790_v29, %v6682_v11  ;;  %v8753_v29 = vld [vmem:[%s15072_s19 + $0x108] sm:$0xf]  ;;  %v4342_v46 = vadd.f32 %v20956_v22, %v20955_v34 }
 0x6a3   : > { %v8111_v58 = vmax.f32 %v8079_v18, 0.0  ;;  %v19127_v42 = vpop.f32.mrf.mxu0  ;;  %v20952_v18 = vld [vmem:[#allocation66_spill] sm:$0xff] }
 0x6a4   : > { %v7531_v51 = vpop.f32.mrf.mxu3  ;;  %v8231_v32 = vpop.f32.mrf.mxu1  ;;  %v4341_v49 = vadd.f32 %v20952_v18, %v20951_v63 }
 0x6a5   : > { %v19123_v16 = vadd.f32 %v8231_v32, %v4340_v41  ;;  %v8129_v14 = vpack.c.bf16 %v8111_v58, %v8110_v56  ;;  %v7569_v60 = vadd.f32 %v7531_v51, %v18787_v35  ;;  %v8886_v56 = vrot.slane %v8753_v29, 5  ;;  %v20954_v58 = vld [vmem:[#allocation14_spill] sm:$0xff]  ;;  %v14816_v51 = vld [vmem:[%s20725_s2 + $0x1a8] sm:$0xff] }
 0x6a6   : > { %14049 = vmatmul.msk.bf16.gmra.mxu0 %vm564_vm3, %v8978_v61  ;;  %14209 = vmatmul.msk.bf16.vlgmr.msra.gmra.mxu2 %vm564_vm3, %v14775_v47  ;;  %v8752_v32 = vld [vmem:[%s15072_s19 + $0x104] sm:$0xe] }
 0x6a7   : > { %20949 = vst [vmem:[#allocation24_spill] sm:$0xff] %v19123_v16  ;;  %13890 = vmatmul.msk.bf16.gmra.mxu1 %vm564_vm3, %v8129_v14  ;;  %v8011_v17 = vadd.f32 %v19046_v36, %v7569_v60  ;;  %v14022_v54 = vrot.slane %v8752_v32, 9  ;;  %v8888_v14 = vrot.slane %v8886_v56, 4  ;;  %11420 = vmatpush.bf16.msrb.mxu2 %v14816_v51  ;;  %v8889_v60 = vrot.slane %v8754_v0, 5  ;;  %v20959_v51 = vld [vmem:[#allocation68_spill] sm:$0xff] }
 0x6a8   : > { %v9181_v16 = vld [vmem:[%s15072_s19 + $0x88] sm:$0x3] }
 0x6a9   : > { %v19142_v40 = vpop.f32.mrf.mxu2  ;;  %v8080_v5 = vadd.f32 %v19070_v57, %v8011_v17  ;;  %v8887_v63 = vsel %vm15074_vm2, %v14022_v54, %v8886_v56  ;;  %v14776_v56 = vld [vmem:[%s15072_s19 + $0x214] sm:$0xff] }
 0x6ab   : > { %v19144_v55 = vpop.f32.mrf.mxu0  ;;  %v8112_v11 = vmax.f32 %v8080_v5, 0.0 }
 0x6ac   : > { %v7533_v44 = vpop.f32.mrf.mxu3  ;;  %v8233_v35 = vpop.f32.mrf.mxu1 }
 0x6ad   : > { %v7570_v38 = vadd.f32 %v7533_v44, %v7128_v10  ;;  %v19140_v27 = vadd.f32 %v8233_v35, %v4341_v49  ;;  %v14812_v10 = vld [vmem:[%s20725_s2 + $0x188] sm:$0xff]  ;;  %v8890_v35 = vsel %vm15074_vm2, %v8888_v14, %v8889_v60 }
 0x6ae   : > { %10536 = vmatpush.bf16.msrb.mxu0 %v14812_v10  ;;  %v8957_v29 = vunpack.c.l.b16 %v8890_v35 }
 0x6af   : > { %20953 = vst [vmem:[#allocation56_spill] sm:$0xff] %v19140_v27  ;;  %v8012_v41 = vadd.f32 %v19063_v59, %v7570_v38  ;;  %v8956_v38 = vunpack.c.l.b16 %v8887_v63  ;;  %v9168_v63 = vld [vmem:[%s15072_s19 + $0x14] sm:$0xf] }
 0x6b1   : > { %v8081_v36 = vadd.f32 %v19070_v57, %v8012_v41  ;;  %14004 = vmatmul.msk.bf16.gmra.mxu3 %vm564_vm3, %v20954_v58  ;;  %v19166_v17 = vpop.f32.mrf.mxu2  ;;  %v14814_v41 = vld [vmem:[%s20725_s2 + $0x198] sm:$0xff]  ;;  %v20958_v58 = vld [vmem:[#allocation36_spill] sm:$0xff] }
 0x6b2   : > { %10978 = vmatpush.bf16.msrb.mxu1 %v14814_v41  ;;  %v4343_v32 = vadd.f32 %v20959_v51, %v20958_v58 }
 0x6b3   : > { %v8113_v59 = vmax.f32 %v8081_v36, 0.0  ;;  %v19168_v44 = vpop.f32.mrf.mxu0  ;;  %v8979_v36 = vpack.c.b16 %v8957_v29, %v8956_v38  ;;  %v20962_v38 = vld [vmem:[#allocation37_spill] sm:$0xff] }
 0x6b4   : > { %v7536_v47 = vpop.f32.mrf.mxu3  ;;  %v8236_v61 = vpop.f32.mrf.mxu1 }
 0x6b5   : > { %v19161_v18 = vadd.f32 %v8236_v61, %v4342_v46  ;;  %v8130_v49 = vpack.c.bf16 %v8113_v59, %v8112_v11  ;;  %v7571_v5 = vadd.f32 %v7536_v47, %v18819_v48  ;;  %v8756_v59 = vld [vmem:[%s15072_s19 + $0x124] sm:$0xf]  ;;  %v20961_v61 = vld [vmem:[#allocation15_spill] sm:$0xff] }
 0x6b6   : > { %14050 = vmatmul.msk.bf16.gmra.mxu0 %vm564_vm3, %v8979_v36  ;;  %14210 = vmatmul.msk.bf16.gmra.mxu2 %vm564_vm3, %v14776_v56  ;;  %v8893_v60 = vrot.slane %v8756_v59, 5 }
 0x6b7   : > { %20957 = vst [vmem:[#allocation8_spill] sm:$0xff] %v19161_v18  ;;  %13891 = vmatmul.msk.bf16.gmra.mxu1 %vm564_vm3, %v8130_v49  ;;  %v8013_v0 = vadd.f32 %v19088_v9, %v7571_v5  ;;  %v8757_v49 = vld [vmem:[%s15072_s19 + $0x128] sm:$0x1]  ;;  %v20963_v5 = vld [vmem:[#allocation69_spill] sm:$0xff]  ;;  %v9178_v18 = vld [vmem:[%s15072_s19 + $0x6c] sm:$0x3] }
 0x6b8   : > { %v8895_v35 = vrot.slane %v8893_v60, 4  ;;  %v4344_v41 = vadd.f32 %v20963_v5, %v20962_v38  ;;  %v20965_v5 = vld [vmem:[#allocation38_spill] sm:$0xff] }
 0x6b9   : > { %v19186_v22 = vpop.f32.mrf.mxu2  ;;  %v8082_v11 = vadd.f32 %v19070_v57, %v8013_v0 }
 0x6bb   : > { %v19188_v46 = vpop.f32.mrf.mxu0  ;;  %v8114_v29 = vmax.f32 %v8082_v11, 0.0 }
 0x6bc   : > { %v7538_v48 = vpop.f32.mrf.mxu3  ;;  %v8238_v54 = vpop.f32.mrf.mxu1 }
 0x6bd   : > { %v7572_v14 = vadd.f32 %v7538_v48, %v18842_v20  ;;  %v19184_v34 = vadd.f32 %v8238_v54, %v4343_v32  ;;  %v8755_v20 = vld [vmem:[%s15072_s19 + $0x120] sm:$0xe]  ;;  %v9167_v54 = vld [vmem:[%s15072_s19 + $0x10] sm:$0xc] }
 0x6be   : > { %v14023_v10 = vrot.slane %v8755_v20, 9  ;;  %v14057_v20 = vrot.slane %v9167_v54, 10 }
 0x6bf   : > { %20960 = vst [vmem:[#allocation25_spill] sm:$0xff] %v19184_v34  ;;  %v8014_v9 = vadd.f32 %v19105_v19, %v7572_v14  ;;  %v8896_v19 = vrot.slane %v8757_v49, 5  ;;  %v9169_v14 = vld [vmem:[%s15072_s19 + $0x18] sm:$0x3] }
 0x6c0   : > { %v8894_v51 = vsel %vm15074_vm2, %v14023_v10, %v8893_v60  ;;  %v9268_v10 = vrot.slane %v9169_v14, 6 }
 0x6c1   : > { %v8083_v47 = vadd.f32 %v19070_v57, %v8014_v9  ;;  %14005 = vmatmul.msk.bf16.gmra.mxu3 %vm564_vm3, %v20961_v61  ;;  %v9265_v57 = vrot.slane %v9168_v63, 6  ;;  %v19208_v9 = vpop.f32.mrf.mxu2  ;;  %v8897_v11 = vsel %vm15074_vm2, %v8895_v35, %v8896_v19  ;;  %v14777_v63 = vld [vmem:[%s15072_s19 + $0x230] sm:$0xff]  ;;  %v20966_v35 = vld [vmem:[#allocation70_spill] sm:$0xff] }
 0x6c2   : > { %v8959_v60 = vunpack.c.l.b16 %v8897_v11 }
 0x6c3   : > { %v8115_v56 = vmax.f32 %v8083_v47, 0.0  ;;  %v19210_v59 = vpop.f32.mrf.mxu0  ;;  %v8958_v47 = vunpack.c.l.b16 %v8894_v51  ;;  %v9267_v49 = vrot.slane %v9265_v57, 4  ;;  %v9266_v19 = vsel %vm15170_vm6, %v14057_v20, %v9265_v57  ;;  %v9171_v57 = vld [vmem:[%s15072_s19 + $0x30] sm:$0xf]  ;;  %v8760_v20 = vld [vmem:[%s15072_s19 + $0x144] sm:$0x1] }
 0x6c4   : > { %v8241_v36 = vpop.f32.mrf.mxu1  ;;  %v8645_v58 = vpop.f32.mrf.mxu3  ;;  %v9380_v14 = vunpack.c.l.b16 %v9266_v19 }
 0x6c5   : > { %v19203_v32 = vadd.f32 %v8241_v36, %v4344_v41  ;;  %v8646_v0 = vadd.f32 %v8645_v58, %v18851_v43  ;;  %v8131_v48 = vpack.c.bf16 %v8115_v56, %v8114_v29  ;;  %v14793_v43 = vld [vmem:[%s20725_s2 + $0x170] sm:$0xff]  ;;  %v8980_v38 = vpack.c.b16 %v8959_v60, %v8958_v47  ;;  %v8759_v47 = vld [vmem:[%s15072_s19 + $0x140] sm:$0xf] }
 0x6c6   : > { %10235 = vmatpush.bf16.msra.mxu3 %v14793_v43  ;;  %v4345_v41 = vadd.f32 %v20966_v35, %v20965_v5  ;;  %14211 = vmatmul.msk.bf16.gmra.mxu2 %vm564_vm3, %v14777_v63  ;;  %v9269_v36 = vsel %vm15170_vm6, %v9267_v49, %v9268_v10  ;;  %v8900_v43 = vrot.slane %v8759_v47, 5  ;;  %v20969_v60 = vld [vmem:[#allocation16_spill] sm:$0xff]  ;;  %v8758_v63 = vld [vmem:[%s15072_s19 + $0x13c] sm:$0xe]  ;;  %v20970_v10 = vld [vmem:[#allocation39_spill] sm:$0xff] }
 0x6c7   : > { %20964 = vst [vmem:[#allocation57_spill] sm:$0xff] %v19203_v32  ;;  %v19215_v61 = vadd.f32 %v19127_v42, %v8646_v0  ;;  %13892 = vmatmul.msk.bf16.gmra.mxu1 %vm564_vm3, %v8131_v48  ;;  %14051 = vmatmul.msk.bf16.gmra.mxu0 %vm564_vm3, %v8980_v38  ;;  %v9381_v11 = vunpack.c.l.b16 %v9269_v36  ;;  %v20971_v38 = vld [vmem:[#allocation71_spill] sm:$0xff]  ;;  %v9175_v32 = vld [vmem:[%s15072_s19 + $0x50] sm:$0x3] }
 0x6c8   : > { %v8902_v49 = vrot.slane %v8900_v43, 4  ;;  %v4346_v5 = vadd.f32 %v20971_v38, %v20970_v10  ;;  %v9170_v47 = vld [vmem:[%s15072_s19 + $0x2c] sm:$0xc] }
 0x6c9   : > { %v19233_v0 = vpop.f32.mrf.mxu2  ;;  %v9412_v35 = vpack.c.b16 %v9381_v11, %v9380_v14 }
 0x6cb   : > { %v19235_v48 = vpop.f32.mrf.mxu0 }
 0x6cc   : > { %v8243_v42 = vpop.f32.mrf.mxu1  ;;  %v8647_v29 = vpop.f32.mrf.mxu3 }
 0x6cd   : > { %v19230_v58 = vadd.f32 %v8243_v42, %v4345_v41  ;;  %v8648_v51 = vadd.f32 %v8647_v29, %v18869_v26  ;;  %v14024_v26 = vrot.slane %v8758_v63, 9  ;;  %v9272_v29 = vrot.slane %v9171_v57, 6 }
 0x6cf   : > { %20968 = vst [vmem:[#allocation90_spill] sm:$0xff] %v19230_v58  ;;  %v19238_v54 = vadd.f32 %v19144_v55, %v8648_v51  ;;  %v8903_v55 = vrot.slane %v8760_v20, 5  ;;  %v8901_v19 = vsel %vm15074_vm2, %v14024_v26, %v8900_v43  ;;  %v14778_v43 = vld [vmem:[%s15072_s19 + $0x24c] sm:$0xff]  ;;  %v14058_v26 = vrot.slane %v9170_v47, 10 }
 0x6d0   : > { %v8960_v14 = vunpack.c.l.b16 %v8901_v19  ;;  %v9274_v10 = vrot.slane %v9272_v29, 4 }
 0x6d1   : > { %14006 = vmatmul.msk.bf16.gmra.mxu3 %vm564_vm3, %v20969_v60  ;;  %v9172_v60 = vld [vmem:[%s15072_s19 + $0x34] sm:$0x3]  ;;  %v8904_v63 = vsel %vm15074_vm2, %v8902_v49, %v8903_v55  ;;  %v19257_v58 = vpop.f32.mrf.mxu2  ;;  %v9273_v55 = vsel %vm15170_vm6, %v14058_v26, %v9272_v29  ;;  %v9174_v29 = vld [vmem:[%s15072_s19 + $0x4c] sm:$0xf]  ;;  %v8761_v26 = vld [vmem:[%s15072_s19 + $0x158] sm:$0xe] }
 0x6d2   : > { %v8961_v11 = vunpack.c.l.b16 %v8904_v63  ;;  %v9382_v63 = vunpack.c.l.b16 %v9273_v55 }
 0x6d3   : > { %v19263_v57 = vpop.f32.mrf.mxu0 }
 0x6d4   : > { %v8246_v41 = vpop.f32.mrf.mxu1  ;;  %v8650_v42 = vpop.f32.mrf.mxu3  ;;  %v8981_v38 = vpack.c.b16 %v8961_v11, %v8960_v14 }
 0x6d5   : > { %v19250_v36 = vadd.f32 %v8246_v41, %v4346_v5  ;;  %v8651_v51 = vadd.f32 %v8650_v42, %v18885_v33  ;;  %v9275_v33 = vrot.slane %v9172_v60, 6  ;;  %v20973_v5 = vld [vmem:[#allocation40_spill] sm:$0xff] }
 0x6d6   : > { %v20974_v41 = vld [vmem:[#allocation72_spill] sm:$0xff]  ;;  %14212 = vmatmul.msk.bf16.gmra.mxu2 %vm564_vm3, %v14778_v43  ;;  %v8762_v43 = vld [vmem:[%s15072_s19 + $0x15c] sm:$0xf] }
 0x6d7   : > { %20972 = vst [vmem:[#allocation26_spill] sm:$0xff] %v19250_v36  ;;  %v19260_v20 = vadd.f32 %v19168_v44, %v8651_v51  ;;  %14085 = vmatmul.msk.bf16.vlgmr.msra.gmra.mxu1 %vm564_vm3, %v9412_v35  ;;  %v4347_v49 = vadd.f32 %v20974_v41, %v20973_v5  ;;  %14052 = vmatmul.msk.bf16.gmra.mxu0 %vm564_vm3, %v8981_v38  ;;  %v8907_v38 = vrot.slane %v8762_v43, 5  ;;  %v20976_v5 = vld [vmem:[#allocation17_spill] sm:$0xff]  ;;  %v9173_v36 = vld [vmem:[%s15072_s19 + $0x48] sm:$0xc] }
 0x6d8   : > { %v9276_v42 = vsel %vm15170_vm6, %v9274_v10, %v9275_v33  ;;  %v8763_v10 = vld [vmem:[%s15072_s19 + $0x160] sm:$0x1]  ;;  %v20977_v41 = vld [vmem:[#allocation41_spill] sm:$0xff] }
 0x6d9   : > { %v19277_v47 = vpop.f32.mrf.mxu2  ;;  %v9383_v14 = vunpack.c.l.b16 %v9276_v42  ;;  %v8909_v33 = vrot.slane %v8907_v38, 4 }
 0x6db   : > { %v19282_v11 = vpop.f32.mrf.mxu0 }
 0x6dc   : > { %v8248_v44 = vpop.f32.mrf.mxu1  ;;  %v8652_v35 = vpop.f32.mrf.mxu3 }
 0x6dd   : > { %v19274_v19 = vadd.f32 %v8248_v44, %v4347_v49  ;;  %v8653_v51 = vadd.f32 %v8652_v35, %v18901_v30  ;;  %v14025_v30 = vrot.slane %v8761_v26, 9  ;;  %v20978_v49 = vld [vmem:[#allocation73_spill] sm:$0xff]  ;;  %v9413_v44 = vpack.c.b16 %v9383_v14, %v9382_v63 }
 0x6de   : > { %v8910_v35 = vrot.slane %v8763_v10, 5 }
 0x6df   : > { %20975 = vst [vmem:[#allocation58_spill] sm:$0xff] %v19274_v19  ;;  %v19280_v60 = vadd.f32 %v19188_v46, %v8653_v51  ;;  %v4348_v46 = vadd.f32 %v20978_v49, %v20977_v41  ;;  %v9279_v51 = vrot.slane %v9174_v29, 6  ;;  %v8908_v43 = vsel %vm15074_vm2, %v14025_v30, %v8907_v38  ;;  %v14779_v38 = vld [vmem:[%s15072_s19 + $0x268] sm:$0xff] }
 0x6e0   : > { %v8911_v26 = vsel %vm15074_vm2, %v8909_v33, %v8910_v35  ;;  %v8962_v63 = vunpack.c.l.b16 %v8908_v43  ;;  %v14059_v30 = vrot.slane %v9173_v36, 10 }
 0x6e1   : > { %14007 = vmatmul.msk.bf16.gmra.mxu3 %vm564_vm3, %v20976_v5  ;;  %v19301_v34 = vpop.f32.mrf.mxu2  ;;  %v8963_v14 = vunpack.c.l.b16 %v8911_v26  ;;  %v9281_v41 = vrot.slane %v9279_v51, 4 }
 0x6e2   : > { %v9280_v35 = vsel %vm15170_vm6, %v14059_v30, %v9279_v51  ;;  %v9177_v51 = vld [vmem:[%s15072_s19 + $0x68] sm:$0xf]  ;;  %v8764_v30 = vld [vmem:[%s15072_s19 + $0x174] sm:$0xe] }
 0x6e3   : > { %v19307_v29 = vpop.f32.mrf.mxu0  ;;  %v8982_v49 = vpack.c.b16 %v8963_v14, %v8962_v63  ;;  %v9384_v26 = vunpack.c.l.b16 %v9280_v35 }
 0x6e4   : > { %v8251_v55 = vpop.f32.mrf.mxu1  ;;  %v8655_v42 = vpop.f32.mrf.mxu3 }
 0x6e5   : > { %v19294_v19 = vadd.f32 %v8251_v55, %v4348_v46  ;;  %v8656_v5 = vadd.f32 %v8655_v42, %v18917_v8  ;;  %v9282_v8 = vrot.slane %v9175_v32, 6  ;;  %v20980_v46 = vld [vmem:[#allocation42_spill] sm:$0xff] }
 0x6e6   : > { %v20981_v55 = vld [vmem:[#allocation74_spill] sm:$0xff]  ;;  %14213 = vmatmul.msk.bf16.gmra.mxu2 %vm564_vm3, %v14779_v38  ;;  %v8765_v38 = vld [vmem:[%s15072_s19 + $0x178] sm:$0xf] }
 0x6e7   : > { %20979 = vst [vmem:[#allocation98_spill] sm:$0xff] %v19294_v19  ;;  %v19304_v10 = vadd.f32 %v19210_v59, %v8656_v5  ;;  %14086 = vmatmul.msk.bf16.gmra.mxu1 %vm564_vm3, %v9413_v44  ;;  %v4349_v33 = vadd.f32 %v20981_v55, %v20980_v46  ;;  %14053 = vmatmul.msk.bf16.gmra.mxu0 %vm564_vm3, %v8982_v49  ;;  %v8914_v49 = vrot.slane %v8765_v38, 5  ;;  %v20983_v46 = vld [vmem:[#allocation18_spill] sm:$0xff]  ;;  %v20984_v55 = vld [vmem:[#allocation43_spill] sm:$0xff] }
 0x6e8   : > { %v9283_v32 = vsel %vm15170_vm6, %v9281_v41, %v9282_v8  ;;  %v8766_v41 = vld [vmem:[%s15072_s19 + $0x17c] sm:$0x1]  ;;  %v9176_v19 = vld [vmem:[%s15072_s19 + $0x64] sm:$0xc] }
 0x6e9   : > { %v19321_v43 = vpop.f32.mrf.mxu2  ;;  %v9385_v63 = vunpack.c.l.b16 %v9283_v32  ;;  %v8916_v8 = vrot.slane %v8914_v49, 4 }
 0x6eb   : > { %v19326_v14 = vpop.f32.mrf.mxu0 }
 0x6ec   : > { %v8253_v59 = vpop.f32.mrf.mxu1  ;;  %v8657_v44 = vpop.f32.mrf.mxu3 }
 0x6ed   : > { %v19318_v36 = vadd.f32 %v8253_v59, %v4349_v33  ;;  %v8658_v42 = vadd.f32 %v8657_v44, %v18937_v21  ;;  %v14026_v21 = vrot.slane %v8764_v30, 9  ;;  %v20985_v33 = vld [vmem:[#allocation75_spill] sm:$0xff]  ;;  %v9414_v59 = vpack.c.b16 %v9385_v63, %v9384_v26 }
 0x6ee   : > { %v8917_v44 = vrot.slane %v8766_v41, 5 }
 0x6ef   : > { %20982 = vst [vmem:[#allocation9_spill] sm:$0xff] %v19318_v36  ;;  %v19324_v5 = vadd.f32 %v19235_v48, %v8658_v42  ;;  %v4350_v48 = vadd.f32 %v20985_v33, %v20984_v55  ;;  %v9286_v42 = vrot.slane %v9177_v51, 6  ;;  %v8915_v38 = vsel %vm15074_vm2, %v14026_v21, %v8914_v49  ;;  %v14780_v49 = vld [vmem:[%s15072_s19 + $0x284] sm:$0xff] }
 0x6f0   : > { %v8918_v30 = vsel %vm15074_vm2, %v8916_v8, %v8917_v44  ;;  %v8964_v26 = vunpack.c.l.b16 %v8915_v38  ;;  %v14060_v21 = vrot.slane %v9176_v19, 10 }
 0x6f1   : > { %14008 = vmatmul.msk.bf16.gmra.mxu3 %vm564_vm3, %v20983_v46  ;;  %v19345_v27 = vpop.f32.mrf.mxu2  ;;  %v8965_v63 = vunpack.c.l.b16 %v8918_v30  ;;  %v9288_v55 = vrot.slane %v9286_v42, 4 }
 0x6f2   : > { %v9287_v44 = vsel %vm15170_vm6, %v14060_v21, %v9286_v42  ;;  %v9180_v42 = vld [vmem:[%s15072_s19 + $0x84] sm:$0xf]  ;;  %v8767_v21 = vld [vmem:[%s15072_s19 + $0x190] sm:$0xe] }
 0x6f3   : > { %v19351_v51 = vpop.f32.mrf.mxu0  ;;  %v8983_v33 = vpack.c.b16 %v8965_v63, %v8964_v26  ;;  %v9386_v30 = vunpack.c.l.b16 %v9287_v44 }
 0x6f4   : > { %v8256_v35 = vpop.f32.mrf.mxu1  ;;  %v8660_v32 = vpop.f32.mrf.mxu3 }
 0x6f5   : > { %v19338_v36 = vadd.f32 %v8256_v35, %v4350_v48  ;;  %v8661_v46 = vadd.f32 %v8660_v32, %v18954_v28  ;;  %v9289_v28 = vrot.slane %v9178_v18, 6  ;;  %v20987_v48 = vld [vmem:[#allocation44_spill] sm:$0xff] }
 0x6f6   : > { %v20988_v35 = vld [vmem:[#allocation76_spill] sm:$0xff]  ;;  %14214 = vmatmul.msk.bf16.gmra.mxu2 %vm564_vm3, %v14780_v49 }
 0x6f7   : > { %20986 = vst [vmem:[#allocation27_spill] sm:$0xff] %v19338_v36  ;;  %v19348_v41 = vadd.f32 %v19263_v57, %v8661_v46  ;;  %14087 = vmatmul.msk.bf16.gmra.mxu1 %vm564_vm3, %v9414_v59  ;;  %v4351_v8 = vadd.f32 %v20988_v35, %v20987_v48  ;;  %14054 = vmatmul.msk.bf16.gmra.mxu0 %vm564_vm3, %v8983_v33  ;;  %v8768_v49 = vld [vmem:[%s15072_s19 + $0x194] sm:$0xf]  ;;  %v20990_v48 = vld [vmem:[#allocation19_spill] sm:$0xff]  ;;  %v20991_v35 = vld [vmem:[#allocation45_spill] sm:$0xff] }
 0x6f8   : > { %v9290_v18 = vsel %vm15170_vm6, %v9288_v55, %v9289_v28  ;;  %v8921_v33 = vrot.slane %v8768_v49, 5  ;;  %v8769_v55 = vld [vmem:[%s15072_s19 + $0x198] sm:$0x1]  ;;  %v9179_v36 = vld [vmem:[%s15072_s19 + $0x80] sm:$0xc] }
 0x6f9   : > { %v19365_v38 = vpop.f32.mrf.mxu2  ;;  %v9387_v26 = vunpack.c.l.b16 %v9290_v18 }
 0x6fa   : > { %v8923_v28 = vrot.slane %v8921_v33, 4 }
 0x6fb   : > { %v19370_v63 = vpop.f32.mrf.mxu0 }
 0x6fc   : > { %v8258_v57 = vpop.f32.mrf.mxu1  ;;  %v8662_v59 = vpop.f32.mrf.mxu3 }
 0x6fd   : > { %v19362_v19 = vadd.f32 %v8258_v57, %v4351_v8  ;;  %v8663_v32 = vadd.f32 %v8662_v59, %v18974_v12  ;;  %v14027_v12 = vrot.slane %v8767_v21, 9  ;;  %v20992_v8 = vld [vmem:[#allocation77_spill] sm:$0xff]  ;;  %v9415_v57 = vpack.c.b16 %v9387_v26, %v9386_v30 }
 0x6fe   : > { %v8924_v59 = vrot.slane %v8769_v55, 5 }
 0x6ff   : > { %20989 = vst [vmem:[#allocation59_spill] sm:$0xff] %v19362_v19  ;;  %v19368_v46 = vadd.f32 %v19282_v11, %v8663_v32  ;;  %v4352_v11 = vadd.f32 %v20992_v8, %v20991_v35  ;;  %v9293_v32 = vrot.slane %v9180_v42, 6  ;;  %v8922_v49 = vsel %vm15074_vm2, %v14027_v12, %v8921_v33  ;;  %v14781_v33 = vld [vmem:[%s15072_s19 + $0x2a0] sm:$0xff] }
 0x700   : > { %v8925_v21 = vsel %vm15074_vm2, %v8923_v28, %v8924_v59  ;;  %v8966_v30 = vunpack.c.l.b16 %v8922_v49  ;;  %v14061_v12 = vrot.slane %v9179_v36, 10 }
 0x701   : > { %14009 = vmatmul.msk.bf16.gmra.mxu3 %vm564_vm3, %v20990_v48  ;;  %v19389_v37 = vpop.f32.mrf.mxu2  ;;  %v8967_v26 = vunpack.c.l.b16 %v8925_v21  ;;  %v9295_v35 = vrot.slane %v9293_v32, 4 }
 0x702   : > { %v9294_v59 = vsel %vm15170_vm6, %v14061_v12, %v9293_v32  ;;  %v9183_v32 = vld [vmem:[%s15072_s19 + $0xa0] sm:$0xf]  ;;  %v8770_v12 = vld [vmem:[%s15072_s19 + $0x1ac] sm:$0xe] }
 0x703   : > { %v19395_v42 = vpop.f32.mrf.mxu0  ;;  %v8984_v8 = vpack.c.b16 %v8967_v26, %v8966_v30  ;;  %v9388_v21 = vunpack.c.l.b16 %v9294_v59 }
 0x704   : > { %v8261_v44 = vpop.f32.mrf.mxu1  ;;  %v8665_v18 = vpop.f32.mrf.mxu3 }
 0x705   : > { %v19382_v19 = vadd.f32 %v8261_v44, %v4352_v11  ;;  %v8666_v48 = vadd.f32 %v8665_v18, %v18991_v15  ;;  %v9296_v15 = vrot.slane %v9181_v16, 6  ;;  %v20994_v11 = vld [vmem:[#allocation46_spill] sm:$0xff] }
 0x706   : > { %v20995_v44 = vld [vmem:[#allocation78_spill] sm:$0xff]  ;;  %14215 = vmatmul.msk.bf16.gmra.mxu2 %vm564_vm3, %v14781_v33  ;;  %v8771_v33 = vld [vmem:[%s15072_s19 + $0x1b0] sm:$0xf] }
 0x707   : > { %20993 = vst [vmem:[#allocation94_spill] sm:$0xff] %v19382_v19  ;;  %v19392_v55 = vadd.f32 %v19307_v29, %v8666_v48  ;;  %14088 = vmatmul.msk.bf16.gmra.mxu1 %vm564_vm3, %v9415_v57  ;;  %v4353_v28 = vadd.f32 %v20995_v44, %v20994_v11  ;;  %14055 = vmatmul.msk.bf16.gmra.mxu0 %vm564_vm3, %v8984_v8  ;;  %v8928_v8 = vrot.slane %v8771_v33, 5  ;;  %v20997_v11 = vld [vmem:[#allocation20_spill] sm:$0xff]  ;;  %v20998_v44 = vld [vmem:[#allocation47_spill] sm:$0xff]  ;;  %v9182_v19 = vld [vmem:[%s15072_s19 + $0x9c] sm:$0xc] }
 0x708   : > { %v9297_v16 = vsel %vm15170_vm6, %v9295_v35, %v9296_v15  ;;  %v8772_v35 = vld [vmem:[%s15072_s19 + $0x1b4] sm:$0x1] }
 0x709   : > { %v19409_v49 = vpop.f32.mrf.mxu2  ;;  %v9389_v30 = vunpack.c.l.b16 %v9297_v16  ;;  %v8930_v15 = vrot.slane %v8928_v8, 4 }
 0x70b   : > { %v19414_v26 = vpop.f32.mrf.mxu0 }
 0x70c   : > { %v8263_v29 = vpop.f32.mrf.mxu1  ;;  %v8667_v57 = vpop.f32.mrf.mxu3 }
 0x70d   : > { %v19406_v36 = vadd.f32 %v8263_v29, %v4353_v28  ;;  %v8668_v18 = vadd.f32 %v8667_v57, %v19011_v4  ;;  %v14028_v4 = vrot.slane %v8770_v12, 9  ;;  %v20999_v28 = vld [vmem:[#allocation79_spill] sm:$0xff]  ;;  %v9416_v29 = vpack.c.b16 %v9389_v30, %v9388_v21 }
 0x70e   : > { %v8931_v57 = vrot.slane %v8772_v35, 5 }
 0x70f   : > { %20996 = vst [vmem:[#allocation28_spill] sm:$0xff] %v19406_v36  ;;  %v19412_v48 = vadd.f32 %v19326_v14, %v8668_v18  ;;  %v4354_v14 = vadd.f32 %v20999_v28, %v20998_v44  ;;  %v9300_v18 = vrot.slane %v9183_v32, 6  ;;  %v8929_v33 = vsel %vm15074_vm2, %v14028_v4, %v8928_v8  ;;  %v14782_v8 = vld [vmem:[%s15072_s19 + $0x2bc] sm:$0xff] }
 0x710   : > { %v8932_v12 = vsel %vm15074_vm2, %v8930_v15, %v8931_v57  ;;  %v8968_v21 = vunpack.c.l.b16 %v8929_v33  ;;  %v14062_v4 = vrot.slane %v9182_v19, 10 }
 0x711   : > { %14010 = vmatmul.msk.bf16.gmra.mxu3 %vm564_vm3, %v20997_v11  ;;  %v19433_v23 = vpop.f32.mrf.mxu2  ;;  %v8969_v30 = vunpack.c.l.b16 %v8932_v12  ;;  %v9302_v44 = vrot.slane %v9300_v18, 4 }
 0x713   : > { %v19439_v32 = vpop.f32.mrf.mxu0  ;;  %v8985_v28 = vpack.c.b16 %v8969_v30, %v8968_v21 }
 0x714   : > { %v8266_v59 = vpop.f32.mrf.mxu1  ;;  %v8670_v16 = vpop.f32.mrf.mxu3 }
 0x715   : > { %v19426_v36 = vadd.f32 %v8266_v59, %v4354_v14  ;;  %v8671_v11 = vadd.f32 %v8670_v16, %v19028_v13  ;;  %v9303_v13 = vrot.slane %v9184_v7, 6  ;;  %v21001_v14 = vld [vmem:[#allocation48_spill] sm:$0xff] }
 0x716   : > { %v21002_v59 = vld [vmem:[#allocation80_spill] sm:$0xff]  ;;  %14216 = vmatmul.msk.bf16.gmra.mxu2 %vm564_vm3, %v14782_v8  ;;  %v21004_v8 = vld [vmem:[#allocation21_spill] sm:$0xff] }
 0x717   : > { %21000 = vst [vmem:[#allocation60_spill] sm:$0xff] %v19426_v36  ;;  %v19436_v35 = vadd.f32 %v19351_v51, %v8671_v11  ;;  %14089 = vmatmul.msk.bf16.gmra.mxu1 %vm564_vm3, %v9416_v29  ;;  %v4355_v15 = vadd.f32 %v21002_v59, %v21001_v14  ;;  %14056 = vmatmul.msk.bf16.gmra.mxu0 %vm564_vm3, %v8985_v28  ;;  %v14227_v36 = vld [vmem:[%s15072_s19 + $0x210] sm:$0x3] }
 0x718   : > { %v9301_v29 = vsel %vm15170_vm6, %v14062_v4, %v9300_v18  ;;  %v9304_v16 = vsel %vm15170_vm6, %v9302_v44, %v9303_v13  ;;  %v9186_v18 = vld [vmem:[%s15072_s19 + $0xbc] sm:$0xf] }
 0x719   : > { %v19453_v33 = vpop.f32.mrf.mxu2  ;;  %v9390_v12 = vunpack.c.l.b16 %v9301_v29  ;;  %v9391_v21 = vunpack.c.l.b16 %v9304_v16  ;;  %v21005_v4 = vld [vmem:[#allocation49_spill] sm:$0xff]  ;;  %v9307_v59 = vrot.slane %v9186_v18, 6  ;;  %v9187_v29 = vld [vmem:[%s15072_s19 + $0xc0] sm:$0x3] }
 0x71a   : > { %v21006_v44 = vld [vmem:[#allocation81_spill] sm:$0xff] }
 0x71b   : > { %v19458_v30 = vpop.f32.mrf.mxu0  ;;  %v4356_v13 = vadd.f32 %v21006_v44, %v21005_v4  ;;  %v9309_v4 = vrot.slane %v9307_v59, 4  ;;  %v9310_v44 = vrot.slane %v9187_v29, 6 }
 0x71c   : > { %v8268_v57 = vpop.f32.mrf.mxu1  ;;  %v8672_v51 = vpop.f32.mrf.mxu3 }
 0x71d   : > { %v19450_v19 = vadd.f32 %v8268_v57, %v4355_v15  ;;  %v8673_v7 = vadd.f32 %v8672_v51, %v19048_v45  ;;  %v9417_v45 = vpack.c.b16 %v9391_v21, %v9390_v12  ;;  %v9185_v51 = vld [vmem:[%s15072_s19 + $0xb8] sm:$0xc]  ;;  %v14795_v21 = vld [vmem:[%s15072_s19 + $0x3f0] sm:$0xff] }
 0x71e   : > { %v14063_v18 = vrot.slane %v9185_v51, 10 }
 0x71f   : > { %21003 = vst [vmem:[#allocation10_spill] sm:$0xff] %v19450_v19  ;;  %v19456_v11 = vadd.f32 %v19370_v63, %v8673_v7  ;;  %v14811_v63 = vld [vmem:[%s20725_s2 + $0x180] sm:$0xff]  ;;  %v14225_v19 = vld [vmem:[%s15072_s19 + $0x208] sm:$0xc] }
 0x720   : > { %10537 = vmatpush.bf16.msrb.mxu0 %v14811_v63  ;;  %v9308_v63 = vsel %vm15170_vm6, %v14063_v18, %v9307_v59  ;;  %v21011_v59 = vld [vmem:[#allocation22_spill] sm:$0xff]  ;;  %v9189_v18 = vld [vmem:[%s15072_s19 + $0xd8] sm:$0xf] }
 0x721   : > { %14011 = vmatmul.msk.bf16.gmra.mxu3 %vm564_vm3, %v21004_v8  ;;  %v19473_v16 = vpop.f32.mrf.mxu2  ;;  %v14783_v8 = vld [vmem:[%s15072_s19 + $0x2d8] sm:$0xff] }
 0x723   : > { %v19479_v12 = vpop.f32.mrf.mxu0 }
 0x724   : > { %v8271_v28 = vpop.f32.mrf.mxu1  ;;  %v8675_v14 = vpop.f32.mrf.mxu3 }
 0x725   : > { %v19468_v15 = vadd.f32 %v8271_v28, %v4356_v13  ;;  %v8676_v57 = vadd.f32 %v8675_v14, %v19065_v1  ;;  %v21008_v13 = vld [vmem:[#allocation50_spill] sm:$0xff]  ;;  %v14226_v14 = vld [vmem:[%s15072_s19 + $0x20c] sm:$0xf] }
 0x726   : > { %v21009_v28 = vld [vmem:[#allocation82_spill] sm:$0xff]  ;;  %14217 = vmatmul.msk.bf16.gmra.mxu2 %vm564_vm3, %v14783_v8  ;;  %v9392_v8 = vunpack.c.l.b16 %v9308_v63 }
 0x727   : > { %21007 = vst [vmem:[#allocation29_spill] sm:$0xff] %v19468_v15  ;;  %v19476_v7 = vadd.f32 %v19395_v42, %v8676_v57  ;;  %14090 = vmatmul.msk.bf16.gmra.mxu1 %vm564_vm3, %v9417_v45  ;;  %v4357_v1 = vadd.f32 %v21009_v28, %v21008_v13  ;;  %14425 = vmatmul.msk.bf16.vlgmr.msrb.gmra.mxu0 %vm564_vm3, %v14795_v21  ;;  %v10005_v13 = vrot.slane %v14226_v14, 6  ;;  %v21013_v14 = vld [vmem:[#allocation83_spill] sm:$0xff] }
 0x728   : > { %v9311_v57 = vsel %vm15170_vm6, %v9309_v4, %v9310_v44  ;;  %v14273_v4 = vrot.slane %v14225_v19, 10 }
 0x729   : > { %v19495_v28 = vpop.f32.mrf.mxu2  ;;  %v9393_v15 = vunpack.c.l.b16 %v9311_v57  ;;  %v10007_v44 = vrot.slane %v10005_v13, 4 }
 0x72a   : > { %v10006_v19 = vsel %vm15170_vm6, %v14273_v4, %v10005_v13  ;;  %v9317_v13 = vrot.slane %v9190_v25, 6 }
 0x72b   : > { %v19502_v53 = vpop.f32.mrf.mxu0 }
 0x72c   : > { %v8273_v42 = vpop.f32.mrf.mxu1  ;;  %v8677_v45 = vpop.f32.mrf.mxu3 }
 0x72d   : > { %v19492_v51 = vadd.f32 %v8273_v42, %v4357_v1  ;;  %v8678_v29 = vadd.f32 %v8677_v45, %v19090_v6  ;;  %v14815_v6 = vld [vmem:[%s20725_s2 + $0x1a0] sm:$0xff]  ;;  %v21012_v1 = vld [vmem:[#allocation51_spill] sm:$0xff]  ;;  %v9418_v45 = vpack.c.b16 %v9393_v15, %v9392_v8 }
 0x72e   : > { %v4358_v42 = vadd.f32 %v21013_v14, %v21012_v1  ;;  %11421 = vmatpush.bf16.msrb.mxu2 %v14815_v6  ;;  %v14796_v8 = vld [vmem:[%s15072_s19 + $0x40c] sm:$0xff]  ;;  %v14064_v6 = vrot.slane %v9188_v62, 10 }
 0x72f   : > { %21010 = vst [vmem:[#allocation61_spill] sm:$0xff] %v19492_v51  ;;  %v19498_v21 = vadd.f32 %v19414_v26, %v8678_v29  ;;  %v10008_v26 = vrot.slane %v14227_v36, 6  ;;  %v9314_v29 = vrot.slane %v9189_v18, 6  ;;  %v14784_v18 = vld [vmem:[%s15072_s19 + $0x2f4] sm:$0xff] }
 0x731   : > { %14012 = vmatmul.msk.bf16.gmra.mxu3 %vm564_vm3, %v21011_v59  ;;  %v10009_v36 = vsel %vm15170_vm6, %v10007_v44, %v10008_v26  ;;  %v19521_v1 = vpop.f32.mrf.mxu2  ;;  %v9316_v14 = vrot.slane %v9314_v29, 4  ;;  %v21015_v26 = vld [vmem:[#allocation52_spill] sm:$0xff]  ;;  %v9315_v25 = vsel %vm15170_vm6, %v14064_v6, %v9314_v29  ;;  %v14230_v29 = vld [vmem:[%s15072_s19 + $0x22c] sm:$0x3] }
 0x732   : > { %v10121_v44 = vunpack.c.l.b16 %v10009_v36 }
 0x733   : > { %v19532_v4 = vpop.f32.mrf.mxu0 }
 0x734   : > { %v8276_v63 = vpop.f32.mrf.mxu1  ;;  %v8680_v57 = vpop.f32.mrf.mxu3 }
 0x735   : > { %v19512_v51 = vadd.f32 %v8276_v63, %v4358_v42  ;;  %v8681_v59 = vadd.f32 %v8680_v57, %v19107_v39  ;;  %v14813_v39 = vld [vmem:[%s20725_s2 + $0x190] sm:$0xff]  ;;  %v10120_v42 = vunpack.c.l.b16 %v10006_v19  ;;  %v21016_v63 = vld [vmem:[#allocation85_spill] sm:$0xff]  ;;  %v14229_v57 = vld [vmem:[%s15072_s19 + $0x228] sm:$0xf] }
 0x736   : > { %10979 = vmatpush.bf16.msrb.mxu1 %v14813_v39  ;;  %14218 = vmatmul.msk.bf16.gmra.mxu2 %vm564_vm3, %v14784_v18  ;;  %v9394_v18 = vunpack.c.l.b16 %v9315_v25 }
 0x737   : > { %21014 = vst [vmem:[#allocation95_spill] sm:$0xff] %v19512_v51  ;;  %v19524_v15 = vadd.f32 %v19439_v32, %v8681_v59  ;;  %14091 = vmatmul.msk.bf16.gmra.mxu1 %vm564_vm3, %v9418_v45  ;;  %v4359_v32 = vadd.f32 %v21016_v63, %v21015_v26  ;;  %14426 = vmatmul.msk.bf16.gmra.mxu0 %vm564_vm3, %v14796_v8  ;;  %v10012_v26 = vrot.slane %v14229_v57, 6 }
 0x738   : > { %v9318_v59 = vsel %vm15170_vm6, %v9316_v14, %v9317_v13  ;;  %v10152_v39 = vpack.c.b16 %v10121_v44, %v10120_v42  ;;  %v9192_v14 = vld [vmem:[%s15072_s19 + $0xf4] sm:$0xf]  ;;  %v14274_v13 = vrot.slane %v14228_v50, 10  ;;  %v10015_v42 = vrot.slane %v14230_v29, 6  ;;  %v21018_v44 = vld [vmem:[#allocation53_spill] sm:$0xff] }
 0x739   : > { %v19546_v63 = vpop.f32.mrf.mxu2  ;;  %v9395_v51 = vunpack.c.l.b16 %v9318_v59  ;;  %v9321_v25 = vrot.slane %v9192_v14, 6  ;;  %v14785_v14 = vld [vmem:[%s15072_s19 + $0x310] sm:$0xff] }
 0x73a   : > { %v10013_v50 = vsel %vm15170_vm6, %v14274_v13, %v10012_v26 }
 0x73b   : > { %v19553_v6 = vpop.f32.mrf.mxu0 }
 0x73c   : > { %v8278_v45 = vpop.f32.mrf.mxu1  ;;  %v8682_v62 = vpop.f32.mrf.mxu3 }
 0x73d   : > { %v19543_v19 = vadd.f32 %v8278_v45, %v4359_v32  ;;  %v8683_v36 = vadd.f32 %v8682_v62, %v19125_v3  ;;  %v10014_v3 = vrot.slane %v10012_v26, 4  ;;  %v21019_v32 = vld [vmem:[#allocation87_spill] sm:$0xff]  ;;  %v9324_v26 = vrot.slane %v9193_v24, 6 }
 0x73e   : > { %v4360_v57 = vadd.f32 %v21019_v32, %v21018_v44  ;;  %v9323_v32 = vrot.slane %v9321_v25, 4 }
 0x73f   : > { %21017 = vst [vmem:[#allocation30_spill] sm:$0xff] %v19543_v19  ;;  %v19549_v8 = vadd.f32 %v19458_v30, %v8683_v36  ;;  %v9419_v30 = vpack.c.b16 %v9395_v51, %v9394_v18  ;;  %v9191_v19 = vld [vmem:[%s15072_s19 + $0xf0] sm:$0xc]  ;;  %v14797_v18 = vld [vmem:[%s15072_s19 + $0x428] sm:$0xff] }
 0x740   : > { %v14065_v44 = vrot.slane %v9191_v19, 10 }
 0x741   : > { %14301 = vmatmul.msk.bf16.vlgmr.msra.gmra.mxu3 %vm564_vm3, %v10152_v39  ;;  %v10016_v39 = vsel %vm15170_vm6, %v10014_v3, %v10015_v42  ;;  %v19568_v29 = vpop.f32.mrf.mxu2  ;;  %v21021_v42 = vld [vmem:[#allocation54_spill] sm:$0xff] }
 0x742   : > { %v10123_v3 = vunpack.c.l.b16 %v10016_v39  ;;  %v9322_v24 = vsel %vm15170_vm6, %v14065_v44, %v9321_v25  ;;  %v14233_v25 = vld [vmem:[%s15072_s19 + $0x248] sm:$0x3] }
 0x744   : > { %v8281_v45 = vpop.f32.mrf.mxu1  ;;  %v8685_v62 = vpop.f32.mrf.mxu3 }
 0x745   : > { %v19559_v59 = vadd.f32 %v8281_v45, %v4360_v57  ;;  %v8686_v36 = vadd.f32 %v8685_v62, %v19142_v40  ;;  %v14818_v40 = vld [vmem:[%s20726_s3 + $0x38] sm:$0xff]  ;;  %v19579_v13 = vpop.f32.mrf.mxu0  ;;  %v10122_v57 = vunpack.c.l.b16 %v10013_v50  ;;  %v14232_v62 = vld [vmem:[%s15072_s19 + $0x244] sm:$0xf] }
 0x746   : > { %11723 = vmatpush.bf16.msrb.mxu3 %v14818_v40  ;;  %v21022_v45 = vld [vmem:[#allocation89_spill] sm:$0xff]  ;;  %14219 = vmatmul.msk.bf16.gmra.mxu2 %vm564_vm3, %v14785_v14  ;;  %v9396_v14 = vunpack.c.l.b16 %v9322_v24  ;;  %v9194_v24 = vld [vmem:[%s15072_s19 + $0x10c] sm:$0xc] }
 0x747   : > { %21020 = vst [vmem:[#allocation62_spill] sm:$0xff] %v19559_v59  ;;  %v19571_v51 = vadd.f32 %v19479_v12, %v8686_v36  ;;  %14092 = vmatmul.msk.bf16.gmra.mxu1 %vm564_vm3, %v9419_v30  ;;  %v4361_v12 = vadd.f32 %v21022_v45, %v21021_v42  ;;  %14427 = vmatmul.msk.bf16.gmra.mxu0 %vm564_vm3, %v14797_v18  ;;  %v10019_v42 = vrot.slane %v14232_v62, 6 }
 0x748   : > { %v9325_v36 = vsel %vm15170_vm6, %v9323_v32, %v9324_v26  ;;  %v10153_v40 = vpack.c.b16 %v10123_v3, %v10122_v57  ;;  %v9195_v32 = vld [vmem:[%s15072_s19 + $0x110] sm:$0xf]  ;;  %v14275_v26 = vrot.slane %v14231_v52, 10  ;;  %v10022_v57 = vrot.slane %v14233_v25, 6 }
 0x749   : > { %v19593_v45 = vpop.f32.mrf.mxu2  ;;  %v9397_v59 = vunpack.c.l.b16 %v9325_v36  ;;  %v9328_v62 = vrot.slane %v9195_v32, 6  ;;  %v9196_v36 = vld [vmem:[%s15072_s19 + $0x114] sm:$0x3]  ;;  %v14066_v25 = vrot.slane %v9194_v24, 10 }
 0x74b   : > { %v9420_v3 = vpack.c.b16 %v9397_v59, %v9396_v14  ;;  %v14798_v14 = vld [vmem:[%s15072_s19 + $0x444] sm:$0xff]  ;;  %v9330_v32 = vrot.slane %v9328_v62, 4 }
 0x74c   : > { %v8283_v30 = vpop.f32.mrf.mxu1  ;;  %v8687_v19 = vpop.f32.mrf.mxu3 }
 0x74d   : > { %v19590_v50 = vadd.f32 %v8283_v30, %v4361_v12  ;;  %v8688_v39 = vadd.f32 %v8687_v19, %v19166_v17  ;;  %v19600_v44 = vpop.f32.mrf.mxu0  ;;  %v10021_v17 = vrot.slane %v10019_v42, 4 }
 0x74f   : > { %21023 = vst [vmem:[#allocation11_spill] sm:$0xff] %v19590_v50  ;;  %v19596_v18 = vadd.f32 %v19502_v53, %v8688_v39  ;;  %v10020_v39 = vsel %vm15170_vm6, %v14275_v26, %v10019_v42  ;;  %v10023_v52 = vsel %vm15170_vm6, %v10021_v17, %v10022_v57  ;;  %v14235_v17 = vld [vmem:[%s15072_s19 + $0x260] sm:$0xf]  ;;  %v14234_v50 = vld [vmem:[%s15072_s19 + $0x25c] sm:$0xc] }
 0x750   : > { %v10124_v42 = vunpack.c.l.b16 %v10020_v39  ;;  %v10125_v26 = vunpack.c.l.b16 %v10023_v52 }
 0x751   : > { %14302 = vmatmul.msk.bf16.gmra.mxu3 %vm564_vm3, %v10153_v40  ;;  %v19612_v40 = vpop.f32.mrf.mxu2 }
 0x752   : > { %v10154_v24 = vpack.c.b16 %v10125_v26, %v10124_v42 }
 0x754   : > { %v8690_v12 = vpop.f32.mrf.mxu3  ;;  %v9497_v53 = vpop.f32.mrf.mxu1 }
 0x755   : > { %v8691_v30 = vadd.f32 %v8690_v12, %v19186_v22  ;;  %v9577_v19 = vadd.f32 %v9497_v53, %v19215_v61  ;;  %v14786_v22 = vld [vmem:[%s15072_s19 + $0x32c] sm:$0xff]  ;;  %v9331_v12 = vrot.slane %v9196_v36, 6  ;;  %v19623_v53 = vpop.f32.mrf.mxu0  ;;  %v10026_v36 = vrot.slane %v14235_v17, 6 }
 0x756   : > { %14220 = vmatmul.msk.bf16.gmra.mxu2 %vm564_vm3, %v14786_v22 }
 0x757   : > { %v19615_v59 = vadd.f32 %v19532_v4, %v8691_v30  ;;  %14093 = vmatmul.msk.bf16.gmra.mxu1 %vm564_vm3, %v9420_v3  ;;  %v19621_v61 = vadd.f32 %v19495_v28, %v9577_v19  ;;  %14428 = vmatmul.msk.bf16.gmra.mxu0 %vm564_vm3, %v14798_v14  ;;  %v9329_v28 = vsel %vm15170_vm6, %v14066_v25, %v9328_v62  ;;  %v14236_v62 = vld [vmem:[%s15072_s19 + $0x264] sm:$0x3] }
 0x758   : > { %v9332_v3 = vsel %vm15170_vm6, %v9330_v32, %v9331_v12  ;;  %v9398_v14 = vunpack.c.l.b16 %v9329_v28  ;;  %v10028_v12 = vrot.slane %v10026_v36, 4 }
 0x759   : > { %v19634_v39 = vpop.f32.mrf.mxu2  ;;  %v9399_v22 = vunpack.c.l.b16 %v9332_v3  ;;  %v9199_v3 = vld [vmem:[%s15072_s19 + $0x130] sm:$0x3] }
 0x75b   : > { %v9421_v42 = vpack.c.b16 %v9399_v22, %v9398_v14  ;;  %v14799_v14 = vld [vmem:[%s15072_s19 + $0x460] sm:$0xff] }
 0x75c   : > { %v8692_v4 = vpop.f32.mrf.mxu3  ;;  %v9499_v57 = vpop.f32.mrf.mxu1 }
 0x75d   : > { %v8693_v30 = vadd.f32 %v8692_v4, %v19208_v9  ;;  %v9578_v19 = vadd.f32 %v9499_v57, %v19238_v54  ;;  %v19644_v32 = vpop.f32.mrf.mxu0  ;;  %v9198_v9 = vld [vmem:[%s15072_s19 + $0x12c] sm:$0xf]  ;;  %v14276_v54 = vrot.slane %v14234_v50, 10 }
 0x75e   : > { %v9335_v4 = vrot.slane %v9198_v9, 6  ;;  %v9338_v9 = vrot.slane %v9199_v3, 6 }
 0x75f   : > { %v19637_v52 = vadd.f32 %v19553_v6, %v8693_v30  ;;  %v19642_v25 = vadd.f32 %v19521_v1, %v9578_v19  ;;  %v10029_v6 = vrot.slane %v14236_v62, 6  ;;  %v9197_v1 = vld [vmem:[%s15072_s19 + $0x128] sm:$0xc]  ;;  %v10027_v30 = vsel %vm15170_vm6, %v14276_v54, %v10026_v36 }
 0x760   : > { %v14067_v22 = vrot.slane %v9197_v1, 10  ;;  %v9337_v62 = vrot.slane %v9335_v4, 4  ;;  %v10126_v36 = vunpack.c.l.b16 %v10027_v30 }
 0x761   : > { %14303 = vmatmul.msk.bf16.gmra.mxu3 %vm564_vm3, %v10154_v24  ;;  %v10030_v50 = vsel %vm15170_vm6, %v10028_v12, %v10029_v6  ;;  %v19656_v19 = vpop.f32.mrf.mxu2  ;;  %v14238_v12 = vld [vmem:[%s15072_s19 + $0x27c] sm:$0xf] }
 0x762   : > { %v10127_v54 = vunpack.c.l.b16 %v10030_v50  ;;  %v10033_v1 = vrot.slane %v14238_v12, 6 }
 0x764   : > { %v8695_v26 = vpop.f32.mrf.mxu3  ;;  %v9502_v17 = vpop.f32.mrf.mxu1 }
 0x765   : > { %v8696_v57 = vadd.f32 %v8695_v26, %v19233_v0  ;;  %v9579_v28 = vadd.f32 %v9502_v17, %v19260_v20  ;;  %v14787_v0 = vld [vmem:[%s15072_s19 + $0x348] sm:$0xff]  ;;  %v19667_v26 = vpop.f32.mrf.mxu0 }
 0x766   : > { %14221 = vmatmul.msk.bf16.gmra.mxu2 %vm564_vm3, %v14787_v0  ;;  %v14237_v0 = vld [vmem:[%s15072_s19 + $0x278] sm:$0xc] }
 0x767   : > { %v19659_v24 = vadd.f32 %v19579_v13, %v8696_v57  ;;  %14094 = vmatmul.msk.bf16.gmra.mxu1 %vm564_vm3, %v9421_v42  ;;  %v19665_v20 = vadd.f32 %v19546_v63, %v9579_v28  ;;  %14429 = vmatmul.msk.bf16.gmra.mxu0 %vm564_vm3, %v14799_v14  ;;  %v9336_v63 = vsel %vm15170_vm6, %v14067_v22, %v9335_v4  ;;  %v14239_v4 = vld [vmem:[%s15072_s19 + $0x280] sm:$0x3] }
 0x768   : > { %v9339_v42 = vsel %vm15170_vm6, %v9337_v62, %v9338_v9  ;;  %v10155_v28 = vpack.c.b16 %v10127_v54, %v10126_v36  ;;  %v9400_v50 = vunpack.c.l.b16 %v9336_v63  ;;  %v10035_v9 = vrot.slane %v10033_v1, 4 }
 0x769   : > { %v19678_v3 = vpop.f32.mrf.mxu2  ;;  %v9401_v14 = vunpack.c.l.b16 %v9339_v42  ;;  %v9202_v42 = vld [vmem:[%s15072_s19 + $0x14c] sm:$0x3] }
 0x76b   : > { %v9422_v36 = vpack.c.b16 %v9401_v14, %v9400_v50  ;;  %v14800_v14 = vld [vmem:[%s15072_s19 + $0x47c] sm:$0xff] }
 0x76c   : > { %v8697_v13 = vpop.f32.mrf.mxu3  ;;  %v9504_v6 = vpop.f32.mrf.mxu1 }
 0x76d   : > { %v8698_v17 = vadd.f32 %v8697_v13, %v19257_v58  ;;  %v9580_v57 = vadd.f32 %v9504_v6, %v19280_v60  ;;  %v19688_v62 = vpop.f32.mrf.mxu0  ;;  %v9201_v58 = vld [vmem:[%s15072_s19 + $0x148] sm:$0xf]  ;;  %v14277_v60 = vrot.slane %v14237_v0, 10 }
 0x76e   : > { %v9342_v13 = vrot.slane %v9201_v58, 6  ;;  %v9345_v58 = vrot.slane %v9202_v42, 6 }
 0x76f   : > { %v19681_v30 = vadd.f32 %v19600_v44, %v8698_v17  ;;  %v19686_v22 = vadd.f32 %v19568_v29, %v9580_v57  ;;  %v10036_v44 = vrot.slane %v14239_v4, 6  ;;  %v9200_v29 = vld [vmem:[%s15072_s19 + $0x144] sm:$0xc]  ;;  %v10034_v17 = vsel %vm15170_vm6, %v14277_v60, %v10033_v1 }
 0x770   : > { %v14068_v0 = vrot.slane %v9200_v29, 10  ;;  %v9344_v4 = vrot.slane %v9342_v13, 4 }
 0x771   : > { %14304 = vmatmul.msk.bf16.gmra.mxu3 %vm564_vm3, %v10155_v28  ;;  %v10037_v57 = vsel %vm15170_vm6, %v10035_v9, %v10036_v44  ;;  %v19700_v28 = vpop.f32.mrf.mxu2  ;;  %v14241_v9 = vld [vmem:[%s15072_s19 + $0x298] sm:$0xf] }
 0x772   : > { %v10129_v1 = vunpack.c.l.b16 %v10037_v57  ;;  %v10040_v29 = vrot.slane %v14241_v9, 6 }
 0x774   : > { %v8700_v54 = vpop.f32.mrf.mxu3  ;;  %v9507_v12 = vpop.f32.mrf.mxu1 }
 0x775   : > { %v8701_v6 = vadd.f32 %v8700_v54, %v19277_v47  ;;  %v9581_v63 = vadd.f32 %v9507_v12, %v19304_v10  ;;  %v14788_v47 = vld [vmem:[%s15072_s19 + $0x364] sm:$0xff]  ;;  %v10128_v54 = vunpack.c.l.b16 %v10034_v17  ;;  %v19711_v60 = vpop.f32.mrf.mxu0 }
 0x776   : > { %14222 = vmatmul.msk.bf16.gmra.mxu2 %vm564_vm3, %v14788_v47  ;;  %v14240_v47 = vld [vmem:[%s15072_s19 + $0x294] sm:$0xc] }
 0x777   : > { %v19703_v50 = vadd.f32 %v19623_v53, %v8701_v6  ;;  %14095 = vmatmul.msk.bf16.gmra.mxu1 %vm564_vm3, %v9422_v36  ;;  %v19709_v10 = vadd.f32 %v19593_v45, %v9581_v63  ;;  %14430 = vmatmul.msk.bf16.gmra.mxu0 %vm564_vm3, %v14800_v14  ;;  %v9343_v45 = vsel %vm15170_vm6, %v14068_v0, %v9342_v13  ;;  %v14242_v13 = vld [vmem:[%s15072_s19 + $0x29c] sm:$0x3] }
 0x778   : > { %v9346_v36 = vsel %vm15170_vm6, %v9344_v4, %v9345_v58  ;;  %v10156_v63 = vpack.c.b16 %v10129_v1, %v10128_v54  ;;  %v9402_v57 = vunpack.c.l.b16 %v9343_v45  ;;  %v10042_v4 = vrot.slane %v10040_v29, 4 }
 0x779   : > { %v19722_v42 = vpop.f32.mrf.mxu2  ;;  %v9403_v14 = vunpack.c.l.b16 %v9346_v36  ;;  %v10043_v58 = vrot.slane %v14242_v13, 6  ;;  %v9205_v36 = vld [vmem:[%s15072_s19 + $0x168] sm:$0x3] }
 0x77b   : > { %v9423_v54 = vpack.c.b16 %v9403_v14, %v9402_v57  ;;  %v14801_v14 = vld [vmem:[%s15072_s19 + $0x498] sm:$0xff] }
 0x77c   : > { %v8702_v53 = vpop.f32.mrf.mxu3  ;;  %v9509_v44 = vpop.f32.mrf.mxu1 }
 0x77d   : > { %v8703_v12 = vadd.f32 %v8702_v53, %v19301_v34  ;;  %v9582_v6 = vadd.f32 %v9509_v44, %v19324_v5  ;;  %v9204_v34 = vld [vmem:[%s15072_s19 + $0x164] sm:$0xf]  ;;  %v14278_v5 = vrot.slane %v14240_v47, 10 }
 0x77e   : > { %v9349_v53 = vrot.slane %v9204_v34, 6  ;;  %v9352_v34 = vrot.slane %v9205_v36, 6 }
 0x77f   : > { %v19725_v17 = vadd.f32 %v19644_v32, %v8703_v12  ;;  %v19730_v0 = vadd.f32 %v19612_v40, %v9582_v6  ;;  %v19734_v32 = vpop.f32.mrf.mxu0  ;;  %v9203_v40 = vld [vmem:[%s15072_s19 + $0x160] sm:$0xc]  ;;  %v10041_v12 = vsel %vm15170_vm6, %v14278_v5, %v10040_v29  ;;  %v10044_v6 = vsel %vm15170_vm6, %v10042_v4, %v10043_v58  ;;  %v14244_v5 = vld [vmem:[%s15072_s19 + $0x2b4] sm:$0xf] }
 0x780   : > { %v14069_v47 = vrot.slane %v9203_v40, 10  ;;  %v9351_v13 = vrot.slane %v9349_v53, 4  ;;  %v10131_v29 = vunpack.c.l.b16 %v10044_v6  ;;  %v10047_v40 = vrot.slane %v14244_v5, 6 }
 0x781   : > { %14305 = vmatmul.msk.bf16.gmra.mxu3 %vm564_vm3, %v10156_v63  ;;  %v19744_v63 = vpop.f32.mrf.mxu2 }
 0x782   : > { %v9350_v58 = vsel %vm15170_vm6, %v14069_v47, %v9349_v53  ;;  %v14243_v53 = vld [vmem:[%s15072_s19 + $0x2b0] sm:$0xc] }
 0x783   : > { %v9404_v6 = vunpack.c.l.b16 %v9350_v58  ;;  %v9206_v58 = vld [vmem:[%s15072_s19 + $0x17c] sm:$0xc] }
 0x784   : > { %v8705_v1 = vpop.f32.mrf.mxu3  ;;  %v9512_v9 = vpop.f32.mrf.mxu1 }
 0x785   : > { %v8706_v44 = vadd.f32 %v8705_v1, %v19321_v43  ;;  %v9583_v45 = vadd.f32 %v9512_v9, %v19348_v41  ;;  %v14789_v43 = vld [vmem:[%s15072_s19 + $0x380] sm:$0xff]  ;;  %v10130_v1 = vunpack.c.l.b16 %v10041_v12 }
 0x786   : > { %14223 = vmatmul.msk.bf16.gmra.mxu2 %vm564_vm3, %v14789_v43  ;;  %v14245_v43 = vld [vmem:[%s15072_s19 + $0x2b8] sm:$0x3] }
 0x787   : > { %v19747_v57 = vadd.f32 %v19667_v26, %v8706_v44  ;;  %14096 = vmatmul.msk.bf16.gmra.mxu1 %vm564_vm3, %v9423_v54  ;;  %v19753_v41 = vadd.f32 %v19634_v39, %v9583_v45  ;;  %14431 = vmatmul.msk.bf16.gmra.mxu0 %vm564_vm3, %v14801_v14  ;;  %v9353_v39 = vsel %vm15170_vm6, %v9351_v13, %v9352_v34  ;;  %v19764_v45 = vpop.f32.mrf.mxu0  ;;  %v10049_v13 = vrot.slane %v10047_v40, 4 }
 0x788   : > { %v10157_v44 = vpack.c.b16 %v10131_v29, %v10130_v1  ;;  %v9405_v14 = vunpack.c.l.b16 %v9353_v39  ;;  %v10050_v34 = vrot.slane %v14245_v43, 6 }
 0x789   : > { %v19766_v36 = vpop.f32.mrf.mxu2 }
 0x78a   : > { %v9424_v1 = vpack.c.b16 %v9405_v14, %v9404_v6 }
 0x78c   : > { %v8707_v26 = vpop.f32.mrf.mxu3  ;;  %v9514_v4 = vpop.f32.mrf.mxu1 }
 0x78d   : > { %v8708_v54 = vadd.f32 %v8707_v26, %v19345_v27  ;;  %v9584_v9 = vadd.f32 %v9514_v4, %v19368_v46  ;;  %v9207_v27 = vld [vmem:[%s15072_s19 + $0x180] sm:$0xf]  ;;  %v14279_v46 = vrot.slane %v14243_v53, 10  ;;  %v14070_v53 = vrot.slane %v9206_v58, 10 }
 0x78e   : > { %v9356_v5 = vrot.slane %v9207_v27, 6 }
 0x78f   : > { %v19769_v12 = vadd.f32 %v19688_v62, %v8708_v54  ;;  %v19774_v47 = vadd.f32 %v19656_v19, %v9584_v9  ;;  %v9208_v19 = vld [vmem:[%s15072_s19 + $0x184] sm:$0x3]  ;;  %v10048_v39 = vsel %vm15170_vm6, %v14279_v46, %v10047_v40  ;;  %v10051_v54 = vsel %vm15170_vm6, %v10049_v13, %v10050_v34  ;;  %v19792_v6 = vpop.f32.mrf.mxu0  ;;  %v14247_v13 = vld [vmem:[%s15072_s19 + $0x2d0] sm:$0xf] }
 0x790   : > { %v9358_v43 = vrot.slane %v9356_v5, 4  ;;  %v9359_v40 = vrot.slane %v9208_v19, 6  ;;  %v10132_v27 = vunpack.c.l.b16 %v10048_v39  ;;  %v10133_v46 = vunpack.c.l.b16 %v10051_v54 }
 0x791   : > { %14306 = vmatmul.msk.bf16.gmra.mxu3 %vm564_vm3, %v10157_v44  ;;  %v19786_v9 = vpop.f32.mrf.mxu2 }
 0x794   : > { %v8710_v62 = vpop.f32.mrf.mxu3  ;;  %v9517_v29 = vpop.f32.mrf.mxu1 }
 0x795   : > { %v8711_v26 = vadd.f32 %v8710_v62, %v19365_v38  ;;  %v9585_v4 = vadd.f32 %v9517_v29, %v19392_v55  ;;  %v14802_v38 = vld [vmem:[%s15072_s19 + $0x4b4] sm:$0xff]  ;;  %v14790_v55 = vld [vmem:[%s15072_s19 + $0x39c] sm:$0xff] }
 0x796   : > { %14224 = vmatmul.msk.bf16.gmra.mxu2 %vm564_vm3, %v14790_v55 }
 0x797   : > { %v19789_v44 = vadd.f32 %v19711_v60, %v8711_v26  ;;  %14097 = vmatmul.msk.bf16.gmra.mxu1 %vm564_vm3, %v9424_v1  ;;  %v19797_v14 = vadd.f32 %v19678_v3, %v9585_v4  ;;  %14432 = vmatmul.msk.bf16.gmra.mxu0 %vm564_vm3, %v14802_v38  ;;  %v9357_v1 = vsel %vm15170_vm6, %v14070_v53, %v9356_v5  ;;  %v10054_v4 = vrot.slane %v14247_v13, 6  ;;  %v14246_v5 = vld [vmem:[%s15072_s19 + $0x2cc] sm:$0xc]  ;;  %v14248_v38 = vld [vmem:[%s15072_s19 + $0x2d4] sm:$0x3] }
 0x798   : > { %v9360_v3 = vsel %vm15170_vm6, %v9358_v43, %v9359_v40  ;;  %v10158_v26 = vpack.c.b16 %v10133_v46, %v10132_v27  ;;  %v9406_v39 = vunpack.c.l.b16 %v9357_v1  ;;  %v14534_v53 = vld [vmem:[%s15072_s19 + $0x404] sm:$0xf]  ;;  %v14280_v43 = vrot.slane %v14246_v5, 10  ;;  %v14533_v13 = vld [vmem:[%s15072_s19 + $0x400] sm:$0xc] }
 0x799   : > { %v19808_v58 = vpop.f32.mrf.mxu2  ;;  %v9407_v54 = vunpack.c.l.b16 %v9360_v3  ;;  %v10056_v40 = vrot.slane %v10054_v4, 4  ;;  %v11191_v27 = vrot.slane %v14534_v53, 6  ;;  %v14581_v3 = vrot.slane %v14533_v13, 10  ;;  %v9211_v5 = vld [vmem:[%s15072_s19 + $0x1a0] sm:$0x3] }
 0x79b   : > { %v9425_v46 = vpack.c.b16 %v9407_v54, %v9406_v39 }
 0x79c   : > { %v8712_v60 = vpop.f32.mrf.mxu3  ;;  %v9519_v34 = vpop.f32.mrf.mxu1 }
 0x79d   : > { %v8713_v62 = vadd.f32 %v8712_v60, %v19389_v37  ;;  %v9586_v29 = vadd.f32 %v9519_v34, %v19412_v48  ;;  %v19819_v37 = vpop.f32.mrf.mxu0  ;;  %v9210_v48 = vld [vmem:[%s15072_s19 + $0x19c] sm:$0xf]  ;;  %v14535_v60 = vld [vmem:[%s15072_s19 + $0x408] sm:$0x3] }
 0x79f   : > { %v19811_v19 = vadd.f32 %v19734_v32, %v8713_v62  ;;  %v19816_v55 = vadd.f32 %v19700_v28, %v9586_v29  ;;  %v10057_v32 = vrot.slane %v14248_v38, 6  ;;  %v9363_v28 = vrot.slane %v9210_v48, 6 }
 0x7a0   : > { %v11193_v62 = vrot.slane %v11191_v27, 4  ;;  %v11194_v29 = vrot.slane %v14535_v60, 6  ;;  %v10055_v38 = vsel %vm15170_vm6, %v14280_v43, %v10054_v4  ;;  %v11192_v48 = vsel %vm15170_vm6, %v14581_v3, %v11191_v27 }
 0x7a1   : > { %21024 = vst [vmem:[#allocation31_spill] sm:$0xff] %v19816_v55  ;;  %14307 = vmatmul.msk.bf16.gmra.mxu3 %vm564_vm3, %v10158_v26  ;;  %v9209_v55 = vld [vmem:[%s15072_s19 + $0x198] sm:$0xc]  ;;  %v10058_v39 = vsel %vm15170_vm6, %v10056_v40, %v10057_v32  ;;  %v19833_v54 = vpop.f32.mrf.mxu2  ;;  %v11306_v13 = vunpack.c.l.b16 %v11192_v48  ;;  %v9365_v32 = vrot.slane %v9363_v28, 4  ;;  %v9366_v60 = vrot.slane %v9211_v5, 6 }
 0x7a2   : > { %v11195_v53 = vsel %vm15170_vm6, %v11193_v62, %v11194_v29  ;;  %v14071_v40 = vrot.slane %v9209_v55, 10  ;;  %v14250_v62 = vld [vmem:[%s15072_s19 + $0x2ec] sm:$0xf] }
 0x7a3   : > { %v11307_v4 = vunpack.c.l.b16 %v11195_v53  ;;  %v10061_v5 = vrot.slane %v14250_v62, 6 }
 0x7a4   : > { %v8715_v34 = vpop.f32.mrf.mxu3  ;;  %v9522_v1 = vpop.f32.mrf.mxu1 }
 0x7a5   : > { %v8716_v26 = vadd.f32 %v8715_v34, %v19409_v49  ;;  %v9587_v31 = vadd.f32 %v9522_v1, %v19436_v35  ;;  %v14803_v35 = vld [vmem:[%s15072_s19 + $0x4d0] sm:$0xff]  ;;  %v10134_v34 = vunpack.c.l.b16 %v10055_v38  ;;  %v10135_v1 = vunpack.c.l.b16 %v10058_v39  ;;  %v19847_v3 = vpop.f32.mrf.mxu0 }
 0x7a6   : > { %v11338_v27 = vpack.c.b16 %v11307_v4, %v11306_v13 }
 0x7a7   : > { %v19840_v49 = vadd.f32 %v19764_v45, %v8716_v26  ;;  %14098 = vmatmul.msk.bf16.gmra.mxu1 %vm564_vm3, %v9425_v46  ;;  %v19845_v43 = vadd.f32 %v19722_v42, %v9587_v31  ;;  %14433 = vmatmul.msk.bf16.gmra.mxu0 %vm564_vm3, %v14803_v35  ;;  %v9364_v31 = vsel %vm15170_vm6, %v14071_v40, %v9363_v28  ;;  %v14249_v35 = vld [vmem:[%s15072_s19 + $0x2e8] sm:$0xc]  ;;  %v14251_v28 = vld [vmem:[%s15072_s19 + $0x2f0] sm:$0x3]  ;;  %v10063_v40 = vrot.slane %v10061_v5, 4 }
 0x7a8   : > { %14609 = vmatmul.msk.bf16.vlgmr.msrb.gmra.mxu2 %vm564_vm3, %v11338_v27  ;;  %v9367_v42 = vsel %vm15170_vm6, %v9365_v32, %v9366_v60  ;;  %v10159_v26 = vpack.c.b16 %v10135_v1, %v10134_v34  ;;  %v9408_v48 = vunpack.c.l.b16 %v9364_v31  ;;  %v14281_v4 = vrot.slane %v14249_v35, 10  ;;  %v14538_v1 = vld [vmem:[%s15072_s19 + $0x424] sm:$0x3]  ;;  %v9214_v35 = vld [vmem:[%s15072_s19 + $0x1bc] sm:$0x3] }
 0x7a9   : > { %v19858_v38 = vpop.f32.mrf.mxu2  ;;  %v9409_v53 = vunpack.c.l.b16 %v9367_v42  ;;  %v10064_v32 = vrot.slane %v14251_v28, 6  ;;  %v11201_v31 = vrot.slane %v14538_v1, 6  ;;  %v9373_v1 = vrot.slane %v9214_v35, 6 }
 0x7ab   : > { %v9426_v34 = vpack.c.b16 %v9409_v53, %v9408_v48  ;;  %v10062_v48 = vsel %vm15170_vm6, %v14281_v4, %v10061_v5  ;;  %v10065_v53 = vsel %vm15170_vm6, %v10063_v40, %v10064_v32 }
 0x7ac   : > { %v8717_v45 = vpop.f32.mrf.mxu3  ;;  %v9524_v46 = vpop.f32.mrf.mxu1 }
 0x7ad   : > { %v8718_v55 = vadd.f32 %v8717_v45, %v19433_v23  ;;  %v9588_v29 = vadd.f32 %v9524_v46, %v19456_v11  ;;  %v9213_v23 = vld [vmem:[%s15072_s19 + $0x1b8] sm:$0xf]  ;;  %v14537_v11 = vld [vmem:[%s15072_s19 + $0x420] sm:$0xf] }
 0x7ae   : > { %v11198_v60 = vrot.slane %v14537_v11, 6  ;;  %v9370_v45 = vrot.slane %v9213_v23, 6  ;;  %v14804_v11 = vld [vmem:[%s15072_s19 + $0x4ec] sm:$0xff] }
 0x7af   : > { %v19861_v39 = vadd.f32 %v19792_v6, %v8718_v55  ;;  %v19866_v13 = vadd.f32 %v19744_v63, %v9588_v29  ;;  %v14536_v6 = vld [vmem:[%s15072_s19 + $0x41c] sm:$0xc]  ;;  %v19875_v29 = vpop.f32.mrf.mxu0 }
 0x7b0   : > { %v14582_v46 = vrot.slane %v14536_v6, 10  ;;  %v11200_v63 = vrot.slane %v11198_v60, 4  ;;  %v9372_v32 = vrot.slane %v9370_v45, 4 }
 0x7b1   : > { %14308 = vmatmul.msk.bf16.gmra.mxu3 %vm564_vm3, %v10159_v26  ;;  %v9212_v26 = vld [vmem:[%s15072_s19 + $0x1b4] sm:$0xc]  ;;  %v19883_v28 = vpop.f32.mrf.mxu2 }
 0x7b2   : > { %v11199_v23 = vsel %vm15170_vm6, %v14582_v46, %v11198_v60  ;;  %v14072_v40 = vrot.slane %v9212_v26, 10  ;;  %v14253_v46 = vld [vmem:[%s15072_s19 + $0x308] sm:$0xf] }
 0x7b3   : > { %v11308_v6 = vunpack.c.l.b16 %v11199_v23  ;;  %v10068_v26 = vrot.slane %v14253_v46, 6 }
 0x7b4   : > { %v8720_v27 = vpop.f32.mrf.mxu3  ;;  %v9527_v62 = vpop.f32.mrf.mxu1 }
 0x7b5   : > { %v8721_v42 = vadd.f32 %v8720_v27, %v19453_v33  ;;  %v9589_v55 = vadd.f32 %v9527_v62, %v19476_v7  ;;  %v11202_v33 = vsel %vm15170_vm6, %v11200_v63, %v11201_v31  ;;  %v10136_v27 = vunpack.c.l.b16 %v10062_v48 }
 0x7b6   : > { %v11309_v5 = vunpack.c.l.b16 %v11202_v33  ;;  %v10137_v62 = vunpack.c.l.b16 %v10065_v53  ;;  %v9374_v63 = vsel %vm15170_vm6, %v9372_v32, %v9373_v1  ;;  %v14252_v33 = vld [vmem:[%s15072_s19 + $0x304] sm:$0xc] }
 0x7b7   : > { %v19890_v7 = vadd.f32 %v19819_v37, %v8721_v42  ;;  %14099 = vmatmul.msk.bf16.gmra.mxu1 %vm564_vm3, %v9426_v34  ;;  %v19895_v4 = vadd.f32 %v19766_v36, %v9589_v55  ;;  %14434 = vmatmul.msk.bf16.gmra.mxu0 %vm564_vm3, %v14804_v11  ;;  %v9371_v36 = vsel %vm15170_vm6, %v14072_v40, %v9370_v45  ;;  %v9411_v23 = vunpack.c.l.b16 %v9374_v63  ;;  %v10541_v45 = vpop.f32.mrf.mxu0  ;;  %v14254_v11 = vld [vmem:[%s15072_s19 + $0x30c] sm:$0x3] }
 0x7b8   : > { %v11339_v60 = vpack.c.b16 %v11309_v5, %v11308_v6  ;;  %v10160_v55 = vpack.c.b16 %v10137_v62, %v10136_v27  ;;  %v9410_v53 = vunpack.c.l.b16 %v9371_v36  ;;  %v14282_v5 = vrot.slane %v14252_v33, 10  ;;  %v14539_v27 = vld [vmem:[%s15072_s19 + $0x438] sm:$0xc]  ;;  %v14541_v62 = vld [vmem:[%s15072_s19 + $0x440] sm:$0x3] }
 0x7b9   : > { %v19906_v35 = vpop.f32.mrf.mxu2  ;;  %v10070_v40 = vrot.slane %v10068_v26, 4  ;;  %v10071_v32 = vrot.slane %v14254_v11, 6  ;;  %v11208_v36 = vrot.slane %v14541_v62, 6 }
 0x7ba   : > { %14610 = vmatmul.msk.bf16.gmra.mxu2 %vm564_vm3, %v11339_v60  ;;  %v9427_v1 = vpack.c.b16 %v9411_v23, %v9410_v53  ;;  %v10069_v33 = vsel %vm15170_vm6, %v14282_v5, %v10068_v26  ;;  %v14805_v26 = vld [vmem:[%s15072_s19 + $0x508] sm:$0xff] }
 0x7bb   : > { %v10072_v53 = vsel %vm15170_vm6, %v10070_v40, %v10071_v32  ;;  %v10138_v62 = vunpack.c.l.b16 %v10069_v33 }
 0x7bc   : > { %v8722_v37 = vpop.f32.mrf.mxu3  ;;  %v9529_v34 = vpop.f32.mrf.mxu1 }
 0x7bd   : > { %v8723_v31 = vadd.f32 %v8722_v37, %v19473_v16  ;;  %v9590_v42 = vadd.f32 %v9529_v34, %v19498_v21  ;;  %v14442_v16 = vld [vmem:[%s15072_s19 + $0x3fc] sm:$0xf]  ;;  %v14583_v34 = vrot.slane %v14539_v27, 10 }
 0x7be   : > { %v14540_v21 = vld [vmem:[%s15072_s19 + $0x43c] sm:$0xf]  ;;  %v10749_v37 = vrot.slane %v14442_v16, 5 }
 0x7bf   : > { %v19909_v48 = vadd.f32 %v19847_v3, %v8723_v31  ;;  %v19914_v6 = vadd.f32 %v19786_v9, %v9590_v42  ;;  %v11205_v3 = vrot.slane %v14540_v21, 6  ;;  %v14441_v42 = vld [vmem:[%s15072_s19 + $0x3f8] sm:$0xe] }
 0x7c0   : > { %v14489_v32 = vrot.slane %v14441_v42, 9 }
 0x7c1   : > { %14309 = vmatmul.msk.bf16.gmra.mxu3 %vm564_vm3, %v10160_v55  ;;  %v11207_v9 = vrot.slane %v11205_v3, 4  ;;  %v14443_v55 = vld [vmem:[%s15072_s19 + $0x400] sm:$0x1]  ;;  %v19929_v23 = vpop.f32.mrf.mxu2  ;;  %v11206_v11 = vsel %vm15170_vm6, %v14583_v34, %v11205_v3  ;;  %v10751_v3 = vrot.slane %v10749_v37, 4 }
 0x7c2   : > { %v11310_v21 = vunpack.c.l.b16 %v11206_v11  ;;  %v10752_v27 = vrot.slane %v14443_v55, 5 }
 0x7c3   : > { %v11209_v16 = vsel %vm15170_vm6, %v11207_v9, %v11208_v36 }
 0x7c4   : > { %v9532_v60 = vpop.f32.mrf.mxu1  ;;  %v10237_v46 = vpop.f32.mrf.mxu3  ;;  %v11311_v5 = vunpack.c.l.b16 %v11209_v16  ;;  %v10753_v36 = vsel %vm15074_vm2, %v10751_v3, %v10752_v27 }
 0x7c5   : > { %v9591_v63 = vadd.f32 %v9532_v60, %v19524_v15  ;;  %v10317_v31 = vadd.f32 %v10237_v46, %v19621_v61  ;;  %v14817_v61 = vld [vmem:[%s20726_s3 + $0x30] sm:$0xff]  ;;  %v10139_v60 = vunpack.c.l.b16 %v10072_v53  ;;  %v10544_v46 = vpop.f32.mrf.mxu0  ;;  %v10865_v16 = vunpack.c.l.b16 %v10753_v36 }
 0x7c6   : > { %11724 = vmatpush.bf16.msrb.mxu3 %v14817_v61  ;;  %v14255_v61 = vld [vmem:[%s15072_s19 + $0x320] sm:$0xc] }
 0x7c7   : > { %v19936_v15 = vadd.f32 %v19875_v29, %v10317_v31  ;;  %14100 = vmatmul.msk.bf16.gmra.mxu1 %vm564_vm3, %v9427_v1  ;;  %v19944_v40 = vadd.f32 %v19808_v58, %v9591_v63  ;;  %v11340_v29 = vpack.c.b16 %v11311_v5, %v11310_v21  ;;  %v14256_v1 = vld [vmem:[%s15072_s19 + $0x324] sm:$0xf]  ;;  %14435 = vmatmul.msk.bf16.gmra.mxu0 %vm564_vm3, %v14805_v26  ;;  %v14257_v26 = vld [vmem:[%s15072_s19 + $0x328] sm:$0x3]  ;;  %v14543_v21 = vld [vmem:[%s15072_s19 + $0x458] sm:$0xf] }
 0x7c8   : > { %v10750_v58 = vsel %vm15074_vm2, %v14489_v32, %v10749_v37  ;;  %v10161_v42 = vpack.c.b16 %v10139_v60, %v10138_v62  ;;  %v10075_v55 = vrot.slane %v14256_v1, 6  ;;  %v10078_v32 = vrot.slane %v14257_v26, 6  ;;  %v14542_v62 = vld [vmem:[%s15072_s19 + $0x454] sm:$0xc]  ;;  %v14544_v60 = vld [vmem:[%s15072_s19 + $0x45c] sm:$0x3] }
 0x7c9   : > { %v19955_v33 = vpop.f32.mrf.mxu2  ;;  %v10864_v11 = vunpack.c.l.b16 %v10750_v58  ;;  %v11212_v3 = vrot.slane %v14543_v21, 6  ;;  %v11215_v58 = vrot.slane %v14544_v60, 6 }
 0x7ca   : > { %14611 = vmatmul.msk.bf16.gmra.mxu2 %vm564_vm3, %v11340_v29  ;;  %v10077_v5 = vrot.slane %v10075_v55, 4 }
 0x7cc   : > { %v9534_v34 = vpop.f32.mrf.mxu1  ;;  %v10239_v9 = vpop.f32.mrf.mxu3 }
 0x7cd   : > { %v9592_v63 = vadd.f32 %v9534_v34, %v19549_v8  ;;  %v10318_v31 = vadd.f32 %v10239_v9, %v19642_v25  ;;  %v14445_v8 = vld [vmem:[%s15072_s19 + $0x418] sm:$0xf]  ;;  %v14283_v25 = vrot.slane %v14255_v61, 10  ;;  %v10546_v27 = vpop.f32.mrf.mxu0  ;;  %v11214_v9 = vrot.slane %v11212_v3, 4 }
 0x7ce   : > { %v10756_v34 = vrot.slane %v14445_v8, 5 }
 0x7cf   : > { %v19957_v53 = vadd.f32 %v10541_v45, %v10318_v31  ;;  %v19962_v37 = vadd.f32 %v19833_v54, %v9592_v63  ;;  %v10896_v45 = vpack.c.b16 %v10865_v16, %v10864_v11  ;;  %v14584_v54 = vrot.slane %v14542_v62, 10  ;;  %v14444_v31 = vld [vmem:[%s15072_s19 + $0x414] sm:$0xe] }
 0x7d0   : > { %v10076_v61 = vsel %vm15170_vm6, %v14283_v25, %v10075_v55  ;;  %v10079_v11 = vsel %vm15170_vm6, %v10077_v5, %v10078_v32  ;;  %v11216_v8 = vsel %vm15170_vm6, %v11214_v9, %v11215_v58  ;;  %v14490_v25 = vrot.slane %v14444_v31, 9 }
 0x7d1   : > { %14310 = vmatmul.msk.bf16.gmra.mxu3 %vm564_vm3, %v10161_v42  ;;  %v14446_v42 = vld [vmem:[%s15072_s19 + $0x41c] sm:$0x1]  ;;  %v19977_v16 = vpop.f32.mrf.mxu2  ;;  %v11213_v26 = vsel %vm15170_vm6, %v14584_v54, %v11212_v3  ;;  %v11313_v62 = vunpack.c.l.b16 %v11216_v8  ;;  %v10758_v5 = vrot.slane %v10756_v34, 4  ;;  %v10140_v60 = vunpack.c.l.b16 %v10076_v61  ;;  %v14259_v3 = vld [vmem:[%s15072_s19 + $0x340] sm:$0xf] }
 0x7d2   : > { %v11312_v21 = vunpack.c.l.b16 %v11213_v26  ;;  %v10759_v32 = vrot.slane %v14446_v42, 5  ;;  %v10082_v31 = vrot.slane %v14259_v3, 6  ;;  %v14260_v8 = vld [vmem:[%s15072_s19 + $0x344] sm:$0x3] }
 0x7d4   : > { %v9537_v29 = vpop.f32.mrf.mxu1  ;;  %v10242_v1 = vpop.f32.mrf.mxu3  ;;  %v10760_v54 = vsel %vm15074_vm2, %v10758_v5, %v10759_v32 }
 0x7d5   : > { %v9593_v36 = vadd.f32 %v9537_v29, %v19571_v51  ;;  %v10319_v63 = vadd.f32 %v10242_v1, %v19665_v20  ;;  %v14806_v20 = vld [vmem:[%s15072_s19 + $0x524] sm:$0xff]  ;;  %v10141_v29 = vunpack.c.l.b16 %v10079_v11  ;;  %v11341_v1 = vpack.c.b16 %v11313_v62, %v11312_v21 }
 0x7d6   : > { %v10867_v26 = vunpack.c.l.b16 %v10760_v54  ;;  %v10084_v62 = vrot.slane %v10082_v31, 4 }
 0x7d7   : > { %v19983_v51 = vadd.f32 %v10544_v46, %v10319_v63  ;;  %14517 = vmatmul.msk.bf16.vlgmr.msrb.gmra.mxu1 %vm564_vm3, %v10896_v45  ;;  %v19988_v55 = vadd.f32 %v19858_v38, %v9593_v36  ;;  %14436 = vmatmul.msk.bf16.gmra.mxu0 %vm564_vm3, %v14806_v20  ;;  %v10757_v38 = vsel %vm15074_vm2, %v14490_v25, %v10756_v34  ;;  %v10549_v63 = vpop.f32.mrf.mxu0  ;;  %v14258_v34 = vld [vmem:[%s15072_s19 + $0x33c] sm:$0xc]  ;;  %v10085_v25 = vrot.slane %v14260_v8, 6 }
 0x7d8   : > { %v10162_v36 = vpack.c.b16 %v10141_v29, %v10140_v60  ;;  %v10866_v11 = vunpack.c.l.b16 %v10757_v38  ;;  %v14284_v21 = vrot.slane %v14258_v34, 10  ;;  %v14547_v60 = vld [vmem:[%s15072_s19 + $0x478] sm:$0x3] }
 0x7d9   : > { %v19999_v42 = vpop.f32.mrf.mxu2 }
 0x7da   : > { %14612 = vmatmul.msk.bf16.gmra.mxu2 %vm564_vm3, %v11341_v1  ;;  %v10897_v32 = vpack.c.b16 %v10867_v26, %v10866_v11  ;;  %v10086_v11 = vsel %vm15170_vm6, %v10084_v62, %v10085_v25 }
 0x7dc   : > { %v9539_v46 = vpop.f32.mrf.mxu1  ;;  %v10244_v45 = vpop.f32.mrf.mxu3 }
 0x7dd   : > { %v9594_v9 = vadd.f32 %v9539_v46, %v19596_v18  ;;  %v10320_v58 = vadd.f32 %v10244_v45, %v19686_v22  ;;  %v14448_v18 = vld [vmem:[%s15072_s19 + $0x434] sm:$0xf]  ;;  %v11222_v45 = vrot.slane %v14547_v60, 6 }
 0x7de   : > { %v14546_v22 = vld [vmem:[%s15072_s19 + $0x474] sm:$0xf]  ;;  %v10763_v3 = vrot.slane %v14448_v18, 5  ;;  %v14807_v18 = vld [vmem:[%s15072_s19 + $0x540] sm:$0xff] }
 0x7df   : > { %v20001_v61 = vadd.f32 %v10546_v27, %v10320_v58  ;;  %v20006_v20 = vadd.f32 %v19883_v28, %v9594_v9  ;;  %v11219_v5 = vrot.slane %v14546_v22, 6  ;;  %v14545_v27 = vld [vmem:[%s15072_s19 + $0x470] sm:$0xc]  ;;  %v14449_v58 = vld [vmem:[%s15072_s19 + $0x438] sm:$0x1] }
 0x7e0   : > { %v14585_v46 = vrot.slane %v14545_v27, 10  ;;  %v14447_v9 = vld [vmem:[%s15072_s19 + $0x430] sm:$0xe]  ;;  %v10765_v25 = vrot.slane %v10763_v3, 4  ;;  %v10766_v27 = vrot.slane %v14449_v58, 5 }
 0x7e1   : > { %14311 = vmatmul.msk.bf16.gmra.mxu3 %vm564_vm3, %v10162_v36  ;;  %v11221_v28 = vrot.slane %v11219_v5, 4  ;;  %v10083_v36 = vsel %vm15170_vm6, %v14284_v21, %v10082_v31  ;;  %v20021_v26 = vpop.f32.mrf.mxu2  ;;  %v14491_v62 = vrot.slane %v14447_v9, 9 }
 0x7e2   : > { %v11220_v34 = vsel %vm15170_vm6, %v14585_v46, %v11219_v5  ;;  %v10142_v60 = vunpack.c.l.b16 %v10083_v36  ;;  %v10767_v46 = vsel %vm15074_vm2, %v10765_v25, %v10766_v27  ;;  %v14548_v27 = vld [vmem:[%s15072_s19 + $0x48c] sm:$0xc] }
 0x7e3   : > { %v11223_v8 = vsel %vm15170_vm6, %v11221_v28, %v11222_v45  ;;  %v11314_v22 = vunpack.c.l.b16 %v11220_v34  ;;  %v14261_v34 = vld [vmem:[%s15072_s19 + $0x358] sm:$0xc] }
 0x7e4   : > { %v9542_v29 = vpop.f32.mrf.mxu1  ;;  %v10247_v1 = vpop.f32.mrf.mxu3  ;;  %v11315_v31 = vunpack.c.l.b16 %v11223_v8 }
 0x7e5   : > { %v9595_v38 = vadd.f32 %v9542_v29, %v19615_v59  ;;  %v10321_v54 = vadd.f32 %v10247_v1, %v19709_v10  ;;  %v10551_v10 = vpop.f32.mrf.mxu0  ;;  %v10143_v29 = vunpack.c.l.b16 %v10086_v11  ;;  %v14262_v1 = vld [vmem:[%s15072_s19 + $0x35c] sm:$0xf]  ;;  %v10869_v11 = vunpack.c.l.b16 %v10767_v46 }
 0x7e6   : > { %v11342_v5 = vpack.c.b16 %v11315_v31, %v11314_v22  ;;  %v14285_v22 = vrot.slane %v14261_v34, 10 }
 0x7e7   : > { %v20027_v59 = vadd.f32 %v10549_v63, %v10321_v54  ;;  %14518 = vmatmul.msk.bf16.gmra.mxu1 %vm564_vm3, %v10897_v32  ;;  %v20032_v21 = vadd.f32 %v19906_v35, %v9595_v38  ;;  %14437 = vmatmul.msk.bf16.gmra.mxu0 %vm564_vm3, %v14807_v18  ;;  %v10764_v35 = vsel %vm15074_vm2, %v14491_v62, %v10763_v3  ;;  %v10089_v54 = vrot.slane %v14262_v1, 6  ;;  %v14263_v3 = vld [vmem:[%s15072_s19 + $0x360] sm:$0x3]  ;;  %v14451_v18 = vld [vmem:[%s15072_s19 + $0x450] sm:$0xf] }
 0x7e8   : > { %v10163_v38 = vpack.c.b16 %v10143_v29, %v10142_v60  ;;  %v10868_v36 = vunpack.c.l.b16 %v10764_v35  ;;  %v10092_v62 = vrot.slane %v14263_v3, 6  ;;  %v14550_v60 = vld [vmem:[%s15072_s19 + $0x494] sm:$0x3]  ;;  %v10770_v1 = vrot.slane %v14451_v18, 5 }
 0x7e9   : > { %v20043_v9 = vpop.f32.mrf.mxu2  ;;  %v10091_v31 = vrot.slane %v10089_v54, 4 }
 0x7ea   : > { %14613 = vmatmul.msk.bf16.gmra.mxu2 %vm564_vm3, %v11342_v5  ;;  %v10898_v25 = vpack.c.b16 %v10869_v11, %v10868_v36 }
 0x7eb   : > { %v10093_v36 = vsel %vm15170_vm6, %v10091_v31, %v10092_v62  ;;  %v10772_v31 = vrot.slane %v10770_v1, 4 }
 0x7ec   : > { %v9544_v63 = vpop.f32.mrf.mxu1  ;;  %v10249_v32 = vpop.f32.mrf.mxu3 }
 0x7ed   : > { %v9596_v28 = vadd.f32 %v9544_v63, %v19637_v52  ;;  %v10322_v45 = vadd.f32 %v10249_v32, %v19730_v0  ;;  %v10554_v52 = vpop.f32.mrf.mxu0  ;;  %v14549_v0 = vld [vmem:[%s15072_s19 + $0x490] sm:$0xf]  ;;  %v11229_v32 = vrot.slane %v14550_v60, 6  ;;  %v10145_v60 = vunpack.c.l.b16 %v10093_v36 }
 0x7ef   : > { %v20045_v58 = vadd.f32 %v10551_v10, %v10322_v45  ;;  %v20050_v8 = vadd.f32 %v19929_v23, %v9596_v28  ;;  %v11226_v10 = vrot.slane %v14549_v0, 6  ;;  %v14586_v23 = vrot.slane %v14548_v27, 10  ;;  %v14450_v28 = vld [vmem:[%s15072_s19 + $0x44c] sm:$0xe]  ;;  %v14452_v45 = vld [vmem:[%s15072_s19 + $0x454] sm:$0x1] }
 0x7f0   : > { %v10773_v62 = vrot.slane %v14452_v45, 5 }
 0x7f1   : > { %14312 = vmatmul.msk.bf16.gmra.mxu3 %vm564_vm3, %v10163_v38  ;;  %v11228_v63 = vrot.slane %v11226_v10, 4  ;;  %v10090_v38 = vsel %vm15170_vm6, %v14285_v22, %v10089_v54  ;;  %v20065_v11 = vpop.f32.mrf.mxu2  ;;  %v11227_v34 = vsel %vm15170_vm6, %v14586_v23, %v11226_v10  ;;  %v14492_v22 = vrot.slane %v14450_v28, 9 }
 0x7f2   : > { %v11316_v18 = vunpack.c.l.b16 %v11227_v34  ;;  %v10144_v27 = vunpack.c.l.b16 %v10090_v38  ;;  %v10774_v23 = vsel %vm15074_vm2, %v10772_v31, %v10773_v62  ;;  %v14264_v34 = vld [vmem:[%s15072_s19 + $0x374] sm:$0xc]  ;;  %v14551_v62 = vld [vmem:[%s15072_s19 + $0x4a8] sm:$0xc] }
 0x7f3   : > { %v11230_v3 = vsel %vm15170_vm6, %v11228_v63, %v11229_v32  ;;  %v10871_v36 = vunpack.c.l.b16 %v10774_v23  ;;  %v14453_v23 = vld [vmem:[%s15072_s19 + $0x468] sm:$0xe] }
 0x7f4   : > { %v9547_v29 = vpop.f32.mrf.mxu1  ;;  %v10252_v5 = vpop.f32.mrf.mxu3  ;;  %v11317_v0 = vunpack.c.l.b16 %v11230_v3  ;;  %v14266_v3 = vld [vmem:[%s15072_s19 + $0x37c] sm:$0x3] }
 0x7f5   : > { %v9597_v35 = vadd.f32 %v9547_v29, %v19659_v24  ;;  %v10323_v46 = vadd.f32 %v10252_v5, %v19753_v41  ;;  %v14808_v41 = vld [vmem:[%s15072_s19 + $0x55c] sm:$0xff]  ;;  %v10556_v10 = vpop.f32.mrf.mxu0  ;;  %v14265_v5 = vld [vmem:[%s15072_s19 + $0x378] sm:$0xf] }
 0x7f6   : > { %v11343_v29 = vpack.c.b16 %v11317_v0, %v11316_v18  ;;  %v10099_v0 = vrot.slane %v14266_v3, 6 }
 0x7f7   : > { %v20071_v24 = vadd.f32 %v10554_v52, %v10323_v46  ;;  %14519 = vmatmul.msk.bf16.gmra.mxu1 %vm564_vm3, %v10898_v25  ;;  %v20076_v54 = vadd.f32 %v19955_v33, %v9597_v35  ;;  %14438 = vmatmul.msk.bf16.gmra.mxu0 %vm564_vm3, %v14808_v41  ;;  %v10771_v33 = vsel %vm15074_vm2, %v14492_v22, %v10770_v1  ;;  %v10096_v46 = vrot.slane %v14265_v5, 6  ;;  %v14552_v41 = vld [vmem:[%s15072_s19 + $0x4ac] sm:$0xf] }
 0x7f8   : > { %v10164_v35 = vpack.c.b16 %v10145_v60, %v10144_v27  ;;  %v10870_v38 = vunpack.c.l.b16 %v10771_v33  ;;  %v11233_v22 = vrot.slane %v14552_v41, 6  ;;  %v14553_v27 = vld [vmem:[%s15072_s19 + $0x4b0] sm:$0x3]  ;;  %v14587_v5 = vrot.slane %v14551_v62, 10 }
 0x7f9   : > { %v20087_v28 = vpop.f32.mrf.mxu2  ;;  %v10098_v18 = vrot.slane %v10096_v46, 4 }
 0x7fa   : > { %14614 = vmatmul.msk.bf16.gmra.mxu2 %vm564_vm3, %v11343_v29  ;;  %v10899_v31 = vpack.c.b16 %v10871_v36, %v10870_v38  ;;  %v11234_v36 = vsel %vm15170_vm6, %v14587_v5, %v11233_v22 }
 0x7fc   : > { %v9549_v52 = vpop.f32.mrf.mxu1  ;;  %v10254_v25 = vpop.f32.mrf.mxu3 }
 0x7fd   : > { %v9598_v63 = vadd.f32 %v9549_v52, %v19681_v30  ;;  %v10324_v32 = vadd.f32 %v10254_v25, %v19774_v47  ;;  %v14454_v30 = vld [vmem:[%s15072_s19 + $0x46c] sm:$0xf]  ;;  %v14286_v47 = vrot.slane %v14264_v34, 10  ;;  %v11236_v52 = vrot.slane %v14553_v27, 6 }
 0x7fe   : > { %v11318_v34 = vunpack.c.l.b16 %v11234_v36  ;;  %v14555_v36 = vld [vmem:[%s15072_s19 + $0x4c8] sm:$0xf] }
 0x7ff   : > { %v20089_v45 = vadd.f32 %v10556_v10, %v10324_v32  ;;  %v20094_v1 = vadd.f32 %v19977_v16, %v9598_v63  ;;  %v10777_v10 = vrot.slane %v14454_v30, 5  ;;  %v11235_v16 = vrot.slane %v11233_v22, 4  ;;  %v14455_v63 = vld [vmem:[%s15072_s19 + $0x470] sm:$0x1]  ;;  %v14268_v22 = vld [vmem:[%s15072_s19 + $0x394] sm:$0xf] }
 0x800   : > { %v10097_v32 = vsel %vm15170_vm6, %v14286_v47, %v10096_v46  ;;  %v14493_v46 = vrot.slane %v14453_v23, 9  ;;  %v10780_v47 = vrot.slane %v14455_v63, 5  ;;  %v14267_v63 = vld [vmem:[%s15072_s19 + $0x390] sm:$0xc] }
 0x801   : > { %14313 = vmatmul.msk.bf16.gmra.mxu3 %vm564_vm3, %v10164_v35  ;;  %v10100_v35 = vsel %vm15170_vm6, %v10098_v18, %v10099_v0  ;;  %v20111_v38 = vpop.f32.mrf.mxu2  ;;  %v10779_v41 = vrot.slane %v10777_v10, 4  ;;  %v10146_v18 = vunpack.c.l.b16 %v10097_v32  ;;  %v14269_v32 = vld [vmem:[%s15072_s19 + $0x398] sm:$0x3] }
 0x802   : > { %v10147_v0 = vunpack.c.l.b16 %v10100_v35 }
 0x804   : > { %v9552_v60 = vpop.f32.mrf.mxu1  ;;  %v10257_v29 = vpop.f32.mrf.mxu3  ;;  %v10165_v5 = vpack.c.b16 %v10147_v0, %v10146_v18 }
 0x805   : > { %v9599_v25 = vadd.f32 %v9552_v60, %v19703_v50  ;;  %v20103_v33 = vadd.f32 %v10257_v29, %v19797_v14  ;;  %v11237_v50 = vsel %vm15170_vm6, %v11235_v16, %v11236_v52  ;;  %v14809_v14 = vld [vmem:[%s15072_s19 + $0x578] sm:$0xff]  ;;  %v10781_v60 = vsel %vm15074_vm2, %v10779_v41, %v10780_v47  ;;  %v14556_v41 = vld [vmem:[%s15072_s19 + $0x4cc] sm:$0x3] }
 0x806   : > { %v11319_v3 = vunpack.c.l.b16 %v11237_v50  ;;  %v10103_v16 = vrot.slane %v14268_v22, 6  ;;  %v10873_v23 = vunpack.c.l.b16 %v10781_v60  ;;  %v14287_v50 = vrot.slane %v14267_v63, 10  ;;  %v14456_v60 = vld [vmem:[%s15072_s19 + $0x484] sm:$0xe] }
 0x807   : > { %14520 = vmatmul.msk.bf16.gmra.mxu1 %vm564_vm3, %v10899_v31  ;;  %v20120_v30 = vadd.f32 %v19999_v42, %v9599_v25  ;;  %14439 = vmatmul.msk.bf16.gmra.mxu0 %vm564_vm3, %v14809_v14  ;;  %v10778_v42 = vsel %vm15074_vm2, %v14493_v46, %v10777_v10  ;;  %v14457_v10 = vld [vmem:[%s15072_s19 + $0x488] sm:$0xf]  ;;  %v10106_v14 = vrot.slane %v14269_v32, 6  ;;  %v14554_v46 = vld [vmem:[%s15072_s19 + $0x4c4] sm:$0xc]  ;;  %v11243_v22 = vrot.slane %v14556_v41, 6 }
 0x808   : > { %v11344_v62 = vpack.c.b16 %v11319_v3, %v11318_v34  ;;  %v10872_v25 = vunpack.c.l.b16 %v10778_v42  ;;  %v11240_v34 = vrot.slane %v14555_v36, 6  ;;  %v10784_v0 = vrot.slane %v14457_v10, 5 }
 0x809   : > { %v20132_v52 = vpop.f32.mrf.mxu2 }
 0x80a   : > { %14615 = vmatmul.msk.bf16.gmra.mxu2 %vm564_vm3, %v11344_v62  ;;  %v10900_v3 = vpack.c.b16 %v10873_v23, %v10872_v25  ;;  %v14588_v62 = vrot.slane %v14554_v46, 10 }
 0x80c   : > { %v9554_v31 = vpop.f32.mrf.mxu1  ;;  %v20125_v27 = vpop.f32.mrf.mxu3  ;;  %v11241_v63 = vsel %vm15170_vm6, %v14588_v62, %v11240_v34 }
 0x80d   : > { %v9600_v29 = vadd.f32 %v9554_v31, %v19725_v17  ;;  %v10105_v17 = vrot.slane %v10103_v16, 4  ;;  %v11320_v32 = vunpack.c.l.b16 %v11241_v63 }
 0x80f   : > { %v20137_v35 = vadd.f32 %v20021_v26, %v9600_v29  ;;  %v11242_v26 = vrot.slane %v11240_v34, 4  ;;  %v14458_v29 = vld [vmem:[%s15072_s19 + $0x48c] sm:$0x1]  ;;  %v10107_v25 = vsel %vm15170_vm6, %v10105_v17, %v10106_v14  ;;  %v14271_v34 = vld [vmem:[%s15072_s19 + $0x3b0] sm:$0xf] }
 0x810   : > { %v10787_v46 = vrot.slane %v14458_v29, 5  ;;  %v10149_v14 = vunpack.c.l.b16 %v10107_v25  ;;  %v14272_v25 = vld [vmem:[%s15072_s19 + $0x3b4] sm:$0x3] }
 0x811   : > { %14314 = vmatmul.msk.bf16.gmra.mxu3 %vm564_vm3, %v10165_v5  ;;  %v10104_v5 = vsel %vm15170_vm6, %v14287_v50, %v10103_v16  ;;  %v20154_v23 = vpop.f32.mrf.mxu2  ;;  %v14494_v16 = vrot.slane %v14456_v60, 9  ;;  %v10786_v50 = vrot.slane %v10784_v0, 4 }
 0x812   : > { %v10148_v17 = vunpack.c.l.b16 %v10104_v5  ;;  %v14270_v5 = vld [vmem:[%s15072_s19 + $0x3ac] sm:$0xc] }
 0x814   : > { %v9557_v47 = vpop.f32.mrf.mxu1  ;;  %v10262_v18 = vpop.f32.mrf.mxu3 }
 0x815   : > { %v9601_v31 = vadd.f32 %v9557_v47, %v19747_v57  ;;  %v20146_v42 = vadd.f32 %v10262_v18, %v19845_v43  ;;  %v11244_v57 = vsel %vm15170_vm6, %v11242_v26, %v11243_v22  ;;  %v14810_v43 = vld [vmem:[%s15072_s19 + $0x594] sm:$0xff]  ;;  %v10788_v18 = vsel %vm15074_vm2, %v10786_v50, %v10787_v46  ;;  %v14557_v50 = vld [vmem:[%s15072_s19 + $0x4e0] sm:$0xc]  ;;  %v14559_v46 = vld [vmem:[%s15072_s19 + $0x4e8] sm:$0x3] }
 0x816   : > { %v11321_v10 = vunpack.c.l.b16 %v11244_v57  ;;  %v10166_v26 = vpack.c.b16 %v10149_v14, %v10148_v17  ;;  %v10110_v22 = vrot.slane %v14271_v34, 6  ;;  %v10875_v29 = vunpack.c.l.b16 %v10788_v18  ;;  %v14558_v57 = vld [vmem:[%s15072_s19 + $0x4e4] sm:$0xf] }
 0x817   : > { %14521 = vmatmul.msk.bf16.gmra.mxu1 %vm564_vm3, %v10900_v3  ;;  %v20163_v36 = vadd.f32 %v20043_v9, %v9601_v31  ;;  %14440 = vmatmul.msk.bf16.gmra.mxu0 %vm564_vm3, %v14810_v43  ;;  %v10785_v9 = vsel %vm15074_vm2, %v14494_v16, %v10784_v0  ;;  %v14460_v0 = vld [vmem:[%s15072_s19 + $0x4a4] sm:$0xf]  ;;  %v14288_v43 = vrot.slane %v14270_v5, 10  ;;  %v14589_v34 = vrot.slane %v14557_v50, 10 }
 0x818   : > { %v11345_v41 = vpack.c.b16 %v11321_v10, %v11320_v32  ;;  %v10874_v60 = vunpack.c.l.b16 %v10785_v9  ;;  %v10113_v32 = vrot.slane %v14272_v25, 6  ;;  %v11247_v10 = vrot.slane %v14558_v57, 6 }
 0x819   : > { %v20175_v31 = vpop.f32.mrf.mxu2  ;;  %v10111_v5 = vsel %vm15170_vm6, %v14288_v43, %v10110_v22 }
 0x81a   : > { %14616 = vmatmul.msk.bf16.gmra.mxu2 %vm564_vm3, %v11345_v41  ;;  %v10901_v16 = vpack.c.b16 %v10875_v29, %v10874_v60  ;;  %v10791_v41 = vrot.slane %v14460_v0, 5  ;;  %v11248_v25 = vsel %vm15170_vm6, %v14589_v34, %v11247_v10 }
 0x81c   : > { %v9559_v3 = vpop.f32.mrf.mxu1  ;;  %v20168_v47 = vpop.f32.mrf.mxu3 }
 0x81d   : > { %v9602_v62 = vadd.f32 %v9559_v3, %v19769_v12  ;;  %v10112_v12 = vrot.slane %v10110_v22, 4  ;;  %v11249_v3 = vrot.slane %v11247_v10, 4  ;;  %v10793_v22 = vrot.slane %v10791_v41, 4 }
 0x81f   : > { %v20180_v63 = vadd.f32 %v20065_v11, %v9602_v62  ;;  %v11250_v11 = vrot.slane %v14559_v46, 6  ;;  %v14459_v62 = vld [vmem:[%s15072_s19 + $0x4a0] sm:$0xe]  ;;  %v10114_v60 = vsel %vm15170_vm6, %v10112_v12, %v10113_v32  ;;  %v10150_v12 = vunpack.c.l.b16 %v10111_v5 }
 0x820   : > { %v14495_v50 = vrot.slane %v14459_v62, 9  ;;  %v10151_v32 = vunpack.c.l.b16 %v10114_v60  ;;  %v14561_v5 = vld [vmem:[%s15072_s19 + $0x500] sm:$0xf] }
 0x821   : > { %21025 = vst [vmem:[#allocation63_spill] sm:$0xff] %v20180_v63  ;;  %14315 = vmatmul.msk.bf16.gmra.mxu3 %vm564_vm3, %v10166_v26  ;;  %v14461_v26 = vld [vmem:[%s15072_s19 + $0x4a8] sm:$0x1]  ;;  %v20197_v29 = vpop.f32.mrf.mxu2  ;;  %v11251_v0 = vsel %vm15170_vm6, %v11249_v3, %v11250_v11 }
 0x822   : > { %v10794_v43 = vrot.slane %v14461_v26, 5  ;;  %v10167_v34 = vpack.c.b16 %v10151_v32, %v10150_v12  ;;  %v14463_v26 = vld [vmem:[%s15072_s19 + $0x4c0] sm:$0xf]  ;;  %v14462_v32 = vld [vmem:[%s15072_s19 + $0x4bc] sm:$0xe] }
 0x824   : > { %v9562_v17 = vpop.f32.mrf.mxu1  ;;  %v10267_v14 = vpop.f32.mrf.mxu3 }
 0x825   : > { %v9603_v9 = vadd.f32 %v9562_v17, %v19789_v44  ;;  %v20189_v18 = vadd.f32 %v10267_v14, %v19895_v4  ;;  %v11322_v44 = vunpack.c.l.b16 %v11248_v25  ;;  %v11323_v4 = vunpack.c.l.b16 %v11251_v0  ;;  %v14560_v25 = vld [vmem:[%s15072_s19 + $0x4fc] sm:$0xc]  ;;  %v14562_v0 = vld [vmem:[%s15072_s19 + $0x504] sm:$0x3] }
 0x827   : > { %14522 = vmatmul.msk.bf16.gmra.mxu1 %vm564_vm3, %v10901_v16  ;;  %v20205_v57 = vadd.f32 %v20087_v28, %v9603_v9  ;;  %v11346_v46 = vpack.c.b16 %v11323_v4, %v11322_v44  ;;  %v10792_v16 = vsel %vm15074_vm2, %v14495_v50, %v10791_v41  ;;  %v10795_v28 = vsel %vm15074_vm2, %v10793_v22, %v10794_v43 }
 0x828   : > { %v10876_v11 = vunpack.c.l.b16 %v10792_v16  ;;  %v10877_v9 = vunpack.c.l.b16 %v10795_v28  ;;  %v11254_v41 = vrot.slane %v14561_v5, 6  ;;  %v10798_v4 = vrot.slane %v14463_v26, 5 }
 0x829   : > { %v14590_v50 = vrot.slane %v14560_v25, 10  ;;  %v11257_v43 = vrot.slane %v14562_v0, 6 }
 0x82a   : > { %14617 = vmatmul.msk.bf16.gmra.mxu2 %vm564_vm3, %v11346_v46  ;;  %v10902_v60 = vpack.c.b16 %v10877_v9, %v10876_v11  ;;  %v11256_v22 = vrot.slane %v11254_v41, 4  ;;  %v14464_v46 = vld [vmem:[%s15072_s19 + $0x4c4] sm:$0x1]  ;;  %v10800_v11 = vrot.slane %v10798_v4, 4 }
 0x82b   : > { %v20215_v3 = vpop.f32.mrf.mxu2  ;;  %v11255_v16 = vsel %vm15170_vm6, %v14590_v50, %v11254_v41  ;;  %v10801_v9 = vrot.slane %v14464_v46, 5  ;;  %v14563_v46 = vld [vmem:[%s15072_s19 + $0x518] sm:$0xc] }
 0x82c   : > { %v9564_v10 = vpop.f32.mrf.mxu1  ;;  %v20208_v17 = vpop.f32.mrf.mxu3  ;;  %v11258_v28 = vsel %vm15170_vm6, %v11256_v22, %v11257_v43  ;;  %v14466_v22 = vld [vmem:[%s15072_s19 + $0x4dc] sm:$0xf] }
 0x82d   : > { %v9604_v14 = vadd.f32 %v9564_v10, %v19811_v19  ;;  %v10802_v25 = vsel %vm15074_vm2, %v10800_v11, %v10801_v9  ;;  %v14564_v43 = vld [vmem:[%s15072_s19 + $0x51c] sm:$0xf] }
 0x82f   : > { %v20218_v62 = vadd.f32 %v20111_v38, %v9604_v14  ;;  %v11324_v14 = vunpack.c.l.b16 %v11255_v16 }
 0x831   : > { %21026 = vst [vmem:[#allocation96_spill] sm:$0xff] %v20218_v62  ;;  %14316 = vmatmul.msk.bf16.gmra.mxu3 %vm564_vm3, %v10167_v34  ;;  %v11325_v34 = vunpack.c.l.b16 %v11258_v28 }
 0x833   : > { %v20231_v10 = vpop.f32.mrf.mxu2  ;;  %v11347_v26 = vpack.c.b16 %v11325_v34, %v11324_v14  ;;  %v10805_v14 = vrot.slane %v14466_v22, 5  ;;  %v14591_v34 = vrot.slane %v14563_v46, 10 }
 0x834   : > { %v9567_v44 = vpop.f32.mrf.mxu1  ;;  %v10272_v19 = vpop.f32.mrf.mxu3 }
 0x835   : > { %v9605_v12 = vadd.f32 %v9567_v44, %v19840_v49  ;;  %v20227_v38 = vadd.f32 %v10272_v19, %v19944_v40  ;;  %v14496_v40 = vrot.slane %v14462_v32, 9  ;;  %v10879_v19 = vunpack.c.l.b16 %v10802_v25 }
 0x837   : > { %14523 = vmatmul.msk.bf16.gmra.mxu1 %vm564_vm3, %v10902_v60  ;;  %v20239_v49 = vadd.f32 %v20132_v52, %v9605_v12  ;;  %v10799_v60 = vsel %vm15074_vm2, %v14496_v40, %v10798_v4  ;;  %v11261_v12 = vrot.slane %v14564_v43, 6  ;;  %v14565_v4 = vld [vmem:[%s15072_s19 + $0x520] sm:$0x3] }
 0x838   : > { %v10878_v44 = vunpack.c.l.b16 %v10799_v60  ;;  %v11264_v40 = vrot.slane %v14565_v4, 6 }
 0x839   : > { %v11262_v60 = vsel %vm15170_vm6, %v14591_v34, %v11261_v12 }
 0x83a   : > { %14618 = vmatmul.msk.bf16.gmra.mxu2 %vm564_vm3, %v11347_v26  ;;  %v10903_v32 = vpack.c.b16 %v10879_v19, %v10878_v44  ;;  %v14467_v26 = vld [vmem:[%s15072_s19 + $0x4e0] sm:$0x1]  ;;  %v10807_v19 = vrot.slane %v10805_v14, 4 }
 0x83b   : > { %v10808_v22 = vrot.slane %v14467_v26, 5 }
 0x83c   : > { %v9569_v5 = vpop.f32.mrf.mxu1  ;;  %v20242_v41 = vpop.f32.mrf.mxu3 }
 0x83d   : > { %v9606_v52 = vadd.f32 %v9569_v5, %v19861_v39  ;;  %v20249_v0 = vpop.f32.mrf.mxu2  ;;  %v11263_v39 = vrot.slane %v11261_v12, 4  ;;  %v10809_v4 = vsel %vm15074_vm2, %v10807_v19, %v10808_v22 }
 0x83e   : > { %v10881_v34 = vunpack.c.l.b16 %v10809_v4 }
 0x83f   : > { %v20252_v50 = vadd.f32 %v20154_v23, %v9606_v52  ;;  %v14465_v23 = vld [vmem:[%s15072_s19 + $0x4d8] sm:$0xe]  ;;  %v11265_v25 = vsel %vm15170_vm6, %v11263_v39, %v11264_v40  ;;  %v11326_v52 = vunpack.c.l.b16 %v11262_v60  ;;  %v14566_v60 = vld [vmem:[%s15072_s19 + $0x534] sm:$0xc] }
 0x840   : > { %v11327_v44 = vunpack.c.l.b16 %v11265_v25  ;;  %v14469_v40 = vld [vmem:[%s15072_s19 + $0x4f8] sm:$0xf] }
 0x841   : > { %21027 = vst [vmem:[#allocation32_spill] sm:$0xff] %v20252_v50  ;;  %v14473_v50 = vld [vmem:[%s15072_s19 + $0x518] sm:$0x1] }
 0x842   : > { %v11348_v43 = vpack.c.b16 %v11327_v44, %v11326_v52  ;;  %v10812_v44 = vrot.slane %v14469_v40, 5 }
 0x844   : > { %v9572_v16 = vpop.f32.mrf.mxu1  ;;  %v10277_v28 = vpop.f32.mrf.mxu3 }
 0x845   : > { %v9607_v11 = vadd.f32 %v9572_v16, %v19890_v7  ;;  %v20260_v9 = vadd.f32 %v10277_v28, %v19988_v55  ;;  %v20264_v5 = vpop.f32.mrf.mxu2  ;;  %v14497_v55 = vrot.slane %v14465_v23, 9 }
 0x847   : > { %14524 = vmatmul.msk.bf16.gmra.mxu1 %vm564_vm3, %v10903_v32  ;;  %v20272_v7 = vadd.f32 %v20175_v31, %v9607_v11  ;;  %v10806_v32 = vsel %vm15074_vm2, %v14497_v55, %v10805_v14  ;;  %v14567_v11 = vld [vmem:[%s15072_s19 + $0x538] sm:$0xf]  ;;  %v14568_v14 = vld [vmem:[%s15072_s19 + $0x53c] sm:$0x3]  ;;  %v14592_v55 = vrot.slane %v14566_v60, 10 }
 0x848   : > { %v10880_v28 = vunpack.c.l.b16 %v10806_v32  ;;  %v11268_v23 = vrot.slane %v14567_v11, 6  ;;  %v11271_v19 = vrot.slane %v14568_v14, 6  ;;  %v10814_v11 = vrot.slane %v10812_v44, 4 }
 0x84a   : > { %14619 = vmatmul.msk.bf16.gmra.mxu2 %vm564_vm3, %v11348_v43  ;;  %v10904_v26 = vpack.c.b16 %v10881_v34, %v10880_v28  ;;  %v14468_v43 = vld [vmem:[%s15072_s19 + $0x4f4] sm:$0xe] }
 0x84b   : > { %v14498_v40 = vrot.slane %v14468_v43, 9 }
 0x84c   : > { %v9574_v12 = vpop.f32.mrf.mxu1  ;;  %v20275_v46 = vpop.f32.mrf.mxu3 }
 0x84d   : > { %v9608_v31 = vadd.f32 %v9574_v12, %v19909_v48  ;;  %v20282_v16 = vpop.f32.mrf.mxu2  ;;  %v11270_v48 = vrot.slane %v11268_v23, 4  ;;  %v14470_v12 = vld [vmem:[%s15072_s19 + $0x4fc] sm:$0x1] }
 0x84f   : > { %v20285_v39 = vadd.f32 %v20197_v29, %v9608_v31  ;;  %v11269_v29 = vsel %vm15170_vm6, %v14592_v55, %v11268_v23  ;;  %v11272_v4 = vsel %vm15170_vm6, %v11270_v48, %v11271_v19  ;;  %v20308_v23 = vld [vmem:[%s20727_s4 + $0x3] ss:$0 sm:$0xff] }
 0x850   : > { %v11328_v28 = vunpack.c.l.b16 %v11269_v29  ;;  %v11329_v34 = vunpack.c.l.b16 %v11272_v4  ;;  %v20322_v29 = vpop.f32.mrf.mxu0 }
 0x851   : > { %21028 = vst [vmem:[#allocation64_spill] sm:$0xff] %v20285_v39  ;;  %v14471_v39 = vld [vmem:[%s15072_s19 + $0x510] sm:$0xe] }
 0x852   : > { %v11349_v60 = vpack.c.b16 %v11329_v34, %v11328_v28 }
 0x854   : > { %v10282_v25 = vpop.f32.mrf.mxu3  ;;  %v10981_v52 = vpop.f32.mrf.mxu1 }
 0x855   : > { %v20292_v22 = vadd.f32 %v10282_v25, %v20032_v21  ;;  %v20296_v32 = vpop.f32.mrf.mxu2  ;;  %v11061_v31 = vadd.f32 %v10981_v52, %v19936_v15  ;;  %v10815_v21 = vrot.slane %v14470_v12, 5  ;;  %v10813_v25 = vsel %vm15074_vm2, %v14498_v40, %v10812_v44  ;;  %v14472_v44 = vld [vmem:[%s15072_s19 + $0x514] sm:$0xf] }
 0x856   : > { %v10882_v43 = vunpack.c.l.b16 %v10813_v25 }
 0x857   : > { %14525 = vmatmul.msk.bf16.gmra.mxu1 %vm564_vm3, %v10904_v26  ;;  %v11503_v14 = vadd.f32 %v20215_v3, %v11061_v31  ;;  %v10816_v52 = vsel %vm15074_vm2, %v10814_v11, %v10815_v21  ;;  %v14570_v31 = vld [vmem:[%s15072_s19 + $0x554] sm:$0xf]  ;;  %v14569_v11 = vld [vmem:[%s15072_s19 + $0x550] sm:$0xc]  ;;  %v14571_v21 = vld [vmem:[%s15072_s19 + $0x558] sm:$0x3] }
 0x858   : > { %v10883_v12 = vunpack.c.l.b16 %v10816_v52  ;;  %v11275_v28 = vrot.slane %v14570_v31, 6  ;;  %v11278_v52 = vrot.slane %v14571_v21, 6 }
 0x859   : > { %v11572_v48 = vadd.f32 %v20308_v23, %v11503_v14 }
 0x85a   : > { %14620 = vmatmul.msk.bf16.gmra.mxu2 %vm564_vm3, %v11349_v60  ;;  %v11277_v25 = vrot.slane %v11275_v28, 4 }
 0x85b   : > { %v11604_v34 = vmax.f32 %v11572_v48, 0.0 }
 0x85c   : > { %v20311_v15 = vpop.f32.mrf.mxu3  ;;  %v10983_v26 = vpop.f32.mrf.mxu1 }
 0x85d   : > { %v11062_v3 = vadd.f32 %v10983_v26, %v19957_v53  ;;  %v20318_v55 = vpop.f32.mrf.mxu2  ;;  %v10905_v53 = vpack.c.b16 %v10883_v12, %v10882_v43  ;;  %v10819_v26 = vrot.slane %v14472_v44, 5  ;;  %v11279_v43 = vsel %vm15170_vm6, %v11277_v25, %v11278_v52 }
 0x85e   : > { %v11331_v44 = vunpack.c.l.b16 %v11279_v43 }
 0x85f   : > { %v11504_v19 = vadd.f32 %v20231_v10, %v11062_v3  ;;  %v14593_v10 = vrot.slane %v14569_v11, 10  ;;  %v10821_v31 = vrot.slane %v10819_v26, 4 }
 0x861   : > { %v11573_v4 = vadd.f32 %v20308_v23, %v11504_v19  ;;  %v11276_v48 = vsel %vm15170_vm6, %v14593_v10, %v11275_v28  ;;  %v20347_v28 = vpop.f32.mrf.mxu0 }
 0x863   : > { %v11605_v40 = vmax.f32 %v11573_v4, 0.0  ;;  %v11330_v4 = vunpack.c.l.b16 %v11276_v48  ;;  %v14573_v48 = vld [vmem:[%s15072_s19 + $0x570] sm:$0xf] }
 0x864   : > { %v10287_v60 = vpop.f32.mrf.mxu3  ;;  %v10986_v14 = vpop.f32.mrf.mxu1 }
 0x865   : > { %v11636_v3 = vpack.c.bf16 %v11605_v40, %v11604_v34  ;;  %v20330_v19 = vadd.f32 %v10287_v60, %v20076_v54  ;;  %v20334_v62 = vpop.f32.mrf.mxu2  ;;  %v11063_v12 = vadd.f32 %v10986_v14, %v19983_v51  ;;  %v14499_v54 = vrot.slane %v14471_v39, 9 }
 0x866   : > { %v10822_v34 = vrot.slane %v14473_v50, 5  ;;  %v11350_v40 = vpack.c.b16 %v11331_v44, %v11330_v4  ;;  %v14572_v44 = vld [vmem:[%s15072_s19 + $0x56c] sm:$0xc] }
 0x867   : > { %14526 = vmatmul.msk.bf16.gmra.mxu1 %vm564_vm3, %v10905_v53  ;;  %14638 = vmatmul.msk.bf16.vlgmr.msrb.gmra.mxu3 %vm564_vm3, %v11636_v3  ;;  %v11505_v51 = vadd.f32 %v20249_v0, %v11063_v12  ;;  %v10820_v50 = vsel %vm15074_vm2, %v14499_v54, %v10819_v26  ;;  %v14475_v3 = vld [vmem:[%s15072_s19 + $0x530] sm:$0xf]  ;;  %v11282_v26 = vrot.slane %v14573_v48, 6 }
 0x868   : > { %v10823_v39 = vsel %vm15074_vm2, %v10821_v31, %v10822_v34  ;;  %v10884_v10 = vunpack.c.l.b16 %v10820_v50  ;;  %v10826_v34 = vrot.slane %v14475_v3, 5 }
 0x869   : > { %v11574_v14 = vadd.f32 %v20308_v23, %v11505_v51  ;;  %v10885_v25 = vunpack.c.l.b16 %v10823_v39  ;;  %v11284_v51 = vrot.slane %v11282_v26, 4 }
 0x86a   : > { %14621 = vmatmul.msk.bf16.gmra.mxu2 %vm564_vm3, %v11350_v40  ;;  %v14594_v40 = vrot.slane %v14572_v44, 10 }
 0x86b   : > { %v11606_v43 = vmax.f32 %v11574_v14, 0.0  ;;  %v10906_v4 = vpack.c.b16 %v10885_v25, %v10884_v10 }
 0x86c   : > { %v20351_v53 = vpop.f32.mrf.mxu3  ;;  %v10988_v11 = vpop.f32.mrf.mxu1  ;;  %v11283_v14 = vsel %vm15170_vm6, %v14594_v40, %v11282_v26 }
 0x86d   : > { %v11064_v21 = vadd.f32 %v10988_v11, %v20001_v61  ;;  %v20358_v60 = vpop.f32.mrf.mxu2  ;;  %v14574_v61 = vld [vmem:[%s15072_s19 + $0x574] sm:$0x3]  ;;  %v20367_v11 = vpop.f32.mrf.mxu0 }
 0x86f   : > { %v11506_v0 = vadd.f32 %v20264_v5, %v11064_v21  ;;  %v11285_v5 = vrot.slane %v14574_v61, 6  ;;  %v14474_v21 = vld [vmem:[%s15072_s19 + $0x52c] sm:$0xe] }
 0x870   : > { %v14500_v3 = vrot.slane %v14474_v21, 9 }
 0x871   : > { %v11575_v52 = vadd.f32 %v20308_v23, %v11506_v0  ;;  %v14476_v0 = vld [vmem:[%s15072_s19 + $0x534] sm:$0x1]  ;;  %v11286_v10 = vsel %vm15170_vm6, %v11284_v51, %v11285_v5 }
 0x873   : > { %v11607_v12 = vmax.f32 %v11575_v52, 0.0  ;;  %v11332_v52 = vunpack.c.l.b16 %v11283_v14  ;;  %v14576_v14 = vld [vmem:[%s15072_s19 + $0x58c] sm:$0xf] }
 0x874   : > { %v10292_v54 = vpop.f32.mrf.mxu3  ;;  %v10991_v31 = vpop.f32.mrf.mxu1 }
 0x875   : > { %v20370_v50 = vadd.f32 %v10292_v54, %v20120_v30  ;;  %v11637_v39 = vpack.c.bf16 %v11607_v12, %v11606_v43  ;;  %v20374_v48 = vpop.f32.mrf.mxu2  ;;  %v11065_v25 = vadd.f32 %v10991_v31, %v20027_v59  ;;  %v11333_v30 = vunpack.c.l.b16 %v11286_v10  ;;  %v20394_v51 = vpop.f32.mrf.mxu0 }
 0x876   : > { %v10828_v43 = vrot.slane %v10826_v34, 4  ;;  %v10829_v12 = vrot.slane %v14476_v0, 5  ;;  %v10827_v59 = vsel %vm15074_vm2, %v14500_v3, %v10826_v34  ;;  %v14478_v34 = vld [vmem:[%s15072_s19 + $0x54c] sm:$0xf]  ;;  %v11289_v10 = vrot.slane %v14576_v14, 6 }
 0x877   : > { %14527 = vmatmul.msk.bf16.gmra.mxu1 %vm564_vm3, %v10906_v4  ;;  %14639 = vmatmul.msk.bf16.gmra.mxu3 %vm564_vm3, %v11637_v39  ;;  %v11351_v44 = vpack.c.b16 %v11333_v30, %v11332_v52  ;;  %v11507_v61 = vadd.f32 %v20282_v16, %v11065_v25  ;;  %v10886_v39 = vunpack.c.l.b16 %v10827_v59  ;;  %v14575_v30 = vld [vmem:[%s15072_s19 + $0x588] sm:$0xc]  ;;  %v14577_v3 = vld [vmem:[%s15072_s19 + $0x590] sm:$0x3] }
 0x878   : > { %v10830_v4 = vsel %vm15074_vm2, %v10828_v43, %v10829_v12 }
 0x879   : > { %v11576_v16 = vadd.f32 %v20308_v23, %v11507_v61  ;;  %v10887_v21 = vunpack.c.l.b16 %v10830_v4  ;;  %v14595_v61 = vrot.slane %v14575_v30, 10 }
 0x87a   : > { %14622 = vmatmul.msk.bf16.gmra.mxu2 %vm564_vm3, %v11351_v44  ;;  %v10833_v44 = vrot.slane %v14478_v34, 5 }
 0x87b   : > { %v11608_v25 = vmax.f32 %v11576_v16, 0.0  ;;  %v11290_v16 = vsel %vm15170_vm6, %v14595_v61, %v11289_v10 }
 0x87c   : > { %v20385_v26 = vpop.f32.mrf.mxu3  ;;  %v10993_v54 = vpop.f32.mrf.mxu1  ;;  %v10835_v14 = vrot.slane %v10833_v44, 4 }
 0x87d   : > { %v11066_v31 = vadd.f32 %v10993_v54, %v20045_v58  ;;  %v20392_v40 = vpop.f32.mrf.mxu2  ;;  %v10907_v58 = vpack.c.b16 %v10887_v21, %v10886_v39  ;;  %v11291_v54 = vrot.slane %v11289_v10, 4 }
 0x87f   : > { %v11508_v5 = vadd.f32 %v20296_v32, %v11066_v31  ;;  %v11292_v32 = vrot.slane %v14577_v3, 6  ;;  %v14477_v31 = vld [vmem:[%s15072_s19 + $0x548] sm:$0xe] }
 0x880   : > { %v14501_v34 = vrot.slane %v14477_v31, 9 }
 0x881   : > { %v11577_v0 = vadd.f32 %v20308_v23, %v11508_v5  ;;  %v14479_v5 = vld [vmem:[%s15072_s19 + $0x550] sm:$0x1]  ;;  %v11293_v39 = vsel %vm15170_vm6, %v11291_v54, %v11292_v32 }
 0x883   : > { %v11609_v52 = vmax.f32 %v11577_v0, 0.0  ;;  %v11334_v0 = vunpack.c.l.b16 %v11290_v16  ;;  %v14579_v16 = vld [vmem:[%s15072_s19 + $0x5a8] sm:$0xf] }
 0x884   : > { %v10297_v43 = vpop.f32.mrf.mxu3  ;;  %v10996_v12 = vpop.f32.mrf.mxu1 }
 0x885   : > { %v20404_v59 = vadd.f32 %v10297_v43, %v20163_v36  ;;  %v11638_v4 = vpack.c.bf16 %v11609_v52, %v11608_v25  ;;  %v20408_v63 = vpop.f32.mrf.mxu2  ;;  %v11067_v21 = vadd.f32 %v10996_v12, %v20071_v24  ;;  %v11335_v36 = vunpack.c.l.b16 %v11293_v39  ;;  %v20417_v52 = vpop.f32.mrf.mxu0 }
 0x886   : > { %v10836_v25 = vrot.slane %v14479_v5, 5  ;;  %v14481_v5 = vld [vmem:[%s15072_s19 + $0x568] sm:$0xf] }
 0x887   : > { %14528 = vmatmul.msk.bf16.gmra.mxu1 %vm564_vm3, %v10907_v58  ;;  %14640 = vmatmul.msk.bf16.gmra.mxu3 %vm564_vm3, %v11638_v4  ;;  %v11352_v30 = vpack.c.b16 %v11335_v36, %v11334_v0  ;;  %v11509_v10 = vadd.f32 %v20318_v55, %v11067_v21  ;;  %v10834_v58 = vsel %vm15074_vm2, %v14501_v34, %v10833_v44  ;;  %v11296_v44 = vrot.slane %v14579_v16, 6  ;;  %v14578_v36 = vld [vmem:[%s15072_s19 + $0x5a4] sm:$0xc]  ;;  %v14580_v34 = vld [vmem:[%s15072_s19 + $0x5ac] sm:$0x3] }
 0x888   : > { %v10837_v43 = vsel %vm15074_vm2, %v10835_v14, %v10836_v25  ;;  %v10888_v55 = vunpack.c.l.b16 %v10834_v58  ;;  %v10840_v25 = vrot.slane %v14481_v5, 5  ;;  %v10627_v58 = vadd.f32 %v20322_v29, %v20103_v33  ;;  %v14482_v16 = vld [vmem:[%s15072_s19 + $0x56c] sm:$0x1] }
 0x889   : > { %v11578_v61 = vadd.f32 %v20308_v23, %v11509_v10  ;;  %v10889_v32 = vunpack.c.l.b16 %v10837_v43  ;;  %v11298_v10 = vrot.slane %v11296_v44, 4 }
 0x88a   : > { %14623 = vmatmul.msk.bf16.gmra.mxu2 %vm564_vm3, %v11352_v30  ;;  %v14596_v30 = vrot.slane %v14578_v36, 10 }
 0x88b   : > { %v11610_v21 = vmax.f32 %v11578_v61, 0.0 }
 0x88c   : > { %v20421_v3 = vpop.f32.mrf.mxu3  ;;  %v10998_v24 = vpop.f32.mrf.mxu1  ;;  %v11297_v61 = vsel %vm15170_vm6, %v14596_v30, %v11296_v44 }
 0x88d   : > { %v11068_v12 = vadd.f32 %v10998_v24, %v20089_v45  ;;  %v20430_v4 = vpop.f32.mrf.mxu2  ;;  %v20435_v39 = vpop.f32.mrf.mxu0  ;;  %v10908_v45 = vpack.c.b16 %v10889_v32, %v10888_v55  ;;  %v11299_v24 = vrot.slane %v14580_v34, 6  ;;  %v21029_v32 = vld [vmem:[#allocation31_spill] sm:$0xff]  ;;  %v11336_v33 = vunpack.c.l.b16 %v11297_v61 }
 0x88f   : > { %v11510_v54 = vadd.f32 %v20334_v62, %v11068_v12  ;;  %v11300_v55 = vsel %vm15170_vm6, %v11298_v10, %v11299_v24 }
 0x891   : > { %v11579_v31 = vadd.f32 %v20308_v23, %v11510_v54  ;;  %v14480_v54 = vld [vmem:[%s15072_s19 + $0x564] sm:$0xe] }
 0x892   : > { %v14502_v29 = vrot.slane %v14480_v54, 9  ;;  %v14484_v54 = vld [vmem:[%s15072_s19 + $0x584] sm:$0xf] }
 0x893   : > { %v11611_v0 = vmax.f32 %v11579_v31, 0.0  ;;  %v10326_v31 = vadd.f32 %v20125_v27, %v21029_v32 }
 0x894   : > { %v10302_v14 = vpop.f32.mrf.mxu3  ;;  %v11001_v62 = vpop.f32.mrf.mxu1 }
 0x895   : > { %v20442_v43 = vadd.f32 %v10302_v14, %v20205_v57  ;;  %v11639_v12 = vpack.c.bf16 %v11611_v0, %v11610_v21  ;;  %v11069_v5 = vadd.f32 %v11001_v62, %v10627_v58  ;;  %v11337_v57 = vunpack.c.l.b16 %v11300_v55  ;;  %v20454_v36 = vpop.f32.mrf.mxu2  ;;  %v20465_v10 = vpop.f32.mrf.mxu0 }
 0x896   : > { %v10842_v21 = vrot.slane %v10840_v25, 4  ;;  %v10843_v0 = vrot.slane %v14482_v16, 5  ;;  %v10628_v56 = vadd.f32 %v20347_v28, %v10326_v31  ;;  %v10841_v14 = vsel %vm15074_vm2, %v14502_v29, %v10840_v25  ;;  %v14483_v29 = vld [vmem:[%s15072_s19 + $0x580] sm:$0xe] }
 0x897   : > { %14529 = vmatmul.msk.bf16.gmra.mxu1 %vm564_vm3, %v10908_v45  ;;  %14641 = vmatmul.msk.bf16.gmra.mxu3 %vm564_vm3, %v11639_v12  ;;  %v11353_v44 = vpack.c.b16 %v11337_v57, %v11336_v33  ;;  %v11511_v34 = vadd.f32 %v20358_v60, %v11069_v5  ;;  %v10890_v60 = vunpack.c.l.b16 %v10841_v14  ;;  %v10847_v5 = vrot.slane %v14484_v54, 5 }
 0x898   : > { %v10844_v62 = vsel %vm15074_vm2, %v10842_v21, %v10843_v0  ;;  %v10629_v33 = vadd.f32 %v20367_v11, %v20146_v42  ;;  %v14485_v21 = vld [vmem:[%s15072_s19 + $0x588] sm:$0x1]  ;;  %v10328_v0 = vadd.f32 %v20168_v47, %v19866_v13 }
 0x899   : > { %v11580_v24 = vadd.f32 %v20308_v23, %v11511_v34  ;;  %v10891_v58 = vunpack.c.l.b16 %v10844_v62  ;;  %v14503_v34 = vrot.slane %v14483_v29, 9  ;;  %v10850_v14 = vrot.slane %v14485_v21, 5  ;;  %v14488_v21 = vld [vmem:[%s15072_s19 + $0x5a4] sm:$0x1] }
 0x89a   : > { %14624 = vmatmul.msk.bf16.gmra.mxu2 %vm564_vm3, %v11353_v44  ;;  %v10630_v42 = vadd.f32 %v20394_v51, %v10328_v0  ;;  %v10330_v0 = vadd.f32 %v20208_v17, %v19914_v6 }
 0x89b   : > { %v11612_v16 = vmax.f32 %v11580_v24, 0.0  ;;  %v10909_v25 = vpack.c.b16 %v10891_v58, %v10890_v60  ;;  %v10848_v13 = vsel %vm15074_vm2, %v14503_v34, %v10847_v5 }
 0x89c   : > { %v20459_v27 = vpop.f32.mrf.mxu3  ;;  %v11003_v45 = vpop.f32.mrf.mxu1  ;;  %v10892_v51 = vunpack.c.l.b16 %v10848_v13 }
 0x89d   : > { %v11070_v30 = vadd.f32 %v11003_v45, %v10628_v56  ;;  %v20471_v55 = vpop.f32.mrf.mxu2  ;;  %v10576_v56 = vpop.f32.mrf.mxu0  ;;  %v10849_v45 = vrot.slane %v10847_v5, 4 }
 0x89f   : > { %v11512_v28 = vadd.f32 %v20374_v48, %v11070_v30  ;;  %v10851_v47 = vsel %vm15074_vm2, %v10849_v45, %v10850_v14  ;;  %v10857_v14 = vrot.slane %v14488_v21, 5 }
 0x8a0   : > { %v10893_v58 = vunpack.c.l.b16 %v10851_v47 }
 0x8a1   : > { %v11581_v12 = vadd.f32 %v20308_v23, %v11512_v28 }
 0x8a3   : > { %v11613_v61 = vmax.f32 %v11581_v12, 0.0  ;;  %v14487_v12 = vld [vmem:[%s15072_s19 + $0x5a0] sm:$0xf] }
 0x8a4   : > { %v10307_v32 = vpop.f32.mrf.mxu3  ;;  %v11006_v31 = vpop.f32.mrf.mxu1  ;;  %v10854_v5 = vrot.slane %v14487_v12, 5  ;;  %v10633_v12 = vadd.f32 %v20465_v10, %v20227_v38 }
 0x8a5   : > { %v11640_v57 = vpack.c.bf16 %v11613_v61, %v11612_v16  ;;  %v20476_v48 = vadd.f32 %v10307_v32, %v20239_v49  ;;  %v11071_v44 = vadd.f32 %v11006_v31, %v10629_v33  ;;  %v11460_v24 = vpop.f32.mrf.mxu2  ;;  %v10579_v54 = vpop.f32.mrf.mxu0  ;;  %v10631_v33 = vadd.f32 %v20417_v52, %v20189_v18 }
 0x8a6   : > { %v10856_v45 = vrot.slane %v10854_v5, 4  ;;  %v10632_v18 = vadd.f32 %v20435_v39, %v10330_v0 }
 0x8a7   : > { %14530 = vmatmul.msk.bf16.gmra.mxu1 %vm564_vm3, %v10909_v25  ;;  %14642 = vmatmul.msk.bf16.gmra.mxu3 %vm564_vm3, %v11640_v57  ;;  %v11513_v49 = vadd.f32 %v20392_v40, %v11071_v44  ;;  %v10910_v25 = vpack.c.b16 %v10893_v58, %v10892_v51 }
 0x8a8   : > { %v10858_v6 = vsel %vm15074_vm2, %v10856_v45, %v10857_v14 }
 0x8a9   : > { %v11582_v28 = vadd.f32 %v20308_v23, %v11513_v49 }
 0x8ab   : > { %v11614_v16 = vmax.f32 %v11582_v28, 0.0  ;;  %v10895_v28 = vunpack.c.l.b16 %v10858_v6 }
 0x8ac   : > { %v20486_v11 = vpop.f32.mrf.mxu3  ;;  %v11008_v62 = vpop.f32.mrf.mxu1 }
 0x8ad   : > { %v11072_v30 = vadd.f32 %v11008_v62, %v10630_v42  ;;  %v11463_v42 = vpop.f32.mrf.mxu2 }
 0x8af   : > { %v11514_v60 = vadd.f32 %v20408_v63, %v11072_v30  ;;  %v14486_v63 = vld [vmem:[%s15072_s19 + $0x59c] sm:$0xe]  ;;  %s267_s19 = sand.u32 1, %s14948_s22  }
 0x8b0   : > { %v14504_v34 = vrot.slane %v14486_v63, 9  ;;  %s12133_s18 = sshll.u32 %s267_s19, 8  ;;  %s12003_s24 = scalar_lea.sflag [#allocation4], %s267_s19 }
 0x8b1   : > { %v11583_v40 = vadd.f32 %v20308_v23, %v11514_v60  ;;  %s20550_s15 = scalar_lea.vmem [#allocation3], %s12133_s18 }
 0x8b2   : > { %v10855_v62 = vsel %vm15074_vm2, %v14504_v34, %v10854_v5  ;;  %s12017_s8 = sshll.u32 %s20550_s15, 4  ;;  %s12018_s8 = int_to_ptr.vmem [resolvable:$true] %s12017_s8 }
 0x8b3   : > { %v11615_v61 = vmax.f32 %v11583_v40, 0.0  ;;  %v10894_v30 = vunpack.c.l.b16 %v10855_v62 }
 0x8b4   : > { %v10312_v32 = vpop.f32.mrf.mxu3  ;;  %v11011_v31 = vpop.f32.mrf.mxu1 }
 0x8b5   : > { %v11641_v57 = vpack.c.bf16 %v11615_v61, %v11614_v16  ;;  %v20499_v29 = vadd.f32 %v10312_v32, %v20272_v7  ;;  %v11073_v44 = vadd.f32 %v11011_v31, %v10631_v33  ;;  %v10581_v7 = vpop.f32.mrf.mxu0  ;;  %v11465_v39 = vpop.f32.mrf.mxu2  ;;  %v10911_v58 = vpack.c.b16 %v10895_v28, %v10894_v30  ;;  %v20543_v28 = vld [vmem:[%s277_s14] ss:$0 sm:$0xff] }
 0x8b6   : > { %v10332_v61 = vadd.f32 %v20242_v41, %v19962_v37  ;;  %v10635_v41 = vadd.f32 %v10579_v54, %v20260_v9 }
 0x8b7   : > { %14531 = vmatmul.msk.bf16.gmra.mxu1 %vm564_vm3, %v10910_v25  ;;  %14643 = vmatmul.msk.bf16.gmra.mxu3 %vm564_vm3, %v11641_v57  ;;  %v11515_v52 = vadd.f32 %v20430_v4, %v11073_v44 }
 0x8b9   : > { %v11584_v13 = vadd.f32 %v20308_v23, %v11515_v52 }
 0x8bb   : > { %v11616_v51 = vmax.f32 %v11584_v13, 0.0 }
 0x8bc   : > { %v11013_v49 = vpop.f32.mrf.mxu1  ;;  %v20531_v54 = vpop.f32.mrf.mxu3 }
 0x8bd   : > { %v11074_v17 = vadd.f32 %v11013_v49, %v10632_v18  ;;  %v10584_v2 = vpop.f32.mrf.mxu0  ;;  %v11468_v5 = vpop.f32.mrf.mxu2 }
 0x8bf   : > { %v11516_v47 = vadd.f32 %v20454_v36, %v11074_v17  ;;  %v10634_v36 = vadd.f32 %v10576_v56, %v10332_v61  ;;  %v10334_v56 = vadd.f32 %v20275_v46, %v20006_v20 }
 0x8c1   : > { %v11585_v60 = vadd.f32 %v20308_v23, %v11516_v47  ;;  %v10636_v14 = vadd.f32 %v10581_v7, %v10334_v56  ;;  %v10637_v7 = vadd.f32 %v10584_v2, %v20292_v22  ;;  %v10336_v47 = vadd.f32 %v20311_v15, %v20050_v8  ;;  %v21030_v22 = vld [vmem:[#allocation91_spill] sm:$0xff] }
 0x8c3   : > { %v11617_v4 = vmax.f32 %v11585_v60, 0.0 }
 0x8c4   : > { %v11016_v40 = vpop.f32.mrf.mxu1 }
 0x8c5   : > { %v11642_v16 = vpack.c.bf16 %v11617_v4, %v11616_v51  ;;  %v11075_v25 = vadd.f32 %v11016_v40, %v10633_v12  ;;  %v10586_v38 = vpop.f32.mrf.mxu0  ;;  %v11470_v34 = vpop.f32.mrf.mxu2 }
 0x8c6   : > { %v10638_v51 = vadd.f32 %v10586_v38, %v10336_v47 }
 0x8c7   : > { %14532 = vmatmul.msk.bf16.gmra.mxu1 %vm564_vm3, %v10911_v58  ;;  %14644 = vmatmul.msk.bf16.gmra.mxu3 %vm564_vm3, %v11642_v16  ;;  %v11517_v32 = vadd.f32 %v20471_v55, %v11075_v25 }
 0x8c9   : > { %v11586_v57 = vadd.f32 %v20308_v23, %v11517_v32 }
 0x8cb   : > { %v11618_v21 = vmax.f32 %v11586_v57, 0.0 }
 0x8cc   : > { %v11018_v31 = vpop.f32.mrf.mxu1 }
 0x8cd   : > { %v11076_v33 = vadd.f32 %v11018_v31, %v10634_v36  ;;  %v10589_v45 = vpop.f32.mrf.mxu0  ;;  %v11473_v6 = vpop.f32.mrf.mxu2 }
 0x8ce   : > { %v10639_v38 = vadd.f32 %v10589_v45, %v20330_v19 }
 0x8cf   : > { %v11518_v63 = vadd.f32 %v11460_v24, %v11076_v33 }
 0x8d1   : > { %v11587_v10 = vadd.f32 %v20308_v23, %v11518_v63 }
 0x8d3   : > { %v11619_v0 = vmax.f32 %v11587_v10, 0.0 }
 0x8d4   : > { %v11021_v37 = vpop.f32.mrf.mxu1 }
 0x8d5   : > { %v11643_v44 = vpack.c.bf16 %v11619_v0, %v11618_v21  ;;  %v11077_v55 = vadd.f32 %v11021_v37, %v10635_v41  ;;  %v10591_v17 = vpop.f32.mrf.mxu0  ;;  %v10338_v0 = vadd.f32 %v20351_v53, %v20094_v1 }
 0x8d7   : > { %14645 = vmatmul.msk.bf16.gmra.mxu3 %vm564_vm3, %v11643_v44  ;;  %v11519_v18 = vadd.f32 %v11463_v42, %v11077_v55  ;;  %v10640_v56 = vadd.f32 %v10591_v17, %v10338_v0 }
 0x8d9   : > { %v11588_v49 = vadd.f32 %v20308_v23, %v11519_v18 }
 0x8db   : > { %v11620_v20 = vmax.f32 %v11588_v49, 0.0 }
 0x8dc   : > { %v11023_v24 = vpop.f32.mrf.mxu1 }
 0x8dd   : > { %v11078_v52 = vadd.f32 %v11023_v24, %v10636_v14  ;;  %v10594_v12 = vpop.f32.mrf.mxu0  ;;  %v21032_v14 = vld [vmem:[#allocation93_spill] sm:$0xff] }
 0x8df   : > { %v11520_v62 = vadd.f32 %v11465_v39, %v11078_v52  ;;  %v11475_v39 = vpop.f32.mrf.mxu2 }
 0x8e1   : > { %v11589_v9 = vadd.f32 %v20308_v23, %v11520_v62 }
 0x8e3   : > { %v11621_v46 = vmax.f32 %v11589_v9, 0.0 }
 0x8e4   : > { %v11026_v13 = vpop.f32.mrf.mxu1 }
 0x8e5   : > { %v11644_v42 = vpack.c.bf16 %v11621_v46, %v11620_v20  ;;  %v11079_v30 = vadd.f32 %v11026_v13, %v10637_v7  ;;  %v10596_v44 = vpop.f32.mrf.mxu0 }
 0x8e7   : > { %14646 = vmatmul.msk.bf16.gmra.mxu3 %vm564_vm3, %v11644_v42  ;;  %v11521_v4 = vadd.f32 %v11468_v5, %v11079_v30  ;;  %v21031_v5 = vld [vmem:[#allocation92_spill] sm:$0xff]  ;;  %v11478_v63 = vpop.f32.mrf.mxu2  ;;  %v10641_v42 = vadd.f32 %v10594_v12, %v20370_v50 }
 0x8e9   : > { %v11590_v16 = vadd.f32 %v20308_v23, %v11521_v4 }
 0x8ea   : > { %v11726_v60 = vpop.f32.mrf.mxu3 }
 0x8eb   : > { %v11806_v58 = vadd.f32 %v11726_v60, %v21030_v22  ;;  %v11622_v32 = vmax.f32 %v11590_v16, 0.0  ;;  %v10340_v60 = vadd.f32 %v20385_v26, %v20137_v35 }
 0x8ec   : > { %v11028_v40 = vpop.f32.mrf.mxu1 }
 0x8ed   : > { %v11906_v8 = vadd.f32 %v20543_v28, %v11806_v58  ;;  %v11080_v15 = vadd.f32 %v11028_v40, %v10638_v51  ;;  %v10599_v9 = vpop.f32.mrf.mxu0  ;;  %v10642_v58 = vadd.f32 %v10596_v44, %v10340_v60  ;;  %v21039_v60 = vld [vmem:[#allocation96_spill] sm:$0xff] }
 0x8ef   : > { %v11938_v2 = vmax.f32 %v11906_v8, 0.0  ;;  %v11522_v61 = vadd.f32 %v11470_v34, %v11080_v15  ;;  %v11480_v52 = vpop.f32.mrf.mxu2  ;;  %v21034_v8 = vld [vmem:[#allocation6_spill] sm:$0xff] }
 0x8f1   : > { %11970 = vst [vmem:[%s20550_s15] sm:$0xff] %v11938_v2  ;;  %v11591_v25 = vadd.f32 %v20308_v23, %v11522_v61 }
 0x8f2   : > { %v11728_v36 = vpop.f32.mrf.mxu3 }
 0x8f3   : > { %v11623_v31 = vmax.f32 %v11591_v25, 0.0  ;;  %v11807_v33 = vadd.f32 %v11728_v36, %v21031_v5 }
 0x8f4   : > { %v11031_v57 = vpop.f32.mrf.mxu1 }
 0x8f5   : > { %v11645_v10 = vpack.c.bf16 %v11623_v31, %v11622_v32  ;;  %v11907_v21 = vadd.f32 %v20543_v28, %v11807_v33  ;;  %v11081_v41 = vadd.f32 %v11031_v57, %v10639_v38  ;;  %v10601_v16 = vpop.f32.mrf.mxu0  ;;  %v21035_v33 = vld [vmem:[#allocation86_spill] sm:$0xff]  ;;  %v10643_v38 = vadd.f32 %v10599_v9, %v20404_v59 }
 0x8f7   : > { %v11939_v37 = vmax.f32 %v11907_v21, 0.0  ;;  %14647 = vmatmul.msk.bf16.gmra.mxu3 %vm564_vm3, %v11645_v10  ;;  %v11523_v55 = vadd.f32 %v11473_v6, %v11081_v41  ;;  %v21033_v6 = vld [vmem:[#allocation84_spill] sm:$0xff]  ;;  %v11483_v4 = vpop.f32.mrf.mxu2 }
 0x8f9   : > { %11971 = vst [vmem:[%s20550_s15 + $0x8] sm:$0xff] %v11939_v37  ;;  %v11592_v49 = vadd.f32 %v20308_v23, %v11523_v55  ;;  %v21036_v37 = vld [vmem:[#allocation63_spill] sm:$0xff] }
 0x8fa   : > { %v11731_v34 = vpop.f32.mrf.mxu3  ;;  %v10342_v41 = vadd.f32 %v20421_v3, %v21036_v37 }
 0x8fb   : > { %v11808_v18 = vadd.f32 %v11731_v34, %v21032_v14  ;;  %v11624_v46 = vmax.f32 %v11592_v49, 0.0 }
 0x8fc   : > { %v11033_v24 = vpop.f32.mrf.mxu1  ;;  %v10644_v55 = vadd.f32 %v10601_v16, %v10342_v41 }
 0x8fd   : > { %v11908_v19 = vadd.f32 %v20543_v28, %v11808_v18  ;;  %v11082_v45 = vadd.f32 %v11033_v24, %v10640_v56  ;;  %v10604_v0 = vpop.f32.mrf.mxu0  ;;  %v21037_v18 = vld [vmem:[#allocation7_spill] sm:$0xff] }
 0x8ff   : > { %v11940_v1 = vmax.f32 %v11908_v19, 0.0  ;;  %v11524_v53 = vadd.f32 %v11475_v39, %v11082_v45  ;;  %v11485_v32 = vpop.f32.mrf.mxu2 }
 0x901   : > { %11972 = vst [vmem:[%s20550_s15 + $0x10] sm:$0xff] %v11940_v1  ;;  %v11593_v62 = vadd.f32 %v20308_v23, %v11524_v53 }
 0x902   : > { %v11733_v20 = vpop.f32.mrf.mxu3 }
 0x903   : > { %v11625_v17 = vmax.f32 %v11593_v62, 0.0  ;;  %v11809_v13 = vadd.f32 %v11733_v20, %v21033_v6 }
 0x904   : > { %v11036_v7 = vpop.f32.mrf.mxu1 }
 0x905   : > { %v11646_v47 = vpack.c.bf16 %v11625_v17, %v11624_v46  ;;  %v11909_v30 = vadd.f32 %v20543_v28, %v11809_v13  ;;  %v11083_v51 = vadd.f32 %v11036_v7, %v10641_v42  ;;  %v10606_v53 = vpop.f32.mrf.mxu0  ;;  %v21038_v17 = vld [vmem:[#allocation23_spill] sm:$0xff]  ;;  %v10645_v7 = vadd.f32 %v10604_v0, %v20442_v43 }
 0x907   : > { %v11941_v39 = vmax.f32 %v11909_v30, 0.0  ;;  %14648 = vmatmul.msk.bf16.gmra.mxu3 %vm564_vm3, %v11646_v47  ;;  %v11525_v40 = vadd.f32 %v11478_v63, %v11083_v51  ;;  %v11488_v59 = vpop.f32.mrf.mxu2 }
 0x909   : > { %11973 = vst [vmem:[%s20550_s15 + $0x18] sm:$0xff] %v11941_v39  ;;  %v11594_v61 = vadd.f32 %v20308_v23, %v11525_v40  ;;  %v10344_v39 = vadd.f32 %v20459_v27, %v21039_v60 }
 0x90a   : > { %v11736_v22 = vpop.f32.mrf.mxu3 }
 0x90b   : > { %v11810_v15 = vadd.f32 %v11736_v22, %v21034_v8  ;;  %v11626_v31 = vmax.f32 %v11594_v61, 0.0  ;;  %v10646_v40 = vadd.f32 %v10606_v53, %v10344_v39 }
 0x90c   : > { %v11038_v50 = vpop.f32.mrf.mxu1 }
 0x90d   : > { %v11910_v12 = vadd.f32 %v20543_v28, %v11810_v15  ;;  %v11084_v2 = vadd.f32 %v11038_v50, %v10642_v58  ;;  %v10609_v22 = vpop.f32.mrf.mxu0  ;;  %v21040_v15 = vld [vmem:[#allocation55_spill] sm:$0xff] }
 0x90f   : > { %v11942_v35 = vmax.f32 %v11910_v12, 0.0  ;;  %v11526_v26 = vadd.f32 %v11480_v52, %v11084_v2  ;;  %v11490_v30 = vpop.f32.mrf.mxu2 }
 0x911   : > { %11974 = vst [vmem:[%s20550_s15 + $0x20] sm:$0xff] %v11942_v35  ;;  %v11595_v25 = vadd.f32 %v20308_v23, %v11526_v26 }
 0x912   : > { %v11738_v36 = vpop.f32.mrf.mxu3 }
 0x913   : > { %v11627_v5 = vmax.f32 %v11595_v25, 0.0  ;;  %v11811_v57 = vadd.f32 %v11738_v36, %v21035_v33 }
 0x914   : > { %v11041_v63 = vpop.f32.mrf.mxu1 }
 0x915   : > { %v11647_v10 = vpack.c.bf16 %v11627_v5, %v11626_v31  ;;  %v11911_v21 = vadd.f32 %v20543_v28, %v11811_v57  ;;  %v11085_v34 = vadd.f32 %v11041_v63, %v10643_v38  ;;  %v21041_v31 = vld [vmem:[#allocation88_spill] sm:$0xff]  ;;  %v10611_v33 = vpop.f32.mrf.mxu0  ;;  %v10647_v63 = vadd.f32 %v10609_v22, %v20476_v48 }
 0x916   : > { %v21046_v22 = vld [vmem:[#allocation8_spill] sm:$0xff] }
 0x917   : > { %v11943_v44 = vmax.f32 %v11911_v21, 0.0  ;;  %14649 = vmatmul.msk.bf16.gmra.mxu3 %vm564_vm3, %v11647_v10  ;;  %v11527_v14 = vadd.f32 %v11483_v4, %v11085_v34  ;;  %v11493_v35 = vpop.f32.mrf.mxu2  ;;  %v21042_v21 = vld [vmem:[#allocation32_spill] sm:$0xff] }
 0x918   : > { %v10346_v0 = vadd.f32 %v20486_v11, %v21042_v21 }
 0x919   : > { %11975 = vst [vmem:[%s20550_s15 + $0x28] sm:$0xff] %v11943_v44  ;;  %v11596_v49 = vadd.f32 %v20308_v23, %v11527_v14  ;;  %v21043_v14 = vld [vmem:[#allocation24_spill] sm:$0xff] }
 0x91a   : > { %v11741_v56 = vpop.f32.mrf.mxu3 }
 0x91b   : > { %v11812_v24 = vadd.f32 %v11741_v56, %v21037_v18  ;;  %v11628_v20 = vmax.f32 %v11596_v49, 0.0  ;;  %v10648_v56 = vadd.f32 %v10611_v33, %v10346_v0 }
 0x91c   : > { %v11043_v19 = vpop.f32.mrf.mxu1 }
 0x91d   : > { %v11912_v45 = vadd.f32 %v20543_v28, %v11812_v24  ;;  %v11086_v52 = vadd.f32 %v11043_v19, %v10644_v55 }
 0x91f   : > { %v11944_v1 = vmax.f32 %v11912_v45, 0.0  ;;  %v11528_v3 = vadd.f32 %v11485_v32, %v11086_v52  ;;  %v11495_v44 = vpop.f32.mrf.mxu2 }
 0x921   : > { %11976 = vst [vmem:[%s20550_s15 + $0x30] sm:$0xff] %v11944_v1  ;;  %v11597_v62 = vadd.f32 %v20308_v23, %v11528_v3 }
 0x922   : > { %v11743_v9 = vpop.f32.mrf.mxu3 }
 0x923   : > { %v11629_v46 = vmax.f32 %v11597_v62, 0.0  ;;  %v11813_v6 = vadd.f32 %v11743_v9, %v21038_v17  ;;  %v21044_v62 = vld [vmem:[#allocation56_spill] sm:$0xff] }
 0x924   : > { %v11046_v13 = vpop.f32.mrf.mxu1 }
 0x925   : > { %v11648_v42 = vpack.c.bf16 %v11629_v46, %v11628_v20  ;;  %v11913_v47 = vadd.f32 %v20543_v28, %v11813_v6  ;;  %v11087_v4 = vadd.f32 %v11046_v13, %v10645_v7  ;;  %v21045_v7 = vld [vmem:[#allocation64_spill] sm:$0xff] }
 0x927   : > { %v11945_v51 = vmax.f32 %v11913_v47, 0.0  ;;  %14650 = vmatmul.msk.bf16.gmra.mxu3 %vm564_vm3, %v11648_v42  ;;  %v11529_v8 = vadd.f32 %v11488_v59, %v11087_v4  ;;  %v10614_v59 = vpop.f32.mrf.mxu0  ;;  %v11498_v20 = vpop.f32.mrf.mxu2  ;;  %v10348_v42 = vadd.f32 %v20531_v54, %v21045_v7 }
 0x928   : > { %v10649_v17 = vadd.f32 %v10614_v59, %v20499_v29 }
 0x929   : > { %11977 = vst [vmem:[%s20550_s15 + $0x38] sm:$0xff] %v11945_v51  ;;  %v11598_v2 = vadd.f32 %v20308_v23, %v11529_v8 }
 0x92a   : > { %v11746_v58 = vpop.f32.mrf.mxu3 }
 0x92b   : > { %v11814_v16 = vadd.f32 %v11746_v58, %v21040_v15  ;;  %v11630_v36 = vmax.f32 %v11598_v2, 0.0 }
 0x92c   : > { %v11048_v43 = vpop.f32.mrf.mxu1 }
 0x92d   : > { %v11914_v50 = vadd.f32 %v20543_v28, %v11814_v16  ;;  %v11088_v12 = vadd.f32 %v11048_v43, %v10646_v40 }
 0x92f   : > { %v11946_v61 = vmax.f32 %v11914_v50, 0.0  ;;  %v11530_v27 = vadd.f32 %v11490_v30, %v11088_v12  ;;  %v10616_v60 = vpop.f32.mrf.mxu0  ;;  %v11500_v15 = vpop.f32.mrf.mxu2 }
 0x930   : > { %v10650_v51 = vadd.f32 %v10616_v60, %v10348_v42  ;;  %v21056_v60 = vld [vmem:[#allocation94_spill] sm:$0xff] }
 0x931   : > { %11978 = vst [vmem:[%s20550_s15 + $0x40] sm:$0xff] %v11946_v61  ;;  %v11599_v26 = vadd.f32 %v20308_v23, %v11530_v27  ;;  %v21047_v27 = vld [vmem:[#allocation25_spill] sm:$0xff] }
 0x932   : > { %v11748_v25 = vpop.f32.mrf.mxu3 }
 0x933   : > { %v11631_v32 = vmax.f32 %v11599_v26, 0.0  ;;  %v11815_v5 = vadd.f32 %v11748_v25, %v21041_v31  ;;  %v21048_v31 = vld [vmem:[#allocation57_spill] sm:$0xff] }
 0x934   : > { %v11051_v57 = vpop.f32.mrf.mxu1 }
 0x935   : > { %v11649_v38 = vpack.c.bf16 %v11631_v32, %v11630_v36  ;;  %v11915_v10 = vadd.f32 %v20543_v28, %v11815_v5  ;;  %v11089_v41 = vadd.f32 %v11051_v57, %v10647_v63  ;;  %v21049_v63 = vld [vmem:[#allocation90_spill] sm:$0xff] }
 0x937   : > { %v11947_v37 = vmax.f32 %v11915_v10, 0.0  ;;  %14651 = vmatmul.msk.bf16.gmra.mxu3 %vm564_vm3, %v11649_v38  ;;  %v11531_v55 = vadd.f32 %v11493_v35, %v11089_v41 }
 0x939   : > { %11979 = vst [vmem:[%s20550_s15 + $0x48] sm:$0xff] %v11947_v37  ;;  %v11600_v45 = vadd.f32 %v20308_v23, %v11531_v55  ;;  %v21050_v37 = vld [vmem:[#allocation26_spill] sm:$0xff] }
 0x93a   : > { %v11751_v34 = vpop.f32.mrf.mxu3  ;;  %v21051_v55 = vld [vmem:[#allocation58_spill] sm:$0xff] }
 0x93b   : > { %v11816_v18 = vadd.f32 %v11751_v34, %v21043_v14  ;;  %v11632_v3 = vmax.f32 %v11600_v45, 0.0 }
 0x93c   : > { %v11053_v24 = vpop.f32.mrf.mxu1 }
 0x93d   : > { %v11916_v48 = vadd.f32 %v20543_v28, %v11816_v18  ;;  %v11090_v19 = vadd.f32 %v11053_v24, %v10648_v56 }
 0x93f   : > { %v11948_v11 = vmax.f32 %v11916_v48, 0.0  ;;  %v11532_v52 = vadd.f32 %v11495_v44, %v11090_v19  ;;  %v21052_v19 = vld [vmem:[#allocation98_spill] sm:$0xff] }
 0x941   : > { %11980 = vst [vmem:[%s20550_s15 + $0x50] sm:$0xff] %v11948_v11  ;;  %v11601_v49 = vadd.f32 %v20308_v23, %v11532_v52 }
 0x942   : > { %v11753_v1 = vpop.f32.mrf.mxu3 }
 0x943   : > { %v11633_v53 = vmax.f32 %v11601_v49, 0.0  ;;  %v11817_v9 = vadd.f32 %v11753_v1, %v21044_v62  ;;  %v21053_v49 = vld [vmem:[#allocation9_spill] sm:$0xff] }
 0x944   : > { %v11056_v46 = vpop.f32.mrf.mxu1 }
 0x945   : > { %v11650_v6 = vpack.c.bf16 %v11633_v53, %v11632_v3  ;;  %v11917_v13 = vadd.f32 %v20543_v28, %v11817_v9  ;;  %v11091_v30 = vadd.f32 %v11056_v46, %v10649_v17  ;;  %v21054_v9 = vld [vmem:[#allocation27_spill] sm:$0xff] }
 0x947   : > { %v11949_v47 = vmax.f32 %v11917_v13, 0.0  ;;  %14652 = vmatmul.msk.bf16.gmra.mxu3 %vm564_vm3, %v11650_v6  ;;  %v11533_v4 = vadd.f32 %v11498_v20, %v11091_v30  ;;  %v21055_v13 = vld [vmem:[#allocation59_spill] sm:$0xff] }
 0x949   : > { %11981 = vst [vmem:[%s20550_s15 + $0x58] sm:$0xff] %v11949_v47  ;;  %v11602_v54 = vadd.f32 %v20308_v23, %v11533_v4 }
 0x94a   : > { %v11756_v39 = vpop.f32.mrf.mxu3 }
 0x94b   : > { %v11818_v58 = vadd.f32 %v11756_v39, %v21046_v22  ;;  %v11634_v2 = vmax.f32 %v11602_v54, 0.0  ;;  %v21058_v54 = vld [vmem:[#allocation60_spill] sm:$0xff] }
 0x94c   : > { %v11058_v40 = vpop.f32.mrf.mxu1 }
 0x94d   : > { %v11918_v29 = vadd.f32 %v20543_v28, %v11818_v58  ;;  %v11092_v8 = vadd.f32 %v11058_v40, %v10650_v51  ;;  %v21057_v58 = vld [vmem:[#allocation28_spill] sm:$0xff] }
 0x94f   : > { %v11950_v16 = vmax.f32 %v11918_v29, 0.0  ;;  %v11534_v43 = vadd.f32 %v11500_v15, %v11092_v8 }
 0x951   : > { %11982 = vst [vmem:[%s20550_s15 + $0x60] sm:$0xff] %v11950_v16  ;;  %v11603_v50 = vadd.f32 %v20308_v23, %v11534_v43 }
 0x952   : > { %v11758_v12 = vpop.f32.mrf.mxu3 }
 0x953   : > { %v11635_v61 = vmax.f32 %v11603_v50, 0.0  ;;  %v11819_v35 = vadd.f32 %v11758_v12, %v21047_v27 }
 0x955   : > { %v11651_v26 = vpack.c.bf16 %v11635_v61, %v11634_v2  ;;  %v11919_v25 = vadd.f32 %v20543_v28, %v11819_v35  ;;  %v21059_v2 = vld [vmem:[#allocation10_spill] sm:$0xff] }
 0x957   : > { %v11951_v36 = vmax.f32 %v11919_v25, 0.0  ;;  %14653 = vmatmul.msk.bf16.gmra.mxu3 %vm564_vm3, %v11651_v26  ;;  %v21060_v25 = vld [vmem:[#allocation29_spill] sm:$0xff] }
 0x959   : > { %11983 = vst [vmem:[%s20550_s15 + $0x68] sm:$0xff] %v11951_v36 }
 0x95a   : > { %v11761_v32 = vpop.f32.mrf.mxu3 }
 0x95b   : > { %v11820_v5 = vadd.f32 %v11761_v32, %v21048_v31 }
 0x95d   : > { %v11920_v33 = vadd.f32 %v20543_v28, %v11820_v5 }
 0x95f   : > { %v11952_v23 = vmax.f32 %v11920_v33, 0.0  ;;  %v21061_v33 = vld [vmem:[#allocation61_spill] sm:$0xff] }
 0x961   : > { %11984 = vst [vmem:[%s20550_s15 + $0x70] sm:$0xff] %v11952_v23 }
 0x962   : > { %v11763_v57 = vpop.f32.mrf.mxu3 }
 0x963   : > { %v11821_v38 = vadd.f32 %v11763_v57, %v21049_v63 }
 0x965   : > { %v11921_v10 = vadd.f32 %v20543_v28, %v11821_v38 }
 0x967   : > { %v11953_v21 = vmax.f32 %v11921_v10, 0.0  ;;  %v21062_v10 = vld [vmem:[#allocation95_spill] sm:$0xff] }
 0x969   : > { %11985 = vst [vmem:[%s20550_s15 + $0x78] sm:$0xff] %v11953_v21 }
 0x96a   : > { %v11766_v0 = vpop.f32.mrf.mxu3 }
 0x96b   : > { %v11822_v41 = vadd.f32 %v11766_v0, %v21050_v37 }
 0x96d   : > { %v11922_v44 = vadd.f32 %v20543_v28, %v11822_v41 }
 0x96f   : > { %v11954_v34 = vmax.f32 %v11922_v44, 0.0  ;;  %v21063_v44 = vld [vmem:[#allocation30_spill] sm:$0xff] }
 0x971   : > { %11986 = vst [vmem:[%s20550_s15 + $0x80] sm:$0xff] %v11954_v34 }
 0x972   : > { %v11768_v56 = vpop.f32.mrf.mxu3 }
 0x973   : > { %v11823_v14 = vadd.f32 %v11768_v56, %v21051_v55 }
 0x975   : > { %v11923_v18 = vadd.f32 %v20543_v28, %v11823_v14 }
 0x977   : > { %v11955_v24 = vmax.f32 %v11923_v18, 0.0  ;;  %v21064_v18 = vld [vmem:[#allocation62_spill] sm:$0xff] }
 0x979   : > { %11987 = vst [vmem:[%s20550_s15 + $0x88] sm:$0xff] %v11955_v24 }
 0x97a   : > { %v11771_v48 = vpop.f32.mrf.mxu3 }
 0x97b   : > { %v11824_v59 = vadd.f32 %v11771_v48, %v21052_v19 }
 0x97d   : > { %v11924_v45 = vadd.f32 %v20543_v28, %v11824_v59 }
 0x97f   : > { %v11956_v11 = vmax.f32 %v11924_v45, 0.0  ;;  %v21065_v45 = vld [vmem:[#allocation11_spill] sm:$0xff] }
 0x981   : > { %11988 = vst [vmem:[%s20550_s15 + $0x90] sm:$0xff] %v11956_v11 }
 0x982   : > { %v11773_v52 = vpop.f32.mrf.mxu3 }
 0x983   : > { %v11825_v1 = vadd.f32 %v11773_v52, %v21053_v49 }
 0x985   : > { %v11925_v3 = vadd.f32 %v20543_v28, %v11825_v1 }
 0x987   : > { %v11957_v53 = vmax.f32 %v11925_v3, 0.0 }
 0x989   : > { %11989 = vst [vmem:[%s20550_s15 + $0x98] sm:$0xff] %v11957_v53 }
 0x98a   : > { %v11776_v62 = vpop.f32.mrf.mxu3 }
 0x98b   : > { %v11826_v20 = vadd.f32 %v11776_v62, %v21054_v9 }
 0x98d   : > { %v11926_v46 = vadd.f32 %v20543_v28, %v11826_v20 }
 0x98f   : > { %v11958_v17 = vmax.f32 %v11926_v46, 0.0 }
 0x991   : > { %11990 = vst [vmem:[%s20550_s15 + $0xa0] sm:$0xff] %v11958_v17 }
 0x992   : > { %v11778_v6 = vpop.f32.mrf.mxu3 }
 0x993   : > { %v11827_v7 = vadd.f32 %v11778_v6, %v21055_v13 }
 0x995   : > { %v11927_v42 = vadd.f32 %v20543_v28, %v11827_v7 }
 0x997   : > { %v11959_v47 = vmax.f32 %v11927_v42, 0.0 }
 0x999   : > { %11991 = vst [vmem:[%s20550_s15 + $0xa8] sm:$0xff] %v11959_v47 }
 0x99a   : > { %v11781_v30 = vpop.f32.mrf.mxu3 }
 0x99b   : > { %v11828_v39 = vadd.f32 %v11781_v30, %v21056_v60 }
 0x99d   : > { %v11928_v51 = vadd.f32 %v20543_v28, %v11828_v39 }
 0x99f   : > { %v11960_v4 = vmax.f32 %v11928_v51, 0.0 }
 0x9a1   : > { %11992 = vst [vmem:[%s20550_s15 + $0xb0] sm:$0xff] %v11960_v4 }
 0x9a2   : > { %v11783_v22 = vpop.f32.mrf.mxu3 }
 0x9a3   : > { %v11829_v40 = vadd.f32 %v11783_v22, %v21057_v58 }
 0x9a5   : > { %v11929_v29 = vadd.f32 %v20543_v28, %v11829_v40 }
 0x9a7   : > { %v11961_v8 = vmax.f32 %v11929_v29, 0.0 }
 0x9a9   : > { %11993 = vst [vmem:[%s20550_s15 + $0xb8] sm:$0xff] %v11961_v8 }
 0x9aa   : > { %v11786_v15 = vpop.f32.mrf.mxu3 }
 0x9ab   : > { %v11830_v16 = vadd.f32 %v11786_v15, %v21058_v54 }
 0x9ad   : > { %v11930_v43 = vadd.f32 %v20543_v28, %v11830_v16 }
 0x9af   : > { %v11962_v50 = vmax.f32 %v11930_v43, 0.0 }
 0x9b1   : > { %11994 = vst [vmem:[%s20550_s15 + $0xc0] sm:$0xff] %v11962_v50 }
 0x9b2   : > { %v11788_v12 = vpop.f32.mrf.mxu3 }
 0x9b3   : > { %v11831_v61 = vadd.f32 %v11788_v12, %v21059_v2 }
 0x9b5   : > { %v11931_v27 = vadd.f32 %v20543_v28, %v11831_v61 }
 0x9b7   : > { %v11963_v35 = vmax.f32 %v11931_v27, 0.0 }
 0x9b9   : > { %11995 = vst [vmem:[%s20550_s15 + $0xc8] sm:$0xff] %v11963_v35 }
 0x9ba   : > { %v11791_v26 = vpop.f32.mrf.mxu3 }
 0x9bb   : > { %v11832_v36 = vadd.f32 %v11791_v26, %v21060_v25 }
 0x9bd   : > { %v11932_v32 = vadd.f32 %v20543_v28, %v11832_v36 }
 0x9bf   : > { %v11964_v31 = vmax.f32 %v11932_v32, 0.0 }
 0x9c1   : > { %11996 = vst [vmem:[%s20550_s15 + $0xd0] sm:$0xff] %v11964_v31 }
 0x9c2   : > { %v11793_v5 = vpop.f32.mrf.mxu3 }
 0x9c3   : > { %v11833_v23 = vadd.f32 %v11793_v5, %v21061_v33 }
 0x9c5   : > { %v11933_v57 = vadd.f32 %v20543_v28, %v11833_v23 }
 0x9c7   : > { %v11965_v63 = vmax.f32 %v11933_v57, 0.0 }
 0x9c9   : > { %11997 = vst [vmem:[%s20550_s15 + $0xd8] sm:$0xff] %v11965_v63 }
 0x9ca   : > { %v11796_v38 = vpop.f32.mrf.mxu3 }
 0x9cb   : > { %v11834_v21 = vadd.f32 %v11796_v38, %v21062_v10 }
 0x9cd   : > { %v11934_v0 = vadd.f32 %v20543_v28, %v11834_v21 }
 0x9cf   : > { %v11966_v37 = vmax.f32 %v11934_v0, 0.0 }
 0x9d1   : > { %11998 = vst [vmem:[%s20550_s15 + $0xe0] sm:$0xff] %v11966_v37 }
 0x9d2   : > { %v11798_v41 = vpop.f32.mrf.mxu3 }
 0x9d3   : > { %v11835_v34 = vadd.f32 %v11798_v41, %v21063_v44 }
 0x9d5   : > { %v11935_v56 = vadd.f32 %v20543_v28, %v11835_v34 }
 0x9d7   : > { %v11967_v55 = vmax.f32 %v11935_v56, 0.0 }
 0x9d9   : > { %11999 = vst [vmem:[%s20550_s15 + $0xe8] sm:$0xff] %v11967_v55 }
 0x9da   : > { %v11801_v14 = vpop.f32.mrf.mxu3 }
 0x9db   : > { %v11836_v24 = vadd.f32 %v11801_v14, %v21064_v18 }
 0x9dd   : > { %v11936_v48 = vadd.f32 %v20543_v28, %v11836_v24 }
 0x9df   : > { %v11968_v19 = vmax.f32 %v11936_v48, 0.0 }
 0x9e1   : > { %12000 = vst [vmem:[%s20550_s15 + $0xf0] sm:$0xff] %v11968_v19 }
 0x9e2   : > { %v11803_v59 = vpop.f32.mrf.mxu3 }
 0x9e3   : > { %v11837_v11 = vadd.f32 %v11803_v59, %v21065_v45 }
 0x9e5   : > { %v11937_v52 = vadd.f32 %v20543_v28, %v11837_v11 }
 0x9e7   : > { %v11969_v49 = vmax.f32 %v11937_v52, 0.0 }
 0x9e9   : > { %12001 = vst [vmem:[%s20550_s15 + $0xf8] sm:$0xff] %v11969_v49 }
 0x9ea   : > { %14913 = shalt.err (!%p14910_p5)
}
 0x9eb   : > { %s14966_s19 = smov 128   ;;  %s14967_s15 = smov 8  }
 0x9ec   : > { %14821 = dma.vmem_to_hbm [thread:$0]  (%p15043_p4), %s12018_s8, 4096, %s12020_s11, %s12003_s24, %s14966_s19, %s14966_s19, %s14967_s15  }
 0x9ed PF: > { %p14827_p6 = scmp.ge.s32.totalorder %s14964_s26, 2  ;;  %s12034_s27 = sand.u32 1, %s14944_s21  }
 0x9ee   : > { %s12035_s28 = scalar_lea.sflag [#allocation4], %s12034_s27 }
 0x9ef   : > { %p14824_p7 = pnand %p14827_p6, %p15050_p8 }
 0x9f1   : > { %p14825_p9 = pneg %p14824_p7 }
 0x9f3   : > { %14939 = dma.done.wait (%p14825_p9), %s12035_s28, 4096  }
 0x9f4   : > { %14941 = vsyncadd (%p14825_p9), %s12035_s28, 4294963200  ;;  %s19_s26 = sadd.s32 1, %s14964_s26   ;;  %s21066_s21 = smov %s14948_s22 }
 0x9f5   : > { %p16_p10 = scmp.ge.s32.totalorder %s19_s26, 4   ;;  %s21067_s22 = smov %s14952_s23 }
 0x9f6   : > { %s21068_s23 = smov %s15056_s10  ;;  %s21069_s24 = smov %s14960_s25 }
 0x9f7   : > { %s21070_s25 = smov %s21072_s29  ;;  %18 = sbr.rel (!%p16_p10) target bundleno = 4 (0x4), region = 121 }
 0x9fc   :  { %12041 = vsyncpa [#allocation4], 1 }
 0x9fd   :  { %12043 = vsyncpa [#allocation4 + $0x1], 1 }

</bundles_post_ra>
